<compile_context>
chip_gen: v7x
topology: tpu7x:2x2x1
jax: 0.10.0
libtpu: 0.0.40
codegen_flags: <defaults>
</compile_context>

<pallas_src>
import functools

import jax
import jax.numpy as jnp
from jax.experimental import pallas as pl
from jax.experimental.pallas import tpu as pltpu


_PT = 4          # max temporal halo (layer 4: pad_t=4)
_PF = 8          # max frequency halo (layer 4: pad_f=8)
_KH, _KW = 2, 3
# (dilation, pad_t, pad_f) for conv_1 .. conv_4
_LAYER_CFG = ((1, 1, 1), (2, 1, 2), (4, 2, 4), (8, 4, 8))
# im2col-pack the 6 taps only while packed K needs <= 3 MXU depth passes
# (256-deep MXU on v6e/v7x; on v5e's 128-deep MXU use 3*128 instead).
_PACK_MAX_K = 3 * 256


# ----------------------------------------------------------------------------
# Fused encoder kernel (one batch element per grid step)
# ----------------------------------------------------------------------------
def _encoder_kernel(x_ref, mask_ref,
                    w0_ref, s0_ref, b0_ref, a0_ref,
                    w1_ref, s1_ref, b1_ref, a1_ref,
                    w2_ref, s2_ref, b2_ref, a2_ref,
                    w3_ref, s3_ref, b3_ref, a3_ref,
                    w4_ref, s4_ref, b4_ref, a4_ref,
                    o_ref, act_ref, col_ref,
                    *, T, F, h, fd, pack):
    # act_ref: (4h, S_alloc) bf16 — channel-major slab over the flattened
    #          zero-padded (T+8, F+16) grid; the zero halo supplies the conv
    #          padding for every dilation.
    # col_ref: (K_pack, M) bf16 — im2col staging for the packed layers only.
    F_pad = F + 2 * _PF
    M = T * F_pad                         # flat output window (incl. F halos)
    OFF = _PT * F_pad + _PF               # flat index of interior (0, 0)
    c_slab, s_alloc = act_ref.shape

    # --- halo-only zeroing: top band (rows 0.._PT) and bottom band + tail.
    # The interior of every channel group is fully overwritten by that layer's
    # masked store, which also rewrites the left/right column halos with zeros
    # (the masked garbage lanes land exactly there).  Done every grid step
    # (each core owns its scratch under "parallel").
    top = (_PT + 1) * F_pad
    bot = (_PT + T) * F_pad
    act_ref[:, 0:top] = jnp.zeros((c_slab, top), jnp.bfloat16)
    act_ref[:, bot:s_alloc] = jnp.zeros((c_slab, s_alloc - bot), jnp.bfloat16)

    mask = mask_ref[...]                  # (1, M) f32: 1.0 valid col, 0.0 halo

    def bn_prelu(y, s_ref, b_ref, a_ref):
        y = y * s_ref[...] + b_ref[...]                   # folded BN (+ bias)
        return jnp.where(y >= 0.0, y, a_ref[...] * y)     # PReLU

    def store(y, c0, cout):
        # Masked garbage columns become the zero F-halo of the next layer.
        act_ref[c0:c0 + cout, OFF:OFF + M] = (y * mask).astype(jnp.bfloat16)

    # ---- conv1x1 (Cin=2) + BN + PReLU: two scaled adds on the VPU ----------
    xw = x_ref[0]                                          # (2, M) f32
    y = w0_ref[:, 0:1] * xw[0:1, :] + w0_ref[:, 1:2] * xw[1:2, :]
    store(bn_prelu(y, s0_ref, b0_ref, a0_ref), 0, h)

    # ---- dilated (2,3) convs ------------------------------------------------
    # Output window index m = t*F_pad + f; each tap (i,j) of a layer with
    # dilation d and padding (pt, pf) reads the contiguous slab window
    # starting at OFF + (i*d - pt)*F_pad + (j*d - pf).
    def dilated(layer, cin, w_ref, s_ref, b_ref, a_ref):
        dil, pad_t, pad_f = _LAYER_CFG[layer]
        srcs = [OFF + (i * dil - pad_t) * F_pad + (j * dil - pad_f)
                for i in range(_KH) for j in range(_KW)]
        if pack[layer]:
            # Small cin: pack the 6 taps along K -> ONE MXU matmul.
            for t, src in enumerate(srcs):
                col_ref[t * cin:(t + 1) * cin, :] = act_ref[0:cin, src:src + M]
            k = _KH * _KW * cin
            y = jnp.dot(w_ref[...], col_ref[0:k, :],
                        preferred_element_type=jnp.float32)
        else:
            # cin already fills the MXU depth: 6 accumulating dots straight
            # from the slab, no staging copies at all.
            y = None
            for t, src in enumerate(srcs):
                part = jnp.dot(w_ref[:, t * cin:(t + 1) * cin],
                               act_ref[0:cin, src:src + M],
                               preferred_element_type=jnp.float32)
                y = part if y is None else y + part
        return bn_prelu(y, s_ref, b_ref, a_ref)            # (cout, M) f32

    store(dilated(0, h,     w1_ref, s1_ref, b1_ref, a1_ref), h,     h)
    store(dilated(1, 2 * h, w2_ref, s2_ref, b2_ref, a2_ref), 2 * h, h)
    store(dilated(2, 3 * h, w3_ref, s3_ref, b3_ref, a3_ref), 3 * h, h)
    y = dilated(3, 4 * h, w4_ref, s4_ref, b4_ref, a4_ref)
    o_ref[0] = y.astype(o_ref.dtype)       # (fd, M) lane-dense store


# ----------------------------------------------------------------------------
# Wrapper
# ----------------------------------------------------------------------------
def encoder_forward(x_nchw, params):
    """x_nchw: [bs, 2, T, F] -> [bs, feature_dim, T, F] (NCHW in and out)."""
    p0, p1, p2, p3, p4 = params
    n, _, T, F = x_nchw.shape
    h = p0[0].shape[0]                      # w0: (h, 2)
    fd = p4[0].shape[0]                     # w4: (fd, 6*4h)
    F_pad = F + 2 * _PF
    S = (T + 2 * _PT) * F_pad
    M = T * F_pad
    OFF = _PT * F_pad + _PF
    s_alloc = S + 2 * _PF                   # tail room for the worst tap window

    # One tiny XLA zero-pad of the 2-channel input; the flattened padded grid
    # makes every dilated-conv tap a contiguous 1-D window (no kernel im2col).
    xp = jnp.pad(x_nchw.astype(jnp.float32),
                 ((0, 0), (0, 0), (_PT, _PT), (_PF, _PF)))
    xw = xp.reshape(n, 2, S)[:, :, OFF:OFF + M]            # (n, 2, M)

    # 1.0 on valid frequency columns, 0.0 on the F-halo columns of each row.
    mask = (jnp.arange(M, dtype=jnp.int32) % F_pad < F
            ).astype(jnp.float32).reshape(1, M)

    cins = (h, 2 * h, 3 * h, 4 * h)
    pack = tuple(_KH * _KW * c <= _PACK_MAX_K for c in cins)
    k_pack = max([_KH * _KW * c for c, p in zip(cins, pack) if p] + [8])

    flat = [xw, mask, *p0, *p1, *p2, *p3, *p4]

    def _whole(arr):
        nd = arr.ndim
        return pl.BlockSpec(arr.shape, lambda b: (0,) * nd)

    in_specs = ([pl.BlockSpec((1, 2, M), lambda b: (b, 0, 0))]
                + [_whole(a) for a in flat[1:]])

    kernel = functools.partial(_encoder_kernel, T=T, F=F, h=h, fd=fd, pack=pack)
    out = pl.pallas_call(
        kernel,
        out_shape=jax.ShapeDtypeStruct((n, fd, M), jnp.float32),
        grid=(n,),
        in_specs=in_specs,
        out_specs=pl.BlockSpec((1, fd, M), lambda b: (b, 0, 0)),
        scratch_shapes=[
            pltpu.VMEM((4 * h, s_alloc), jnp.bfloat16),   # channel-major slab
            pltpu.VMEM((k_pack, M), jnp.bfloat16),        # im2col staging
        ],
        compiler_params=pltpu.CompilerParams(
            dimension_semantics=("parallel",),
            vmem_limit_bytes=48 * 1024 * 1024),
    )(*flat)

    # Drop the F-halo columns (reshape is free; one thin slice in XLA).
    return out.reshape(n, fd, T, F_pad)[:, :, :, :F]


# ----------------------------------------------------------------------------
# Deterministic parameter initialization (shapes from Encoder.__init__)
# ----------------------------------------------------------------------------
def _fold_bn(bias, cout):
    # BatchNorm2d eval defaults: gamma=1, beta=0, running_mean=0, running_var=1
    eps = 1e-5
    gamma = jnp.ones((cout,), jnp.float32)
    beta = jnp.zeros((cout,), jnp.float32)
    mean = jnp.zeros((cout,), jnp.float32)
    var = jnp.ones((cout,), jnp.float32)
    scale = gamma / jnp.sqrt(var + eps)
    shift = beta + (bias - mean) * scale
    return scale.reshape(cout, 1), shift.reshape(cout, 1)


def _init_conv1x1(key, cin, cout):
    kw_key, kb_key = jax.random.split(key)
    bound = 1.0 / (cin ** 0.5)
    w = jax.random.uniform(kw_key, (cout, cin), jnp.float32, -bound, bound)
    b = jax.random.uniform(kb_key, (cout,), jnp.float32, -bound, bound)
    scale, shift = _fold_bn(b, cout)
    alpha = jnp.full((cout, 1), 0.25, jnp.float32)         # PReLU default
    return w, scale, shift, alpha                          # w: (cout, 2) f32


def _init_dilated(key, cin, cout):
    kw_key, kb_key = jax.random.split(key)
    fan_in = cin * _KH * _KW
    bound = 1.0 / (fan_in ** 0.5)
    w = jax.random.uniform(kw_key, (_KH * _KW, cin, cout), jnp.float32,
                           -bound, bound)
    b = jax.random.uniform(kb_key, (cout,), jnp.float32, -bound, bound)
    scale, shift = _fold_bn(b, cout)
    alpha = jnp.full((cout, 1), 0.25, jnp.float32)
    # kernel layout: (cout, K) with K = tap*cin + channel (tap = i*KW + j), bf16
    w_k = jnp.transpose(w.reshape(_KH * _KW * cin, cout)).astype(jnp.bfloat16)
    return w_k, scale, shift, alpha


def init_encoder_params(key, hidden_channel, feature_dim):
    h = hidden_channel
    keys = jax.random.split(key, 5)
    return (
        _init_conv1x1(keys[0], 2, h),                      # conv1x1
        _init_dilated(keys[1], h, h),                      # conv_1 (dil 1)
        _init_dilated(keys[2], 2 * h, h),                  # conv_2 (dil 2)
        _init_dilated(keys[3], 3 * h, h),                  # conv_3 (dil 4)
        _init_dilated(keys[4], 4 * h, feature_dim),        # conv_4 (dil 8)
    )


# ----------------------------------------------------------------------------
# Pure-JAX reference (mimics bf16 slab storage so the comparison is tight)
# ----------------------------------------------------------------------------
def _bf16(x):
    return x.astype(jnp.bfloat16).astype(jnp.float32)


def _ref_dilated(x_nhwc, p, dil, pad_t, pad_f, t_out):
    w, scale, shift, alpha = p
    cout = w.shape[0]
    cin = w.shape[1] // (_KH * _KW)
    wk = jnp.transpose(w.astype(jnp.float32)).reshape(_KH, _KW, cin, cout)
    y = jax.lax.conv_general_dilated(
        x_nhwc, wk, window_strides=(1, 1),
        padding=((pad_t, pad_t), (pad_f, pad_f)),
        rhs_dilation=(dil, dil),
        dimension_numbers=("NHWC", "HWIO", "NHWC"))
    y = y[:, :t_out]
    y = y * scale[:, 0] + shift[:, 0]
    return jnp.where(y >= 0.0, y, alpha[:, 0] * y)


def encoder_ref(x_nchw, params):
    p0, p1, p2, p3, p4 = params
    x = jnp.transpose(x_nchw, (0, 2, 3, 1)).astype(jnp.float32)   # NHWC
    t = x.shape[1]
    w0, s0, b0, a0 = p0
    y = jnp.einsum("ntfc,hc->ntfh", x, w0)
    y = y * s0[:, 0] + b0[:, 0]
    y = jnp.where(y >= 0.0, y, a0[:, 0] * y)
    x = _bf16(y)
    lo = _bf16(_ref_dilated(x, p1, 1, 1, 1, t)); x = jnp.concatenate([x, lo], -1)
    lo = _bf16(_ref_dilated(x, p2, 2, 1, 2, t)); x = jnp.concatenate([x, lo], -1)
    lo = _bf16(_ref_dilated(x, p3, 4, 2, 4, t)); x = jnp.concatenate([x, lo], -1)
    lo = _ref_dilated(x, p4, 8, 4, 8, t)                          # final stays f32
    return jnp.transpose(lo, (0, 3, 1, 2))


# ----------------------------------------------------------------------------
if __name__ == "__main__":
    key = jax.random.PRNGKey(0)
    kx, kp = jax.random.split(key)

    bs, T, F = 2, 8, 16
    hidden_channel, feature_dim = 64, 64   # module defaults; exercises both
                                           # the packed and per-tap dot paths

    x = jax.random.normal(kx, (bs, 2, T, F), jnp.float32)   # [bs, 2, T, F]
    params = init_encoder_params(kp, hidden_channel, feature_dim)

    out = jax.jit(encoder_forward)(x, params)
    out = jax.block_until_ready(out)

    assert out.shape == (bs, feature_dim, T, F), out.shape
    ref = encoder_ref(x, params)
    err = float(jnp.max(jnp.abs(out - ref)))
    assert jnp.allclose(out, ref, rtol=5e-2, atol=5e-2), err

    print("KERNEL_OK")
</pallas_src>

<mosaic_0001>
module attributes {stable_mosaic.version = 11 : i64} {
  func.func @_encoder_kernel(%arg0: i32, %arg1: memref<1x2x256xf32, #tpu.memory_space<vmem>>, %arg2: memref<1x256xf32, #tpu.memory_space<vmem>>, %arg3: memref<64x2xf32, #tpu.memory_space<vmem>>, %arg4: memref<64x1xf32, #tpu.memory_space<vmem>>, %arg5: memref<64x1xf32, #tpu.memory_space<vmem>>, %arg6: memref<64x1xf32, #tpu.memory_space<vmem>>, %arg7: memref<64x384xbf16, #tpu.memory_space<vmem>>, %arg8: memref<64x1xf32, #tpu.memory_space<vmem>>, %arg9: memref<64x1xf32, #tpu.memory_space<vmem>>, %arg10: memref<64x1xf32, #tpu.memory_space<vmem>>, %arg11: memref<64x768xbf16, #tpu.memory_space<vmem>>, %arg12: memref<64x1xf32, #tpu.memory_space<vmem>>, %arg13: memref<64x1xf32, #tpu.memory_space<vmem>>, %arg14: memref<64x1xf32, #tpu.memory_space<vmem>>, %arg15: memref<64x1152xbf16, #tpu.memory_space<vmem>>, %arg16: memref<64x1xf32, #tpu.memory_space<vmem>>, %arg17: memref<64x1xf32, #tpu.memory_space<vmem>>, %arg18: memref<64x1xf32, #tpu.memory_space<vmem>>, %arg19: memref<64x1536xbf16, #tpu.memory_space<vmem>>, %arg20: memref<64x1xf32, #tpu.memory_space<vmem>>, %arg21: memref<64x1xf32, #tpu.memory_space<vmem>>, %arg22: memref<64x1xf32, #tpu.memory_space<vmem>>, %arg23: memref<1x64x256xf32, #tpu.memory_space<vmem>>, %arg24: memref<256x528xbf16, #tpu.memory_space<vmem>>, %arg25: memref<768x256xbf16, #tpu.memory_space<vmem>>) attributes {dimension_semantics = [#tpu.dimension_semantics<parallel>], iteration_bounds = array<i64: 2>, scalar_prefetch = 0 : i64, scratch_operands = 2 : i64, tpu.core_type = #tpu.core_type<tc>, window_params = [{transform_indices = @transform_0, window_bounds = array<i64: 1, 2, 256>}, {pipeline_mode = #tpu.pipeline_mode<synchronous>, transform_indices = @transform_1, window_bounds = array<i64: 1, 256>}, {pipeline_mode = #tpu.pipeline_mode<synchronous>, transform_indices = @transform_2, window_bounds = array<i64: 64, 2>}, {pipeline_mode = #tpu.pipeline_mode<synchronous>, transform_indices = @transform_3, window_bounds = array<i64: 64, 1>}, {pipeline_mode = #tpu.pipeline_mode<synchronous>, transform_indices = @transform_4, window_bounds = array<i64: 64, 1>}, {pipeline_mode = #tpu.pipeline_mode<synchronous>, transform_indices = @transform_5, window_bounds = array<i64: 64, 1>}, {pipeline_mode = #tpu.pipeline_mode<synchronous>, transform_indices = @transform_6, window_bounds = array<i64: 64, 384>}, {pipeline_mode = #tpu.pipeline_mode<synchronous>, transform_indices = @transform_7, window_bounds = array<i64: 64, 1>}, {pipeline_mode = #tpu.pipeline_mode<synchronous>, transform_indices = @transform_8, window_bounds = array<i64: 64, 1>}, {pipeline_mode = #tpu.pipeline_mode<synchronous>, transform_indices = @transform_9, window_bounds = array<i64: 64, 1>}, {pipeline_mode = #tpu.pipeline_mode<synchronous>, transform_indices = @transform_10, window_bounds = array<i64: 64, 768>}, {pipeline_mode = #tpu.pipeline_mode<synchronous>, transform_indices = @transform_11, window_bounds = array<i64: 64, 1>}, {pipeline_mode = #tpu.pipeline_mode<synchronous>, transform_indices = @transform_12, window_bounds = array<i64: 64, 1>}, {pipeline_mode = #tpu.pipeline_mode<synchronous>, transform_indices = @transform_13, window_bounds = array<i64: 64, 1>}, {pipeline_mode = #tpu.pipeline_mode<synchronous>, transform_indices = @transform_14, window_bounds = array<i64: 64, 1152>}, {pipeline_mode = #tpu.pipeline_mode<synchronous>, transform_indices = @transform_15, window_bounds = array<i64: 64, 1>}, {pipeline_mode = #tpu.pipeline_mode<synchronous>, transform_indices = @transform_16, window_bounds = array<i64: 64, 1>}, {pipeline_mode = #tpu.pipeline_mode<synchronous>, transform_indices = @transform_17, window_bounds = array<i64: 64, 1>}, {pipeline_mode = #tpu.pipeline_mode<synchronous>, transform_indices = @transform_18, window_bounds = array<i64: 64, 1536>}, {pipeline_mode = #tpu.pipeline_mode<synchronous>, transform_indices = @transform_19, window_bounds = array<i64: 64, 1>}, {pipeline_mode = #tpu.pipeline_mode<synchronous>, transform_indices = @transform_20, window_bounds = array<i64: 64, 1>}, {pipeline_mode = #tpu.pipeline_mode<synchronous>, transform_indices = @transform_21, window_bounds = array<i64: 64, 1>}, {transform_indices = @transform_22, window_bounds = array<i64: 1, 64, 256>}]} {
    %cst = arith.constant 0.000000e+00 : bf16
    %0 = vector.broadcast %cst : bf16 to vector<256x160xbf16>
    %c0 = arith.constant 0 : index
    %c0_0 = arith.constant 0 : index
    %1 = vector.load %arg24[%c0, %c0_0] : memref<256x528xbf16, #tpu.memory_space<vmem>>, vector<256x160xbf16>
    tpu.vector_store %arg24[%c0, %c0_0], %0 {strides = array<i32>} : memref<256x528xbf16, #tpu.memory_space<vmem>>, vector<256x160xbf16>,
    %cst_1 = arith.constant 0.000000e+00 : bf16
    %2 = vector.broadcast %cst_1 : bf16 to vector<256x144xbf16>
    %c0_2 = arith.constant 0 : index
    %c384 = arith.constant 384 : index
    %3 = vector.load %arg24[%c0_2, %c384] : memref<256x528xbf16, #tpu.memory_space<vmem>>, vector<256x144xbf16>
    tpu.vector_store %arg24[%c0_2, %c384], %2 {strides = array<i32>} : memref<256x528xbf16, #tpu.memory_space<vmem>>, vector<256x144xbf16>,
    %c0_3 = arith.constant 0 : index
    %c0_4 = arith.constant 0 : index
    %4 = vector.load %arg2[%c0_3, %c0_4] : memref<1x256xf32, #tpu.memory_space<vmem>>, vector<1x256xf32>
    %c0_5 = arith.constant 0 : index
    %c0_6 = arith.constant 0 : index
    %c0_7 = arith.constant 0 : index
    %5 = vector.load %arg1[%c0_5, %c0_6, %c0_7] : memref<1x2x256xf32, #tpu.memory_space<vmem>>, vector<1x2x256xf32>
    %6 = vector.shape_cast %5 : vector<1x2x256xf32> to vector<2x256xf32>
    %c0_8 = arith.constant 0 : index
    %c0_9 = arith.constant 0 : index
    %7 = vector.load %arg3[%c0_8, %c0_9] : memref<64x2xf32, #tpu.memory_space<vmem>>, vector<64x1xf32>
    %8 = vector.extract_strided_slice %6 {offsets = [0, 0], sizes = [1, 256], strides = [1, 1]} : vector<2x256xf32> to vector<1x256xf32>
    %9 = vector.broadcast %7 : vector<64x1xf32> to vector<64x256xf32>
    %10 = vector.broadcast %8 : vector<1x256xf32> to vector<64x256xf32>
    %11 = arith.mulf %9, %10 : vector<64x256xf32>
    %c0_10 = arith.constant 0 : index
    %c1 = arith.constant 1 : index
    %12 = vector.load %arg3[%c0_10, %c1] : memref<64x2xf32, #tpu.memory_space<vmem>>, vector<64x1xf32>
    %13 = vector.extract_strided_slice %6 {offsets = [1, 0], sizes = [1, 256], strides = [1, 1]} : vector<2x256xf32> to vector<1x256xf32>
    %14 = vector.broadcast %12 : vector<64x1xf32> to vector<64x256xf32>
    %15 = vector.broadcast %13 : vector<1x256xf32> to vector<64x256xf32>
    %16 = arith.mulf %14, %15 : vector<64x256xf32>
    %17 = arith.addf %11, %16 : vector<64x256xf32>
    %c0_11 = arith.constant 0 : index
    %c0_12 = arith.constant 0 : index
    %18 = vector.load %arg4[%c0_11, %c0_12] : memref<64x1xf32, #tpu.memory_space<vmem>>, vector<64x1xf32>
    %19 = vector.broadcast %18 : vector<64x1xf32> to vector<64x256xf32>
    %20 = arith.mulf %17, %19 : vector<64x256xf32>
    %c0_13 = arith.constant 0 : index
    %c0_14 = arith.constant 0 : index
    %21 = vector.load %arg5[%c0_13, %c0_14] : memref<64x1xf32, #tpu.memory_space<vmem>>, vector<64x1xf32>
    %22 = vector.broadcast %21 : vector<64x1xf32> to vector<64x256xf32>
    %23 = arith.addf %20, %22 : vector<64x256xf32>
    %cst_15 = arith.constant 0.000000e+00 : f32
    %24 = vector.broadcast %cst_15 : f32 to vector<64x256xf32>
    %25 = arith.cmpf oge, %23, %24 : vector<64x256xf32>
    %c0_16 = arith.constant 0 : index
    %c0_17 = arith.constant 0 : index
    %26 = vector.load %arg6[%c0_16, %c0_17] : memref<64x1xf32, #tpu.memory_space<vmem>>, vector<64x1xf32>
    %27 = vector.broadcast %26 : vector<64x1xf32> to vector<64x256xf32>
    %28 = arith.mulf %27, %23 : vector<64x256xf32>
    %29 = arith.select %25, %23, %28 : vector<64x256xi1>, vector<64x256xf32>
    %30 = vector.broadcast %4 : vector<1x256xf32> to vector<64x256xf32>
    %31 = arith.mulf %29, %30 : vector<64x256xf32>
    %32 = arith.truncf %31 : vector<64x256xf32> to vector<64x256xbf16>
    %c0_18 = arith.constant 0 : index
    %c136 = arith.constant 136 : index
    %33 = vector.load %arg24[%c0_18, %c136] : memref<256x528xbf16, #tpu.memory_space<vmem>>, vector<64x256xbf16>
    tpu.vector_store %arg24[%c0_18, %c136], %32 {strides = array<i32>} : memref<256x528xbf16, #tpu.memory_space<vmem>>, vector<64x256xbf16>,
    %c0_19 = arith.constant 0 : index
    %c103 = arith.constant 103 : index
    %34 = vector.load %arg24[%c0_19, %c103] : memref<256x528xbf16, #tpu.memory_space<vmem>>, vector<64x256xbf16>
    %c0_20 = arith.constant 0 : index
    %c0_21 = arith.constant 0 : index
    %35 = vector.load %arg25[%c0_20, %c0_21] : memref<768x256xbf16, #tpu.memory_space<vmem>>, vector<64x256xbf16>
    tpu.vector_store %arg25[%c0_20, %c0_21], %34 {strides = array<i32>} : memref<768x256xbf16, #tpu.memory_space<vmem>>, vector<64x256xbf16>,
    %c0_22 = arith.constant 0 : index
    %c104 = arith.constant 104 : index
    %36 = vector.load %arg24[%c0_22, %c104] : memref<256x528xbf16, #tpu.memory_space<vmem>>, vector<64x256xbf16>
    %c64 = arith.constant 64 : index
    %c0_23 = arith.constant 0 : index
    %37 = vector.load %arg25[%c64, %c0_23] : memref<768x256xbf16, #tpu.memory_space<vmem>>, vector<64x256xbf16>
    tpu.vector_store %arg25[%c64, %c0_23], %36 {strides = array<i32>} : memref<768x256xbf16, #tpu.memory_space<vmem>>, vector<64x256xbf16>,
    %c0_24 = arith.constant 0 : index
    %c105 = arith.constant 105 : index
    %38 = vector.load %arg24[%c0_24, %c105] : memref<256x528xbf16, #tpu.memory_space<vmem>>, vector<64x256xbf16>
    %c128 = arith.constant 128 : index
    %c0_25 = arith.constant 0 : index
    %39 = vector.load %arg25[%c128, %c0_25] : memref<768x256xbf16, #tpu.memory_space<vmem>>, vector<64x256xbf16>
    tpu.vector_store %arg25[%c128, %c0_25], %38 {strides = array<i32>} : memref<768x256xbf16, #tpu.memory_space<vmem>>, vector<64x256xbf16>,
    %c0_26 = arith.constant 0 : index
    %c135 = arith.constant 135 : index
    %40 = vector.load %arg24[%c0_26, %c135] : memref<256x528xbf16, #tpu.memory_space<vmem>>, vector<64x256xbf16>
    %c192 = arith.constant 192 : index
    %c0_27 = arith.constant 0 : index
    %41 = vector.load %arg25[%c192, %c0_27] : memref<768x256xbf16, #tpu.memory_space<vmem>>, vector<64x256xbf16>
    tpu.vector_store %arg25[%c192, %c0_27], %40 {strides = array<i32>} : memref<768x256xbf16, #tpu.memory_space<vmem>>, vector<64x256xbf16>,
    %c0_28 = arith.constant 0 : index
    %c136_29 = arith.constant 136 : index
    %42 = vector.load %arg24[%c0_28, %c136_29] : memref<256x528xbf16, #tpu.memory_space<vmem>>, vector<64x256xbf16>
    %c256 = arith.constant 256 : index
    %c0_30 = arith.constant 0 : index
    %43 = vector.load %arg25[%c256, %c0_30] : memref<768x256xbf16, #tpu.memory_space<vmem>>, vector<64x256xbf16>
    tpu.vector_store %arg25[%c256, %c0_30], %42 {strides = array<i32>} : memref<768x256xbf16, #tpu.memory_space<vmem>>, vector<64x256xbf16>,
    %c0_31 = arith.constant 0 : index
    %c137 = arith.constant 137 : index
    %44 = vector.load %arg24[%c0_31, %c137] : memref<256x528xbf16, #tpu.memory_space<vmem>>, vector<64x256xbf16>
    %c320 = arith.constant 320 : index
    %c0_32 = arith.constant 0 : index
    %45 = vector.load %arg25[%c320, %c0_32] : memref<768x256xbf16, #tpu.memory_space<vmem>>, vector<64x256xbf16>
    tpu.vector_store %arg25[%c320, %c0_32], %44 {strides = array<i32>} : memref<768x256xbf16, #tpu.memory_space<vmem>>, vector<64x256xbf16>,
    %c0_33 = arith.constant 0 : index
    %c0_34 = arith.constant 0 : index
    %46 = vector.load %arg7[%c0_33, %c0_34] : memref<64x384xbf16, #tpu.memory_space<vmem>>, vector<64x384xbf16>
    %c0_35 = arith.constant 0 : index
    %c0_36 = arith.constant 0 : index
    %47 = vector.load %arg25[%c0_35, %c0_36] : memref<768x256xbf16, #tpu.memory_space<vmem>>, vector<384x256xbf16>
    %cst_37 = arith.constant dense<0.000000e+00> : vector<64x256xf32>
    %48 = tpu.matmul %46, %47, %cst_37 {dimension_numbers = #tpu.dot_dimension_numbers<[1], [0], [0], [1], [0, 0, 1, 1], [], []>} : vector<64x384xbf16>, vector<384x256xbf16>, vector<64x256xf32> -> vector<64x256xf32>
    %c0_38 = arith.constant 0 : index
    %c0_39 = arith.constant 0 : index
    %49 = vector.load %arg8[%c0_38, %c0_39] : memref<64x1xf32, #tpu.memory_space<vmem>>, vector<64x1xf32>
    %50 = vector.broadcast %49 : vector<64x1xf32> to vector<64x256xf32>
    %51 = arith.mulf %48, %50 : vector<64x256xf32>
    %c0_40 = arith.constant 0 : index
    %c0_41 = arith.constant 0 : index
    %52 = vector.load %arg9[%c0_40, %c0_41] : memref<64x1xf32, #tpu.memory_space<vmem>>, vector<64x1xf32>
    %53 = vector.broadcast %52 : vector<64x1xf32> to vector<64x256xf32>
    %54 = arith.addf %51, %53 : vector<64x256xf32>
    %cst_42 = arith.constant 0.000000e+00 : f32
    %55 = vector.broadcast %cst_42 : f32 to vector<64x256xf32>
    %56 = arith.cmpf oge, %54, %55 : vector<64x256xf32>
    %c0_43 = arith.constant 0 : index
    %c0_44 = arith.constant 0 : index
    %57 = vector.load %arg10[%c0_43, %c0_44] : memref<64x1xf32, #tpu.memory_space<vmem>>, vector<64x1xf32>
    %58 = vector.broadcast %57 : vector<64x1xf32> to vector<64x256xf32>
    %59 = arith.mulf %58, %54 : vector<64x256xf32>
    %60 = arith.select %56, %54, %59 : vector<64x256xi1>, vector<64x256xf32>
    %61 = vector.broadcast %4 : vector<1x256xf32> to vector<64x256xf32>
    %62 = arith.mulf %60, %61 : vector<64x256xf32>
    %63 = arith.truncf %62 : vector<64x256xf32> to vector<64x256xbf16>
    %c64_45 = arith.constant 64 : index
    %c136_46 = arith.constant 136 : index
    %64 = vector.load %arg24[%c64_45, %c136_46] : memref<256x528xbf16, #tpu.memory_space<vmem>>, vector<64x256xbf16>
    tpu.vector_store %arg24[%c64_45, %c136_46], %63 {strides = array<i32>} : memref<256x528xbf16, #tpu.memory_space<vmem>>, vector<64x256xbf16>,
    %c0_47 = arith.constant 0 : index
    %c102 = arith.constant 102 : index
    %65 = vector.load %arg24[%c0_47, %c102] : memref<256x528xbf16, #tpu.memory_space<vmem>>, vector<128x256xbf16>
    %c0_48 = arith.constant 0 : index
    %c0_49 = arith.constant 0 : index
    %66 = vector.load %arg25[%c0_48, %c0_49] : memref<768x256xbf16, #tpu.memory_space<vmem>>, vector<128x256xbf16>
    tpu.vector_store %arg25[%c0_48, %c0_49], %65 {strides = array<i32>} : memref<768x256xbf16, #tpu.memory_space<vmem>>, vector<128x256xbf16>,
    %c0_50 = arith.constant 0 : index
    %c104_51 = arith.constant 104 : index
    %67 = vector.load %arg24[%c0_50, %c104_51] : memref<256x528xbf16, #tpu.memory_space<vmem>>, vector<128x256xbf16>
    %c128_52 = arith.constant 128 : index
    %c0_53 = arith.constant 0 : index
    %68 = vector.load %arg25[%c128_52, %c0_53] : memref<768x256xbf16, #tpu.memory_space<vmem>>, vector<128x256xbf16>
    tpu.vector_store %arg25[%c128_52, %c0_53], %67 {strides = array<i32>} : memref<768x256xbf16, #tpu.memory_space<vmem>>, vector<128x256xbf16>,
    %c0_54 = arith.constant 0 : index
    %c106 = arith.constant 106 : index
    %69 = vector.load %arg24[%c0_54, %c106] : memref<256x528xbf16, #tpu.memory_space<vmem>>, vector<128x256xbf16>
    %c256_55 = arith.constant 256 : index
    %c0_56 = arith.constant 0 : index
    %70 = vector.load %arg25[%c256_55, %c0_56] : memref<768x256xbf16, #tpu.memory_space<vmem>>, vector<128x256xbf16>
    tpu.vector_store %arg25[%c256_55, %c0_56], %69 {strides = array<i32>} : memref<768x256xbf16, #tpu.memory_space<vmem>>, vector<128x256xbf16>,
    %c0_57 = arith.constant 0 : index
    %c166 = arith.constant 166 : index
    %71 = vector.load %arg24[%c0_57, %c166] : memref<256x528xbf16, #tpu.memory_space<vmem>>, vector<128x256xbf16>
    %c384_58 = arith.constant 384 : index
    %c0_59 = arith.constant 0 : index
    %72 = vector.load %arg25[%c384_58, %c0_59] : memref<768x256xbf16, #tpu.memory_space<vmem>>, vector<128x256xbf16>
    tpu.vector_store %arg25[%c384_58, %c0_59], %71 {strides = array<i32>} : memref<768x256xbf16, #tpu.memory_space<vmem>>, vector<128x256xbf16>,
    %c0_60 = arith.constant 0 : index
    %c168 = arith.constant 168 : index
    %73 = vector.load %arg24[%c0_60, %c168] : memref<256x528xbf16, #tpu.memory_space<vmem>>, vector<128x256xbf16>
    %c512 = arith.constant 512 : index
    %c0_61 = arith.constant 0 : index
    %74 = vector.load %arg25[%c512, %c0_61] : memref<768x256xbf16, #tpu.memory_space<vmem>>, vector<128x256xbf16>
    tpu.vector_store %arg25[%c512, %c0_61], %73 {strides = array<i32>} : memref<768x256xbf16, #tpu.memory_space<vmem>>, vector<128x256xbf16>,
    %c0_62 = arith.constant 0 : index
    %c170 = arith.constant 170 : index
    %75 = vector.load %arg24[%c0_62, %c170] : memref<256x528xbf16, #tpu.memory_space<vmem>>, vector<128x256xbf16>
    %c640 = arith.constant 640 : index
    %c0_63 = arith.constant 0 : index
    %76 = vector.load %arg25[%c640, %c0_63] : memref<768x256xbf16, #tpu.memory_space<vmem>>, vector<128x256xbf16>
    tpu.vector_store %arg25[%c640, %c0_63], %75 {strides = array<i32>} : memref<768x256xbf16, #tpu.memory_space<vmem>>, vector<128x256xbf16>,
    %c0_64 = arith.constant 0 : index
    %c0_65 = arith.constant 0 : index
    %77 = vector.load %arg11[%c0_64, %c0_65] : memref<64x768xbf16, #tpu.memory_space<vmem>>, vector<64x768xbf16>
    %c0_66 = arith.constant 0 : index
    %c0_67 = arith.constant 0 : index
    %78 = vector.load %arg25[%c0_66, %c0_67] : memref<768x256xbf16, #tpu.memory_space<vmem>>, vector<768x256xbf16>
    %cst_68 = arith.constant dense<0.000000e+00> : vector<64x256xf32>
    %79 = tpu.matmul %77, %78, %cst_68 {dimension_numbers = #tpu.dot_dimension_numbers<[1], [0], [0], [1], [0, 0, 1, 1], [], []>} : vector<64x768xbf16>, vector<768x256xbf16>, vector<64x256xf32> -> vector<64x256xf32>
    %c0_69 = arith.constant 0 : index
    %c0_70 = arith.constant 0 : index
    %80 = vector.load %arg12[%c0_69, %c0_70] : memref<64x1xf32, #tpu.memory_space<vmem>>, vector<64x1xf32>
    %81 = vector.broadcast %80 : vector<64x1xf32> to vector<64x256xf32>
    %82 = arith.mulf %79, %81 : vector<64x256xf32>
    %c0_71 = arith.constant 0 : index
    %c0_72 = arith.constant 0 : index
    %83 = vector.load %arg13[%c0_71, %c0_72] : memref<64x1xf32, #tpu.memory_space<vmem>>, vector<64x1xf32>
    %84 = vector.broadcast %83 : vector<64x1xf32> to vector<64x256xf32>
    %85 = arith.addf %82, %84 : vector<64x256xf32>
    %cst_73 = arith.constant 0.000000e+00 : f32
    %86 = vector.broadcast %cst_73 : f32 to vector<64x256xf32>
    %87 = arith.cmpf oge, %85, %86 : vector<64x256xf32>
    %c0_74 = arith.constant 0 : index
    %c0_75 = arith.constant 0 : index
    %88 = vector.load %arg14[%c0_74, %c0_75] : memref<64x1xf32, #tpu.memory_space<vmem>>, vector<64x1xf32>
    %89 = vector.broadcast %88 : vector<64x1xf32> to vector<64x256xf32>
    %90 = arith.mulf %89, %85 : vector<64x256xf32>
    %91 = arith.select %87, %85, %90 : vector<64x256xi1>, vector<64x256xf32>
    %92 = vector.broadcast %4 : vector<1x256xf32> to vector<64x256xf32>
    %93 = arith.mulf %91, %92 : vector<64x256xf32>
    %94 = arith.truncf %93 : vector<64x256xf32> to vector<64x256xbf16>
    %c128_76 = arith.constant 128 : index
    %c136_77 = arith.constant 136 : index
    %95 = vector.load %arg24[%c128_76, %c136_77] : memref<256x528xbf16, #tpu.memory_space<vmem>>, vector<64x256xbf16>
    tpu.vector_store %arg24[%c128_76, %c136_77], %94 {strides = array<i32>} : memref<256x528xbf16, #tpu.memory_space<vmem>>, vector<64x256xbf16>,
    %c0_78 = arith.constant 0 : index
    %c0_79 = arith.constant 0 : index
    %96 = vector.load %arg15[%c0_78, %c0_79] : memref<64x1152xbf16, #tpu.memory_space<vmem>>, vector<64x192xbf16>
    %c0_80 = arith.constant 0 : index
    %c68 = arith.constant 68 : index
    %97 = vector.load %arg24[%c0_80, %c68] : memref<256x528xbf16, #tpu.memory_space<vmem>>, vector<192x256xbf16>
    %cst_81 = arith.constant dense<0.000000e+00> : vector<64x256xf32>
    %98 = tpu.matmul %96, %97, %cst_81 {dimension_numbers = #tpu.dot_dimension_numbers<[1], [0], [0], [1], [0, 0, 1, 1], [], []>} : vector<64x192xbf16>, vector<192x256xbf16>, vector<64x256xf32> -> vector<64x256xf32>
    %c0_82 = arith.constant 0 : index
    %c192_83 = arith.constant 192 : index
    %99 = vector.load %arg15[%c0_82, %c192_83] : memref<64x1152xbf16, #tpu.memory_space<vmem>>, vector<64x192xbf16>
    %c0_84 = arith.constant 0 : index
    %c72 = arith.constant 72 : index
    %100 = vector.load %arg24[%c0_84, %c72] : memref<256x528xbf16, #tpu.memory_space<vmem>>, vector<192x256xbf16>
    %cst_85 = arith.constant dense<0.000000e+00> : vector<64x256xf32>
    %101 = tpu.matmul %99, %100, %cst_85 {dimension_numbers = #tpu.dot_dimension_numbers<[1], [0], [0], [1], [0, 0, 1, 1], [], []>} : vector<64x192xbf16>, vector<192x256xbf16>, vector<64x256xf32> -> vector<64x256xf32>
    %102 = arith.addf %98, %101 : vector<64x256xf32>
    %c0_86 = arith.constant 0 : index
    %c384_87 = arith.constant 384 : index
    %103 = vector.load %arg15[%c0_86, %c384_87] : memref<64x1152xbf16, #tpu.memory_space<vmem>>, vector<64x192xbf16>
    %c0_88 = arith.constant 0 : index
    %c76 = arith.constant 76 : index
    %104 = vector.load %arg24[%c0_88, %c76] : memref<256x528xbf16, #tpu.memory_space<vmem>>, vector<192x256xbf16>
    %cst_89 = arith.constant dense<0.000000e+00> : vector<64x256xf32>
    %105 = tpu.matmul %103, %104, %cst_89 {dimension_numbers = #tpu.dot_dimension_numbers<[1], [0], [0], [1], [0, 0, 1, 1], [], []>} : vector<64x192xbf16>, vector<192x256xbf16>, vector<64x256xf32> -> vector<64x256xf32>
    %106 = arith.addf %102, %105 : vector<64x256xf32>
    %c0_90 = arith.constant 0 : index
    %c576 = arith.constant 576 : index
    %107 = vector.load %arg15[%c0_90, %c576] : memref<64x1152xbf16, #tpu.memory_space<vmem>>, vector<64x192xbf16>
    %c0_91 = arith.constant 0 : index
    %c196 = arith.constant 196 : index
    %108 = vector.load %arg24[%c0_91, %c196] : memref<256x528xbf16, #tpu.memory_space<vmem>>, vector<192x256xbf16>
    %cst_92 = arith.constant dense<0.000000e+00> : vector<64x256xf32>
    %109 = tpu.matmul %107, %108, %cst_92 {dimension_numbers = #tpu.dot_dimension_numbers<[1], [0], [0], [1], [0, 0, 1, 1], [], []>} : vector<64x192xbf16>, vector<192x256xbf16>, vector<64x256xf32> -> vector<64x256xf32>
    %110 = arith.addf %106, %109 : vector<64x256xf32>
    %c0_93 = arith.constant 0 : index
    %c768 = arith.constant 768 : index
    %111 = vector.load %arg15[%c0_93, %c768] : memref<64x1152xbf16, #tpu.memory_space<vmem>>, vector<64x192xbf16>
    %c0_94 = arith.constant 0 : index
    %c200 = arith.constant 200 : index
    %112 = vector.load %arg24[%c0_94, %c200] : memref<256x528xbf16, #tpu.memory_space<vmem>>, vector<192x256xbf16>
    %cst_95 = arith.constant dense<0.000000e+00> : vector<64x256xf32>
    %113 = tpu.matmul %111, %112, %cst_95 {dimension_numbers = #tpu.dot_dimension_numbers<[1], [0], [0], [1], [0, 0, 1, 1], [], []>} : vector<64x192xbf16>, vector<192x256xbf16>, vector<64x256xf32> -> vector<64x256xf32>
    %114 = arith.addf %110, %113 : vector<64x256xf32>
    %c0_96 = arith.constant 0 : index
    %c960 = arith.constant 960 : index
    %115 = vector.load %arg15[%c0_96, %c960] : memref<64x1152xbf16, #tpu.memory_space<vmem>>, vector<64x192xbf16>
    %c0_97 = arith.constant 0 : index
    %c204 = arith.constant 204 : index
    %116 = vector.load %arg24[%c0_97, %c204] : memref<256x528xbf16, #tpu.memory_space<vmem>>, vector<192x256xbf16>
    %cst_98 = arith.constant dense<0.000000e+00> : vector<64x256xf32>
    %117 = tpu.matmul %115, %116, %cst_98 {dimension_numbers = #tpu.dot_dimension_numbers<[1], [0], [0], [1], [0, 0, 1, 1], [], []>} : vector<64x192xbf16>, vector<192x256xbf16>, vector<64x256xf32> -> vector<64x256xf32>
    %118 = arith.addf %114, %117 : vector<64x256xf32>
    %c0_99 = arith.constant 0 : index
    %c0_100 = arith.constant 0 : index
    %119 = vector.load %arg16[%c0_99, %c0_100] : memref<64x1xf32, #tpu.memory_space<vmem>>, vector<64x1xf32>
    %120 = vector.broadcast %119 : vector<64x1xf32> to vector<64x256xf32>
    %121 = arith.mulf %118, %120 : vector<64x256xf32>
    %c0_101 = arith.constant 0 : index
    %c0_102 = arith.constant 0 : index
    %122 = vector.load %arg17[%c0_101, %c0_102] : memref<64x1xf32, #tpu.memory_space<vmem>>, vector<64x1xf32>
    %123 = vector.broadcast %122 : vector<64x1xf32> to vector<64x256xf32>
    %124 = arith.addf %121, %123 : vector<64x256xf32>
    %cst_103 = arith.constant 0.000000e+00 : f32
    %125 = vector.broadcast %cst_103 : f32 to vector<64x256xf32>
    %126 = arith.cmpf oge, %124, %125 : vector<64x256xf32>
    %c0_104 = arith.constant 0 : index
    %c0_105 = arith.constant 0 : index
    %127 = vector.load %arg18[%c0_104, %c0_105] : memref<64x1xf32, #tpu.memory_space<vmem>>, vector<64x1xf32>
    %128 = vector.broadcast %127 : vector<64x1xf32> to vector<64x256xf32>
    %129 = arith.mulf %128, %124 : vector<64x256xf32>
    %130 = arith.select %126, %124, %129 : vector<64x256xi1>, vector<64x256xf32>
    %131 = vector.broadcast %4 : vector<1x256xf32> to vector<64x256xf32>
    %132 = arith.mulf %130, %131 : vector<64x256xf32>
    %133 = arith.truncf %132 : vector<64x256xf32> to vector<64x256xbf16>
    %c192_106 = arith.constant 192 : index
    %c136_107 = arith.constant 136 : index
    %134 = vector.load %arg24[%c192_106, %c136_107] : memref<256x528xbf16, #tpu.memory_space<vmem>>, vector<64x256xbf16>
    tpu.vector_store %arg24[%c192_106, %c136_107], %133 {strides = array<i32>} : memref<256x528xbf16, #tpu.memory_space<vmem>>, vector<64x256xbf16>,
    %c0_108 = arith.constant 0 : index
    %c0_109 = arith.constant 0 : index
    %135 = vector.load %arg19[%c0_108, %c0_109] : memref<64x1536xbf16, #tpu.memory_space<vmem>>, vector<64x256xbf16>
    %c0_110 = arith.constant 0 : index
    %c0_111 = arith.constant 0 : index
    %136 = vector.load %arg24[%c0_110, %c0_111] : memref<256x528xbf16, #tpu.memory_space<vmem>>, vector<256x256xbf16>
    %cst_112 = arith.constant dense<0.000000e+00> : vector<64x256xf32>
    %137 = tpu.matmul %135, %136, %cst_112 {dimension_numbers = #tpu.dot_dimension_numbers<[1], [0], [0], [1], [0, 0, 1, 1], [], []>} : vector<64x256xbf16>, vector<256x256xbf16>, vector<64x256xf32> -> vector<64x256xf32>
    %c0_113 = arith.constant 0 : index
    %c256_114 = arith.constant 256 : index
    %138 = vector.load %arg19[%c0_113, %c256_114] : memref<64x1536xbf16, #tpu.memory_space<vmem>>, vector<64x256xbf16>
    %c0_115 = arith.constant 0 : index
    %c8 = arith.constant 8 : index
    %139 = vector.load %arg24[%c0_115, %c8] : memref<256x528xbf16, #tpu.memory_space<vmem>>, vector<256x256xbf16>
    %cst_116 = arith.constant dense<0.000000e+00> : vector<64x256xf32>
    %140 = tpu.matmul %138, %139, %cst_116 {dimension_numbers = #tpu.dot_dimension_numbers<[1], [0], [0], [1], [0, 0, 1, 1], [], []>} : vector<64x256xbf16>, vector<256x256xbf16>, vector<64x256xf32> -> vector<64x256xf32>
    %141 = arith.addf %137, %140 : vector<64x256xf32>
    %c0_117 = arith.constant 0 : index
    %c512_118 = arith.constant 512 : index
    %142 = vector.load %arg19[%c0_117, %c512_118] : memref<64x1536xbf16, #tpu.memory_space<vmem>>, vector<64x256xbf16>
    %c0_119 = arith.constant 0 : index
    %c16 = arith.constant 16 : index
    %143 = vector.load %arg24[%c0_119, %c16] : memref<256x528xbf16, #tpu.memory_space<vmem>>, vector<256x256xbf16>
    %cst_120 = arith.constant dense<0.000000e+00> : vector<64x256xf32>
    %144 = tpu.matmul %142, %143, %cst_120 {dimension_numbers = #tpu.dot_dimension_numbers<[1], [0], [0], [1], [0, 0, 1, 1], [], []>} : vector<64x256xbf16>, vector<256x256xbf16>, vector<64x256xf32> -> vector<64x256xf32>
    %145 = arith.addf %141, %144 : vector<64x256xf32>
    %c0_121 = arith.constant 0 : index
    %c768_122 = arith.constant 768 : index
    %146 = vector.load %arg19[%c0_121, %c768_122] : memref<64x1536xbf16, #tpu.memory_space<vmem>>, vector<64x256xbf16>
    %c0_123 = arith.constant 0 : index
    %c256_124 = arith.constant 256 : index
    %147 = vector.load %arg24[%c0_123, %c256_124] : memref<256x528xbf16, #tpu.memory_space<vmem>>, vector<256x256xbf16>
    %cst_125 = arith.constant dense<0.000000e+00> : vector<64x256xf32>
    %148 = tpu.matmul %146, %147, %cst_125 {dimension_numbers = #tpu.dot_dimension_numbers<[1], [0], [0], [1], [0, 0, 1, 1], [], []>} : vector<64x256xbf16>, vector<256x256xbf16>, vector<64x256xf32> -> vector<64x256xf32>
    %149 = arith.addf %145, %148 : vector<64x256xf32>
    %c0_126 = arith.constant 0 : index
    %c1024 = arith.constant 1024 : index
    %150 = vector.load %arg19[%c0_126, %c1024] : memref<64x1536xbf16, #tpu.memory_space<vmem>>, vector<64x256xbf16>
    %c0_127 = arith.constant 0 : index
    %c264 = arith.constant 264 : index
    %151 = vector.load %arg24[%c0_127, %c264] : memref<256x528xbf16, #tpu.memory_space<vmem>>, vector<256x256xbf16>
    %cst_128 = arith.constant dense<0.000000e+00> : vector<64x256xf32>
    %152 = tpu.matmul %150, %151, %cst_128 {dimension_numbers = #tpu.dot_dimension_numbers<[1], [0], [0], [1], [0, 0, 1, 1], [], []>} : vector<64x256xbf16>, vector<256x256xbf16>, vector<64x256xf32> -> vector<64x256xf32>
    %153 = arith.addf %149, %152 : vector<64x256xf32>
    %c0_129 = arith.constant 0 : index
    %c1280 = arith.constant 1280 : index
    %154 = vector.load %arg19[%c0_129, %c1280] : memref<64x1536xbf16, #tpu.memory_space<vmem>>, vector<64x256xbf16>
    %c0_130 = arith.constant 0 : index
    %c272 = arith.constant 272 : index
    %155 = vector.load %arg24[%c0_130, %c272] : memref<256x528xbf16, #tpu.memory_space<vmem>>, vector<256x256xbf16>
    %cst_131 = arith.constant dense<0.000000e+00> : vector<64x256xf32>
    %156 = tpu.matmul %154, %155, %cst_131 {dimension_numbers = #tpu.dot_dimension_numbers<[1], [0], [0], [1], [0, 0, 1, 1], [], []>} : vector<64x256xbf16>, vector<256x256xbf16>, vector<64x256xf32> -> vector<64x256xf32>
    %157 = arith.addf %153, %156 : vector<64x256xf32>
    %c0_132 = arith.constant 0 : index
    %c0_133 = arith.constant 0 : index
    %158 = vector.load %arg20[%c0_132, %c0_133] : memref<64x1xf32, #tpu.memory_space<vmem>>, vector<64x1xf32>
    %159 = vector.broadcast %158 : vector<64x1xf32> to vector<64x256xf32>
    %160 = arith.mulf %157, %159 : vector<64x256xf32>
    %c0_134 = arith.constant 0 : index
    %c0_135 = arith.constant 0 : index
    %161 = vector.load %arg21[%c0_134, %c0_135] : memref<64x1xf32, #tpu.memory_space<vmem>>, vector<64x1xf32>
    %162 = vector.broadcast %161 : vector<64x1xf32> to vector<64x256xf32>
    %163 = arith.addf %160, %162 : vector<64x256xf32>
    %cst_136 = arith.constant 0.000000e+00 : f32
    %164 = vector.broadcast %cst_136 : f32 to vector<64x256xf32>
    %165 = arith.cmpf oge, %163, %164 : vector<64x256xf32>
    %c0_137 = arith.constant 0 : index
    %c0_138 = arith.constant 0 : index
    %166 = vector.load %arg22[%c0_137, %c0_138] : memref<64x1xf32, #tpu.memory_space<vmem>>, vector<64x1xf32>
    %167 = vector.broadcast %166 : vector<64x1xf32> to vector<64x256xf32>
    %168 = arith.mulf %167, %163 : vector<64x256xf32>
    %169 = arith.select %165, %163, %168 : vector<64x256xi1>, vector<64x256xf32>
    %c0_139 = arith.constant 0 : index
    %c0_140 = arith.constant 0 : index
    %c0_141 = arith.constant 0 : index
    %170 = vector.load %arg23[%c0_139, %c0_140, %c0_141] : memref<1x64x256xf32, #tpu.memory_space<vmem>>, vector<1x64x256xf32>
    %171 = vector.shape_cast %170 : vector<1x64x256xf32> to vector<64x256xf32>
    %172 = vector.shape_cast %169 : vector<64x256xf32> to vector<1x64x256xf32>
    tpu.vector_store %arg23[%c0_139, %c0_140, %c0_141], %172 {strides = array<i32>} : memref<1x64x256xf32, #tpu.memory_space<vmem>>, vector<1x64x256xf32>,
    return
  }
  func.func @transform_0(%arg0: i32) -> (i32, i32, i32) {
    %c0_i32 = arith.constant 0 : i32
    %c0_i32_0 = arith.constant 0 : i32
    %c0_i32_1 = arith.constant 0 : i32
    return %arg0, %c0_i32, %c0_i32_0 : i32, i32, i32
  }
  func.func @transform_1(%arg0: i32) -> (i32, i32) {
    %c0_i32 = arith.constant 0 : i32
    %c0_i32_0 = arith.constant 0 : i32
    %c0_i32_1 = arith.constant 0 : i32
    return %c0_i32, %c0_i32_0 : i32, i32
  }
  func.func @transform_2(%arg0: i32) -> (i32, i32) {
    %c0_i32 = arith.constant 0 : i32
    %c0_i32_0 = arith.constant 0 : i32
    %c0_i32_1 = arith.constant 0 : i32
    return %c0_i32, %c0_i32_0 : i32, i32
  }
  func.func @transform_3(%arg0: i32) -> (i32, i32) {
    %c0_i32 = arith.constant 0 : i32
    %c0_i32_0 = arith.constant 0 : i32
    %c0_i32_1 = arith.constant 0 : i32
    return %c0_i32, %c0_i32_0 : i32, i32
  }
  func.func @transform_4(%arg0: i32) -> (i32, i32) {
    %c0_i32 = arith.constant 0 : i32
    %c0_i32_0 = arith.constant 0 : i32
    %c0_i32_1 = arith.constant 0 : i32
    return %c0_i32, %c0_i32_0 : i32, i32
  }
  func.func @transform_5(%arg0: i32) -> (i32, i32) {
    %c0_i32 = arith.constant 0 : i32
    %c0_i32_0 = arith.constant 0 : i32
    %c0_i32_1 = arith.constant 0 : i32
    return %c0_i32, %c0_i32_0 : i32, i32
  }
  func.func @transform_6(%arg0: i32) -> (i32, i32) {
    %c0_i32 = arith.constant 0 : i32
    %c0_i32_0 = arith.constant 0 : i32
    %c0_i32_1 = arith.constant 0 : i32
    return %c0_i32, %c0_i32_0 : i32, i32
  }
  func.func @transform_7(%arg0: i32) -> (i32, i32) {
    %c0_i32 = arith.constant 0 : i32
    %c0_i32_0 = arith.constant 0 : i32
    %c0_i32_1 = arith.constant 0 : i32
    return %c0_i32, %c0_i32_0 : i32, i32
  }
  func.func @transform_8(%arg0: i32) -> (i32, i32) {
    %c0_i32 = arith.constant 0 : i32
    %c0_i32_0 = arith.constant 0 : i32
    %c0_i32_1 = arith.constant 0 : i32
    return %c0_i32, %c0_i32_0 : i32, i32
  }
  func.func @transform_9(%arg0: i32) -> (i32, i32) {
    %c0_i32 = arith.constant 0 : i32
    %c0_i32_0 = arith.constant 0 : i32
    %c0_i32_1 = arith.constant 0 : i32
    return %c0_i32, %c0_i32_0 : i32, i32
  }
  func.func @transform_10(%arg0: i32) -> (i32, i32) {
    %c0_i32 = arith.constant 0 : i32
    %c0_i32_0 = arith.constant 0 : i32
    %c0_i32_1 = arith.constant 0 : i32
    return %c0_i32, %c0_i32_0 : i32, i32
  }
  func.func @transform_11(%arg0: i32) -> (i32, i32) {
    %c0_i32 = arith.constant 0 : i32
    %c0_i32_0 = arith.constant 0 : i32
    %c0_i32_1 = arith.constant 0 : i32
    return %c0_i32, %c0_i32_0 : i32, i32
  }
  func.func @transform_12(%arg0: i32) -> (i32, i32) {
    %c0_i32 = arith.constant 0 : i32
    %c0_i32_0 = arith.constant 0 : i32
    %c0_i32_1 = arith.constant 0 : i32
    return %c0_i32, %c0_i32_0 : i32, i32
  }
  func.func @transform_13(%arg0: i32) -> (i32, i32) {
    %c0_i32 = arith.constant 0 : i32
    %c0_i32_0 = arith.constant 0 : i32
    %c0_i32_1 = arith.constant 0 : i32
    return %c0_i32, %c0_i32_0 : i32, i32
  }
  func.func @transform_14(%arg0: i32) -> (i32, i32) {
    %c0_i32 = arith.constant 0 : i32
    %c0_i32_0 = arith.constant 0 : i32
    %c0_i32_1 = arith.constant 0 : i32
    return %c0_i32, %c0_i32_0 : i32, i32
  }
  func.func @transform_15(%arg0: i32) -> (i32, i32) {
    %c0_i32 = arith.constant 0 : i32
    %c0_i32_0 = arith.constant 0 : i32
    %c0_i32_1 = arith.constant 0 : i32
    return %c0_i32, %c0_i32_0 : i32, i32
  }
  func.func @transform_16(%arg0: i32) -> (i32, i32) {
    %c0_i32 = arith.constant 0 : i32
    %c0_i32_0 = arith.constant 0 : i32
    %c0_i32_1 = arith.constant 0 : i32
    return %c0_i32, %c0_i32_0 : i32, i32
  }
  func.func @transform_17(%arg0: i32) -> (i32, i32) {
    %c0_i32 = arith.constant 0 : i32
    %c0_i32_0 = arith.constant 0 : i32
    %c0_i32_1 = arith.constant 0 : i32
    return %c0_i32, %c0_i32_0 : i32, i32
  }
  func.func @transform_18(%arg0: i32) -> (i32, i32) {
    %c0_i32 = arith.constant 0 : i32
    %c0_i32_0 = arith.constant 0 : i32
    %c0_i32_1 = arith.constant 0 : i32
    return %c0_i32, %c0_i32_0 : i32, i32
  }
  func.func @transform_19(%arg0: i32) -> (i32, i32) {
    %c0_i32 = arith.constant 0 : i32
    %c0_i32_0 = arith.constant 0 : i32
    %c0_i32_1 = arith.constant 0 : i32
    return %c0_i32, %c0_i32_0 : i32, i32
  }
  func.func @transform_20(%arg0: i32) -> (i32, i32) {
    %c0_i32 = arith.constant 0 : i32
    %c0_i32_0 = arith.constant 0 : i32
    %c0_i32_1 = arith.constant 0 : i32
    return %c0_i32, %c0_i32_0 : i32, i32
  }
  func.func @transform_21(%arg0: i32) -> (i32, i32) {
    %c0_i32 = arith.constant 0 : i32
    %c0_i32_0 = arith.constant 0 : i32
    %c0_i32_1 = arith.constant 0 : i32
    return %c0_i32, %c0_i32_0 : i32, i32
  }
  func.func @transform_22(%arg0: i32) -> (i32, i32, i32) {
    %c0_i32 = arith.constant 0 : i32
    %c0_i32_0 = arith.constant 0 : i32
    %c0_i32_1 = arith.constant 0 : i32
    return %arg0, %c0_i32, %c0_i32_0 : i32, i32, i32
  }
}

</mosaic_0001>

<bundles_post_ra>
// kernel: encoder_forward.1
= control target key start
LH: loop header
LB: loop body
LE: loop exit
PB: predicated region body
PF: predicated region fallthrough
CT: control target
= control target key end

     0   :  { %s13639_s0 = inlined_call_operand.vmem [shape: f32[2,2,256], index: 0, kind: input, shape index: {}]   ;;  %s13640_s1 = inlined_call_operand.vmem [shape: f32[1,256], index: 1, kind: input, shape index: {}]   ;;  %s13641_s2 = inlined_call_operand.vmem [shape: f32[64,2], index: 2, kind: input, shape index: {}]   ;;  %s13642_s3 = inlined_call_operand.vmem [shape: f32[64,1], index: 3, kind: input, shape index: {}]   ;;  %s13643_s4 = inlined_call_operand.vmem [shape: f32[64,1], index: 4, kind: input, shape index: {}]   ;;  %s13644_s5 = inlined_call_operand.vmem [shape: f32[64,1], index: 5, kind: input, shape index: {}]   ;;  %s13645_s6 = inlined_call_operand.vmem [shape: bf16[64,384], index: 6, kind: input, shape index: {}]   ;;  %s13646_s7 = inlined_call_operand.vmem [shape: f32[64,1], index: 7, kind: input, shape index: {}]   ;;  %s13647_s8 = inlined_call_operand.vmem [shape: f32[64,1], index: 8, kind: input, shape index: {}]   ;;  %s13648_s9 = inlined_call_operand.vmem [shape: f32[64,1], index: 9, kind: input, shape index: {}]   ;;  %s13649_s10 = inlined_call_operand.vmem [shape: bf16[64,768], index: 10, kind: input, shape index: {}]   ;;  %s13650_s11 = inlined_call_operand.vmem [shape: f32[64,1], index: 11, kind: input, shape index: {}]   ;;  %s13651_s12 = inlined_call_operand.vmem [shape: f32[64,1], index: 12, kind: input, shape index: {}]   ;;  %s13652_s13 = inlined_call_operand.vmem [shape: f32[64,1], index: 13, kind: input, shape index: {}]   ;;  %s13653_s14 = inlined_call_operand.vmem [shape: bf16[64,1152], index: 14, kind: input, shape index: {}]   ;;  %s13654_s15 = inlined_call_operand.vmem [shape: f32[64,1], index: 15, kind: input, shape index: {}]   ;;  %s13655_s16 = inlined_call_operand.vmem [shape: f32[64,1], index: 16, kind: input, shape index: {}]   ;;  %s13656_s17 = inlined_call_operand.vmem [shape: f32[64,1], index: 17, kind: input, shape index: {}]   ;;  %s13657_s18 = inlined_call_operand.vmem [shape: bf16[64,1536], index: 18, kind: input, shape index: {}]   ;;  %s13658_s19 = inlined_call_operand.vmem [shape: f32[64,1], index: 19, kind: input, shape index: {}]   ;;  %s13659_s20 = inlined_call_operand.vmem [shape: f32[64,1], index: 20, kind: input, shape index: {}]   ;;  %s13660_s21 = inlined_call_operand.vmem [shape: f32[64,1], index: 21, kind: input, shape index: {}]   ;;  %s13661_s22 = inlined_call_operand.vmem [shape: f32[2,64,256], index: 22, kind: output, shape index: {}]  }
   0x1   :  { %13766 = sst [smem:[#allocation51_spill]] %s13639_s0 }
   0x2   :  { %13767 = sst [smem:[#allocation52_spill]] %s13640_s1 }
   0x3   :  { %13768 = sst [smem:[#allocation53_spill]] %s13641_s2 }
   0x4   :  { %13769 = sst [smem:[#allocation54_spill]] %s13642_s3  ;;  %s8944_s3 = smov 0  }
   0x5   :  { %13770 = sst [smem:[#allocation55_spill]] %s13643_s4 }
   0x6   :  { %13771 = sst [smem:[#allocation56_spill]] %s13644_s5 }
   0x7   :  { %13772 = sst [smem:[#allocation57_spill]] %s13645_s6 }
   0x8 LB: > { %p7893_p0 = scmp.ge.s32.totalorder %s8808_s3, 1  ;;  %p612_p1 = scmp.lt.s32.totalorder %s8808_s3, 3  ;;  %s8808_s3 = sphi %s8944_s3, %s32_s3  }
   0xa   : > { %p613_p2 = pnand %p7893_p0, %p612_p1 }
   0xc   : > { %616 = sbr.rel (%p613_p2) target bundleno = 3043 (0xbe3), region = 108 }
  0x13   : > { %s13773_s4 = sld [smem:[#allocation53_spill]]  ;;  %v8810_v2 = vmov 1   ;;  %v8811_v3 = vmov 0   ;;  %s13774_s0 = sld [smem:[#allocation54_spill]]  ;;  %v802_v43 = vlaneseq  ;;  %vm686_vm0 = vcmask 261120  }
  0x14   : > { %8327 = vset.pattern.permute.xlu0 %v8810_v2  ;;  %8325 = vset.pattern.permute.xlu1 %v8810_v2  ;;  %685 = vst [vmem:[#allocation2] sm:$0xff] %v8811_v3  ;;  %718 = vst [vmem:[#allocation2 + $0x18] sm:$0xff] %v8811_v3  ;;  %s13775_s5 = sld [smem:[#allocation55_spill]]  ;;  %s13776_s29 = sld [smem:[#allocation56_spill]] }
  0x15   : > { %721 = vst [vmem:[#allocation2 + $0x40] sm:$0xff] %v8811_v3  ;;  %723 = vst [vmem:[#allocation2 + $0x68] sm:$0xff] %v8811_v3  ;;  %s13777_s28 = sadd.s32 4294967295, %s8808_s3   ;;  %v803_v45 = vshrl.u32 %v802_v43, 7  ;;  %s13779_s26 = sld [smem:[#allocation51_spill]] }
  0x16   : > { %725 = vst [vmem:[#allocation2 + $0x90] sm:$0xff] %v8811_v3  ;;  %727 = vst [vmem:[#allocation2 + $0xb8] sm:$0xff] %v8811_v3  ;;  %p674_p3 = scmp.lt.s32.totalorder %s13777_s28, 1  ;;  %s13778_s1 = smov %s13777_s28 }
  0x17   : > { %729 = vst [vmem:[#allocation2 + $0xe0] sm:$0xff] %v8811_v3  ;;  %731 = vst [vmem:[#allocation2 + $0x108] sm:$0xff] %v8811_v3  ;;  %v870_v48 = vsub.s32 1, %v803_v45  ;;  %v874_v49 = vsub.s32 3, %v803_v45  ;;  %v804_v50 = vsub.s32 0, %v803_v45  ;;  %v808_v51 = vsub.s32 2, %v803_v45 }
  0x18   : > { %733 = vst [vmem:[#allocation2 + $0x130] sm:$0xff] %v8811_v3  ;;  %735 = vst [vmem:[#allocation2 + $0x158] sm:$0xff] %v8811_v3  ;;  %s13954_s1 = smov (!%p674_p3, %s13778_s1), 1  ;;  %s13780_s23 = sld [smem:[#allocation52_spill]] }
  0x19   : > { %v755_v0 = vld [vmem:[%s13773_s4 + $0x10] sm:$0xff]  ;;  %v753_v1 = vld [vmem:[%s13773_s4] sm:$0xff]  ;;  %737 = vst [vmem:[#allocation2 + $0x180] sm:$0xff] %v8811_v3  ;;  %739 = vst [vmem:[#allocation2 + $0x1a8] sm:$0xff] %v8811_v3  ;;  %s8056_s24 = sshll.u32 %s13954_s1, 2  ;;  %s13671_s28 = smov 8  }
  0x1a   : > { %741 = vst [vmem:[#allocation2 + $0x1d0] sm:$0xff] %v8811_v3  ;;  %743 = vst [vmem:[#allocation2 + $0x1f8] sm:$0xff] %v8811_v3  ;;  %845 = vperm.xlu0 %8327, %v755_v0   ;;  %837 = vperm.xlu1 %8325, %v753_v1   ;;  %v757_v4 = vld [vmem:[%s13773_s4 + $0x20] sm:$0xff]  ;;  %v754_v5 = vld [vmem:[%s13773_s4 + $0x8] sm:$0xff]  ;;  %s13669_s6 = smov 24   ;;  %s8815_s25 = smov 23  }
  0x1b   : > { %745 = vst [vmem:[#allocation2 + $0x220] sm:$0xff] %v8811_v3  ;;  %747 = vst [vmem:[#allocation2 + $0x248] sm:$0xff] %v8811_v3  ;;  %v759_v6 = vld [vmem:[%s13773_s4 + $0x30] sm:$0xff]  ;;  %v756_v7 = vld [vmem:[%s13773_s4 + $0x18] sm:$0xff]  ;;  %s678_s2 = scalar_lea.vmem %s13779_s26, %s8056_s24  ;;  %s8813_s24 = smov 25  }
  0x1c   : > { %749 = vst [vmem:[#allocation2 + $0x270] sm:$0xff] %v8811_v3  ;;  %v918_v8 = vld [vmem:[%s13774_s0] sm:$0xff]  ;;  %v919_v10 = vld [vmem:[%s13774_s0 + $0x8] sm:$0xff]  ;;  %v921_v13 = vld [vmem:[%s13774_s0 + $0x18] sm:$0xff]  ;;  %s8816_s26 = smov 121   ;;  %s8821_s27 = smov 26  }
  0x1d   : > { %v982_v9 = vld [vmem:[%s13775_s5] sm:$0xff]  ;;  %v983_v11 = vld [vmem:[%s13775_s5 + $0x8] sm:$0xff]  ;;  %v984_v14 = vld [vmem:[%s13775_s5 + $0x10] sm:$0xff]  ;;  %687 = vst.msk [vmem:[#allocation2 + $0x8] sm:$0xff] %vm686_vm0, %v8811_v3  ;;  %s8822_s30 = smov 88  }
  0x1e   : > { %853 = vperm.xlu0 %8327, %v757_v4   ;;  %841 = vperm.xlu1 %8325, %v754_v5   ;;  %v758_v12 = vld [vmem:[%s13773_s4 + $0x28] sm:$0xff]  ;;  %v920_v15 = vld [vmem:[%s13774_s0 + $0x10] sm:$0xff]  ;;  %v1062_v17 = vld [vmem:[%s13776_s29] sm:$0xff]  ;;  %689 = vst.msk [vmem:[#allocation2 + $0x30] sm:$0xff] %vm686_vm0, %v8811_v3 }
  0x1f   : > { %v923_v16 = vld [vmem:[%s13774_s0 + $0x28] sm:$0xff]  ;;  %v986_v18 = vld [vmem:[%s13775_s5 + $0x20] sm:$0xff]  ;;  %v924_v20 = vld [vmem:[%s13774_s0 + $0x30] sm:$0xff]  ;;  %691 = vst.msk [vmem:[#allocation2 + $0x58] sm:$0xff] %vm686_vm0, %v8811_v3 }
  0x20   : > { %v1063_v19 = vld [vmem:[%s13776_s29 + $0x8] sm:$0xff]  ;;  %v985_v21 = vld [vmem:[%s13775_s5 + $0x18] sm:$0xff]  ;;  %v1066_v22 = vld [vmem:[%s13776_s29 + $0x20] sm:$0xff]  ;;  %693 = vst.msk [vmem:[#allocation2 + $0x80] sm:$0xff] %vm686_vm0, %v8811_v3 }
  0x21   : > { %v760_v23 = vld [vmem:[%s13773_s4 + $0x38] sm:$0xff]  ;;  %v988_v24 = vld [vmem:[%s13775_s5 + $0x30] sm:$0xff]  ;;  %v922_v26 = vld [vmem:[%s13774_s0 + $0x20] sm:$0xff]  ;;  %695 = vst.msk [vmem:[#allocation2 + $0xa8] sm:$0xff] %vm686_vm0, %v8811_v3  ;;  %s8057_s4 = sshll.u32 %s13954_s1, 7 }
  0x22   : > { %861 = vperm.xlu0 %8327, %v759_v6   ;;  %8326 = vset.pattern.permute.xlu1 %v8811_v3  ;;  %v1068_v25 = vld [vmem:[%s13776_s29 + $0x30] sm:$0xff]  ;;  %v1065_v28 = vld [vmem:[%s13776_s29 + $0x18] sm:$0xff]  ;;  %v987_v29 = vld [vmem:[%s13775_s5 + $0x28] sm:$0xff]  ;;  %697 = vst.msk [vmem:[#allocation2 + $0xd0] sm:$0xff] %vm686_vm0, %v8811_v3 }
  0x23   : > { %778 = vperm.xlu1 %8326, %v756_v7   ;;  %v1064_v27 = vld [vmem:[%s13776_s29 + $0x10] sm:$0xff]  ;;  %v925_v30 = vld [vmem:[%s13774_s0 + $0x38] sm:$0xff]  ;;  %v1067_v31 = vld [vmem:[%s13776_s29 + $0x28] sm:$0xff]  ;;  %699 = vst.msk [vmem:[#allocation2 + $0xf8] sm:$0xff] %vm686_vm0, %v8811_v3  ;;  %s13692_s0 = smov 56  }
  0x24   : > { %v989_v32 = vld [vmem:[%s13775_s5 + $0x38] sm:$0xff]  ;;  %v752_v52 = vld [vmem:[%s678_s2] sm:$0xf]  ;;  %701 = vst.msk [vmem:[#allocation2 + $0x120] sm:$0xff] %vm686_vm0, %v8811_v3  ;;  %703 = vst.msk [vmem:[#allocation2 + $0x148] sm:$0xff] %vm686_vm0, %v8811_v3  ;;  %s13667_s2 = smov 120  }
  0x25   : > { %v1069_v33 = vld [vmem:[%s13776_s29 + $0x38] sm:$0xff]  ;;  %v871_v55 = vrot.slane %v752_v52, %v870_v48  ;;  %v875_v56 = vrot.slane %v752_v52, %v874_v49  ;;  %v805_v57 = vrot.slane %v752_v52, %v804_v50  ;;  %v809_v58 = vrot.slane %v752_v52, %v808_v51  ;;  %705 = vst.msk [vmem:[#allocation2 + $0x170] sm:$0xff] %vm686_vm0, %v8811_v3 }
  0x26   : > { %8332 = vset.pattern.permute.xlu0 %v8811_v3  ;;  %707 = vst.msk [vmem:[#allocation2 + $0x198] sm:$0xff] %vm686_vm0, %v8811_v3  ;;  %709 = vst.msk [vmem:[#allocation2 + $0x1c0] sm:$0xff] %vm686_vm0, %v8811_v3 }
  0x27   : > { %763 = vperm.xlu0 %8332, %v753_v1   ;;  %8328 = vset.pattern.permute.xlu1 %v8810_v2  ;;  %v9099_v60 = vrot.slane %v871_v55, %v870_v48  ;;  %v9101_v61 = vrot.slane %v875_v56, %v870_v48  ;;  %v9103_v62 = vrot.slane %v805_v57, %v804_v50 }
  0x28   : > { %849 = vperm.xlu1 %8328, %v756_v7   ;;  %v9105_v63 = vrot.slane %v809_v58, %v804_v50  ;;  %711 = vst.msk [vmem:[#allocation2 + $0x1e8] sm:$0xff] %vm686_vm0, %v8811_v3  ;;  %713 = vst.msk [vmem:[#allocation2 + $0x210] sm:$0xff] %vm686_vm0, %v8811_v3 }
  0x29   : > { %715 = vst.msk [vmem:[#allocation2 + $0x238] sm:$0xff] %vm686_vm0, %v8811_v3  ;;  %717 = vst.msk [vmem:[#allocation2 + $0x260] sm:$0xff] %vm686_vm0, %v8811_v3 }
  0x2b   : > { %768 = vperm.xlu0 %8332, %v754_v5  }
  0x2c   : > { %8329 = vset.pattern.permute.xlu1 %v8811_v3 }
  0x2d   : > { %928 = vperm.xlu1 %8329, %v918_v8  }
  0x2f   : > { %773 = vperm.xlu0 %8332, %v755_v0  }
  0x31   : > { %992 = vperm.xlu1 %8329, %v982_v9  }
  0x33   : > { %933 = vperm.xlu0 %8332, %v919_v10  }
  0x35   : > { %997 = vperm.xlu1 %8329, %v983_v11  }
  0x37   : > { %783 = vperm.xlu0 %8332, %v757_v4  }
  0x39   : > { %788 = vperm.xlu1 %8329, %v758_v12  }
  0x3b   : > { %943 = vperm.xlu0 %8332, %v921_v13  }
  0x3d   : > { %8330 = vset.pattern.permute.xlu1 %v8810_v2 }
  0x3e   : > { %857 = vperm.xlu1 %8330, %v758_v12  }
  0x3f   : > { %1002 = vperm.xlu0 %8332, %v984_v14  }
  0x42   : > { %8331 = vset.pattern.permute.xlu1 %v8811_v3 }
  0x43   : > { %793 = vperm.xlu0 %8332, %v759_v6   ;;  %938 = vperm.xlu1 %8331, %v920_v15  }
  0x47   : > { %953 = vperm.xlu0 %8332, %v923_v16   ;;  %1072 = vperm.xlu1 %8331, %v1062_v17  }
  0x4b   : > { %1012 = vperm.xlu0 %8332, %v986_v18   ;;  %1077 = vperm.xlu1 %8331, %v1063_v19  }
  0x4f   : > { %958 = vperm.xlu0 %8332, %v924_v20   ;;  %1007 = vperm.xlu1 %8331, %v985_v21  }
  0x53   : > { %1092 = vperm.xlu0 %8332, %v1066_v22   ;;  %798 = vperm.xlu1 %8331, %v760_v23  }
  0x57   : > { %1022 = vperm.xlu0 %8332, %v988_v24   ;;  %8333 = vset.pattern.permute.xlu1 %v8810_v2  ;;  %v751_v24 = vld [vmem:[%s13780_s23] sm:$0x3]  ;;  %s13783_s23 = sld [smem:[#allocation57_spill]] }
  0x58   : > { %865 = vperm.xlu1 %8333, %v760_v23  }
  0x5b   : > { %1102 = vperm.xlu0 %8332, %v1068_v25  }
  0x5c   : > { %8334 = vset.pattern.permute.xlu1 %v8811_v3 }
  0x5d   : > { %948 = vperm.xlu1 %8334, %v922_v26  }
  0x61   : > { %1082 = vperm.xlu1 %8334, %v1064_v27  }
  0x65   : > { %1087 = vperm.xlu1 %8334, %v1065_v28  }
  0x69   : > { %1017 = vperm.xlu1 %8334, %v987_v29  }
  0x6d   : > { %963 = vperm.xlu1 %8334, %v925_v30   ;;  %v9158_v30 = vrot.slane %v751_v24, %v870_v48 }
  0x6f   : > { %13781 = vst [vmem:[#allocation4_spill] sm:$0xff] %v9158_v30 }
  0x71   : > { %1097 = vperm.xlu1 %8334, %v1067_v31   ;;  %v9160_v31 = vrot.slane %v751_v24, %v804_v50 }
  0x73   : > { %13782 = vst [vmem:[#allocation5_spill] sm:$0xff] %v9160_v31 }
  0x75   : > { %1027 = vperm.xlu1 %8334, %v989_v32  }
  0x79   : > { %1107 = vperm.xlu1 %8334, %v1069_v33  }
  0x99   : > { %v838_v34 = vpop.permute.xlu1 %837  ;;  %v9075_v35 = vpop.permute.xlu0 %845 }
  0x9a   : > { %v886_v7 = vmul.f32 %v9099_v60, %v838_v34  ;;  %v887_v8 = vmul.f32 %v9101_v61, %v838_v34  ;;  %v890_v55 = vmul.f32 %v9099_v60, %v9075_v35  ;;  %v891_v56 = vmul.f32 %v9101_v61, %v9075_v35 }
  0x9d   : > { %v842_v36 = vpop.permute.xlu1 %841  ;;  %v9077_v37 = vpop.permute.xlu0 %853 }
  0x9e   : > { %v888_v9 = vmul.f32 %v9099_v60, %v842_v36  ;;  %v889_v10 = vmul.f32 %v9101_v61, %v842_v36 }
  0xa1   : > { %v9079_v38 = vpop.permute.xlu0 %861 }
  0xa2   : > { %v9081_v39 = vpop.permute.xlu1 %778 }
  0xa6   : > { %v764_v40 = vpop.permute.xlu0 %763 }
  0xa7   : > { %v9085_v41 = vpop.permute.xlu1 %849  ;;  %v820_v1 = vmul.f32 %v9103_v62, %v764_v40  ;;  %v821_v2 = vmul.f32 %v9105_v63, %v764_v40 }
  0xa9   : > { %v902_v11 = vadd.f32 %v886_v7, %v820_v1  ;;  %v903_v12 = vadd.f32 %v887_v8, %v821_v2  ;;  %v893_v7 = vmul.f32 %v9101_v61, %v9085_v41 }
  0xaa   : > { %v769_v42 = vpop.permute.xlu0 %768 }
  0xab   : > { %v822_v5 = vmul.f32 %v9103_v62, %v769_v42  ;;  %v823_v6 = vmul.f32 %v9105_v63, %v769_v42 }
  0xac   : > { %v929_v44 = vpop.permute.xlu1 %928 }
  0xad   : > { %v904_v13 = vadd.f32 %v888_v9, %v822_v5  ;;  %v905_v14 = vadd.f32 %v889_v10, %v823_v6  ;;  %v966_v17 = vmul.f32 %v929_v44, %v902_v11  ;;  %v967_v18 = vmul.f32 %v929_v44, %v903_v12 }
  0xae   : > { %v9092_v46 = vpop.permute.xlu0 %773  ;;  %v892_v6 = vmul.f32 %v9099_v60, %v9085_v41  ;;  %v826_v10 = vmul.f32 %v9103_v62, %v9081_v39  ;;  %v894_v12 = vmul.f32 %v9099_v60, %v9077_v37 }
  0xaf   : > { %v824_v57 = vmul.f32 %v9103_v62, %v9092_v46  ;;  %v825_v58 = vmul.f32 %v9105_v63, %v9092_v46  ;;  %v827_v46 = vmul.f32 %v9105_v63, %v9081_v39 }
  0xb0   : > { %v993_v47 = vpop.permute.xlu1 %992 }
  0xb1   : > { %v1030_v21 = vadd.f32 %v993_v47, %v966_v17  ;;  %v1031_v22 = vadd.f32 %v993_v47, %v967_v18  ;;  %v906_v2 = vadd.f32 %v890_v55, %v824_v57  ;;  %v907_v5 = vadd.f32 %v891_v56, %v825_v58 }
  0xb2   : > { %v934_v54 = vpop.permute.xlu0 %933  ;;  %v909_v17 = vadd.f32 %v893_v7, %v827_v46  ;;  %v898_v7 = vmul.f32 %v9099_v60, %v9079_v38 }
  0xb3   : > { %v968_v19 = vmul.f32 %v934_v54, %v904_v13  ;;  %v969_v20 = vmul.f32 %v934_v54, %v905_v14  ;;  %vm1046_vm1 = vcmp.ge.f32.partialorder %v1030_v21, 0.0  ;;  %vm1047_vm2 = vcmp.ge.f32.partialorder %v1031_v22, 0.0 }
  0xb4   : > { %v998_v53 = vpop.permute.xlu1 %997  ;;  %v895_v13 = vmul.f32 %v9101_v61, %v9077_v37 }
  0xb5   : > { %v1032_v27 = vadd.f32 %v998_v53, %v968_v19  ;;  %v1033_v28 = vadd.f32 %v998_v53, %v969_v20 }
  0xb6   : > { %v9107_v0 = vpop.permute.xlu0 %783 }
  0xb7   : > { %vm1048_vm3 = vcmp.ge.f32.partialorder %v1032_v27, 0.0  ;;  %vm1049_vm4 = vcmp.ge.f32.partialorder %v1033_v28, 0.0  ;;  %v828_v41 = vmul.f32 %v9103_v62, %v9107_v0  ;;  %v829_v14 = vmul.f32 %v9105_v63, %v9107_v0 }
  0xb8   : > { %v9097_v59 = vpop.permute.xlu1 %788 }
  0xb9   : > { %v911_v24 = vadd.f32 %v895_v13, %v829_v14  ;;  %v830_v0 = vmul.f32 %v9103_v62, %v9097_v59 }
  0xba   : > { %v9119_v15 = vpop.permute.xlu0 %943 }
  0xbb   : > { %v973_v39 = vmul.f32 %v9119_v15, %v909_v17 }
  0xbd   : > { %v9111_v4 = vpop.permute.xlu1 %857 }
  0xbe   : > { %v1003_v29 = vpop.permute.xlu0 %1002 }
  0xc2   : > { %v9121_v16 = vpop.permute.xlu1 %938  ;;  %v9162_v44 = vpop.permute.xlu0 %793 }
  0xc3   : > { %v970_v9 = vmul.f32 %v9121_v16, %v906_v2  ;;  %v971_v35 = vmul.f32 %v9121_v16, %v907_v5  ;;  %v908_v16 = vadd.f32 %v892_v6, %v826_v10 }
  0xc5   : > { %v1034_v18 = vadd.f32 %v1003_v29, %v970_v9  ;;  %v1035_v19 = vadd.f32 %v1003_v29, %v971_v35  ;;  %v972_v20 = vmul.f32 %v9119_v15, %v908_v16  ;;  %v896_v29 = vmul.f32 %v9099_v60, %v9111_v4 }
  0xc6   : > { %v1073_v23 = vpop.permute.xlu1 %1072  ;;  %v9172_v54 = vpop.permute.xlu0 %953 }
  0xc7   : > { %v1110_v25 = vmul.f32 %v1073_v23, %v1030_v21  ;;  %v1111_v26 = vmul.f32 %v1073_v23, %v1031_v22  ;;  %v910_v23 = vadd.f32 %v894_v12, %v828_v41  ;;  %vm1051_vm5 = vcmp.ge.f32.partialorder %v1035_v19, 0.0 }
  0xc8   : > { %vm1050_vm6 = vcmp.ge.f32.partialorder %v1034_v18, 0.0  ;;  %v912_v58 = vadd.f32 %v896_v29, %v830_v0 }
  0xc9   : > { %v1127_v36 = vsel %vm1047_vm2, %v1031_v22, %v1111_v26  ;;  %v1126_v40 = vsel %vm1046_vm1, %v1030_v21, %v1110_v25  ;;  %vm1201_vm1 = vcmask 64512   ;;  %vm1218_vm2 = vcmask 1047616  }
  0xca   : > { %v1078_v32 = vpop.permute.xlu1 %1077  ;;  %v1154_v47 = vmul.f32 %v9158_v30, %v1127_v36  ;;  %v1153_v49 = vmul.f32 %v9160_v31, %v1126_v40  ;;  %v1013_v8 = vpop.permute.xlu0 %1012  ;;  %v976_v9 = vmul.f32 %v9172_v54, %v912_v58 }
  0xcb   : > { %v1112_v33 = vmul.f32 %v1078_v32, %v1032_v27  ;;  %v1113_v34 = vmul.f32 %v1078_v32, %v1033_v28 }
  0xcd   : > { %v1129_v42 = vsel %vm1049_vm4, %v1033_v28, %v1113_v34  ;;  %v1128_v43 = vsel %vm1048_vm3, %v1032_v27, %v1112_v33  ;;  %vm1280_vm3 = vcmask 203776   ;;  %vm1353_vm4 = vcmask 195584  }
  0xce   : > { %v1008_v45 = vpop.permute.xlu1 %1007  ;;  %v1156_v48 = vmul.f32 %v9158_v30, %v1129_v42  ;;  %v1155_v50 = vmul.f32 %v9160_v31, %v1128_v43  ;;  %v959_v21 = vpop.permute.xlu0 %958  ;;  %v831_v42 = vmul.f32 %v9105_v63, %v9097_v59  ;;  %v897_v43 = vmul.f32 %v9101_v61, %v9111_v4 }
  0xcf   : > { %v1036_v26 = vadd.f32 %v1008_v45, %v972_v20  ;;  %v1037_v27 = vadd.f32 %v1008_v45, %v973_v39  ;;  %v832_v59 = vmul.f32 %v9103_v62, %v9162_v44  ;;  %v833_v4 = vmul.f32 %v9105_v63, %v9162_v44 }
  0xd0   : > { %v1170_v51 = vpack.c.bf16 %v1156_v48, %v1154_v47  ;;  %v1169_v52 = vpack.c.bf16 %v1155_v50, %v1153_v49  ;;  %v913_v2 = vadd.f32 %v897_v43, %v831_v42 }
  0xd1   : > { %vm1052_vm7 = vcmp.ge.f32.partialorder %v1036_v26, 0.0  ;;  %vm1053_vm8 = vcmp.ge.f32.partialorder %v1037_v27, 0.0  ;;  %v914_v44 = vadd.f32 %v898_v7, %v832_v59 }
  0xd2   : > { %v9168_v53 = vpop.permute.xlu1 %798  ;;  %1187 = vrot.lane.b32.xlu1 %v1170_v51, %s13671_s28  ;;  %1185 = vrot.lane.b32.xlu0 %v1169_v52, %s13671_s28  ;;  %v1093_v45 = vpop.permute.xlu0 %1092  ;;  %v977_v35 = vmul.f32 %v9172_v54, %v913_v2 }
  0xd3   : > { %v978_v16 = vmul.f32 %v959_v21, %v914_v44 }
  0xd6   : > { %v1023_v10 = vpop.permute.xlu0 %1022 }
  0xd7   : > { %v9182_v1 = vpop.permute.xlu1 %865 }
  0xd8   : > { %v900_v41 = vmul.f32 %v9099_v60, %v9182_v1 }
  0xdc   : > { %v949_v11 = vpop.permute.xlu1 %948 }
  0xdd   : > { %v974_v28 = vmul.f32 %v949_v11, %v910_v23  ;;  %v975_v32 = vmul.f32 %v949_v11, %v911_v24  ;;  %v1042_v23 = vadd.f32 %v1023_v10, %v978_v16 }
  0xdf   : > { %v1038_v47 = vadd.f32 %v1013_v8, %v974_v28  ;;  %v1039_v48 = vadd.f32 %v1013_v8, %v975_v32  ;;  %v899_v8 = vmul.f32 %v9101_v61, %v9079_v38  ;;  %v901_v38 = vmul.f32 %v9101_v61, %v9182_v1 }
  0xe0   : > { %v1083_v22 = vpop.permute.xlu1 %1082  ;;  %vm1058_vm13 = vcmp.ge.f32.partialorder %v1042_v23, 0.0 }
  0xe1   : > { %v1114_v25 = vmul.f32 %v1083_v22, %v1034_v18  ;;  %v1115_v37 = vmul.f32 %v1083_v22, %v1035_v19  ;;  %v1118_v46 = vmul.f32 %v1093_v45, %v1038_v47  ;;  %v1119_v11 = vmul.f32 %v1093_v45, %v1039_v48 }
  0xe2   : > { %v915_v13 = vadd.f32 %v899_v8, %v833_v4  ;;  %vm1055_vm9 = vcmp.ge.f32.partialorder %v1039_v48, 0.0  ;;  %vm1054_vm10 = vcmp.ge.f32.partialorder %v1038_v47, 0.0 }
  0xe3   : > { %v1131_v36 = vsel %vm1051_vm5, %v1035_v19, %v1115_v37  ;;  %v1130_v40 = vsel %vm1050_vm6, %v1034_v18, %v1114_v25  ;;  %v834_v18 = vmul.f32 %v9103_v62, %v9168_v53  ;;  %v835_v19 = vmul.f32 %v9105_v63, %v9168_v53  ;;  %v1103_v37 = vpop.permute.xlu0 %1102 }
  0xe4   : > { %v1088_v33 = vpop.permute.xlu1 %1087  ;;  %v1158_v52 = vmul.f32 %v9158_v30, %v1131_v36  ;;  %v1157_v56 = vmul.f32 %v9160_v31, %v1130_v40  ;;  %v979_v17 = vmul.f32 %v959_v21, %v915_v13  ;;  %v1135_v39 = vsel %vm1055_vm9, %v1039_v48, %v1119_v11 }
  0xe5   : > { %v1116_v15 = vmul.f32 %v1088_v33, %v1036_v26  ;;  %v1117_v34 = vmul.f32 %v1088_v33, %v1037_v27  ;;  %v1134_v22 = vsel %vm1054_vm10, %v1038_v47, %v1118_v46  ;;  %v916_v61 = vadd.f32 %v900_v41, %v834_v18 }
  0xe6   : > { %v1043_v24 = vadd.f32 %v1023_v10, %v979_v17  ;;  %v917_v1 = vadd.f32 %v901_v38, %v835_v19  ;;  %v1162_v21 = vmul.f32 %v9158_v30, %v1135_v39  ;;  %v1161_v62 = vmul.f32 %v9160_v31, %v1134_v22  ;;  %v8582_v17 = vld [vmem:[%s13783_s23 + $0x4] ss:$12 sps:$4 sm:$0xff]  }
  0xe7   : > { %v1133_v49 = vsel %vm1053_vm8, %v1037_v27, %v1117_v34  ;;  %v1132_v50 = vsel %vm1052_vm7, %v1036_v26, %v1116_v15  ;;  %v1122_v29 = vmul.f32 %v1103_v37, %v1042_v23  ;;  %1830 = vmatprep.mubr.bf16.mxu0 %v8582_v17  ;;  %vm1426_vm5 = vcmask 187392  }
  0xe8   : > { %v1018_v51 = vpop.permute.xlu1 %1017  ;;  %v1160_v55 = vmul.f32 %v9158_v30, %v1133_v49  ;;  %v1159_v57 = vmul.f32 %v9160_v31, %v1132_v50  ;;  %v1123_v33 = vmul.f32 %v1103_v37, %v1043_v24  ;;  %vm1059_vm14 = vcmp.ge.f32.partialorder %v1043_v24, 0.0 }
  0xe9   : > { %v1040_v14 = vadd.f32 %v1018_v51, %v976_v9  ;;  %v1041_v54 = vadd.f32 %v1018_v51, %v977_v35  ;;  %v1138_v48 = vsel %vm1058_vm13, %v1042_v23, %v1122_v29  ;;  %vm1499_vm6 = vcmask 990208  }
  0xea   : > { %v1172_v5 = vpack.c.bf16 %v1160_v55, %v1158_v52  ;;  %v1171_v6 = vpack.c.bf16 %v1159_v57, %v1157_v56  ;;  %v1139_v47 = vsel %vm1059_vm14, %v1043_v24, %v1123_v33  ;;  %v1165_v55 = vmul.f32 %v9160_v31, %v1138_v48 }
  0xeb   : > { %vm1056_vm11 = vcmp.ge.f32.partialorder %v1040_v14, 0.0  ;;  %vm1057_vm12 = vcmp.ge.f32.partialorder %v1041_v54, 0.0  ;;  %v1166_v51 = vmul.f32 %v9158_v30, %v1139_v47  ;;  %v1949_v47 = vld [vmem:[%s13646_s7 + $0x28] sm:$0xff]  ;;  %vm1572_vm7 = vcmask 982016  }
  0xec   : > { %v964_v12 = vpop.permute.xlu1 %963  ;;  %1191 = vrot.lane.b32.xlu1 %v1172_v5, %s13671_s28  ;;  %1189 = vrot.lane.b32.xlu0 %v1171_v6, %s13671_s28  ;;  %vm1645_vm8 = vcmask 973824   ;;  %vm2629_vm9 = vcmask 179200   ;;  %vm2340_vm10 = vcmask 211968  }
  0xed   : > { %v980_v28 = vmul.f32 %v964_v12, %v916_v61  ;;  %v981_v63 = vmul.f32 %v964_v12, %v917_v1  ;;  %v1944_v61 = vld [vmem:[%s13646_s7] sm:$0xff]  ;;  %v2009_v1 = vld [vmem:[%s13647_s8 + $0x8] sm:$0xff] }
  0xf0   : > { %v1098_v20 = vpop.permute.xlu1 %1097 }
  0xf1   : > { %v1120_v25 = vmul.f32 %v1098_v20, %v1040_v14  ;;  %v1121_v60 = vmul.f32 %v1098_v20, %v1041_v54 }
  0xf3   : > { %v1137_v26 = vsel %vm1057_vm12, %v1041_v54, %v1121_v60  ;;  %v1136_v27 = vsel %vm1056_vm11, %v1040_v14, %v1120_v25  ;;  %v1945_v25 = vld [vmem:[%s13646_s7 + $0x8] sm:$0xff] }
  0xf4   : > { %v1028_v53 = vpop.permute.xlu1 %1027  ;;  %v1164_v32 = vmul.f32 %v9158_v30, %v1137_v26  ;;  %v1163_v0 = vmul.f32 %v9160_v31, %v1136_v27  ;;  %v2008_v27 = vld [vmem:[%s13647_s8] sm:$0xff] }
  0xf5   : > { %v1044_v15 = vadd.f32 %v1028_v53, %v980_v28  ;;  %v1045_v34 = vadd.f32 %v1028_v53, %v981_v63  ;;  %v1946_v53 = vld [vmem:[%s13646_s7 + $0x10] sm:$0xff] }
  0xf6   : > { %v1174_v36 = vpack.c.bf16 %v1164_v32, %v1162_v21  ;;  %v1173_v40 = vpack.c.bf16 %v1163_v0, %v1161_v62  ;;  %v1947_v62 = vld [vmem:[%s13646_s7 + $0x18] sm:$0xff]  ;;  %v2089_v32 = vld [vmem:[%s13648_s9 + $0x8] sm:$0xff] }
  0xf7   : > { %vm1060_vm15 = vcmp.ge.f32.partialorder %v1044_v15, 0.0  ;;  %vm1061_vm0 = vcmp.ge.f32.partialorder %v1045_v34, 0.0 }
  0xf8   : > { %v1108_v42 = vpop.permute.xlu1 %1107  ;;  %1195 = vrot.lane.b32.xlu1 %v1174_v36, %s13671_s28  ;;  %1193 = vrot.lane.b32.xlu0 %v1173_v40, %s13671_s28 }
  0xf9   : > { %v1124_v43 = vmul.f32 %v1108_v42, %v1044_v15  ;;  %v1125_v45 = vmul.f32 %v1108_v42, %v1045_v34 }
  0xfb   : > { %v1141_v49 = vsel %vm1061_vm0, %v1045_v34, %v1125_v45  ;;  %v1140_v50 = vsel %vm1060_vm15, %v1044_v15, %v1124_v43  ;;  %v2088_v15 = vld [vmem:[%s13648_s9] sm:$0xff]  ;;  %v2011_v34 = vld [vmem:[%s13647_s8 + $0x18] sm:$0xff]  ;;  %v2010_v45 = vld [vmem:[%s13647_s8 + $0x10] sm:$0xff] }
  0xfc   : > { %v1168_v52 = vmul.f32 %v9158_v30, %v1141_v49  ;;  %v1167_v56 = vmul.f32 %v9160_v31, %v1140_v50  ;;  %v1948_v50 = vld [vmem:[%s13646_s7 + $0x20] sm:$0xff] }
  0xfe   : > { %v1176_v57 = vpack.c.bf16 %v1168_v52, %v1166_v51  ;;  %v1175_v59 = vpack.c.bf16 %v1167_v56, %v1165_v55  ;;  %v2091_v51 = vld [vmem:[%s13648_s9 + $0x18] sm:$0xff] }
 0x100   : > { %1199 = vrot.lane.b32.xlu1 %v1176_v57, %s13671_s28  ;;  %1197 = vrot.lane.b32.xlu0 %v1175_v59, %s13671_s28  ;;  %v2090_v57 = vld [vmem:[%s13648_s9 + $0x10] sm:$0xff]  ;;  %v2013_v59 = vld [vmem:[%s13647_s8 + $0x28] sm:$0xff]  ;;  %s13914_s28 = smov 120  }
 0x104   : > { %8336 = vrot.lane.b32.xlu0 %v8811_v3, %s8813_s24  ;;  %8341 = vrot.lane.b32.xlu1 %v8811_v3, %s8813_s24 }
 0x108   : > { %8346 = vrot.lane.b32.xlu0 %v8811_v3, %s13669_s6  ;;  %8351 = vrot.lane.b32.xlu1 %v8811_v3, %s13669_s6 }
 0x10c   : > { %8356 = vrot.lane.b32.xlu0 %v8811_v3, %s8815_s25 }
 0x144   : > { %v1188_v4 = vpop.permute.xlu1 %1187  ;;  %v1186_v58 = vpop.permute.xlu0 %1185 }
 0x145   : > { %1222 = vst.msk [vmem:[#allocation2 + $0x18] sm:$0xff] %vm1201_vm1, %v1188_v4  ;;  %v9260_v2 = vsel %vm1201_vm1, %v1186_v58, %v1188_v4 }
 0x146   : > { %1219 = vst.msk [vmem:[#allocation2 + $0x8] sm:$0xff] %vm1218_vm2, %v1186_v58  ;;  %1220 = vst [vmem:[#allocation2 + $0x10] sm:$0xff] %v9260_v2 }
 0x14c   : > { %v9318_v38 = vld [vmem:[#allocation2 + $0x18] sm:$0xff] }
 0x14d   : > { %v9264_v5 = vld [vmem:[#allocation2 + $0x8] sm:$0xff] }
 0x14e   : > { %1258 = vrot.lane.b32.xlu0 %v9264_v5, %s8813_s24 }
 0x15e   : > { %v1192_v6 = vpop.permute.xlu1 %1191  ;;  %v1190_v7 = vpop.permute.xlu0 %1189 }
 0x15f   : > { %1225 = vst.msk [vmem:[#allocation2 + $0x40] sm:$0xff] %vm1201_vm1, %v1192_v6  ;;  %v9270_v8 = vsel %vm1201_vm1, %v1190_v7, %v1192_v6 }
 0x160   : > { %1223 = vst.msk [vmem:[#allocation2 + $0x30] sm:$0xff] %vm1218_vm2, %v1190_v7  ;;  %1224 = vst [vmem:[#allocation2 + $0x38] sm:$0xff] %v9270_v8 }
 0x166   : > { %v9332_v14 = vld [vmem:[#allocation2 + $0x40] sm:$0xff] }
 0x167   : > { %v9274_v9 = vld [vmem:[#allocation2 + $0x30] sm:$0xff] }
 0x168   : > { %1264 = vrot.lane.b32.xlu1 %v9274_v9, %s8813_s24 }
 0x16a   : > { %v1196_v35 = vpop.permute.xlu1 %1195  ;;  %v1194_v10 = vpop.permute.xlu0 %1193 }
 0x16b   : > { %1228 = vst.msk [vmem:[#allocation2 + $0x68] sm:$0xff] %vm1201_vm1, %v1196_v35  ;;  %v9280_v46 = vsel %vm1201_vm1, %v1194_v10, %v1196_v35  ;;  %v2012_v35 = vld [vmem:[%s13647_s8 + $0x20] sm:$0xff] }
 0x16c   : > { %1226 = vst.msk [vmem:[#allocation2 + $0x58] sm:$0xff] %vm1218_vm2, %v1194_v10  ;;  %1227 = vst [vmem:[#allocation2 + $0x60] sm:$0xff] %v9280_v46  ;;  %v1951_v10 = vld [vmem:[%s13646_s7 + $0x38] sm:$0xff] }
 0x172   : > { %v1200_v11 = vpop.permute.xlu1 %1199  ;;  %v1198_v12 = vpop.permute.xlu0 %1197  ;;  %v9338_v54 = vld [vmem:[#allocation2 + $0x68] sm:$0xff] }
 0x173   : > { %v9284_v44 = vld [vmem:[#allocation2 + $0x58] sm:$0xff]  ;;  %1231 = vst.msk [vmem:[#allocation2 + $0x90] sm:$0xff] %vm1201_vm1, %v1200_v11  ;;  %v9288_v13 = vsel %vm1201_vm1, %v1198_v12, %v1200_v11 }
 0x174   : > { %1229 = vst.msk [vmem:[#allocation2 + $0x80] sm:$0xff] %vm1218_vm2, %v1198_v12  ;;  %1270 = vrot.lane.b32.xlu1 %v9284_v44, %s8813_s24  ;;  %1230 = vst [vmem:[#allocation2 + $0x88] sm:$0xff] %v9288_v13 }
 0x176   : > { %v9399_v18 = vpop.permute.xlu1 %8341  ;;  %v9401_v19 = vpop.permute.xlu0 %8336 }
 0x177   : > { %v8338_v33 = vunpack.i.l.bf16 %v9401_v19  ;;  %v8339_v56 = vunpack.i.h.bf16 %v9401_v19  ;;  %v8343_v17 = vunpack.i.l.bf16 %v9399_v18 }
 0x178   : > { %1337 = vrot.lane.b32.xlu1 %v9274_v9, %s13669_s6 }
 0x17a   : > { %v9352_v16 = vld [vmem:[#allocation2 + $0x90] sm:$0xff]  ;;  %v9406_v20 = vpop.permute.xlu1 %8351  ;;  %v9410_v39 = vpop.permute.xlu0 %8346 }
 0x17b   : > { %v9296_v41 = vld [vmem:[#allocation2 + $0x80] sm:$0xff] }
 0x17c   : > { %1343 = vrot.lane.b32.xlu1 %v9284_v44, %s13669_s6  ;;  %1276 = vrot.lane.b32.xlu0 %v9296_v41, %s8813_s24 }
 0x17e   : > { %v9416_v23 = vpop.permute.xlu0 %8356 }
 0x180   : > { %1410 = vrot.lane.b32.xlu1 %v9274_v9, %s8815_s25  ;;  %1331 = vrot.lane.b32.xlu0 %v9264_v5, %s13669_s6 }
 0x184   : > { %1416 = vrot.lane.b32.xlu1 %v9284_v44, %s8815_s25  ;;  %1349 = vrot.lane.b32.xlu0 %v9296_v41, %s13669_s6 }
 0x188   : > { %1260 = vrot.lane.b32.xlu1 %v9260_v2, %s8813_s24  ;;  %1404 = vrot.lane.b32.xlu0 %v9264_v5, %s8815_s25 }
 0x18c   : > { %8361 = vrot.lane.b32.xlu1 %v8811_v3, %s8815_s25  ;;  %1422 = vrot.lane.b32.xlu0 %v9296_v41, %s8815_s25 }
 0x190   : > { %1479 = vrot.lane.b32.xlu1 %v9318_v38, %s8816_s26  ;;  %1475 = vrot.lane.b32.xlu0 %v9264_v5, %s8816_s26 }
 0x194   : > { %1266 = vrot.lane.b32.xlu0 %v9270_v8, %s8813_s24  ;;  %1278 = vrot.lane.b32.xlu1 %v9288_v13, %s8813_s24 }
 0x198   : > { %1272 = vrot.lane.b32.xlu0 %v9280_v46, %s8813_s24  ;;  %1333 = vrot.lane.b32.xlu1 %v9260_v2, %s13669_s6  ;;  %s8818_s24 = smov 119  }
 0x19c   : > { %1485 = vrot.lane.b32.xlu0 %v9332_v14, %s8816_s26  ;;  %1481 = vrot.lane.b32.xlu1 %v9274_v9, %s8816_s26 }
 0x1a0   : > { %1487 = vrot.lane.b32.xlu0 %v9284_v44, %s8816_s26  ;;  %1491 = vrot.lane.b32.xlu1 %v9338_v54, %s8816_s26 }
 0x1a4   : > { %1339 = vrot.lane.b32.xlu0 %v9270_v8, %s13669_s6  ;;  %1351 = vrot.lane.b32.xlu1 %v9288_v13, %s13669_s6 }
 0x1a8   : > { %1345 = vrot.lane.b32.xlu0 %v9280_v46, %s13669_s6  ;;  %1406 = vrot.lane.b32.xlu1 %v9260_v2, %s8815_s25  ;;  %s13785_s6 = smov 8  }
 0x1ac   : > { %1497 = vrot.lane.b32.xlu0 %v9352_v16, %s8816_s26  ;;  %1493 = vrot.lane.b32.xlu1 %v9296_v41, %s8816_s26 }
 0x1b0   : > { %1548 = vrot.lane.b32.xlu0 %v9264_v5, %s13667_s2  ;;  %1552 = vrot.lane.b32.xlu1 %v9318_v38, %s13667_s2 }
 0x1b4   : > { %1412 = vrot.lane.b32.xlu0 %v9270_v8, %s8815_s25  ;;  %1424 = vrot.lane.b32.xlu1 %v9288_v13, %s8815_s25 }
 0x1b8   : > { %1418 = vrot.lane.b32.xlu0 %v9280_v46, %s8815_s25  ;;  %1554 = vrot.lane.b32.xlu1 %v9274_v9, %s13667_s2  ;;  %s8825_s25 = smov 60  }
 0x1bc   : > { %1558 = vrot.lane.b32.xlu0 %v9332_v14, %s13667_s2  ;;  %1483 = vrot.lane.b32.xlu1 %v9270_v8, %s8816_s26 }
 0x1c0   : > { %1477 = vrot.lane.b32.xlu0 %v9260_v2, %s8816_s26  ;;  %1564 = vrot.lane.b32.xlu1 %v9338_v54, %s13667_s2  ;;  %v1259_v60 = vpop.permute.xlu0 %1258 }
 0x1c1   : > { %v1281_v43 = vsel %vm1280_vm3, %v8338_v33, %v1259_v60 }
 0x1c4   : > { %1560 = vrot.lane.b32.xlu0 %v9284_v44, %s13667_s2  ;;  %1495 = vrot.lane.b32.xlu1 %v9288_v13, %s8816_s26 }
 0x1c8   : > { %1489 = vrot.lane.b32.xlu0 %v9280_v46, %s8816_s26  ;;  %1566 = vrot.lane.b32.xlu1 %v9296_v41, %s13667_s2  ;;  %s8819_s26 = smov 22  }
 0x1cc   : > { %1570 = vrot.lane.b32.xlu0 %v9352_v16, %s13667_s2  ;;  %1556 = vrot.lane.b32.xlu1 %v9270_v8, %s13667_s2 }
 0x1d0   : > { %1550 = vrot.lane.b32.xlu0 %v9260_v2, %s13667_s2  ;;  %1625 = vrot.lane.b32.xlu1 %v9318_v38, %s8818_s24 }
 0x1d4   : > { %1621 = vrot.lane.b32.xlu0 %v9264_v5, %s8818_s24  ;;  %1568 = vrot.lane.b32.xlu1 %v9288_v13, %s13667_s2 }
 0x1d8   : > { %1562 = vrot.lane.b32.xlu0 %v9280_v46, %s13667_s2  ;;  %1627 = vrot.lane.b32.xlu1 %v9274_v9, %s8818_s24  ;;  %s13793_s2 = smov 24  }
 0x1da   : > { %v9414_v22 = vpop.permute.xlu1 %1264 }
 0x1db   : > { %v1283_v7 = vsel %vm1280_vm3, %v8339_v56, %v9414_v22 }
 0x1dc   : > { %1631 = vrot.lane.b32.xlu0 %v9332_v14, %s8818_s24  ;;  %1629 = vrot.lane.b32.xlu1 %v9270_v8, %s8818_s24 }
 0x1e0   : > { %1623 = vrot.lane.b32.xlu0 %v9260_v2, %s8818_s24  ;;  %1637 = vrot.lane.b32.xlu1 %v9338_v54, %s8818_s24 }
 0x1e4   : > { %1633 = vrot.lane.b32.xlu0 %v9284_v44, %s8818_s24  ;;  %1641 = vrot.lane.b32.xlu1 %v9288_v13, %s8818_s24 }
 0x1e6   : > { %v9420_v24 = vpop.permute.xlu1 %1270 }
 0x1e8   : > { %1635 = vrot.lane.b32.xlu0 %v9280_v46, %s8818_s24  ;;  %1639 = vrot.lane.b32.xlu1 %v9296_v41, %s8818_s24 }
 0x1ea   : > { %v9427_v37 = vpop.permute.xlu1 %1337 }
 0x1ec   : > { %1643 = vrot.lane.b32.xlu0 %v9352_v16, %s8818_s24  ;;  %1959 = vperm.xlu1 %8334, %v1945_v25   ;;  %v1950_v25 = vld [vmem:[%s13646_s7 + $0x30] sm:$0xff]  ;;  %s8820_s24 = smov 90  }
 0x1ee   : > { %v9436_v26 = vpop.permute.xlu1 %1343  ;;  %v9438_v21 = vpop.permute.xlu0 %1276 }
 0x1f0   : > { %1954 = vperm.xlu0 %8332, %v1944_v61   ;;  %2023 = vperm.xlu1 %8334, %v2009_v1  }
 0x1f2   : > { %v9446_v28 = vpop.permute.xlu1 %1410  ;;  %v9448_v63 = vpop.permute.xlu0 %1331 }
 0x1f4   : > { %2018 = vperm.xlu0 %8332, %v2008_v27   ;;  %1969 = vperm.xlu1 %8334, %v1947_v62   ;;  %v8344_v62 = vunpack.i.h.bf16 %v9399_v18 }
 0x1f6   : > { %v9456_v0 = vpop.permute.xlu1 %1416  ;;  %v9458_v29 = vpop.permute.xlu0 %1349 }
 0x1f8   : > { %1964 = vperm.xlu0 %8332, %v1946_v53   ;;  %2103 = vperm.xlu1 %8334, %v2089_v32   ;;  %v2092_v53 = vld [vmem:[%s13648_s9 + $0x20] sm:$0xff]  ;;  %v2015_v32 = vld [vmem:[%s13647_s8 + $0x38] sm:$0xff] }
 0x1fa   : > { %v1261_v36 = vpop.permute.xlu1 %1260  ;;  %v9467_v40 = vpop.permute.xlu0 %1404 }
 0x1fb   : > { %v1282_v42 = vsel %vm1280_vm3, %v1259_v60, %v1261_v36  ;;  %v2093_v60 = vld [vmem:[%s13648_s9 + $0x28] sm:$0xff]  ;;  %v2014_v36 = vld [vmem:[%s13647_s8 + $0x30] sm:$0xff] }
 0x1fc   : > { %2098 = vperm.xlu0 %8332, %v2088_v15   ;;  %2033 = vperm.xlu1 %8334, %v2011_v34   ;;  %v8348_v34 = vunpack.i.l.bf16 %v9410_v39 }
 0x1fd   : > { %1798 = vmatprep.subr.bf16.mxu0 %v1282_v42  ;;  %v2095_v42 = vld [vmem:[%s13648_s9 + $0x38] sm:$0xff] }
 0x1fe   : > { %1799 = vmatpush1.bf16.msra.mxu0 %v1281_v43  ;;  %v9477_v48 = vpop.permute.xlu1 %8361  ;;  %v9479_v49 = vpop.permute.xlu0 %1422 }
 0x200   : > { %2028 = vperm.xlu0 %8332, %v2010_v45   ;;  %1979 = vperm.xlu1 %8334, %v1949_v47   ;;  %v8349_v47 = vunpack.i.h.bf16 %v9410_v39 }
 0x202   : > { %v9487_v52 = vpop.permute.xlu1 %1479  ;;  %v9489_v55 = vpop.permute.xlu0 %1475 }
 0x204   : > { %1974 = vperm.xlu0 %8332, %v1948_v50   ;;  %2113 = vperm.xlu1 %8334, %v2091_v51   ;;  %v2094_v51 = vld [vmem:[%s13648_s9 + $0x30] sm:$0xff] }
 0x206   : > { %v1279_v4 = vpop.permute.xlu1 %1278  ;;  %v1267_v58 = vpop.permute.xlu0 %1266 }
 0x207   : > { %v1284_v6 = vsel %vm1280_vm3, %v9414_v22, %v1267_v58  ;;  %v1285_v22 = vsel %vm1280_vm3, %v8343_v17, %v9420_v24  ;;  %v1288_v27 = vsel %vm1280_vm3, %v9438_v21, %v1279_v4 }
 0x208   : > { %2108 = vperm.xlu0 %8332, %v2090_v57   ;;  %2043 = vperm.xlu1 %8334, %v2013_v59   ;;  %v8353_v59 = vunpack.i.l.bf16 %v9406_v20 }
 0x209   : > { %1800 = vmatprep.subr.bf16.mxu0 %v1284_v6 }
 0x20a   : > { %1801 = vmatpush1.bf16.msra.mxu0 %v1283_v7  ;;  %v1334_v11 = vpop.permute.xlu1 %1333  ;;  %v1273_v12 = vpop.permute.xlu0 %1272  ;;  %v8354_v7 = vunpack.i.h.bf16 %v9406_v20  ;;  %v8358_v20 = vunpack.i.l.bf16 %v9416_v23 }
 0x20b   : > { %v1286_v19 = vsel %vm1280_vm3, %v9420_v24, %v1273_v12  ;;  %v1287_v24 = vsel %vm1280_vm3, %v8344_v62, %v9438_v21  ;;  %v1355_v18 = vsel %vm1353_vm4, %v9448_v63, %v1334_v11  ;;  %v1354_v21 = vsel %vm1353_vm4, %v8348_v34, %v9448_v63 }
 0x20c   : > { %2038 = vperm.xlu0 %8332, %v2012_v35   ;;  %1989 = vperm.xlu1 %8334, %v1951_v10   ;;  %v1356_v63 = vsel %vm1353_vm4, %v8349_v47, %v9427_v37  ;;  %v8364_v62 = vunpack.i.h.bf16 %v9477_v48 }
 0x20d   : > { %1802 = vmatprep.subr.bf16.mxu0 %v1286_v19  ;;  %v8359_v19 = vunpack.i.h.bf16 %v9416_v23 }
 0x20e   : > { %1803 = vmatpush1.bf16.msra.mxu0 %v1285_v22  ;;  %v9519_v61 = vpop.permute.xlu1 %1481  ;;  %v9521_v1 = vpop.permute.xlu0 %1485 }
 0x20f   : > { %1804 = vmatprep.subr.bf16.mxu0 %v1288_v27 }
 0x210   : > { %1984 = vperm.xlu0 %8332, %v1950_v25   ;;  %2123 = vperm.xlu1 %8334, %v2093_v60   ;;  %v8363_v25 = vunpack.i.l.bf16 %v9477_v48  ;;  %v1433_v48 = vsel %vm1426_vm5, %v8364_v62, %v9479_v49 }
 0x212   : > { %1805 = vmatpush1.bf16.msra.mxu0 %v1287_v24  ;;  %v9534_v33 = vpop.permute.xlu1 %1491  ;;  %v9536_v15 = vpop.permute.xlu0 %1487  ;;  %v1431_v24 = vsel %vm1426_vm5, %v8363_v25, %v9456_v0 }
 0x213   : > { %1806 = vmatprep.subr.bf16.mxu0 %v1355_v18 }
 0x214   : > { %2118 = vperm.xlu0 %8332, %v2092_v53   ;;  %2053 = vperm.xlu1 %8334, %v2015_v32  }
 0x216   : > { %1807 = vmatpush1.bf16.msra.mxu0 %v1354_v21  ;;  %v1352_v43 = vpop.permute.xlu1 %1351  ;;  %v1340_v45 = vpop.permute.xlu0 %1339 }
 0x217   : > { %v1357_v50 = vsel %vm1353_vm4, %v9427_v37, %v1340_v45  ;;  %v1358_v37 = vsel %vm1353_vm4, %v8353_v59, %v9436_v26  ;;  %v1361_v6 = vsel %vm1353_vm4, %v9458_v29, %v1352_v43 }
 0x218   : > { %2048 = vperm.xlu0 %8332, %v2014_v36   ;;  %2133 = vperm.xlu1 %8334, %v2095_v42  }
 0x219   : > { %1808 = vmatprep.subr.bf16.mxu0 %v1357_v50 }
 0x21a   : > { %1809 = vmatpush1.bf16.msra.mxu0 %v1356_v63  ;;  %v1407_v56 = vpop.permute.xlu1 %1406  ;;  %v1346_v57 = vpop.permute.xlu0 %1345 }
 0x21b   : > { %v1359_v39 = vsel %vm1353_vm4, %v9436_v26, %v1346_v57  ;;  %v1360_v26 = vsel %vm1353_vm4, %v8354_v7, %v9458_v29  ;;  %v1428_v11 = vsel %vm1426_vm5, %v9467_v40, %v1407_v56  ;;  %v1427_v29 = vsel %vm1426_vm5, %v8358_v20, %v9467_v40  ;;  %v8583_v56 = vld [vmem:[%s13783_s23 + $0x1c] ss:$12 sps:$4 sm:$0xff]  }
 0x21c   : > { %2128 = vperm.xlu0 %8332, %v2094_v51   ;;  %2585 = vrot.lane.b32.xlu1 %v9260_v2, %s8819_s26  ;;  %v1429_v40 = vsel %vm1426_vm5, %v8359_v19, %v9446_v28  ;;  %v8588_v19 = vld [vmem:[%s13783_s23 + $0x30] ss:$12 sps:$4 sm:$0xff]  }
 0x21d   : > { %1810 = vmatprep.subr.bf16.mxu0 %v1359_v39 }
 0x21e   : > { %1811 = vmatpush1.bf16.msra.mxu0 %v1358_v37  ;;  %v9564_v4 = vpop.permute.xlu1 %1493  ;;  %v9566_v58 = vpop.permute.xlu0 %1497 }
 0x21f   : > { %1812 = vmatprep.subr.bf16.mxu0 %v1361_v6  ;;  %v8585_v6 = vld [vmem:[%s13783_s23 + $0x18] ss:$12 sps:$4 sm:$0xff]  }
 0x220   : > { %2583 = vrot.lane.b32.xlu0 %v9264_v5, %s8819_s26  ;;  %2589 = vrot.lane.b32.xlu1 %v9274_v9, %s8819_s26 }
 0x222   : > { %1813 = vmatpush1.bf16.msra.mxu0 %v1360_v26  ;;  %v9577_v35 = vpop.permute.xlu1 %1552  ;;  %v9579_v10 = vpop.permute.xlu0 %1548 }
 0x223   : > { %1814 = vmatprep.subr.bf16.mxu0 %v1428_v11 }
 0x224   : > { %8366 = vrot.lane.b32.xlu0 %v8811_v3, %s8819_s26  ;;  %2595 = vrot.lane.b32.xlu1 %v9284_v44, %s8819_s26 }
 0x226   : > { %1815 = vmatpush1.bf16.msra.mxu0 %v1427_v29  ;;  %v1425_v12 = vpop.permute.xlu1 %1424  ;;  %v1413_v17 = vpop.permute.xlu0 %1412 }
 0x227   : > { %v1430_v22 = vsel %vm1426_vm5, %v9446_v28, %v1413_v17  ;;  %v1434_v32 = vsel %vm1426_vm5, %v9479_v49, %v1425_v12 }
 0x228   : > { %2591 = vrot.lane.b32.xlu0 %v9270_v8, %s8819_s26  ;;  %8371 = vrot.lane.b32.xlu1 %v8811_v3, %s8819_s26 }
 0x229   : > { %1816 = vmatprep.subr.bf16.mxu0 %v1430_v22 }
 0x22a   : > { %1817 = vmatpush1.bf16.msra.mxu0 %v1429_v40  ;;  %v9600_v60 = vpop.permute.xlu1 %1554  ;;  %v1419_v27 = vpop.permute.xlu0 %1418  ;;  %v8589_v40 = vld [vmem:[%s13783_s23 + $0x4c] ss:$12 sps:$4 sm:$0xff]  }
 0x22b   : > { %v1432_v23 = vsel %vm1426_vm5, %v9456_v0, %v1419_v27 }
 0x22c   : > { %2597 = vrot.lane.b32.xlu0 %v9280_v46, %s8819_s26  ;;  %2603 = vrot.lane.b32.xlu1 %v9288_v13, %s8819_s26 }
 0x22d   : > { %1818 = vmatprep.subr.bf16.mxu0 %v1432_v23 }
 0x22e   : > { %1819 = vmatpush1.bf16.msra.mxu0 %v1431_v24  ;;  %v1484_v28 = vpop.permute.xlu1 %1483  ;;  %v1559_v53 = vpop.permute.xlu0 %1558 }
 0x22f   : > { %1820 = vmatprep.subr.bf16.mxu0 %v1434_v32  ;;  %v1503_v42 = vsel %vm1499_vm6, %v1484_v28, %v9521_v1 }
 0x230   : > { %8381 = vrot.lane.b32.xlu1 %v8811_v3, %s8819_s26  ;;  %2601 = vrot.lane.b32.xlu0 %v9296_v41, %s8819_s26 }
 0x232   : > { %1821 = vmatpush1.bf16.msra.mxu0 %v1433_v48  ;;  %v1565_v18 = vpop.permute.xlu1 %1564  ;;  %v1478_v34 = vpop.permute.xlu0 %1477  ;;  %v9717_v48 = vld [vmem:[#allocation2] sm:$0xff] }
 0x233   : > { %v1501_v0 = vsel %vm1499_vm6, %v1478_v34, %v9487_v52  ;;  %v1500_v21 = vsel %vm1499_vm6, %v9489_v55, %v1478_v34  ;;  %v1502_v52 = vsel %vm1499_vm6, %v9519_v61, %v1484_v28  ;;  %v8592_v34 = vld [vmem:[%s13783_s23 + $0x8] ss:$12 sps:$4 sm:$0xff]  }
 0x234   : > { %2730 = vrot.lane.b32.xlu1 %v9318_v38, %s8820_s24  ;;  %8376 = vrot.lane.b32.xlu0 %v8811_v3, %s8819_s26 }
 0x235   : > { %1822 = vmatprep.subr.bf16.mxu0 %v1501_v0  ;;  %v9735_v0 = vpack.i.bf16 %v9717_v48, %v9717_v48 }
 0x236   : > { %1823 = vmatpush1.bf16.msra.mxu0 %v1500_v21  ;;  %v1496_v49 = vpop.permute.xlu1 %1495  ;;  %v1561_v36 = vpop.permute.xlu0 %1560 }
 0x237   : > { %1824 = vmatprep.subr.bf16.mxu0 %v1503_v42  ;;  %v1507_v61 = vsel %vm1499_vm6, %v1496_v49, %v9566_v58 }
 0x238   : > { %2734 = vrot.lane.b32.xlu1 %v9270_v8, %s8820_s24  ;;  %2728 = vrot.lane.b32.xlu0 %v9260_v2, %s8820_s24 }
 0x23a   : > { %1825 = vmatpush1.bf16.msra.mxu0 %v1502_v52  ;;  %v1567_v55 = vpop.permute.xlu1 %1566  ;;  %v1490_v43 = vpop.permute.xlu0 %1489 }
 0x23b   : > { %v1505_v45 = vsel %vm1499_vm6, %v1490_v43, %v9534_v33  ;;  %v1504_v47 = vsel %vm1499_vm6, %v9536_v15, %v1490_v43  ;;  %v1506_v33 = vsel %vm1499_vm6, %v9564_v4, %v1496_v49  ;;  %v8580_v15 = vld [vmem:[%s13783_s23] ss:$12 sps:$4 sm:$0xff]  }
 0x23c   : > { %2732 = vrot.lane.b32.xlu1 %v9274_v9, %s8820_s24  ;;  %2726 = vrot.lane.b32.xlu0 %v9264_v5, %s8820_s24 }
 0x23d   : > { %1826 = vmatprep.subr.bf16.mxu0 %v1505_v45 }
 0x23e   : > { %1827 = vmatpush1.bf16.msra.mxu0 %v1504_v47  ;;  %v1557_v1 = vpop.permute.xlu1 %1556  ;;  %v1571_v50 = vpop.permute.xlu0 %1570 }
 0x23f   : > { %1828 = vmatprep.subr.bf16.mxu0 %v1507_v61  ;;  %v1576_v4 = vsel %vm1572_vm7, %v1557_v1, %v1559_v53  ;;  %v1575_v58 = vsel %vm1572_vm7, %v9600_v60, %v1557_v1 }
 0x240   : > { %2742 = vrot.lane.b32.xlu1 %v9338_v54, %s8820_s24  ;;  %2736 = vrot.lane.b32.xlu0 %v9332_v14, %s8820_s24 }
 0x242   : > { %1829 = vmatpush1.bf16.msra.mxu0 %v1506_v33  ;;  %v1626_v63 = vpop.permute.xlu1 %1625  ;;  %v1551_v51 = vpop.permute.xlu0 %1550 }
 0x243   : > { %v1574_v57 = vsel %vm1572_vm7, %v1551_v51, %v9577_v35  ;;  %v1573_v59 = vsel %vm1572_vm7, %v9579_v10, %v1551_v51  ;;  %v8586_v35 = vld [vmem:[%s13783_s23 + $0x34] ss:$12 sps:$4 sm:$0xff]  }
 0x244   : > { %2746 = vrot.lane.b32.xlu1 %v9288_v13, %s8820_s24  ;;  %2740 = vrot.lane.b32.xlu0 %v9280_v46, %s8820_s24 }
 0x245   : > { %1831 = vmatmul.mubr.bf16.vlgmr.msra.gmra.mrb[0].mxu0 %v8580_v15  ;;  %1871 = vmatprep.subr.bf16.mxu0 %v1574_v57 }
 0x246   : > { %1872 = vmatpush1.bf16.msra.mxu0 %v1573_v59  ;;  %v1569_v39 = vpop.permute.xlu1 %1568  ;;  %v1622_v37 = vpop.permute.xlu0 %1621  ;;  %1840 = vmatprep.mubr.bf16.mxu0 %v8583_v56 }
 0x247   : > { %1873 = vmatprep.subr.bf16.mxu0 %v1576_v4  ;;  %v1580_v12 = vsel %vm1572_vm7, %v1569_v39, %v1571_v50  ;;  %v1579_v17 = vsel %vm1572_vm7, %v1567_v55, %v1569_v39 }
 0x248   : > { %2744 = vrot.lane.b32.xlu1 %v9296_v41, %s8820_s24  ;;  %2738 = vrot.lane.b32.xlu0 %v9284_v44, %s8820_s24 }
 0x24a   : > { %1874 = vmatpush1.bf16.msra.mxu0 %v1575_v58  ;;  %v1628_v7 = vpop.permute.xlu1 %1627  ;;  %v1563_v26 = vpop.permute.xlu0 %1562 }
 0x24b   : > { %v1578_v10 = vsel %vm1572_vm7, %v1563_v26, %v1565_v18  ;;  %v1577_v11 = vsel %vm1572_vm7, %v1561_v36, %v1563_v26 }
 0x24c   : > { %2296 = vrot.lane.b32.xlu1 %v9260_v2, %s8821_s27  ;;  %2748 = vrot.lane.b32.xlu0 %v9352_v16, %s8820_s24 }
 0x24d   : > { %1841 = vmatmul.mubr.bf16.gmra.mrb[4].mxu0 %v8585_v6  ;;  %1875 = vmatprep.subr.bf16.mxu0 %v1578_v10 }
 0x24e   : > { %1876 = vmatpush1.bf16.msra.mxu0 %v1577_v11  ;;  %v1630_v20 = vpop.permute.xlu1 %1629  ;;  %v1632_v29 = vpop.permute.xlu0 %1631  ;;  %1850 = vmatprep.mubr.bf16.mxu0 %v8586_v35 }
 0x24f   : > { %1877 = vmatprep.subr.bf16.mxu0 %v1580_v12  ;;  %v1649_v23 = vsel %vm1645_vm8, %v1630_v20, %v1632_v29 }
 0x250   : > { %2875 = vrot.lane.b32.xlu1 %v9318_v38, %s8822_s30  ;;  %2294 = vrot.lane.b32.xlu0 %v9264_v5, %s8821_s27 }
 0x252   : > { %1878 = vmatpush1.bf16.msra.mxu0 %v1579_v17  ;;  %v1638_v22 = vpop.permute.xlu1 %1637  ;;  %v1624_v25 = vpop.permute.xlu0 %1623 }
 0x253   : > { %v1647_v60 = vsel %vm1645_vm8, %v1624_v25, %v1626_v63  ;;  %v1646_v38 = vsel %vm1645_vm8, %v1622_v37, %v1624_v25 }
 0x254   : > { %2871 = vrot.lane.b32.xlu1 %v9264_v5, %s8822_s30  ;;  %2873 = vrot.lane.b32.xlu0 %v9260_v2, %s8822_s30  ;;  %v1648_v5 = vsel %vm1645_vm8, %v1628_v7, %v1630_v20  ;;  %v8591_v2 = vld [vmem:[%s13783_s23 + $0x48] ss:$12 sps:$4 sm:$0xff]  }
 0x255   : > { %1851 = vmatmul.mubr.bf16.gmra.mrb[8].mxu0 %v8588_v19  ;;  %1879 = vmatprep.subr.bf16.mxu0 %v1647_v60 }
 0x256   : > { %1880 = vmatpush1.bf16.msra.mxu0 %v1646_v38  ;;  %v1634_v27 = vpop.permute.xlu0 %1633  ;;  %1860 = vmatprep.mubr.bf16.mxu0 %v8589_v40  ;;  %v1642_v62 = vpop.permute.xlu1 %1641 }
 0x257   : > { %1881 = vmatprep.subr.bf16.mxu0 %v1649_v23 }
 0x258   : > { %2302 = vrot.lane.b32.xlu1 %v9270_v8, %s8821_s27  ;;  %8386 = vrot.lane.b32.xlu0 %v8811_v3, %s8821_s27 }
 0x25a   : > { %1882 = vmatpush1.bf16.msra.mxu0 %v1648_v5  ;;  %v1636_v24 = vpop.permute.xlu0 %1635  ;;  %v1640_v3 = vpop.permute.xlu1 %1639 }
 0x25b   : > { %v1651_v28 = vsel %vm1645_vm8, %v1636_v24, %v1638_v22  ;;  %v1650_v53 = vsel %vm1645_vm8, %v1634_v27, %v1636_v24 }
 0x25c   : > { %2881 = vrot.lane.b32.xlu1 %v9332_v14, %s8822_s30  ;;  %2300 = vrot.lane.b32.xlu0 %v9274_v9, %s8821_s27  ;;  %v1652_v14 = vsel %vm1645_vm8, %v1640_v3, %v1642_v62 }
 0x25d   : > { %1861 = vmatmul.mubr.bf16.gmra.mrb[12].mxu0 %v8591_v2  ;;  %1883 = vmatprep.subr.bf16.mxu0 %v1651_v28 }
 0x25e   : > { %1884 = vmatpush1.bf16.msra.mxu0 %v1650_v53  ;;  %v1644_v32 = vpop.permute.xlu0 %1643  ;;  %1903 = vmatprep.mubr.bf16.mxu0 %v9717_v48 }
 0x25f   : > { %v1653_v18 = vsel %vm1645_vm8, %v1642_v62, %v1644_v32 }
 0x260   : > { %2306 = vrot.lane.b32.xlu1 %v9284_v44, %s8821_s27  ;;  %2879 = vrot.lane.b32.xlu0 %v9270_v8, %s8822_s30  ;;  %v8593_v8 = vld [vmem:[%s13783_s23 + $0x20] ss:$12 sps:$4 sm:$0xff]  }
 0x261   : > { %1885 = vmatprep.subr.bf16.mxu0 %v1653_v18 }
 0x262   : > { %1886 = vmatpush1.bf16.msra.mxu0 %v1652_v14 }
 0x264   : > { %2885 = vrot.lane.b32.xlu1 %v9280_v46, %s8822_s30  ;;  %2877 = vrot.lane.b32.xlu0 %v9274_v9, %s8822_s30 }
 0x265   : > { %1904 = vmatmul.mubr.bf16.vlgmr.msra.gmra.mrb[0].mxu0 %v8592_v34 }
 0x266   : > { %1913 = vmatprep.mubr.bf16.mxu0 %v9717_v48 }
 0x268   : > { %8391 = vrot.lane.b32.xlu1 %v9735_v0, %s8821_s27  ;;  %2308 = vrot.lane.b32.xlu0 %v9280_v46, %s8821_s27  ;;  %v8594_v46 = vld [vmem:[%s13783_s23 + $0x38] ss:$12 sps:$4 sm:$0xff]  }
 0x26b   : > { %v9745_v21 = vpop.permute.xlu1 %1959 }
 0x26c   : > { %2312 = vrot.lane.b32.xlu1 %v9296_v41, %s8821_s27  ;;  %2887 = vrot.lane.b32.xlu0 %v9338_v54, %s8822_s30 }
 0x26d   : > { %1914 = vmatmul.mubr.bf16.gmra.mrb[4].mxu0 %v8593_v8 }
 0x26e   : > { %1923 = vmatprep.mubr.bf16.mxu0 %v9717_v48 }
 0x26f   : > { %v9752_v9 = vpop.permute.xlu1 %2023  ;;  %v9754_v49 = vpop.permute.xlu0 %1954 }
 0x270   : > { %2891 = vrot.lane.b32.xlu1 %v9288_v13, %s8822_s30  ;;  %2883 = vrot.lane.b32.xlu0 %v9284_v44, %s8822_s30 }
 0x273   : > { %v9763_v36 = vpop.permute.xlu1 %1969  ;;  %v9765_v54 = vpop.permute.xlu0 %2018 }
 0x274   : > { %2889 = vrot.lane.b32.xlu1 %v9296_v41, %s8822_s30  ;;  %2314 = vrot.lane.b32.xlu0 %v9288_v13, %s8821_s27  ;;  %v8595_v41 = vld [vmem:[%s13783_s23 + $0x50] ss:$12 sps:$4 sm:$0xff]  }
 0x275   : > { %1924 = vmatmul.mubr.bf16.gmra.mrb[8].mxu0 %v8594_v46 }
 0x276   : > { %1933 = vmatprep.mubr.bf16.mxu0 %v9717_v48 }
 0x277   : > { %v9772_v42 = vpop.permute.xlu1 %2103  ;;  %v9774_v44 = vpop.permute.xlu0 %1964 }
 0x278   : > { %2893 = vrot.lane.b32.xlu0 %v9352_v16, %s8822_s30  ;;  %8401 = vrot.lane.b32.xlu1 %v9735_v0, %s8821_s27 }
 0x27b   : > { %v9783_v52 = vpop.permute.xlu1 %2033  ;;  %v9785_v13 = vpop.permute.xlu0 %2098 }
 0x27c   : > { %8396 = vrot.lane.b32.xlu0 %v9735_v0, %s8821_s27 }
 0x27d   : > { %1934 = vmatmul.mubr.bf16.gmra.mrb[12].mxu0 %v8595_v41 }
 0x27f   : > { %v9789_v55 = vpop.permute.xlu1 %1979  ;;  %v9791_v43 = vpop.permute.xlu0 %2028 }
 0x283   : > { %v9793_v16 = vpop.permute.xlu1 %2113  ;;  %v9795_v45 = vpop.permute.xlu0 %1974 }
 0x287   : > { %v9797_v47 = vpop.permute.xlu1 %2043  ;;  %v9799_v1 = vpop.permute.xlu0 %2108 }
 0x28b   : > { %v9801_v50 = vpop.permute.xlu1 %1989  ;;  %v9803_v61 = vpop.permute.xlu0 %2038 }
 0x28f   : > { %v9805_v33 = vpop.permute.xlu1 %2123  ;;  %v9807_v15 = vpop.permute.xlu0 %1984 }
 0x293   : > { %v9809_v63 = vpop.permute.xlu1 %2053  ;;  %v9811_v51 = vpop.permute.xlu0 %2118 }
 0x297   : > { %v9813_v56 = vpop.permute.xlu1 %2133  ;;  %v9815_v57 = vpop.permute.xlu0 %2048 }
 0x29b   : > { %v2586_v59 = vpop.permute.xlu1 %2585  ;;  %v9817_v39 = vpop.permute.xlu0 %2128 }
 0x29f   : > { %v2590_v37 = vpop.permute.xlu1 %2589  ;;  %v2584_v4 = vpop.permute.xlu0 %2583 }
 0x2a0   : > { %v2631_v58 = vsel %vm2629_vm9, %v2584_v4, %v2586_v59 }
 0x2a1   : > { %3426 = vmatprep.subr.bf16.mxu1 %v2631_v58 }
 0x2a3   : > { %v2596_v6 = vpop.permute.xlu1 %2595  ;;  %v8367_v7 = vpop.permute.xlu0 %8366 }
 0x2a4   : > { %v8368_v26 = vunpack.i.l.bf16 %v8367_v7  ;;  %v8369_v35 = vunpack.i.h.bf16 %v8367_v7 }
 0x2a6   : > { %v2630_v10 = vsel %vm2629_vm9, %v8368_v26, %v2584_v4  ;;  %v2632_v17 = vsel %vm2629_vm9, %v8369_v35, %v2590_v37 }
 0x2a7   : > { %v8372_v11 = vpop.permute.xlu1 %8371  ;;  %v2592_v20 = vpop.permute.xlu0 %2591  ;;  %3427 = vmatpush1.bf16.msra.mxu1 %v2630_v10 }
 0x2a8   : > { %v2633_v29 = vsel %vm2629_vm9, %v2590_v37, %v2592_v20  ;;  %v8373_v12 = vunpack.i.l.bf16 %v8372_v11  ;;  %v8374_v40 = vunpack.i.h.bf16 %v8372_v11 }
 0x2a9   : > { %3428 = vmatprep.subr.bf16.mxu1 %v2633_v29 }
 0x2aa   : > { %v2634_v60 = vsel %vm2629_vm9, %v8373_v12, %v2596_v6 }
 0x2ab   : > { %v2604_v19 = vpop.permute.xlu1 %2603  ;;  %v2598_v22 = vpop.permute.xlu0 %2597  ;;  %3429 = vmatpush1.bf16.msra.mxu1 %v2632_v17 }
 0x2ac   : > { %v2635_v25 = vsel %vm2629_vm9, %v2596_v6, %v2598_v22 }
 0x2ad   : > { %3430 = vmatprep.subr.bf16.mxu1 %v2635_v25 }
 0x2af   : > { %v9825_v38 = vpop.permute.xlu1 %8381  ;;  %v2602_v27 = vpop.permute.xlu0 %2601  ;;  %3431 = vmatpush1.bf16.msra.mxu1 %v2634_v60 }
 0x2b0   : > { %v2637_v23 = vsel %vm2629_vm9, %v2602_v27, %v2604_v19  ;;  %v2636_v62 = vsel %vm2629_vm9, %v8374_v40, %v2602_v27 }
 0x2b1   : > { %3432 = vmatprep.subr.bf16.mxu1 %v2637_v23 }
 0x2b3   : > { %v9829_v5 = vpop.permute.xlu1 %2730  ;;  %v9831_v2 = vpop.permute.xlu0 %8376  ;;  %3433 = vmatpush1.bf16.msra.mxu1 %v2636_v62 }
 0x2b7   : > { %v9833_v24 = vpop.permute.xlu1 %2734  ;;  %v9835_v28 = vpop.permute.xlu0 %2728 }
 0x2bb   : > { %v9837_v53 = vpop.permute.xlu1 %2732  ;;  %v9839_v3 = vpop.permute.xlu0 %2726 }
 0x2bf   : > { %v9841_v32 = vpop.permute.xlu1 %2742  ;;  %v9843_v18 = vpop.permute.xlu0 %2736 }
 0x2c3   : > { %v9845_v14 = vpop.permute.xlu1 %2746  ;;  %v9847_v34 = vpop.permute.xlu0 %2740 }
 0x2c7   : > { %v9849_v8 = vpop.permute.xlu1 %2744  ;;  %v9851_v46 = vpop.permute.xlu0 %2738 }
 0x2cb   : > { %v2297_v41 = vpop.permute.xlu1 %2296  ;;  %v9853_v59 = vpop.permute.xlu0 %2748 }
 0x2cf   : > { %v9855_v37 = vpop.permute.xlu1 %2875  ;;  %v2295_v4 = vpop.permute.xlu0 %2294 }
 0x2d0   : > { %v2342_v58 = vsel %vm2340_vm10, %v2295_v4, %v2297_v41 }
 0x2d1   : > { %3353 = vmatprep.subr.bf16.mxu0 %v2342_v58 }
 0x2d3   : > { %v9858_v6 = vpop.permute.xlu1 %2871  ;;  %v9860_v7 = vpop.permute.xlu0 %2873 }
 0x2d7   : > { %v2303_v26 = vpop.permute.xlu1 %2302  ;;  %v8387_v35 = vpop.permute.xlu0 %8386 }
 0x2d8   : > { %v8388_v10 = vunpack.i.l.bf16 %v8387_v35  ;;  %v8389_v11 = vunpack.i.h.bf16 %v8387_v35 }
 0x2da   : > { %v2341_v20 = vsel %vm2340_vm10, %v8388_v10, %v2295_v4 }
 0x2db   : > { %v9863_v29 = vpop.permute.xlu1 %2881  ;;  %v2301_v12 = vpop.permute.xlu0 %2300  ;;  %3354 = vmatpush1.bf16.msra.mxu0 %v2341_v20 }
 0x2dc   : > { %v2344_v17 = vsel %vm2340_vm10, %v2301_v12, %v2303_v26  ;;  %v2343_v19 = vsel %vm2340_vm10, %v8389_v11, %v2301_v12 }
 0x2dd   : > { %3355 = vmatprep.subr.bf16.mxu0 %v2344_v17 }
 0x2df   : > { %v2307_v22 = vpop.permute.xlu1 %2306  ;;  %v9867_v25 = vpop.permute.xlu0 %2879  ;;  %3356 = vmatpush1.bf16.msra.mxu0 %v2343_v19 }
 0x2e3   : > { %v9869_v40 = vpop.permute.xlu1 %2885  ;;  %v9871_v60 = vpop.permute.xlu0 %2877 }
 0x2e7   : > { %v8392_v27 = vpop.permute.xlu1 %8391  ;;  %v2309_v23 = vpop.permute.xlu0 %2308 }
 0x2e8   : > { %v8393_v62 = vunpack.i.l.bf16 %v8392_v27  ;;  %v2346_v41 = vsel %vm2340_vm10, %v2307_v22, %v2309_v23  ;;  %v8394_v35 = vunpack.i.h.bf16 %v8392_v27 }
 0x2e9   : > { %3357 = vmatprep.subr.bf16.mxu0 %v2346_v41 }
 0x2ea   : > { %v2345_v4 = vsel %vm2340_vm10, %v8393_v62, %v2307_v22 }
 0x2eb   : > { %v9875_v58 = vpop.permute.xlu0 %2887  ;;  %3358 = vmatpush1.bf16.msra.mxu0 %v2345_v4  ;;  %v2313_v10 = vpop.permute.xlu1 %2312 }
 0x2ec   : > { %v2347_v12 = vsel %vm2340_vm10, %v8394_v35, %v2313_v10 }
 0x2ef   : > { %v9877_v26 = vpop.permute.xlu0 %2883 }
 0x2f0   : > { %13784 = vst [vmem:[#allocation6_spill] sm:$0xff] %v9877_v26 }
 0x2f3   : > { %v2315_v11 = vpop.permute.xlu0 %2314 }
 0x2f4   : > { %v2348_v20 = vsel %vm2340_vm10, %v2313_v10, %v2315_v11 }
 0x2f5   : > { %3359 = vmatprep.subr.bf16.mxu0 %v2348_v20 }
 0x2f6   : > { %3360 = vmatpush1.bf16.msra.mxu0 %v2347_v12 }
 0x338   : > { %v1905_v17 = vpop.f32.mrb[0].mxu0 }
 0x339   : > { %v1992_v19 = vmul.f32 %v9754_v49, %v1905_v17  ;;  %v1907_v23 = vpop.f32.mrb[1].mxu0 }
 0x33a   : > { %v1993_v22 = vmul.f32 %v9754_v49, %v1907_v23  ;;  %v1909_v62 = vpop.f32.mrb[2].mxu0 }
 0x33b   : > { %v2056_v41 = vadd.f32 %v9765_v54, %v1992_v19  ;;  %v1994_v4 = vmul.f32 %v9745_v21, %v1909_v62  ;;  %v1911_v27 = vpop.f32.mrb[3].mxu0 }
 0x33c   : > { %v2057_v26 = vadd.f32 %v9765_v54, %v1993_v22  ;;  %v1995_v11 = vmul.f32 %v9745_v21, %v1911_v27 }
 0x33d   : > { %vm2072_vm11 = vcmp.ge.f32.partialorder %v2056_v41, 0.0  ;;  %v2136_v35 = vmul.f32 %v9785_v13, %v2056_v41  ;;  %v2058_v10 = vadd.f32 %v9752_v9, %v1994_v4 }
 0x33e   : > { %vm2073_vm12 = vcmp.ge.f32.partialorder %v2057_v26, 0.0  ;;  %v2137_v20 = vmul.f32 %v9785_v13, %v2057_v26  ;;  %v2059_v49 = vadd.f32 %v9752_v9, %v1995_v11 }
 0x33f   : > { %v2152_v12 = vsel %vm2072_vm11, %v2056_v41, %v2136_v35  ;;  %vm2074_vm13 = vcmp.ge.f32.partialorder %v2058_v10, 0.0  ;;  %v2138_v17 = vmul.f32 %v9772_v42, %v2058_v10 }
 0x340   : > { %v2153_v19 = vsel %vm2073_vm12, %v2057_v26, %v2137_v20  ;;  %vm2075_vm14 = vcmp.ge.f32.partialorder %v2059_v49, 0.0  ;;  %v2139_v54 = vmul.f32 %v9772_v42, %v2059_v49  ;;  %v1915_v23 = vpop.f32.mrb[4].mxu0  ;;  %v2168_v4 = vmul.f32 %v2152_v12, %v9160_v31 }
 0x341   : > { %v2154_v21 = vsel %vm2074_vm13, %v2058_v10, %v2138_v17  ;;  %v1996_v22 = vmul.f32 %v9774_v44, %v1915_v23  ;;  %v1917_v62 = vpop.f32.mrb[5].mxu0  ;;  %v2169_v11 = vmul.f32 %v2153_v19, %v9158_v30 }
 0x342   : > { %v2170_v27 = vmul.f32 %v2154_v21, %v9160_v31  ;;  %v2155_v13 = vsel %vm2075_vm14, %v2059_v49, %v2139_v54  ;;  %v1997_v9 = vmul.f32 %v9774_v44, %v1917_v62  ;;  %v1919_v41 = vpop.f32.mrb[6].mxu0 }
 0x343   : > { %v2171_v26 = vmul.f32 %v2155_v13, %v9158_v30  ;;  %v2060_v35 = vadd.f32 %v9791_v43, %v1996_v22  ;;  %v1998_v42 = vmul.f32 %v9763_v36, %v1919_v41  ;;  %v1921_v10 = vpop.f32.mrb[7].mxu0 }
 0x344   : > { %v2061_v20 = vadd.f32 %v9791_v43, %v1997_v9  ;;  %v1999_v17 = vmul.f32 %v9763_v36, %v1921_v10  ;;  %v2184_v12 = vpack.c.bf16 %v2170_v27, %v2168_v4 }
 0x345   : > { %vm2076_vm15 = vcmp.ge.f32.partialorder %v2060_v35, 0.0  ;;  %v2140_v49 = vmul.f32 %v9799_v1, %v2060_v35  ;;  %v2062_v44 = vadd.f32 %v9783_v52, %v1998_v42  ;;  %v2185_v54 = vpack.c.bf16 %v2171_v26, %v2169_v11 }
 0x346   : > { %vm2077_vm0 = vcmp.ge.f32.partialorder %v2061_v20, 0.0  ;;  %v2141_v19 = vmul.f32 %v9799_v1, %v2061_v20  ;;  %v2063_v23 = vadd.f32 %v9783_v52, %v1999_v17  ;;  %2200 = vrot.lane.b32.xlu0 %v2184_v12, %s13785_s6 }
 0x347   : > { %v2156_v21 = vsel %vm2076_vm15, %v2060_v35, %v2140_v49  ;;  %vm2078_vm3 = vcmp.ge.f32.partialorder %v2062_v44, 0.0  ;;  %v2142_v43 = vmul.f32 %v9793_v16, %v2062_v44  ;;  %2202 = vrot.lane.b32.xlu1 %v2185_v54, %s13785_s6 }
 0x348   : > { %v2157_v36 = vsel %vm2077_vm0, %v2061_v20, %v2141_v19  ;;  %vm2079_vm5 = vcmp.ge.f32.partialorder %v2063_v23, 0.0  ;;  %v2143_v22 = vmul.f32 %v9793_v16, %v2063_v23  ;;  %v1925_v62 = vpop.f32.mrb[8].mxu0  ;;  %v2172_v1 = vmul.f32 %v2156_v21, %v9160_v31 }
 0x349   : > { %v2158_v4 = vsel %vm2078_vm3, %v2062_v44, %v2142_v43  ;;  %v2000_v27 = vmul.f32 %v9795_v45, %v1925_v62  ;;  %v1927_v13 = vpop.f32.mrb[9].mxu0  ;;  %v2173_v26 = vmul.f32 %v2157_v36, %v9158_v30  ;;  %vm2774_vm3 = vcmask 736256  }
 0x34a   : > { %v2174_v52 = vmul.f32 %v2158_v4, %v9160_v31  ;;  %v2159_v9 = vsel %vm2079_vm5, %v2063_v23, %v2143_v22  ;;  %v2001_v41 = vmul.f32 %v9795_v45, %v1927_v13  ;;  %v1929_v11 = vpop.f32.mrb[10].mxu0  ;;  %vm3064_vm5 = vcmask 703488  }
 0x34b   : > { %v2175_v35 = vmul.f32 %v2159_v9, %v9158_v30  ;;  %v2064_v42 = vadd.f32 %v9803_v61, %v2000_v27  ;;  %v2002_v16 = vmul.f32 %v9789_v55, %v1929_v11  ;;  %v1931_v10 = vpop.f32.mrb[11].mxu0 }
 0x34c   : > { %v2065_v20 = vadd.f32 %v9803_v61, %v2001_v41  ;;  %v2003_v17 = vmul.f32 %v9789_v55, %v1931_v10  ;;  %v2186_v12 = vpack.c.bf16 %v2174_v52, %v2172_v1 }
 0x34d   : > { %vm2080_vm6 = vcmp.ge.f32.partialorder %v2064_v42, 0.0  ;;  %v2144_v49 = vmul.f32 %v9811_v51, %v2064_v42  ;;  %v2066_v45 = vadd.f32 %v9797_v47, %v2002_v16  ;;  %v2187_v44 = vpack.c.bf16 %v2175_v35, %v2173_v26 }
 0x34e   : > { %vm2081_vm8 = vcmp.ge.f32.partialorder %v2065_v20, 0.0  ;;  %v2145_v54 = vmul.f32 %v9811_v51, %v2065_v20  ;;  %v2067_v19 = vadd.f32 %v9797_v47, %v2003_v17  ;;  %2204 = vrot.lane.b32.xlu0 %v2186_v12, %s13785_s6 }
 0x34f   : > { %v2160_v23 = vsel %vm2080_vm6, %v2064_v42, %v2144_v49  ;;  %vm2082_vm11 = vcmp.ge.f32.partialorder %v2066_v45, 0.0  ;;  %v2146_v61 = vmul.f32 %v9805_v33, %v2066_v45  ;;  %2206 = vrot.lane.b32.xlu1 %v2187_v44, %s13785_s6 }
 0x350   : > { %v2161_v55 = vsel %vm2081_vm8, %v2065_v20, %v2145_v54  ;;  %vm2083_vm12 = vcmp.ge.f32.partialorder %v2067_v19, 0.0  ;;  %v2147_v21 = vmul.f32 %v9805_v33, %v2067_v19  ;;  %v1935_v43 = vpop.f32.mrb[12].mxu0  ;;  %v2176_v51 = vmul.f32 %v2160_v23, %v9160_v31 }
 0x351   : > { %v2162_v36 = vsel %vm2082_vm11, %v2066_v45, %v2146_v61  ;;  %v2004_v22 = vmul.f32 %v9807_v15, %v1935_v43  ;;  %v1937_v62 = vpop.f32.mrb[13].mxu0  ;;  %v2177_v1 = vmul.f32 %v2161_v55, %v9158_v30  ;;  %v9953_v61 = vpop.permute.xlu1 %2891 }
 0x352   : > { %v2178_v47 = vmul.f32 %v2162_v36, %v9160_v31  ;;  %v2163_v4 = vsel %vm2083_vm12, %v2067_v19, %v2147_v21  ;;  %v2005_v27 = vmul.f32 %v9807_v15, %v1937_v62  ;;  %v1939_v13 = vpop.f32.mrb[14].mxu0  ;;  %v9955_v55 = vpop.permute.xlu0 %2893 }
 0x353   : > { %v2179_v52 = vmul.f32 %v2163_v4, %v9158_v30  ;;  %v2068_v9 = vadd.f32 %v9815_v57, %v2004_v22  ;;  %v2006_v33 = vmul.f32 %v9801_v50, %v1939_v13  ;;  %v1941_v41 = vpop.f32.mrb[15].mxu0 }
 0x354   : > { %v2069_v11 = vadd.f32 %v9815_v57, %v2005_v27  ;;  %v2007_v26 = vmul.f32 %v9801_v50, %v1941_v41  ;;  %v2188_v35 = vpack.c.bf16 %v2178_v47, %v2176_v51 }
 0x355   : > { %vm2084_vm13 = vcmp.ge.f32.partialorder %v2068_v9, 0.0  ;;  %v2148_v42 = vmul.f32 %v9817_v39, %v2068_v9  ;;  %v2070_v15 = vadd.f32 %v9809_v63, %v2006_v33  ;;  %v2189_v16 = vpack.c.bf16 %v2179_v52, %v2177_v1 }
 0x356   : > { %vm2085_vm14 = vcmp.ge.f32.partialorder %v2069_v11, 0.0  ;;  %v2149_v10 = vmul.f32 %v9817_v39, %v2069_v11  ;;  %v2071_v20 = vadd.f32 %v9809_v63, %v2007_v26  ;;  %2208 = vrot.lane.b32.xlu0 %v2188_v35, %s13785_s6  ;;  %v9959_v21 = vpop.permute.xlu0 %8396 }
 0x357   : > { %v2164_v17 = vsel %vm2084_vm13, %v2068_v9, %v2148_v42  ;;  %vm2086_vm15 = vcmp.ge.f32.partialorder %v2070_v15, 0.0  ;;  %v2150_v57 = vmul.f32 %v9813_v56, %v2070_v15  ;;  %2210 = vrot.lane.b32.xlu1 %v2189_v16, %s13785_s6 }
 0x358   : > { %v2165_v50 = vsel %vm2085_vm14, %v2069_v11, %v2149_v10  ;;  %vm2087_vm0 = vcmp.ge.f32.partialorder %v2071_v20, 0.0  ;;  %v2151_v12 = vmul.f32 %v9813_v56, %v2071_v20  ;;  %v2180_v45 = vmul.f32 %v2164_v17, %v9160_v31  ;;  %v9957_v56 = vpop.permute.xlu1 %2889  ;;  %v10081_v17 = vld [vmem:[#allocation2 + $0x8] sm:$0xff] }
 0x359   : > { %v2166_v49 = vsel %vm2086_vm15, %v2070_v15, %v2150_v57  ;;  %v2181_v63 = vmul.f32 %v2165_v50, %v9158_v30  ;;  %v2970_v57 = vld [vmem:[#allocation2 + $0x18] sm:$0xff] }
 0x35a   : > { %v2182_v44 = vmul.f32 %v2166_v49, %v9160_v31  ;;  %v2167_v39 = vsel %vm2087_vm0, %v2071_v20, %v2151_v12  ;;  %v10075_v20 = vld [vmem:[#allocation2 + $0x10] sm:$0xff]  ;;  %v10090_v50 = vld [vmem:[#allocation2 + $0x38] sm:$0xff]  ;;  %v2973_v49 = vld [vmem:[#allocation2 + $0x40] sm:$0xff] }
 0x35b   : > { %v2183_v54 = vmul.f32 %v2167_v39, %v9158_v30  ;;  %v10096_v12 = vld [vmem:[#allocation2 + $0x30] sm:$0xff]  ;;  %v10114_v39 = vld [vmem:[#allocation2 + $0x60] sm:$0xff] }
 0x35c   : > { %v2190_v19 = vpack.c.bf16 %v2182_v44, %v2180_v45  ;;  %v9961_v43 = vpop.permute.xlu1 %8401  ;;  %v8598_v45 = vld [vmem:[%s13649_s10 + $0xc] ss:$24 sps:$4 sm:$0xff]   ;;  %v10104_v44 = vld [vmem:[#allocation2 + $0x58] sm:$0xff] }
 0x35d   : > { %v2191_v23 = vpack.c.bf16 %v2183_v54, %v2181_v63  ;;  %13786 = vst [vmem:[#allocation7_spill] sm:$0xff] %v9961_v43  ;;  %3458 = vmatprep.mubr.bf16.mxu1 %v8598_v45  ;;  %v2976_v63 = vld [vmem:[#allocation2 + $0x68] sm:$0xff]  ;;  %v10123_v54 = vld [vmem:[#allocation2 + $0x80] sm:$0xff] }
 0x35e   : > { %2212 = vrot.lane.b32.xlu0 %v2190_v19, %s13785_s6  ;;  %v10129_v19 = vld [vmem:[#allocation2 + $0x88] sm:$0xff] }
 0x35f   : > { %2214 = vrot.lane.b32.xlu1 %v2191_v23, %s13785_s6 }
 0x3b8   : > { %v2201_v36 = vpop.permute.xlu0 %2200 }
 0x3b9   : > { %2232 = vst.msk [vmem:[#allocation2 + $0xa8] sm:$0xff] %vm1218_vm2, %v2201_v36  ;;  %v2203_v22 = vpop.permute.xlu1 %2202 }
 0x3ba   : > { %v9965_v62 = vsel %vm1201_vm1, %v2201_v36, %v2203_v22  ;;  %2234 = vst.msk [vmem:[#allocation2 + $0xb8] sm:$0xff] %vm1201_vm1, %v2203_v22  ;;  %v2979_v22 = vld [vmem:[#allocation2 + $0x90] sm:$0xff] }
 0x3bb   : > { %13787 = vst [vmem:[#allocation8_spill] sm:$0xff] %v9965_v62  ;;  %2233 = vst [vmem:[#allocation2 + $0xb0] sm:$0xff] %v9965_v62 }
 0x3c0   : > { %v2205_v51 = vpop.permute.xlu0 %2204  ;;  %v9969_v47 = vld [vmem:[#allocation2 + $0xa8] sm:$0xff] }
 0x3c1   : > { %2235 = vst.msk [vmem:[#allocation2 + $0xd0] sm:$0xff] %vm1218_vm2, %v2205_v51  ;;  %v2207_v4 = vpop.permute.xlu1 %2206  ;;  %2607 = vrot.lane.b32.xlu0 %v9969_v47, %s8819_s26  ;;  %2895 = vrot.lane.b32.xlu1 %v9969_v47, %s8822_s30  ;;  %v9981_v13 = vld [vmem:[#allocation2 + $0xb8] sm:$0xff] }
 0x3c2   : > { %v9977_v27 = vsel %vm1201_vm1, %v2205_v51, %v2207_v4  ;;  %2237 = vst.msk [vmem:[#allocation2 + $0xe0] sm:$0xff] %vm1201_vm1, %v2207_v4 }
 0x3c3   : > { %13788 = vst [vmem:[#allocation9_spill] sm:$0xff] %v9977_v27  ;;  %2236 = vst [vmem:[#allocation2 + $0xd8] sm:$0xff] %v9977_v27 }
 0x3c5   : > { %2750 = vrot.lane.b32.xlu0 %v9969_v47, %s8820_s24  ;;  %2754 = vrot.lane.b32.xlu1 %v9981_v13, %s8820_s24 }
 0x3c8   : > { %v2209_v1 = vpop.permute.xlu0 %2208  ;;  %v10011_v26 = vld [vmem:[#allocation2 + $0xd0] sm:$0xff] }
 0x3c9   : > { %2238 = vst.msk [vmem:[#allocation2 + $0xf8] sm:$0xff] %vm1218_vm2, %v2209_v1  ;;  %v2211_v52 = vpop.permute.xlu1 %2210  ;;  %2318 = vrot.lane.b32.xlu0 %v9969_v47, %s8821_s27  ;;  %2899 = vrot.lane.b32.xlu1 %v9981_v13, %s8822_s30  ;;  %13790 = vst [vmem:[#allocation11_spill] sm:$0xff] %v10011_v26  ;;  %v10021_v35 = vld [vmem:[#allocation2 + $0xe0] sm:$0xff] }
 0x3ca   : > { %v9993_v9 = vsel %vm1201_vm1, %v2209_v1, %v2211_v52  ;;  %2240 = vst.msk [vmem:[#allocation2 + $0x108] sm:$0xff] %vm1201_vm1, %v2211_v52 }
 0x3cb   : > { %13789 = vst [vmem:[#allocation10_spill] sm:$0xff] %v9993_v9  ;;  %2239 = vst [vmem:[#allocation2 + $0x100] sm:$0xff] %v9993_v9 }
 0x3cd   : > { %2752 = vrot.lane.b32.xlu0 %v9965_v62, %s8820_s24  ;;  %2609 = vrot.lane.b32.xlu1 %v9965_v62, %s8819_s26 }
 0x3d0   : > { %v2213_v33 = vpop.permute.xlu0 %2212  ;;  %v10035_v42 = vld [vmem:[#allocation2 + $0xf8] sm:$0xff] }
 0x3d1   : > { %2241 = vst.msk [vmem:[#allocation2 + $0x120] sm:$0xff] %vm1218_vm2, %v2213_v33  ;;  %2897 = vrot.lane.b32.xlu0 %v9965_v62, %s8822_s30  ;;  %2320 = vrot.lane.b32.xlu1 %v9965_v62, %s8821_s27  ;;  %v2215_v41 = vpop.permute.xlu1 %2214  ;;  %13791 = vst [vmem:[#allocation12_spill] sm:$0xff] %v10035_v42  ;;  %v10045_v15 = vld [vmem:[#allocation2 + $0x108] sm:$0xff] }
 0x3d2   : > { %v10007_v11 = vsel %vm1201_vm1, %v2213_v33, %v2215_v41  ;;  %2243 = vst.msk [vmem:[#allocation2 + $0x130] sm:$0xff] %vm1201_vm1, %v2215_v41 }
 0x3d3   : > { %2242 = vst [vmem:[#allocation2 + $0x128] sm:$0xff] %v10007_v11 }
 0x3d5   : > { %2324 = vrot.lane.b32.xlu0 %v10011_v26, %s8821_s27  ;;  %2613 = vrot.lane.b32.xlu1 %v10011_v26, %s8819_s26 }
 0x3d8   : > { %v10055_v16 = vld [vmem:[#allocation2 + $0x120] sm:$0xff] }
 0x3d9   : > { %2901 = vrot.lane.b32.xlu0 %v10011_v26, %s8822_s30  ;;  %2756 = vrot.lane.b32.xlu1 %v10011_v26, %s8820_s24  ;;  %13792 = vst [vmem:[#allocation13_spill] sm:$0xff] %v10055_v16  ;;  %v10069_v10 = vld [vmem:[#allocation2 + $0x130] sm:$0xff] }
 0x3dd   : > { %2760 = vrot.lane.b32.xlu0 %v10021_v35, %s8820_s24  ;;  %2905 = vrot.lane.b32.xlu1 %v10021_v35, %s8822_s30 }
 0x3e1   : > { %2615 = vrot.lane.b32.xlu0 %v9977_v27, %s8819_s26  ;;  %2758 = vrot.lane.b32.xlu1 %v9977_v27, %s8820_s24 }
 0x3e5   : > { %2903 = vrot.lane.b32.xlu0 %v9977_v27, %s8822_s30  ;;  %2326 = vrot.lane.b32.xlu1 %v9977_v27, %s8821_s27 }
 0x3e9   : > { %2762 = vrot.lane.b32.xlu0 %v10035_v42, %s8820_s24  ;;  %2619 = vrot.lane.b32.xlu1 %v10035_v42, %s8819_s26 }
 0x3ed   : > { %2907 = vrot.lane.b32.xlu0 %v10035_v42, %s8822_s30  ;;  %2330 = vrot.lane.b32.xlu1 %v10035_v42, %s8821_s27 }
 0x3f1   : > { %2911 = vrot.lane.b32.xlu0 %v10045_v15, %s8822_s30  ;;  %2766 = vrot.lane.b32.xlu1 %v10045_v15, %s8820_s24 }
 0x3f5   : > { %2621 = vrot.lane.b32.xlu0 %v9993_v9, %s8819_s26  ;;  %2909 = vrot.lane.b32.xlu1 %v9993_v9, %s8822_s30 }
 0x3f9   : > { %2764 = vrot.lane.b32.xlu0 %v9993_v9, %s8820_s24  ;;  %2768 = vrot.lane.b32.xlu1 %v10055_v16, %s8820_s24 }
 0x3fd   : > { %2332 = vrot.lane.b32.xlu0 %v9993_v9, %s8821_s27  ;;  %2336 = vrot.lane.b32.xlu1 %v10055_v16, %s8821_s27 }
 0x401   : > { %2625 = vrot.lane.b32.xlu0 %v10055_v16, %s8819_s26  ;;  %2627 = vrot.lane.b32.xlu1 %v10007_v11, %s8819_s26  ;;  %s8823_s26 = smov 86  }
 0x405   : > { %2772 = vrot.lane.b32.xlu0 %v10069_v10, %s8820_s24  ;;  %2913 = vrot.lane.b32.xlu1 %v10055_v16, %s8822_s30 }
 0x409   : > { %2917 = vrot.lane.b32.xlu0 %v10069_v10, %s8822_s30  ;;  %2441 = vrot.lane.b32.xlu1 %v10075_v20, %s13793_s2 }
 0x40d   : > { %2439 = vrot.lane.b32.xlu0 %v10081_v17, %s13793_s2  ;;  %3020 = vrot.lane.b32.xlu1 %v2970_v57, %s8823_s26  ;;  %v8378_v57 = vunpack.i.l.bf16 %v9831_v2 }
 0x411   : > { %3018 = vrot.lane.b32.xlu0 %v10075_v20, %s8823_s26  ;;  %3016 = vrot.lane.b32.xlu1 %v10081_v17, %s8823_s26 }
 0x415   : > { %8406 = vrot.lane.b32.xlu0 %v9735_v0, %s13793_s2  ;;  %2447 = vrot.lane.b32.xlu1 %v10090_v50, %s13793_s2 }
 0x419   : > { %2445 = vrot.lane.b32.xlu0 %v10096_v12, %s13793_s2  ;;  %3026 = vrot.lane.b32.xlu1 %v2973_v49, %s8823_s26 }
 0x41d   : > { %3024 = vrot.lane.b32.xlu0 %v10090_v50, %s8823_s26  ;;  %2451 = vrot.lane.b32.xlu1 %v10104_v44, %s13793_s2 }
 0x421   : > { %3022 = vrot.lane.b32.xlu0 %v10096_v12, %s8823_s26  ;;  %2770 = vrot.lane.b32.xlu1 %v10007_v11, %s8820_s24  ;;  %s8827_s24 = smov 52  }
 0x425   : > { %2453 = vrot.lane.b32.xlu0 %v10114_v39, %s13793_s2  ;;  %3030 = vrot.lane.b32.xlu1 %v10114_v39, %s8823_s26 }
 0x429   : > { %3032 = vrot.lane.b32.xlu0 %v2976_v63, %s8823_s26  ;;  %8411 = vrot.lane.b32.xlu1 %v9735_v0, %s13793_s2 }
 0x42d   : > { %3028 = vrot.lane.b32.xlu0 %v10104_v44, %s8823_s26  ;;  %2457 = vrot.lane.b32.xlu1 %v10123_v54, %s13793_s2 }
 0x431   : > { %2459 = vrot.lane.b32.xlu0 %v10129_v19, %s13793_s2  ;;  %3036 = vrot.lane.b32.xlu1 %v10129_v19, %s8823_s26 }
 0x433   : > { %v2608_v23 = vpop.permute.xlu0 %2607  ;;  %v10135_v36 = vpop.permute.xlu1 %2895 }
 0x434   : > { %v2638_v45 = vsel %vm2629_vm9, %v8378_v57, %v2608_v23 }
 0x435   : > { %3038 = vrot.lane.b32.xlu0 %v2979_v22, %s8823_s26  ;;  %3034 = vrot.lane.b32.xlu1 %v10123_v54, %s8823_s26  ;;  %v8398_v22 = vunpack.i.l.bf16 %v9959_v21 }
 0x437   : > { %v10140_v51 = vpop.permute.xlu0 %2750  ;;  %v10142_v4 = vpop.permute.xlu1 %2754 }
 0x439   : > { %2463 = vrot.lane.b32.xlu0 %v9969_v47, %s13793_s2  ;;  %2465 = vrot.lane.b32.xlu1 %v9965_v62, %s13793_s2 }
 0x43b   : > { %v2319_v1 = vpop.permute.xlu0 %2318  ;;  %v10148_v52 = vpop.permute.xlu1 %2899 }
 0x43d   : > { %3042 = vrot.lane.b32.xlu0 %v9965_v62, %s8823_s26  ;;  %3044 = vrot.lane.b32.xlu1 %v9981_v13, %s8823_s26 }
 0x43f   : > { %v10154_v33 = vpop.permute.xlu0 %2752  ;;  %v2610_v41 = vpop.permute.xlu1 %2609 }
 0x440   : > { %v2639_v49 = vsel %vm2629_vm9, %v2608_v23, %v2610_v41 }
 0x441   : > { %8416 = vrot.lane.b32.xlu0 %v9735_v0, %s13793_s2  ;;  %2915 = vrot.lane.b32.xlu1 %v10007_v11, %s8822_s30  ;;  %v2349_v0 = vsel %vm2340_vm10, %v8398_v22, %v2319_v1  ;;  %v8379_v22 = vunpack.i.h.bf16 %v9831_v2 }
 0x442   : > { %3434 = vmatprep.subr.bf16.mxu1 %v2639_v49 }
 0x443   : > { %3435 = vmatpush1.bf16.msra.mxu1 %v2638_v45  ;;  %v10163_v63 = vpop.permute.xlu0 %2897  ;;  %v2321_v13 = vpop.permute.xlu1 %2320 }
 0x444   : > { %v2350_v30 = vsel %vm2340_vm10, %v2319_v1, %v2321_v13 }
 0x445   : > { %3040 = vrot.lane.b32.xlu1 %v9969_v47, %s8823_s26  ;;  %2338 = vrot.lane.b32.xlu0 %v10007_v11, %s8821_s27  ;;  %s13805_s27 = smov 56  }
 0x446   : > { %3361 = vmatprep.subr.bf16.mxu0 %v2350_v30 }
 0x447   : > { %3362 = vmatpush1.bf16.msra.mxu0 %v2349_v0  ;;  %v2325_v41 = vpop.permute.xlu0 %2324  ;;  %v2614_v23 = vpop.permute.xlu1 %2613 }
 0x448   : > { %v2640_v0 = vsel %vm2629_vm9, %v8379_v22, %v2614_v23  ;;  %v8613_v22 = vld [vmem:[%s13649_s10 + $0x4] ss:$24 sps:$4 sm:$0xff]  }
 0x449   : > { %2471 = vrot.lane.b32.xlu1 %v9977_v27, %s13793_s2  ;;  %2469 = vrot.lane.b32.xlu0 %v10011_v26, %s13793_s2 }
 0x44a   : > { %3385 = vmatprep.mubr.bf16.mxu0 %v8613_v22 }
 0x44b   : > { %v10176_v57 = vpop.permute.xlu0 %2901  ;;  %v10178_v49 = vpop.permute.xlu1 %2756 }
 0x44d   : > { %3050 = vrot.lane.b32.xlu1 %v10021_v35, %s8823_s26  ;;  %3048 = vrot.lane.b32.xlu0 %v9977_v27, %s8823_s26 }
 0x44f   : > { %v10184_v30 = vpop.permute.xlu0 %2760  ;;  %v10186_v1 = vpop.permute.xlu1 %2905 }
 0x451   : > { %2475 = vrot.lane.b32.xlu1 %v10035_v42, %s13793_s2  ;;  %3046 = vrot.lane.b32.xlu0 %v10011_v26, %s8823_s26  ;;  %v8399_v26 = vunpack.i.h.bf16 %v9959_v21 }
 0x453   : > { %v2616_v45 = vpop.permute.xlu0 %2615  ;;  %v10192_v13 = vpop.permute.xlu1 %2758  ;;  %v2351_v2 = vsel %vm2340_vm10, %v8399_v26, %v2325_v41 }
 0x454   : > { %v2641_v35 = vsel %vm2629_vm9, %v2614_v23, %v2616_v45 }
 0x455   : > { %3054 = vrot.lane.b32.xlu1 %v9993_v9, %s8823_s26  ;;  %2477 = vrot.lane.b32.xlu0 %v9993_v9, %s13793_s2 }
 0x456   : > { %3436 = vmatprep.subr.bf16.mxu1 %v2641_v35 }
 0x457   : > { %3437 = vmatpush1.bf16.msra.mxu1 %v2640_v0  ;;  %v10201_v31 = vpop.permute.xlu0 %2903  ;;  %v2327_v27 = vpop.permute.xlu1 %2326  ;;  %v8383_v0 = vunpack.i.l.bf16 %v9825_v38 }
 0x458   : > { %v2352_v62 = vsel %vm2340_vm10, %v2325_v41, %v2327_v27 }
 0x459   : > { %2473 = vrot.lane.b32.xlu1 %v9717_v48, %s13793_s2  ;;  %3056 = vrot.lane.b32.xlu0 %v10045_v15, %s8823_s26  ;;  %v3572_v15 = vld [vmem:[%s13650_s11] sm:$0xff] }
 0x45a   : > { %3363 = vmatprep.subr.bf16.mxu0 %v2352_v62 }
 0x45b   : > { %3364 = vmatpush1.bf16.msra.mxu0 %v2351_v2  ;;  %v10210_v45 = vpop.permute.xlu0 %2762  ;;  %v2620_v23 = vpop.permute.xlu1 %2619  ;;  %v3573_v2 = vld [vmem:[%s13650_s11 + $0x8] sm:$0xff] }
 0x45d   : > { %2481 = vrot.lane.b32.xlu1 %v10055_v16, %s13793_s2  ;;  %3052 = vrot.lane.b32.xlu0 %v10035_v42, %s8823_s26  ;;  %v3575_v42 = vld [vmem:[%s13650_s11 + $0x18] sm:$0xff] }
 0x45f   : > { %v10219_v21 = vpop.permute.xlu0 %2907  ;;  %v2331_v62 = vpop.permute.xlu1 %2330 }
 0x461   : > { %3060 = vrot.lane.b32.xlu1 %v10007_v11, %s8823_s26  ;;  %3062 = vrot.lane.b32.xlu0 %v10069_v10, %s8823_s26 }
 0x463   : > { %v10225_v27 = vpop.permute.xlu0 %2911  ;;  %v10227_v26 = vpop.permute.xlu1 %2766 }
 0x465   : > { %2479 = vrot.lane.b32.xlu1 %v9717_v48, %s13793_s2  ;;  %2483 = vrot.lane.b32.xlu0 %v10007_v11, %s13793_s2  ;;  %v2642_v48 = vsel %vm2629_vm9, %v8383_v0, %v2620_v23  ;;  %v3636_v11 = vld [vmem:[%s13651_s12] sm:$0xff] }
 0x467   : > { %v2622_v41 = vpop.permute.xlu0 %2621  ;;  %v10236_v35 = vpop.permute.xlu1 %2909 }
 0x468   : > { %v2643_v10 = vsel %vm2629_vm9, %v2620_v23, %v2622_v41  ;;  %v3637_v23 = vld [vmem:[%s13651_s12 + $0x8] sm:$0xff] }
 0x469   : > { %3582 = vperm.xlu1 %8334, %v3572_v15   ;;  %3058 = vrot.lane.b32.xlu0 %v10055_v16, %s8823_s26  ;;  %v3574_v15 = vld [vmem:[%s13650_s11 + $0x10] sm:$0xff]  ;;  %v3716_v16 = vld [vmem:[%s13652_s13] sm:$0xff]  ;;  %s13694_s26 = smov 64  }
 0x46a   : > { %3438 = vmatprep.subr.bf16.mxu1 %v2643_v10  ;;  %v8403_v10 = vunpack.i.l.bf16 %v9961_v43 }
 0x46b   : > { %3439 = vmatpush1.bf16.msra.mxu1 %v2642_v48  ;;  %v10249_v22 = vpop.permute.xlu0 %2764  ;;  %v10251_v9 = vpop.permute.xlu1 %2768 }
 0x46d   : > { %3646 = vperm.xlu1 %8334, %v3636_v11   ;;  %3587 = vperm.xlu0 %8332, %v3573_v2   ;;  %v8384_v11 = vunpack.i.h.bf16 %v9825_v38  ;;  %v2353_v2 = vsel %vm2340_vm10, %v8403_v10, %v2331_v62  ;;  %v3638_v38 = vld [vmem:[%s13651_s12 + $0x10] sm:$0xff]  ;;  %v3639_v10 = vld [vmem:[%s13651_s12 + $0x18] sm:$0xff] }
 0x46f   : > { %v2333_v41 = vpop.permute.xlu0 %2332  ;;  %v10259_v0 = vpop.permute.xlu1 %2336 }
 0x470   : > { %13794 = vst [vmem:[#allocation14_spill] sm:$0xff] %v10259_v0  ;;  %v2354_v48 = vsel %vm2340_vm10, %v2331_v62, %v2333_v41  ;;  %v3717_v62 = vld [vmem:[%s13652_s13 + $0x8] sm:$0xff] }
 0x471   : > { %3592 = vperm.xlu1 %8334, %v3574_v15   ;;  %3651 = vperm.xlu0 %8332, %v3637_v23  }
 0x472   : > { %3365 = vmatprep.subr.bf16.mxu0 %v2354_v48 }
 0x473   : > { %3366 = vmatpush1.bf16.msra.mxu0 %v2353_v2  ;;  %v2626_v0 = vpop.permute.xlu0 %2625  ;;  %v2628_v43 = vpop.permute.xlu1 %2627  ;;  %v3577_v2 = vld [vmem:[%s13650_s11 + $0x28] sm:$0xff] }
 0x474   : > { %v2645_v41 = vsel %vm2629_vm9, %v2626_v0, %v2628_v43  ;;  %v2644_v15 = vsel %vm2629_vm9, %v8384_v11, %v2626_v0  ;;  %v2776_v43 = vsel %vm2774_vm3, %v9835_v28, %v9829_v5  ;;  %v2778_v5 = vsel %vm2774_vm3, %v9833_v24, %v9843_v18 }
 0x475   : > { %3726 = vperm.xlu1 %8334, %v3716_v16   ;;  %3597 = vperm.xlu0 %8332, %v3575_v42   ;;  %v2775_v42 = vsel %vm2774_vm3, %v9839_v3, %v9835_v28  ;;  %v3576_v16 = vld [vmem:[%s13650_s11 + $0x20] sm:$0xff]  ;;  %v2777_v28 = vsel %vm2774_vm3, %v9837_v53, %v9833_v24  ;;  %v3718_v3 = vld [vmem:[%s13652_s13 + $0x10] sm:$0xff]  ;;  %v2780_v18 = vsel %vm2774_vm3, %v9847_v34, %v9841_v32  ;;  %v3719_v53 = vld [vmem:[%s13652_s13 + $0x18] sm:$0xff]  ;;  %vm2919_vm9 = vcmask 719872  }
 0x476   : > { %3440 = vmatprep.subr.bf16.mxu1 %v2645_v41  ;;  %v2779_v24 = vsel %vm2774_vm3, %v9851_v46, %v9847_v34  ;;  %v2782_v32 = vsel %vm2774_vm3, %v9845_v14, %v9853_v59  ;;  %v2781_v34 = vsel %vm2774_vm3, %v9849_v8, %v9845_v14  ;;  %v3641_v46 = vld [vmem:[%s13651_s12 + $0x28] sm:$0xff]  ;;  %v2784_v59 = vsel %vm2774_vm3, %v10154_v33, %v10142_v4  ;;  %v3579_v8 = vld [vmem:[%s13650_s11 + $0x38] sm:$0xff] }
 0x477   : > { %3441 = vmatpush1.bf16.msra.mxu1 %v2644_v15  ;;  %v10279_v23 = vpop.permute.xlu0 %2772  ;;  %v10284_v0 = vpop.permute.xlu1 %2913  ;;  %v2783_v14 = vsel %vm2774_vm3, %v10140_v51, %v10154_v33  ;;  %v2786_v4 = vsel %vm2774_vm3, %v10192_v13, %v10184_v30  ;;  %v2785_v51 = vsel %vm2774_vm3, %v10178_v49, %v10192_v13  ;;  %v3721_v33 = vld [vmem:[%s13652_s13 + $0x28] sm:$0xff]  ;;  %v2788_v30 = vsel %vm2774_vm3, %v10249_v22, %v10227_v26  ;;  %v3643_v13 = vld [vmem:[%s13651_s12 + $0x38] sm:$0xff] }
 0x478   : > { %3442 = vmatprep.subr.bf16.mxu1 %v2776_v43  ;;  %v2787_v49 = vsel %vm2774_vm3, %v10210_v45, %v10249_v22  ;;  %v8596_v45 = vld [vmem:[%s13649_s10 + $0x8] ss:$24 sps:$4 sm:$0xff]   ;;  %v3723_v22 = vld [vmem:[%s13652_s13 + $0x38] sm:$0xff] }
 0x479   : > { %3656 = vperm.xlu1 %8334, %v3638_v38   ;;  %3731 = vperm.xlu0 %8332, %v3717_v62   ;;  %v3640_v38 = vld [vmem:[%s13651_s12 + $0x20] sm:$0xff] }
 0x47b   : > { %3443 = vmatpush1.bf16.msra.mxu1 %v2775_v42  ;;  %v10295_v48 = vpop.permute.xlu0 %2917  ;;  %v10300_v11 = vpop.permute.xlu1 %2441  ;;  %v3578_v42 = vld [vmem:[%s13650_s11 + $0x30] sm:$0xff] }
 0x47c   : > { %3444 = vmatprep.subr.bf16.mxu1 %v2778_v5  ;;  %v3720_v5 = vld [vmem:[%s13652_s13 + $0x20] sm:$0xff] }
 0x47d   : > { %3602 = vperm.xlu1 %8334, %v3576_v16   ;;  %3661 = vperm.xlu0 %8332, %v3639_v10  }
 0x47f   : > { %3445 = vmatpush1.bf16.msra.mxu1 %v2777_v28  ;;  %v10311_v41 = vpop.permute.xlu0 %2439  ;;  %v10316_v15 = vpop.permute.xlu1 %3020 }
 0x480   : > { %3446 = vmatprep.subr.bf16.mxu1 %v2780_v18 }
 0x481   : > { %3736 = vperm.xlu1 %8334, %v3718_v3   ;;  %3607 = vperm.xlu0 %8332, %v3577_v2   ;;  %v3642_v2 = vld [vmem:[%s13651_s12 + $0x30] sm:$0xff] }
 0x483   : > { %3447 = vmatpush1.bf16.msra.mxu1 %v2779_v24  ;;  %v10327_v62 = vpop.permute.xlu0 %3018  ;;  %v10332_v43 = vpop.permute.xlu1 %3016 }
 0x484   : > { %3448 = vmatprep.subr.bf16.mxu1 %v2782_v32 }
 0x485   : > { %3741 = vperm.xlu0 %8332, %v3719_v53   ;;  %3666 = vperm.xlu1 %8334, %v3640_v38   ;;  %v3722_v53 = vld [vmem:[%s13652_s13 + $0x30] sm:$0xff] }
 0x487   : > { %3449 = vmatpush1.bf16.msra.mxu1 %v2781_v34  ;;  %v10343_v16 = vpop.permute.xlu0 %8406  ;;  %v10348_v10 = vpop.permute.xlu1 %2447 }
 0x488   : > { %3450 = vmatprep.subr.bf16.mxu1 %v2784_v59  ;;  %v8777_v59 = vld [vmem:[#allocation2] sm:$0xff] }
 0x489   : > { %3671 = vperm.xlu0 %8332, %v3641_v46   ;;  %3612 = vperm.xlu1 %8334, %v3578_v42  }
 0x48b   : > { %3451 = vmatpush1.bf16.msra.mxu1 %v2783_v14  ;;  %v10359_v28 = vpop.permute.xlu0 %2445  ;;  %v10364_v3 = vpop.permute.xlu1 %3026  ;;  %v10415_v14 = vpack.i.bf16 %v8777_v59, %v8777_v59 }
 0x48c   : > { %3452 = vmatprep.subr.bf16.mxu1 %v2786_v4 }
 0x48d   : > { %3617 = vperm.xlu0 %8332, %v3579_v8   ;;  %3746 = vperm.xlu1 %8334, %v3720_v5   ;;  %v2923_v5 = vsel %vm2919_vm9, %v9867_v25, %v9863_v29 }
 0x48f   : > { %3453 = vmatpush1.bf16.msra.mxu1 %v2785_v51  ;;  %v10375_v18 = vpop.permute.xlu0 %3024  ;;  %v10380_v24 = vpop.permute.xlu1 %2451  ;;  %v2925_v51 = vsel %vm2919_vm9, %v9869_v40, %v9875_v58 }
 0x490   : > { %3454 = vmatprep.subr.bf16.mxu1 %v2788_v30  ;;  %v2927_v30 = vsel %vm2919_vm9, %v9953_v61, %v9955_v55 }
 0x491   : > { %3751 = vperm.xlu0 %8332, %v3721_v33   ;;  %3676 = vperm.xlu1 %8334, %v3642_v2   ;;  %v8605_v2 = vld [vmem:[%s13649_s10 + $0x6c] ss:$24 sps:$4 sm:$0xff]  }
 0x493   : > { %3455 = vmatpush1.bf16.msra.mxu1 %v2787_v49  ;;  %v10391_v38 = vpop.permute.xlu0 %3022  ;;  %v2771_v26 = vpop.permute.xlu1 %2770 }
 0x494   : > { %v2790_v32 = vsel %vm2774_vm3, %v2771_v26, %v10279_v23  ;;  %v2789_v34 = vsel %vm2774_vm3, %v10251_v9, %v2771_v26  ;;  %v2921_v23 = vsel %vm2919_vm9, %v9860_v7, %v9855_v37  ;;  %v8599_v9 = vld [vmem:[%s13649_s10 + $0x3c] ss:$24 sps:$4 sm:$0xff]   ;;  %v2920_v37 = vsel %vm2919_vm9, %v9858_v6, %v9860_v7  ;;  %v8601_v7 = vld [vmem:[%s13649_s10 + $0x38] ss:$24 sps:$4 sm:$0xff]  }
 0x495   : > { %3681 = vperm.xlu0 %8332, %v3643_v13   ;;  %3756 = vperm.xlu1 %8334, %v3722_v53   ;;  %v2922_v6 = vsel %vm2919_vm9, %v9871_v60, %v9867_v25  ;;  %v13795_v25 = vld [vmem:[#allocation6_spill] sm:$0xff]  ;;  %v8607_v13 = vld [vmem:[%s13649_s10 + $0x68] ss:$24 sps:$4 sm:$0xff]   ;;  %v2929_v53 = vsel %vm2919_vm9, %v10163_v63, %v10148_v52  ;;  %v2931_v52 = vsel %vm2919_vm9, %v10201_v31, %v10186_v1 }
 0x496   : > { %3456 = vmatprep.subr.bf16.mxu1 %v2790_v32  ;;  %v2924_v60 = vsel %vm2919_vm9, %v13795_v25, %v9869_v40  ;;  %v2926_v40 = vsel %vm2919_vm9, %v9957_v56, %v9953_v61  ;;  %v8608_v32 = vld [vmem:[%s13649_s10 + $0x9c] ss:$24 sps:$4 sm:$0xff]   ;;  %v2928_v61 = vsel %vm2919_vm9, %v10135_v36, %v10163_v63  ;;  %v2930_v36 = vsel %vm2919_vm9, %v10176_v57, %v10201_v31  ;;  %v8610_v63 = vld [vmem:[%s13649_s10 + $0x98] ss:$24 sps:$4 sm:$0xff]   ;;  %v13796_v31 = vld [vmem:[#allocation8_spill] sm:$0xff] }
 0x497   : > { %3457 = vmatpush1.bf16.msra.mxu1 %v2789_v34  ;;  %v10403_v46 = vpop.permute.xlu0 %2453  ;;  %v10408_v42 = vpop.permute.xlu1 %3030  ;;  %v2932_v57 = vsel %vm2919_vm9, %v10219_v21, %v10236_v35  ;;  %v13801_v25 = vld [vmem:[#allocation12_spill] sm:$0xff] }
 0x498   : > { %3499 = vmatprep.subr.bf16.mxu1 %v2921_v23  ;;  %v8616_v23 = vld [vmem:[%s13649_s10 + $0x14] ss:$24 sps:$4 sm:$0xff]  }
 0x499   : > { %3761 = vperm.xlu0 %8332, %v3723_v22   ;;  %4019 = vrot.lane.b32.xlu1 %v10081_v17, %s13692_s0 }
 0x49a   : > { %3459 = vmatmul.mubr.bf16.vlgmr.msra.gmra.mrb[0].mxu1 %v8596_v45  ;;  %v2933_v45 = vsel %vm2919_vm9, %v10236_v35, %v10225_v27  ;;  %v3066_v35 = vsel %vm3064_vm5, %v10327_v62, %v10316_v15  ;;  %v8408_v15 = vunpack.i.l.bf16 %v10343_v16 }
 0x49b   : > { %3500 = vmatpush1.bf16.msra.mxu1 %v2920_v37  ;;  %v10420_v8 = vpop.permute.xlu0 %3032  ;;  %v10425_v4 = vpop.permute.xlu1 %8411  ;;  %3468 = vmatprep.mubr.bf16.mxu1 %v8599_v9 }
 0x49c   : > { %3501 = vmatprep.subr.bf16.mxu1 %v2923_v5  ;;  %v13797_v5 = vld [vmem:[#allocation11_spill] sm:$0xff] }
 0x49d   : > { %4021 = vrot.lane.b32.xlu0 %v10075_v20, %s13692_s0  ;;  %8421 = vrot.lane.b32.xlu1 %v10415_v14, %s13692_s0 }
 0x49f   : > { %3502 = vmatpush1.bf16.msra.mxu1 %v2922_v6  ;;  %v10437_v29 = vpop.permute.xlu0 %3028  ;;  %v10442_v33 = vpop.permute.xlu1 %2457  ;;  %v13798_v6 = vld [vmem:[#allocation9_spill] sm:$0xff] }
 0x4a0   : > { %3503 = vmatprep.subr.bf16.mxu1 %v2925_v51  ;;  %v13799_v51 = vld [vmem:[#allocation7_spill] sm:$0xff] }
 0x4a1   : > { %4025 = vrot.lane.b32.xlu0 %v10096_v12, %s13692_s0  ;;  %4027 = vrot.lane.b32.xlu1 %v10090_v50, %s13692_s0 }
 0x4a2   : > { %3469 = vmatmul.mubr.bf16.gmra.mrb[4].mxu1 %v8601_v7 }
 0x4a3   : > { %3504 = vmatpush1.bf16.msra.mxu1 %v2924_v60  ;;  %v10454_v58 = vpop.permute.xlu0 %2459  ;;  %v10459_v49 = vpop.permute.xlu1 %3036  ;;  %3478 = vmatprep.mubr.bf16.mxu1 %v8605_v2  ;;  %v13800_v2 = vld [vmem:[#allocation14_spill] sm:$0xff] }
 0x4a4   : > { %3505 = vmatprep.subr.bf16.mxu1 %v2927_v30  ;;  %v13802_v60 = vld [vmem:[#allocation10_spill] sm:$0xff]  ;;  %v3065_v30 = vsel %vm3064_vm5, %v10332_v43, %v10327_v62  ;;  %v13803_v62 = vld [vmem:[#allocation13_spill] sm:$0xff]  ;;  %v3067_v43 = vsel %vm3064_vm5, %v10391_v38, %v10375_v18  ;;  %v2490_v38 = vsel %vm1353_vm4, %v10380_v24, %v10403_v46 }
 0x4a5   : > { %4031 = vrot.lane.b32.xlu0 %v10104_v44, %s13692_s0  ;;  %4033 = vrot.lane.b32.xlu1 %v10114_v39, %s13692_s0  ;;  %v8604_v46 = vld [vmem:[%s13653_s14 + $0x4] ss:$36 sps:$4 sm:$0xff]  }
 0x4a7   : > { %3506 = vmatpush1.bf16.msra.mxu1 %v2926_v40  ;;  %v10471_v55 = vpop.permute.xlu0 %3038  ;;  %v10476_v26 = vpop.permute.xlu1 %3034 }
 0x4a8   : > { %3507 = vmatprep.subr.bf16.mxu1 %v2929_v53  ;;  %v2486_v53 = vsel %vm1353_vm4, %v10311_v41, %v10300_v11  ;;  %v2485_v11 = vsel %vm1353_vm4, %v8408_v15, %v10311_v41  ;;  %v8413_v41 = vunpack.i.l.bf16 %v10425_v4 }
 0x4a9   : > { %8426 = vrot.lane.b32.xlu0 %v10415_v14, %s13692_s0  ;;  %4037 = vrot.lane.b32.xlu1 %v10123_v54, %s13692_s0 }
 0x4aa   : > { %3479 = vmatmul.mubr.bf16.gmra.mrb[8].mxu1 %v8607_v13 }
 0x4ab   : > { %3508 = vmatpush1.bf16.msra.mxu1 %v2928_v61  ;;  %v10488_v56 = vpop.permute.xlu0 %2463  ;;  %v10493_v34 = vpop.permute.xlu1 %2465  ;;  %3488 = vmatprep.mubr.bf16.mxu1 %v8608_v32  ;;  %v3068_v32 = vsel %vm3064_vm5, %v10375_v18, %v10364_v3 }
 0x4ac   : > { %3509 = vmatprep.subr.bf16.mxu1 %v2931_v52  ;;  %v2488_v52 = vsel %vm1353_vm4, %v10359_v28, %v10348_v10  ;;  %v3069_v10 = vsel %vm3064_vm5, %v10437_v29, %v10408_v42  ;;  %v3071_v29 = vsel %vm3064_vm5, %v10476_v26, %v10459_v49 }
 0x4ad   : > { %4039 = vrot.lane.b32.xlu0 %v10129_v19, %s13692_s0  ;;  %4043 = vrot.lane.b32.xlu1 %v9969_v47, %s13692_s0 }
 0x4af   : > { %3510 = vmatpush1.bf16.msra.mxu1 %v2930_v36  ;;  %v10505_v1 = vpop.permute.xlu0 %3042  ;;  %v10510_v22 = vpop.permute.xlu1 %3044  ;;  %v3070_v36 = vsel %vm3064_vm5, %v10408_v42, %v10420_v8  ;;  %v3072_v8 = vsel %vm3064_vm5, %v10459_v49, %v10471_v55  ;;  %v8414_v42 = vunpack.i.h.bf16 %v10425_v4  ;;  %v2489_v55 = vsel %vm1353_vm4, %v8413_v41, %v10380_v24  ;;  %v8637_v41 = vld [vmem:[%s13649_s10 + $0x94] ss:$24 sps:$4 sm:$0xff]  }
 0x4b0   : > { %3511 = vmatprep.subr.bf16.mxu1 %v2933_v45  ;;  %v8409_v45 = vunpack.i.h.bf16 %v10343_v16 }
 0x4b1   : > { %4045 = vrot.lane.b32.xlu0 %v13796_v31, %s13692_s0  ;;  %8431 = vrot.lane.b32.xlu1 %v10415_v14, %s13692_s0  ;;  %v2491_v49 = vsel %vm1353_vm4, %v8414_v42, %v10442_v33  ;;  %v8642_v42 = vld [vmem:[%s13649_s10 + $0x90] ss:$24 sps:$4 sm:$0xff]  }
 0x4b2   : > { %3489 = vmatmul.mubr.bf16.gmra.mrb[12].mxu1 %v8610_v63  ;;  %v2487_v18 = vsel %vm1353_vm4, %v8409_v45, %v10359_v28  ;;  %v8602_v28 = vld [vmem:[%s13653_s14 + $0x8] ss:$36 sps:$4 sm:$0xff]  }
 0x4b3   : > { %3512 = vmatpush1.bf16.msra.mxu1 %v2932_v57  ;;  %v10522_v27 = vpop.permute.xlu0 %8416  ;;  %v2916_v9 = vpop.permute.xlu1 %2915  ;;  %3531 = vmatprep.mubr.bf16.mxu1 %v8616_v23 }
 0x4b4   : > { %v2935_v59 = vsel %vm2919_vm9, %v2916_v9, %v10295_v48  ;;  %v2934_v37 = vsel %vm2919_vm9, %v10284_v0, %v2916_v9  ;;  %v8404_v48 = vunpack.i.h.bf16 %v13799_v51  ;;  %v3074_v9 = vsel %vm3064_vm5, %v10505_v1, %v10510_v22 }
 0x4b5   : > { %4049 = vrot.lane.b32.xlu0 %v13797_v5, %s13692_s0  ;;  %4051 = vrot.lane.b32.xlu1 %v13798_v6, %s13692_s0  ;;  %v8418_v24 = vunpack.i.l.bf16 %v10522_v27 }
 0x4b6   : > { %3513 = vmatprep.subr.bf16.mxu1 %v2935_v59  ;;  %v2355_v40 = vsel %vm2340_vm10, %v8404_v48, %v13800_v2  ;;  %v8419_v48 = vunpack.i.h.bf16 %v10522_v27 }
 0x4b7   : > { %3514 = vmatpush1.bf16.msra.mxu1 %v2934_v37  ;;  %v2339_v21 = vpop.permute.xlu0 %2338  ;;  %v10535_v7 = vpop.permute.xlu1 %3040  ;;  %v2492_v37 = vsel %vm1353_vm4, %v10442_v33, %v10454_v58 }
 0x4b8   : > { %3515 = vmatprep.subr.bf16.mxu1 %v3066_v35  ;;  %v2356_v0 = vsel %vm2340_vm10, %v13800_v2, %v2339_v21  ;;  %v3073_v4 = vsel %vm3064_vm5, %v10535_v7, %v10505_v1  ;;  %v2494_v21 = vsel %vm1353_vm4, %v10488_v56, %v10493_v34  ;;  %v2493_v1 = vsel %vm1353_vm4, %v8418_v24, %v10488_v56 }
 0x4b9   : > { %4055 = vrot.lane.b32.xlu0 %v13801_v25, %s13692_s0  ;;  %4057 = vrot.lane.b32.xlu1 %v13802_v60, %s13692_s0  ;;  %vm3972_vm10 = vcmask 523264  }
 0x4ba   : > { %3367 = vmatprep.subr.bf16.mxu0 %v2356_v0 }
 0x4bb   : > { %3368 = vmatpush1.bf16.msra.mxu0 %v2355_v40  ;;  %3516 = vmatpush1.bf16.msra.mxu1 %v3065_v30  ;;  %v10550_v13 = vpop.permute.xlu0 %2469  ;;  %v10558_v61 = vpop.permute.xlu1 %2471 }
 0x4bc   : > { %3369 = vmatprep.subr.bf16.mxu0 %v2486_v53  ;;  %3517 = vmatprep.subr.bf16.mxu1 %v3068_v32  ;;  %v2496_v34 = vsel %vm1353_vm4, %v10550_v13, %v10558_v61  ;;  %v2495_v56 = vsel %vm1353_vm4, %v8419_v48, %v10550_v13 }
 0x4bd   : > { %8436 = vrot.lane.b32.xlu0 %v10415_v14, %s13692_s0  ;;  %4061 = vrot.lane.b32.xlu1 %v13803_v62, %s13692_s0 }
 0x4bf   : > { %3370 = vmatpush1.bf16.msra.mxu0 %v2485_v11  ;;  %3518 = vmatpush1.bf16.msra.mxu1 %v3067_v43  ;;  %v3049_v3 = vpop.permute.xlu0 %3048  ;;  %v3051_v63 = vpop.permute.xlu1 %3050  ;;  %v8611_v43 = vld [vmem:[%s13649_s10] ss:$24 sps:$4 sm:$0xff]  }
 0x4c0   : > { %3371 = vmatprep.subr.bf16.mxu0 %v2488_v52  ;;  %3519 = vmatprep.subr.bf16.mxu1 %v3070_v36  ;;  %v3076_v58 = vsel %vm3064_vm5, %v3049_v3, %v3051_v63  ;;  %v8621_v36 = vld [vmem:[%s13649_s10 + $0x40] ss:$24 sps:$4 sm:$0xff]   ;;  %v8628_v63 = vld [vmem:[%s13649_s10 + $0x74] ss:$24 sps:$4 sm:$0xff]  }
 0x4c1   : > { %8446 = vrot.lane.b32.xlu0 %v10415_v14, %s13692_s0  ;;  %8441 = vrot.lane.b32.xlu1 %v10415_v14, %s13692_s0  ;;  %s13804_s0 = smov 64  }
 0x4c3   : > { %3372 = vmatpush1.bf16.msra.mxu0 %v2487_v18  ;;  %3520 = vmatpush1.bf16.msra.mxu1 %v3069_v10  ;;  %v3047_v16 = vpop.permute.xlu0 %3046  ;;  %v2476_v23 = vpop.permute.xlu1 %2475 }
 0x4c4   : > { %3373 = vmatprep.subr.bf16.mxu0 %v2490_v38  ;;  %3521 = vmatprep.subr.bf16.mxu1 %v3072_v8  ;;  %v3075_v33 = vsel %vm3064_vm5, %v3047_v16, %v3049_v3  ;;  %v8617_v3 = vld [vmem:[%s13649_s10 + $0x34] ss:$24 sps:$4 sm:$0xff]   ;;  %v8632_v16 = vld [vmem:[%s13653_s14 + $0x98] ss:$36 sps:$4 sm:$0xff]  }
 0x4c5   : > { %4264 = vrot.lane.b32.xlu0 %v10075_v20, %s8825_s25  ;;  %4262 = vrot.lane.b32.xlu1 %v10081_v17, %s8825_s25  ;;  %v8639_v38 = vld [vmem:[%s13649_s10 + $0xa4] ss:$24 sps:$4 sm:$0xff]  }
 0x4c7   : > { %3374 = vmatpush1.bf16.msra.mxu0 %v2489_v55  ;;  %3522 = vmatpush1.bf16.msra.mxu1 %v3071_v29  ;;  %v2478_v57 = vpop.permute.xlu0 %2477  ;;  %v3055_v59 = vpop.permute.xlu1 %3054 }
 0x4c8   : > { %3523 = vmatprep.subr.bf16.mxu1 %v3074_v9  ;;  %3375 = vmatprep.subr.bf16.mxu0 %v2492_v37  ;;  %v2498_v15 = vsel %vm1353_vm4, %v2476_v23, %v2478_v57  ;;  %v8641_v57 = vld [vmem:[%s13649_s10 + $0xa0] ss:$24 sps:$4 sm:$0xff]  }
 0x4c9   : > { %3958 = vrot.lane.b32.xlu0 %v8602_v28, %s13694_s26  ;;  %3956 = vrot.lane.b32.xlu1 %v8604_v46, %s13694_s26  ;;  %v8634_v28 = vld [vmem:[%s13653_s14 + $0xdc] ss:$36 sps:$4 sm:$0xff]   ;;  %v8636_v46 = vld [vmem:[%s13653_s14 + $0x94] ss:$36 sps:$4 sm:$0xff]  }
 0x4cb   : > { %3376 = vmatpush1.bf16.msra.mxu0 %v2491_v49  ;;  %3524 = vmatpush1.bf16.msra.mxu1 %v3073_v4  ;;  %v3057_v26 = vpop.permute.xlu0 %3056  ;;  %v2474_v22 = vpop.permute.xlu1 %2473 }
 0x4cc   : > { %3525 = vmatprep.subr.bf16.mxu1 %v3076_v58  ;;  %3377 = vmatprep.subr.bf16.mxu0 %v2494_v21  ;;  %v3078_v7 = vsel %vm3064_vm5, %v3055_v59, %v3057_v26  ;;  %v2497_v40 = vsel %vm1353_vm4, %v2474_v22, %v2476_v23  ;;  %v10799_v21 = vld [vmem:[#allocation2 + $0x128] sm:$0xff] }
 0x4cd   : > { %4268 = vrot.lane.b32.xlu0 %v10096_v12, %s8825_s25  ;;  %8451 = vrot.lane.b32.xlu1 %v10415_v14, %s8825_s25 }
 0x4cf   : > { %3378 = vmatpush1.bf16.msra.mxu0 %v2493_v1  ;;  %3526 = vmatpush1.bf16.msra.mxu1 %v3075_v33  ;;  %v3053_v35 = vpop.permute.xlu0 %3052  ;;  %v2482_v51 = vpop.permute.xlu1 %2481 }
 0x4d0   : > { %v3077_v2 = vsel %vm3064_vm5, %v3053_v35, %v3055_v59  ;;  %3527 = vmatprep.subr.bf16.mxu1 %v3078_v7  ;;  %3379 = vmatprep.subr.bf16.mxu0 %v2496_v34  ;;  %v8643_v59 = vld [vmem:[%s13653_s14 + $0xe0] ss:$36 sps:$4 sm:$0xff]  }
 0x4d1   : > { %4274 = vrot.lane.b32.xlu0 %v10104_v44, %s8825_s25  ;;  %4270 = vrot.lane.b32.xlu1 %v10090_v50, %s8825_s25 }
 0x4d3   : > { %3380 = vmatpush1.bf16.msra.mxu0 %v2495_v56  ;;  %3528 = vmatpush1.bf16.msra.mxu1 %v3077_v2  ;;  %v3063_v0 = vpop.permute.xlu0 %3062  ;;  %v3061_v30 = vpop.permute.xlu1 %3060 }
 0x4d4   : > { %3381 = vmatprep.subr.bf16.mxu0 %v2498_v15  ;;  %v3080_v27 = vsel %vm3064_vm5, %v3061_v30, %v3063_v0 }
 0x4d5   : > { %8456 = vrot.lane.b32.xlu0 %v10415_v14, %s8825_s25  ;;  %4276 = vrot.lane.b32.xlu1 %v10114_v39, %s8825_s25 }
 0x4d6   : > { %3529 = vmatprep.subr.bf16.mxu1 %v3080_v27 }
 0x4d7   : > { %3382 = vmatpush1.bf16.msra.mxu0 %v2497_v40  ;;  %v2484_v13 = vpop.permute.xlu0 %2483  ;;  %v2480_v53 = vpop.permute.xlu1 %2479 }
 0x4d8   : > { %v2499_v32 = vsel %vm1353_vm4, %v2480_v53, %v2482_v51  ;;  %v2500_v61 = vsel %vm1353_vm4, %v2482_v51, %v2484_v13  ;;  %vm4089_vm4 = vcmask 457728  }
 0x4d9   : > { %4282 = vrot.lane.b32.xlu0 %v10129_v19, %s8825_s25  ;;  %4280 = vrot.lane.b32.xlu1 %v10123_v54, %s8825_s25  ;;  %v8614_v54 = vld [vmem:[%s13649_s10 + $0x10] ss:$24 sps:$4 sm:$0xff]   ;;  %v8619_v19 = vld [vmem:[%s13649_s10 + $0x44] ss:$24 sps:$4 sm:$0xff]  }
 0x4da   : > { %3383 = vmatprep.subr.bf16.mxu0 %v2500_v61 }
 0x4db   : > { %3384 = vmatpush1.bf16.msra.mxu0 %v2499_v32  ;;  %v3059_v11 = vpop.permute.xlu0 %3058 }
 0x4dc   : > { %v3079_v52 = vsel %vm3064_vm5, %v3059_v11, %v3061_v30 }
 0x4dd   : > { %4288 = vrot.lane.b32.xlu0 %v13796_v31, %s8825_s25  ;;  %4286 = vrot.lane.b32.xlu1 %v9969_v47, %s8825_s25  ;;  %v8622_v47 = vld [vmem:[%s13649_s10 + $0x30] ss:$24 sps:$4 sm:$0xff]   ;;  %v8626_v31 = vld [vmem:[%s13649_s10 + $0x64] ss:$24 sps:$4 sm:$0xff]  }
 0x4de   : > { %3530 = vmatpush1.bf16.msra.mxu1 %v3079_v52  ;;  %3386 = vmatmul.mubr.bf16.vlgmr.msra.gmra.mrb[16].mxu0 %v8611_v43 }
 0x4df   : > { %3395 = vmatprep.mubr.bf16.mxu0 %v8617_v3 }
 0x4e1   : > { %3532 = vmatmul.mubr.bf16.vlgmr.msra.gmra.mrb[0].mxu1 %v8614_v54  ;;  %4292 = vrot.lane.b32.xlu0 %v13797_v5, %s8825_s25  ;;  %v8623_v5 = vld [vmem:[%s13653_s14 + $0x4c] ss:$36 sps:$4 sm:$0xff]  }
 0x4e2   : > { %8461 = vrot.lane.b32.xlu1 %v10415_v14, %s8825_s25  ;;  %3541 = vmatprep.mubr.bf16.mxu1 %v8619_v19 }
 0x4e5   : > { %4298 = vrot.lane.b32.xlu0 %v13801_v25, %s8825_s25  ;;  %v8625_v25 = vld [vmem:[%s13653_s14 + $0x50] ss:$36 sps:$4 sm:$0xff]  }
 0x4e6   : > { %4294 = vrot.lane.b32.xlu1 %v13798_v6, %s8825_s25  ;;  %3396 = vmatmul.mubr.bf16.gmra.mrb[20].mxu0 %v8622_v47  ;;  %v8631_v6 = vld [vmem:[%s13649_s10 + $0x60] ss:$24 sps:$4 sm:$0xff]  }
 0x4e7   : > { %3405 = vmatprep.mubr.bf16.mxu0 %v8626_v31 }
 0x4e8   : > { %v10698_v45 = vpop.permute.xlu1 %3582 }
 0x4e9   : > { %3542 = vmatmul.mubr.bf16.gmra.mrb[4].mxu1 %v8621_v36  ;;  %3960 = vrot.lane.b32.xlu0 %v8623_v5, %s13804_s0 }
 0x4ea   : > { %4300 = vrot.lane.b32.xlu1 %v13802_v60, %s8825_s25  ;;  %3551 = vmatprep.mubr.bf16.mxu1 %v8628_v63  ;;  %v8630_v60 = vld [vmem:[%s13649_s10 + $0x70] ss:$24 sps:$4 sm:$0xff]  }
 0x4ec   : > { %v10712_v10 = vpop.permute.xlu0 %3587  ;;  %v10714_v18 = vpop.permute.xlu1 %3646 }
 0x4ed   : > { %8466 = vrot.lane.b32.xlu0 %v10415_v14, %s8825_s25 }
 0x4ee   : > { %3962 = vrot.lane.b32.xlu1 %v8625_v25, %s13804_s0  ;;  %3406 = vmatmul.mubr.bf16.gmra.mrb[24].mxu0 %v8631_v6 }
 0x4ef   : > { %3415 = vmatprep.mubr.bf16.mxu0 %v8637_v41 }
 0x4f0   : > { %v10728_v8 = vpop.permute.xlu0 %3651  ;;  %v10730_v23 = vpop.permute.xlu1 %3592 }
 0x4f1   : > { %3552 = vmatmul.mubr.bf16.gmra.mrb[8].mxu1 %v8630_v60  ;;  %3966 = vrot.lane.b32.xlu0 %v8632_v16, %s13804_s0 }
 0x4f2   : > { %4304 = vrot.lane.b32.xlu1 %v13803_v62, %s8825_s25  ;;  %3561 = vmatprep.mubr.bf16.mxu1 %v8639_v38 }
 0x4f4   : > { %v10744_v29 = vpop.permute.xlu0 %3597  ;;  %v10746_v55 = vpop.permute.xlu1 %3726 }
 0x4f5   : > { %3968 = vrot.lane.b32.xlu0 %v8634_v28, %s13804_s0 }
 0x4f6   : > { %3964 = vrot.lane.b32.xlu1 %v8636_v46, %s13804_s0  ;;  %3416 = vmatmul.mubr.bf16.gmra.mrb[28].mxu0 %v8642_v42 }
 0x4f8   : > { %v10753_v62 = vpop.permute.xlu0 %3731  ;;  %v10755_v9 = vpop.permute.xlu1 %3656 }
 0x4f9   : > { %3562 = vmatmul.mubr.bf16.gmra.mrb[12].mxu1 %v8641_v57  ;;  %8476 = vrot.lane.b32.xlu0 %v10415_v14, %s8825_s25 }
 0x4fa   : > { %8471 = vrot.lane.b32.xlu1 %v10415_v14, %s8825_s25 }
 0x4fc   : > { %v10764_v37 = vpop.permute.xlu0 %3661  ;;  %v10766_v24 = vpop.permute.xlu1 %3602 }
 0x4fd   : > { %4514 = vrot.lane.b32.xlu0 %v10075_v20, %s8827_s24 }
 0x4fe   : > { %3970 = vrot.lane.b32.xlu1 %v8643_v59, %s13804_s0 }
 0x500   : > { %v10771_v4 = vpop.permute.xlu0 %3607  ;;  %v10773_v49 = vpop.permute.xlu1 %3736 }
 0x501   : > { %4518 = vrot.lane.b32.xlu0 %v10096_v12, %s8827_s24 }
 0x502   : > { %4512 = vrot.lane.b32.xlu1 %v10081_v17, %s8827_s24 }
 0x504   : > { %v10779_v26 = vpop.permute.xlu0 %3741  ;;  %v10781_v58 = vpop.permute.xlu1 %3666 }
 0x505   : > { %4524 = vrot.lane.b32.xlu0 %v10104_v44, %s8827_s24 }
 0x506   : > { %8481 = vrot.lane.b32.xlu1 %v10415_v14, %s8827_s24 }
 0x508   : > { %v10787_v20 = vpop.permute.xlu0 %3671  ;;  %v10789_v22 = vpop.permute.xlu1 %3612 }
 0x509   : > { %8486 = vrot.lane.b32.xlu0 %v10415_v14, %s8827_s24 }
 0x50a   : > { %4520 = vrot.lane.b32.xlu1 %v10090_v50, %s8827_s24 }
 0x50c   : > { %v10795_v17 = vpop.permute.xlu0 %3617  ;;  %v10797_v12 = vpop.permute.xlu1 %3746 }
 0x50d   : > { %4063 = vrot.lane.b32.xlu0 %v10799_v21, %s13805_s27 }
 0x50e   : > { %4526 = vrot.lane.b32.xlu1 %v10114_v39, %s8827_s24 }
 0x510   : > { %v10805_v44 = vpop.permute.xlu0 %3751  ;;  %v10807_v33 = vpop.permute.xlu1 %3676 }
 0x511   : > { %4306 = vrot.lane.b32.xlu0 %v10799_v21, %s8825_s25 }
 0x514   : > { %v10811_v50 = vpop.permute.xlu0 %3681  ;;  %v10813_v14 = vpop.permute.xlu1 %3756 }
 0x518   : > { %v10815_v1 = vpop.permute.xlu0 %3761  ;;  %v4020_v35 = vpop.permute.xlu1 %4019 }
 0x51c   : > { %v4022_v7 = vpop.permute.xlu0 %4021  ;;  %v8422_v51 = vpop.permute.xlu1 %8421 }
 0x51d   : > { %v8423_v34 = vunpack.i.l.bf16 %v8422_v51  ;;  %v4091_v39 = vsel %vm4089_vm4, %v4020_v35, %v4022_v7  ;;  %v8424_v48 = vunpack.i.h.bf16 %v8422_v51 }
 0x51e   : > { %4151 = vmatprep.subr.bf16.mxu0 %v4091_v39 }
 0x51f   : > { %v4090_v2 = vsel %vm4089_vm4, %v8423_v34, %v4020_v35 }
 0x520   : > { %v4026_v56 = vpop.permute.xlu0 %4025  ;;  %v4028_v0 = vpop.permute.xlu1 %4027  ;;  %4152 = vmatpush1.bf16.msra.mxu0 %v4090_v2 }
 0x521   : > { %v4093_v30 = vsel %vm4089_vm4, %v4026_v56, %v4028_v0  ;;  %v4092_v15 = vsel %vm4089_vm4, %v8424_v48, %v4026_v56 }
 0x522   : > { %4153 = vmatprep.subr.bf16.mxu0 %v4093_v30 }
 0x524   : > { %v4032_v27 = vpop.permute.xlu0 %4031  ;;  %v4034_v40 = vpop.permute.xlu1 %4033  ;;  %4154 = vmatpush1.bf16.msra.mxu0 %v4092_v15 }
 0x525   : > { %v4095_v13 = vsel %vm4089_vm4, %v4032_v27, %v4034_v40 }
 0x526   : > { %4155 = vmatprep.subr.bf16.mxu0 %v4095_v13 }
 0x528   : > { %v8427_v53 = vpop.permute.xlu0 %8426  ;;  %v4038_v32 = vpop.permute.xlu1 %4037 }
 0x529   : > { %v8428_v61 = vunpack.i.l.bf16 %v8427_v53  ;;  %v8429_v43 = vunpack.i.h.bf16 %v8427_v53 }
 0x52b   : > { %v4094_v11 = vsel %vm4089_vm4, %v8428_v61, %v4032_v27  ;;  %v4096_v19 = vsel %vm4089_vm4, %v8429_v43, %v4038_v32 }
 0x52c   : > { %v4040_v3 = vpop.permute.xlu0 %4039  ;;  %v4044_v52 = vpop.permute.xlu1 %4043  ;;  %4156 = vmatpush1.bf16.msra.mxu0 %v4094_v11 }
 0x52d   : > { %v4097_v54 = vsel %vm4089_vm4, %v4038_v32, %v4040_v3 }
 0x52e   : > { %4157 = vmatprep.subr.bf16.mxu0 %v4097_v54 }
 0x530   : > { %v4046_v47 = vpop.permute.xlu0 %4045  ;;  %v8432_v31 = vpop.permute.xlu1 %8431  ;;  %4158 = vmatpush1.bf16.msra.mxu0 %v4096_v19 }
 0x531   : > { %v8433_v36 = vunpack.i.l.bf16 %v8432_v31  ;;  %v4099_v5 = vsel %vm4089_vm4, %v4044_v52, %v4046_v47  ;;  %v8434_v63 = vunpack.i.h.bf16 %v8432_v31 }
 0x532   : > { %4159 = vmatprep.subr.bf16.mxu0 %v4099_v5 }
 0x533   : > { %v4098_v25 = vsel %vm4089_vm4, %v8433_v36, %v4044_v52 }
 0x534   : > { %v4050_v6 = vpop.permute.xlu0 %4049  ;;  %v4052_v41 = vpop.permute.xlu1 %4051  ;;  %4160 = vmatpush1.bf16.msra.mxu0 %v4098_v25 }
 0x535   : > { %v4101_v60 = vsel %vm4089_vm4, %v4050_v6, %v4052_v41  ;;  %v4100_v16 = vsel %vm4089_vm4, %v8434_v63, %v4050_v6 }
 0x536   : > { %4161 = vmatprep.subr.bf16.mxu0 %v4101_v60 }
 0x538   : > { %v4056_v38 = vpop.permute.xlu0 %4055  ;;  %v4058_v28 = vpop.permute.xlu1 %4057  ;;  %4162 = vmatpush1.bf16.msra.mxu0 %v4100_v16 }
 0x539   : > { %v4103_v46 = vsel %vm4089_vm4, %v4056_v38, %v4058_v28 }
 0x53a   : > { %4163 = vmatprep.subr.bf16.mxu0 %v4103_v46 }
 0x53c   : > { %v8437_v42 = vpop.permute.xlu0 %8436  ;;  %v4062_v52 = vpop.permute.xlu1 %4061 }
 0x53d   : > { %v8438_v57 = vunpack.i.l.bf16 %v8437_v42  ;;  %v8439_v3 = vunpack.i.h.bf16 %v8437_v42 }
 0x53f   : > { %v4102_v59 = vsel %vm4089_vm4, %v8438_v57, %v4056_v38  ;;  %v4104_v47 = vsel %vm4089_vm4, %v8439_v3, %v4062_v52 }
 0x540   : > { %v10831_v35 = vpop.permute.xlu0 %8446  ;;  %4164 = vmatpush1.bf16.msra.mxu0 %v4102_v59 }
 0x544   : > { %v10833_v7 = vpop.permute.xlu0 %4264 }
 0x548   : > { %v10835_v51 = vpop.permute.xlu0 %3958 }
 0x549   : > { %7942 = vmatprep.mubr.msk.bf16.mxu0 %vm3972_vm10, %v10835_v51 }
 0x54c   : > { %v10839_v34 = vpop.permute.xlu0 %4268 }
 0x550   : > { %v10841_v39 = vpop.permute.xlu0 %4274 }
 0x554   : > { %v10843_v48 = vpop.permute.xlu0 %8456 }
 0x558   : > { %v10845_v2 = vpop.permute.xlu0 %4282 }
 0x55c   : > { %v10847_v56 = vpop.permute.xlu0 %4288 }
 0x560   : > { %v10849_v0 = vpop.permute.xlu0 %4292 }
 0x564   : > { %v10851_v30 = vpop.permute.xlu0 %4298 }
 0x565   : > { %13806 = vst [vmem:[#allocation6_spill] sm:$0xff] %v10851_v30 }
 0x568   : > { %v10853_v15 = vpop.permute.xlu0 %3960 }
 0x56c   : > { %v10855_v27 = vpop.permute.xlu0 %8466 }
 0x570   : > { %v10857_v40 = vpop.permute.xlu0 %3966 }
 0x574   : > { %v10859_v13 = vpop.permute.xlu0 %3968 }
 0x575   : > { %13807 = vst [vmem:[#allocation8_spill] sm:$0xff] %v10859_v13 }
 0x578   : > { %v10861_v53 = vpop.permute.xlu0 %8476 }
 0x579   : > { %13808 = vst [vmem:[#allocation11_spill] sm:$0xff] %v10861_v53 }
 0x57c   : > { %v10863_v32 = vpop.permute.xlu0 %4514 }
 0x57d   : > { %13809 = vst [vmem:[#allocation9_spill] sm:$0xff] %v10863_v32 }
 0x580   : > { %v10865_v61 = vpop.permute.xlu0 %4518 }
 0x581   : > { %13810 = vst [vmem:[#allocation7_spill] sm:$0xff] %v10865_v61 }
 0x584   : > { %v10867_v43 = vpop.permute.xlu0 %4524 }
 0x585   : > { %13811 = vst [vmem:[#allocation14_spill] sm:$0xff] %v10867_v43 }
 0x588   : > { %v10869_v11 = vpop.permute.xlu0 %8486 }
 0x589   : > { %13812 = vst [vmem:[#allocation12_spill] sm:$0xff] %v10869_v11  ;;  %v11142_v11 = vld [vmem:[#allocation2 + $0x108] sm:$0xff] }
 0x58c   : > { %v4064_v54 = vpop.permute.xlu0 %4063 }
 0x58d   : > { %v4105_v19 = vsel %vm4089_vm4, %v4062_v52, %v4064_v54 }
 0x58e   : > { %4165 = vmatprep.subr.bf16.mxu0 %v4105_v19 }
 0x58f   : > { %4166 = vmatpush1.bf16.msra.mxu0 %v4104_v47 }
 0x5b1   : > { %v3387_v31 = vpop.f32.mrb[16].mxu0 }
 0x5b2   : > { %v3389_v36 = vpop.f32.mrb[17].mxu0 }
 0x5b3   : > { %v3391_v5 = vpop.f32.mrb[18].mxu0 }
 0x5b4   : > { %v3533_v63 = vpop.f32.mrb[0].mxu1  ;;  %v3393_v25 = vpop.f32.mrb[19].mxu0 }
 0x5b5   : > { %v8090_v6 = vadd.f32 %v3533_v63, %v3387_v31  ;;  %v3535_v41 = vpop.f32.mrb[1].mxu1 }
 0x5b6   : > { %v8091_v60 = vadd.f32 %v3535_v41, %v3389_v36  ;;  %v3537_v16 = vpop.f32.mrb[2].mxu1 }
 0x5b7   : > { %v3620_v38 = vmul.f32 %v8090_v6, %v10698_v45  ;;  %v8092_v28 = vadd.f32 %v3537_v16, %v3391_v5  ;;  %v3539_v46 = vpop.f32.mrb[3].mxu1 }
 0x5b8   : > { %v3621_v42 = vmul.f32 %v8091_v60, %v10698_v45  ;;  %v8093_v57 = vadd.f32 %v3539_v46, %v3393_v25 }
 0x5b9   : > { %v3684_v59 = vadd.f32 %v10714_v18, %v3620_v38  ;;  %v3622_v3 = vmul.f32 %v8092_v28, %v10712_v10  ;;  %v3397_v52 = vpop.f32.mrb[20].mxu0 }
 0x5ba   : > { %v3685_v54 = vadd.f32 %v10714_v18, %v3621_v42  ;;  %v3623_v19 = vmul.f32 %v8093_v57, %v10712_v10  ;;  %v3399_v47 = vpop.f32.mrb[21].mxu0  ;;  %v10885_v42 = vpop.permute.xlu1 %8441 }
 0x5bb   : > { %vm3700_vm6 = vcmp.ge.f32.partialorder %v3684_v59, 0.0  ;;  %v3764_v31 = vmul.f32 %v10746_v55, %v3684_v59  ;;  %v3686_v36 = vadd.f32 %v10728_v8, %v3622_v3  ;;  %v3401_v5 = vpop.f32.mrb[22].mxu0 }
 0x5bc   : > { %vm3701_vm8 = vcmp.ge.f32.partialorder %v3685_v54, 0.0  ;;  %v3765_v45 = vmul.f32 %v10746_v55, %v3685_v54  ;;  %v3687_v63 = vadd.f32 %v10728_v8, %v3623_v19  ;;  %v3543_v25 = vpop.f32.mrb[4].mxu1  ;;  %v3403_v6 = vpop.f32.mrb[23].mxu0  ;;  %v13813_v19 = vld [vmem:[#allocation5_spill] sm:$0xff] }
 0x5bd   : > { %v3780_v41 = vsel %vm3700_vm6, %v3684_v59, %v3764_v31  ;;  %vm3702_vm11 = vcmp.ge.f32.partialorder %v3686_v36, 0.0  ;;  %v3766_v18 = vmul.f32 %v10753_v62, %v3686_v36  ;;  %v8094_v60 = vadd.f32 %v3543_v25, %v3397_v52  ;;  %v3545_v10 = vpop.f32.mrb[5].mxu1  ;;  %v13814_v25 = vld [vmem:[#allocation4_spill] sm:$0xff] }
 0x5be   : > { %v3781_v16 = vsel %vm3701_vm8, %v3685_v54, %v3765_v45  ;;  %vm3703_vm12 = vcmp.ge.f32.partialorder %v3687_v63, 0.0  ;;  %v3767_v38 = vmul.f32 %v10753_v62, %v3687_v63  ;;  %v8095_v28 = vadd.f32 %v3545_v10, %v3399_v47  ;;  %v3547_v46 = vpop.f32.mrb[6].mxu1 }
 0x5bf   : > { %v3782_v57 = vsel %vm3702_vm11, %v3686_v36, %v3766_v18  ;;  %v3624_v55 = vmul.f32 %v8094_v60, %v10730_v23  ;;  %v8096_v8 = vadd.f32 %v3547_v46, %v3401_v5  ;;  %v3549_v3 = vpop.f32.mrb[7].mxu1  ;;  %v3796_v59 = vmul.f32 %v3780_v41, %v13813_v19 }
 0x5c0   : > { %v3783_v31 = vsel %vm3703_vm12, %v3687_v63, %v3767_v38  ;;  %v3625_v43 = vmul.f32 %v8095_v28, %v10730_v23  ;;  %v8097_v52 = vadd.f32 %v3549_v3, %v3403_v6  ;;  %v3798_v54 = vmul.f32 %v3782_v57, %v13813_v19 }
 0x5c1   : > { %v3688_v45 = vadd.f32 %v10755_v9, %v3624_v55  ;;  %v3626_v62 = vmul.f32 %v8096_v8, %v10744_v29  ;;  %v3407_v47 = vpop.f32.mrb[24].mxu0  ;;  %v3797_v10 = vmul.f32 %v3781_v16, %v13814_v25  ;;  %v3799_v36 = vmul.f32 %v3783_v31, %v13814_v25 }
 0x5c2   : > { %v3689_v5 = vadd.f32 %v10755_v9, %v3625_v43  ;;  %v3627_v18 = vmul.f32 %v8097_v52, %v10744_v29  ;;  %v3812_v41 = vpack.c.bf16 %v3798_v54, %v3796_v59  ;;  %v3409_v63 = vpop.f32.mrb[25].mxu0  ;;  %v10902_v43 = vpop.permute.xlu1 %4262 }
 0x5c3   : > { %vm3704_vm13 = vcmp.ge.f32.partialorder %v3688_v45, 0.0  ;;  %v3768_v23 = vmul.f32 %v10773_v49, %v3688_v45  ;;  %v3690_v6 = vadd.f32 %v10764_v37, %v3626_v62  ;;  %v3813_v60 = vpack.c.bf16 %v3799_v36, %v3797_v10  ;;  %v3411_v38 = vpop.f32.mrb[26].mxu0 }
 0x5c4   : > { %vm3705_vm14 = vcmp.ge.f32.partialorder %v3689_v5, 0.0  ;;  %v3769_v28 = vmul.f32 %v10773_v49, %v3689_v5  ;;  %v3691_v16 = vadd.f32 %v10764_v37, %v3627_v18  ;;  %v3553_v46 = vpop.f32.mrb[8].mxu1  ;;  %3828 = vrot.lane.b32.xlu1 %v3812_v41, %s13785_s6  ;;  %v3413_v9 = vpop.f32.mrb[27].mxu0 }
 0x5c5   : > { %v3784_v29 = vsel %vm3704_vm13, %v3688_v45, %v3768_v23  ;;  %vm3706_vm15 = vcmp.ge.f32.partialorder %v3690_v6, 0.0  ;;  %v3770_v57 = vmul.f32 %v10779_v26, %v3690_v6  ;;  %v8098_v55 = vadd.f32 %v3553_v46, %v3407_v47  ;;  %v3555_v8 = vpop.f32.mrb[9].mxu1  ;;  %3830 = vrot.lane.b32.xlu0 %v3813_v60, %s13785_s6 }
 0x5c6   : > { %v3785_v3 = vsel %vm3705_vm14, %v3689_v5, %v3769_v28  ;;  %vm3707_vm0 = vcmp.ge.f32.partialorder %v3691_v16, 0.0  ;;  %v3771_v49 = vmul.f32 %v10779_v26, %v3691_v16  ;;  %v8099_v59 = vadd.f32 %v3555_v8, %v3409_v63  ;;  %v3557_v37 = vpop.f32.mrb[10].mxu1 }
 0x5c7   : > { %v3786_v31 = vsel %vm3706_vm15, %v3690_v6, %v3770_v57  ;;  %v3628_v52 = vmul.f32 %v8098_v55, %v10766_v24  ;;  %v8100_v54 = vadd.f32 %v3557_v37, %v3411_v38  ;;  %v3559_v62 = vpop.f32.mrb[11].mxu1  ;;  %v3800_v45 = vmul.f32 %v3784_v29, %v13813_v19 }
 0x5c8   : > { %v3787_v10 = vsel %vm3707_vm0, %v3691_v16, %v3771_v49  ;;  %v3629_v36 = vmul.f32 %v8099_v59, %v10766_v24  ;;  %v8101_v47 = vadd.f32 %v3559_v62, %v3413_v9  ;;  %v3802_v18 = vmul.f32 %v3786_v31, %v13813_v19  ;;  %v10917_v16 = vpop.permute.xlu1 %3956 }
 0x5c9   : > { %v3692_v5 = vadd.f32 %v10781_v58, %v3628_v52  ;;  %v3630_v41 = vmul.f32 %v8100_v54, %v10771_v4  ;;  %v3417_v26 = vpop.f32.mrb[28].mxu0  ;;  %v3801_v63 = vmul.f32 %v3785_v3, %v13814_v25  ;;  %v3803_v23 = vmul.f32 %v3787_v10, %v13814_v25 }
 0x5ca   : > { %v3693_v6 = vadd.f32 %v10781_v58, %v3629_v36  ;;  %v3631_v60 = vmul.f32 %v8101_v47, %v10771_v4  ;;  %v3814_v38 = vpack.c.bf16 %v3802_v18, %v3800_v45  ;;  %v3419_v28 = vpop.f32.mrb[29].mxu0  ;;  %vm4332_vm14 = vcmask 490496  }
 0x5cb   : > { %vm3708_vm3 = vcmp.ge.f32.partialorder %v3692_v5, 0.0  ;;  %v3772_v24 = vmul.f32 %v10797_v12, %v3692_v5  ;;  %v3694_v46 = vadd.f32 %v10787_v20, %v3630_v41  ;;  %v3815_v9 = vpack.c.bf16 %v3803_v23, %v3801_v63  ;;  %v3421_v29 = vpop.f32.mrb[30].mxu0 }
 0x5cc   : > { %vm3709_vm9 = vcmp.ge.f32.partialorder %v3693_v6, 0.0  ;;  %v3773_v57 = vmul.f32 %v10797_v12, %v3693_v6  ;;  %v3695_v55 = vadd.f32 %v10787_v20, %v3631_v60  ;;  %v3563_v8 = vpop.f32.mrb[12].mxu1  ;;  %3832 = vrot.lane.b32.xlu1 %v3814_v38, %s13785_s6  ;;  %v3423_v4 = vpop.f32.mrb[31].mxu0  ;;  %vm4582_vm15 = vcmask 424960  }
 0x5cd   : > { %v3788_v58 = vsel %vm3708_vm3, %v3692_v5, %v3772_v24  ;;  %vm3710_vm5 = vcmp.ge.f32.partialorder %v3694_v46, 0.0  ;;  %v3774_v3 = vmul.f32 %v10805_v44, %v3694_v46  ;;  %v8102_v49 = vadd.f32 %v3563_v8, %v3417_v26  ;;  %v3565_v59 = vpop.f32.mrb[13].mxu1  ;;  %3834 = vrot.lane.b32.xlu0 %v3815_v9, %s13785_s6  ;;  %v10935_v23 = vpop.permute.xlu1 %8451 }
 0x5ce   : > { %v3789_v37 = vsel %vm3709_vm9, %v3693_v6, %v3773_v57  ;;  %vm3711_vm6 = vcmp.ge.f32.partialorder %v3695_v55, 0.0  ;;  %v3775_v31 = vmul.f32 %v10805_v44, %v3695_v55  ;;  %v8103_v52 = vadd.f32 %v3565_v59, %v3419_v28  ;;  %v3567_v12 = vpop.f32.mrb[14].mxu1 }
 0x5cf   : > { %v3790_v54 = vsel %vm3710_vm5, %v3694_v46, %v3774_v3  ;;  %v3632_v20 = vmul.f32 %v8102_v49, %v10789_v22  ;;  %v8104_v62 = vadd.f32 %v3567_v12, %v3421_v29  ;;  %v3569_v45 = vpop.f32.mrb[15].mxu1  ;;  %v3804_v10 = vmul.f32 %v3788_v58, %v13813_v19  ;;  %v8780_v12 = vld [vmem:[#allocation2 + $0xa8] sm:$0xff] }
 0x5d0   : > { %v3791_v36 = vsel %vm3711_vm6, %v3695_v55, %v3775_v31  ;;  %v3633_v47 = vmul.f32 %v8103_v52, %v10789_v22  ;;  %v8105_v18 = vadd.f32 %v3569_v45, %v3423_v4  ;;  %v3806_v5 = vmul.f32 %v3790_v54, %v13813_v19  ;;  %v8779_v31 = vld [vmem:[#allocation2 + $0x88] sm:$0xff]  ;;  %v8781_v54 = vld [vmem:[#allocation2] sm:$0xff]  ;;  %v8783_v45 = vld [vmem:[#allocation2 + $0xd0] sm:$0xff] }
 0x5d1   : > { %v3696_v41 = vadd.f32 %v10807_v33, %v3632_v20  ;;  %v3634_v26 = vmul.f32 %v8104_v62, %v10795_v17  ;;  %v3805_v44 = vmul.f32 %v3789_v37, %v13814_v25  ;;  %v3807_v63 = vmul.f32 %v3791_v36, %v13814_v25  ;;  %v10947_v8 = vpop.permute.xlu1 %4270  ;;  %v8782_v62 = vld [vmem:[#allocation2 + $0xb0] sm:$0xff]  ;;  %v8784_v36 = vld [vmem:[#allocation2 + $0xd8] sm:$0xff] }
 0x5d2   : > { %v3697_v6 = vadd.f32 %v10807_v33, %v3633_v47  ;;  %v3635_v60 = vmul.f32 %v8105_v18, %v10795_v17  ;;  %v3816_v38 = vpack.c.bf16 %v3806_v5, %v3804_v10  ;;  %v8490_v20 = vpack.i.bf16 %v8781_v54, %v8781_v54  ;;  %v8785_v47 = vld [vmem:[#allocation2 + $0xf8] sm:$0xff]  ;;  %v8786_v5 = vld [vmem:[#allocation2 + $0x100] sm:$0xff] }
 0x5d3   : > { %vm3712_vm8 = vcmp.ge.f32.partialorder %v3696_v41, 0.0  ;;  %v3776_v22 = vmul.f32 %v10813_v14, %v3696_v41  ;;  %v3698_v28 = vadd.f32 %v10811_v50, %v3634_v26  ;;  %v3817_v24 = vpack.c.bf16 %v3807_v63, %v3805_v44 }
 0x5d4   : > { %vm3713_vm11 = vcmp.ge.f32.partialorder %v3697_v6, 0.0  ;;  %v3777_v46 = vmul.f32 %v10813_v14, %v3697_v6  ;;  %v3699_v9 = vadd.f32 %v10811_v50, %v3635_v60  ;;  %3836 = vrot.lane.b32.xlu1 %v3816_v38, %s13785_s6 }
 0x5d5   : > { %v3792_v29 = vsel %vm3712_vm8, %v3696_v41, %v3776_v22  ;;  %vm3714_vm12 = vcmp.ge.f32.partialorder %v3698_v28, 0.0  ;;  %v3778_v33 = vmul.f32 %v10815_v1, %v3698_v28  ;;  %3838 = vrot.lane.b32.xlu0 %v3817_v24, %s13785_s6  ;;  %v10955_v37 = vpop.permute.xlu1 %4276  ;;  %v8787_v41 = vld [vmem:[#allocation2 + $0x120] sm:$0xff] }
 0x5d6   : > { %v3793_v17 = vsel %vm3713_vm11, %v3697_v6, %v3777_v46  ;;  %vm3715_vm13 = vcmp.ge.f32.partialorder %v3699_v9, 0.0  ;;  %v3779_v57 = vmul.f32 %v10815_v1, %v3699_v9  ;;  %v3808_v14 = vmul.f32 %v3792_v29, %v13813_v19  ;;  %v8778_v1 = vld [vmem:[#allocation2 + $0x80] sm:$0xff]  ;;  %v11000_v29 = vpop.permute.xlu0 %4306 }
 0x5d7   : > { %v3794_v55 = vsel %vm3714_vm12, %v3698_v28, %v3778_v33  ;;  %v3809_v58 = vmul.f32 %v3793_v17, %v13814_v25  ;;  %13821 = vst [vmem:[#allocation19_spill] sm:$0xff] %v11000_v29 }
 0x5d8   : > { %v3795_v4 = vsel %vm3715_vm13, %v3699_v9, %v3779_v57  ;;  %v3810_v50 = vmul.f32 %v3794_v55, %v13813_v19 }
 0x5d9   : > { %v3811_v3 = vmul.f32 %v3795_v4, %v13814_v25  ;;  %v10959_v52 = vpop.permute.xlu1 %4280  ;;  %v11132_v25 = vld [vmem:[#allocation2 + $0xd0] sm:$0xff] }
 0x5da   : > { %v3818_v49 = vpack.c.bf16 %v3810_v50, %v3808_v14 }
 0x5db   : > { %v3819_v59 = vpack.c.bf16 %v3811_v3, %v3809_v58 }
 0x5dc   : > { %3840 = vrot.lane.b32.xlu1 %v3818_v49, %s13785_s6 }
 0x5dd   : > { %3842 = vrot.lane.b32.xlu0 %v3819_v59, %s13785_s6  ;;  %v10965_v10 = vpop.permute.xlu1 %4286 }
 0x5e0   : > { %4530 = vrot.lane.b32.xlu1 %v8778_v1, %s8827_s24 }
 0x5e1   : > { %4532 = vrot.lane.b32.xlu0 %v8779_v31, %s8827_s24  ;;  %v10969_v18 = vpop.permute.xlu1 %8461 }
 0x5e4   : > { %4536 = vrot.lane.b32.xlu1 %v8780_v12, %s8827_s24 }
 0x5e5   : > { %4538 = vrot.lane.b32.xlu0 %v8782_v62, %s8827_s24  ;;  %v10976_v26 = vpop.permute.xlu1 %4294  ;;  %v11072_v62 = vld [vmem:[#allocation2 + $0x18] sm:$0xff] }
 0x5e6   : > { %13826 = vst [vmem:[#allocation24_spill] sm:$0xff] %v11072_v62 }
 0x5e8   : > { %8491 = vrot.lane.b32.xlu1 %v8490_v20, %s8827_s24 }
 0x5e9   : > { %4542 = vrot.lane.b32.xlu0 %v8783_v45, %s8827_s24  ;;  %v10980_v44 = vpop.permute.xlu1 %4300  ;;  %v11078_v45 = vld [vmem:[#allocation2 + $0x10] sm:$0xff] }
 0x5ea   : > { %13827 = vst [vmem:[#allocation25_spill] sm:$0xff] %v11078_v45 }
 0x5ec   : > { %4544 = vrot.lane.b32.xlu1 %v8784_v36, %s8827_s24  ;;  %v11080_v36 = vld [vmem:[#allocation2 + $0x38] sm:$0xff] }
 0x5ed   : > { %4548 = vrot.lane.b32.xlu0 %v8785_v47, %s8827_s24  ;;  %v10982_v63 = vpop.permute.xlu1 %3962  ;;  %v11086_v47 = vld [vmem:[#allocation2 + $0x30] sm:$0xff] }
 0x5ee   : > { %13828 = vst [vmem:[#allocation26_spill] sm:$0xff] %v11086_v47 }
 0x5f0   : > { %4550 = vrot.lane.b32.xlu1 %v8786_v5, %s8827_s24  ;;  %v11092_v5 = vld [vmem:[#allocation2 + $0x68] sm:$0xff] }
 0x5f1   : > { %8496 = vrot.lane.b32.xlu0 %v8490_v20, %s8827_s24  ;;  %v10984_v6 = vpop.permute.xlu1 %4304 }
 0x5f2   : > { %13815 = vst [vmem:[#allocation10_spill] sm:$0xff] %v10984_v6  ;;  %v11188_v6 = vld [vmem:[#allocation2 + $0x130] sm:$0xff] }
 0x5f4   : > { %4554 = vrot.lane.b32.xlu1 %v8787_v41, %s8827_s24  ;;  %v11098_v41 = vld [vmem:[#allocation2 + $0x8] sm:$0xff] }
 0x5f5   : > { %4556 = vrot.lane.b32.xlu0 %v10799_v21, %s8827_s24  ;;  %v10986_v60 = vpop.permute.xlu1 %3964 }
 0x5f8   : > { %8501 = vrot.lane.b32.xlu1 %v8490_v20, %s8827_s24 }
 0x5f9   : > { %8506 = vrot.lane.b32.xlu0 %v8490_v20, %s8827_s24  ;;  %v10988_v38 = vpop.permute.xlu1 %8471 }
 0x5fa   : > { %13816 = vst [vmem:[#allocation13_spill] sm:$0xff] %v10988_v38 }
 0x5fd   : > { %v10990_v22 = vpop.permute.xlu1 %3970 }
 0x601   : > { %v10992_v28 = vpop.permute.xlu1 %4512 }
 0x602   : > { %13817 = vst [vmem:[#allocation15_spill] sm:$0xff] %v10992_v28  ;;  %v11158_v28 = vld [vmem:[#allocation2 + $0xe0] sm:$0xff] }
 0x605   : > { %v10994_v24 = vpop.permute.xlu1 %8481 }
 0x606   : > { %13818 = vst [vmem:[#allocation16_spill] sm:$0xff] %v10994_v24 }
 0x609   : > { %v10996_v46 = vpop.permute.xlu1 %4520 }
 0x60a   : > { %13819 = vst [vmem:[#allocation17_spill] sm:$0xff] %v10996_v46 }
 0x60d   : > { %v10998_v9 = vpop.permute.xlu1 %4526 }
 0x60e   : > { %13820 = vst [vmem:[#allocation18_spill] sm:$0xff] %v10998_v9  ;;  %v11140_v9 = vld [vmem:[#allocation2 + $0xb0] sm:$0xff] }
 0x636   : > { %v3829_v33 = vpop.permute.xlu1 %3828 }
 0x637   : > { %3860 = vst.msk [vmem:[#allocation2 + $0x148] sm:$0xff] %vm1218_vm2, %v3829_v33  ;;  %v3831_v17 = vpop.permute.xlu0 %3830 }
 0x638   : > { %v11004_v57 = vsel %vm1201_vm1, %v3829_v33, %v3831_v17  ;;  %3862 = vst.msk [vmem:[#allocation2 + $0x158] sm:$0xff] %vm1201_vm1, %v3831_v17  ;;  %v11100_v33 = vld [vmem:[#allocation2 + $0x88] sm:$0xff]  ;;  %v11106_v17 = vld [vmem:[#allocation2 + $0x40] sm:$0xff] }
 0x639   : > { %3861 = vst [vmem:[#allocation2 + $0x150] sm:$0xff] %v11004_v57  ;;  %4069 = vrot.lane.b32.xlu0 %v11004_v57, %s13805_s27 }
 0x63d   : > { %4312 = vrot.lane.b32.xlu0 %v11004_v57, %s8825_s25 }
 0x63e   : > { %v3833_v55 = vpop.permute.xlu1 %3832  ;;  %v11012_v4 = vld [vmem:[#allocation2 + $0x148] sm:$0xff] }
 0x63f   : > { %3863 = vst.msk [vmem:[#allocation2 + $0x170] sm:$0xff] %vm1218_vm2, %v3833_v55  ;;  %v3835_v14 = vpop.permute.xlu0 %3834  ;;  %4067 = vrot.lane.b32.xlu1 %v11012_v4, %s13805_s27  ;;  %v11182_v38 = vld [vmem:[#allocation2 + $0x158] sm:$0xff] }
 0x640   : > { %v11018_v50 = vsel %vm1201_vm1, %v3833_v55, %v3835_v14  ;;  %3865 = vst.msk [vmem:[#allocation2 + $0x180] sm:$0xff] %vm1201_vm1, %v3835_v14  ;;  %v11108_v55 = vld [vmem:[#allocation2 + $0x80] sm:$0xff] }
 0x641   : > { %13822 = vst [vmem:[#allocation20_spill] sm:$0xff] %v11018_v50  ;;  %3864 = vst [vmem:[#allocation2 + $0x178] sm:$0xff] %v11018_v50  ;;  %4562 = vrot.lane.b32.xlu0 %v11004_v57, %s8827_s24  ;;  %v11114_v14 = vld [vmem:[#allocation2 + $0x60] sm:$0xff] }
 0x642   : > { %13829 = vst [vmem:[#allocation27_spill] sm:$0xff] %v11108_v55 }
 0x643   : > { %4310 = vrot.lane.b32.xlu1 %v11012_v4, %s8825_s25 }
 0x646   : > { %v3837_v58 = vpop.permute.xlu1 %3836  ;;  %v11026_v3 = vld [vmem:[#allocation2 + $0x170] sm:$0xff] }
 0x647   : > { %3866 = vst.msk [vmem:[#allocation2 + $0x198] sm:$0xff] %vm1218_vm2, %v3837_v58  ;;  %v3839_v49 = vpop.permute.xlu0 %3838  ;;  %4560 = vrot.lane.b32.xlu1 %v11012_v4, %s8827_s24  ;;  %4073 = vrot.lane.b32.xlu0 %v11026_v3, %s13805_s27 }
 0x648   : > { %v11034_v59 = vsel %vm1201_vm1, %v3837_v58, %v3839_v49  ;;  %3868 = vst.msk [vmem:[#allocation2 + $0x1a8] sm:$0xff] %vm1201_vm1, %v3839_v49  ;;  %v11116_v58 = vld [vmem:[#allocation2 + $0xb8] sm:$0xff] }
 0x649   : > { %13823 = vst [vmem:[#allocation21_spill] sm:$0xff] %v11034_v59  ;;  %3867 = vst [vmem:[#allocation2 + $0x1a0] sm:$0xff] %v11034_v59  ;;  %v11122_v49 = vld [vmem:[#allocation2 + $0x58] sm:$0xff] }
 0x64a   : > { %13830 = vst [vmem:[#allocation28_spill] sm:$0xff] %v11122_v49 }
 0x64b   : > { %4075 = vrot.lane.b32.xlu1 %v11018_v50, %s13805_s27  ;;  %4316 = vrot.lane.b32.xlu0 %v11026_v3, %s8825_s25 }
 0x64e   : > { %v3841_v1 = vpop.permute.xlu1 %3840  ;;  %v11052_v54 = vld [vmem:[#allocation2 + $0x198] sm:$0xff] }
 0x64f   : > { %3869 = vst.msk [vmem:[#allocation2 + $0x1c0] sm:$0xff] %vm1218_vm2, %v3841_v1  ;;  %4318 = vrot.lane.b32.xlu1 %v11018_v50, %s8825_s25  ;;  %v3843_v31 = vpop.permute.xlu0 %3842  ;;  %4566 = vrot.lane.b32.xlu0 %v11026_v3, %s8827_s24  ;;  %13824 = vst [vmem:[#allocation22_spill] sm:$0xff] %v11052_v54  ;;  %v11206_v30 = vld [vmem:[#allocation2 + $0x1a8] sm:$0xff] }
 0x650   : > { %v11048_v12 = vsel %vm1201_vm1, %v3841_v1, %v3843_v31  ;;  %3871 = vst.msk [vmem:[#allocation2 + $0x1d0] sm:$0xff] %vm1201_vm1, %v3843_v31  ;;  %v11124_v1 = vld [vmem:[#allocation2 + $0xd8] sm:$0xff]  ;;  %v11130_v31 = vld [vmem:[#allocation2 + $0x90] sm:$0xff]  ;;  %13843 = vst [vmem:[#allocation41_spill] sm:$0xff] %v11206_v30 }
 0x651   : > { %3870 = vst [vmem:[#allocation2 + $0x1c8] sm:$0xff] %v11048_v12  ;;  %13831 = vst [vmem:[#allocation29_spill] sm:$0xff] %v11124_v1 }
 0x652   : > { %v11148_v61 = vpop.permute.xlu1 %4530 }
 0x653   : > { %4568 = vrot.lane.b32.xlu1 %v11018_v50, %s8827_s24  ;;  %4079 = vrot.lane.b32.xlu0 %v11052_v54, %s13805_s27  ;;  %v11134_v19 = vpop.permute.xlu0 %4532  ;;  %13833 = vst [vmem:[#allocation31_spill] sm:$0xff] %v11148_v61  ;;  %v11170_v61 = vld [vmem:[#allocation2 + $0x120] sm:$0xff] }
 0x654   : > { %13832 = vst [vmem:[#allocation30_spill] sm:$0xff] %v11134_v19  ;;  %v11152_v19 = vld [vmem:[#allocation2 + $0xa8] sm:$0xff] }
 0x656   : > { %v11070_v20 = vld [vmem:[#allocation2 + $0x1c0] sm:$0xff]  ;;  %v11160_v32 = vpop.permute.xlu1 %4536 }
 0x657   : > { %4081 = vrot.lane.b32.xlu1 %v11034_v59, %s13805_s27  ;;  %4322 = vrot.lane.b32.xlu0 %v11052_v54, %s8825_s25  ;;  %13825 = vst [vmem:[#allocation23_spill] sm:$0xff] %v11070_v20  ;;  %v11150_v46 = vpop.permute.xlu0 %4538  ;;  %13835 = vst [vmem:[#allocation33_spill] sm:$0xff] %v11160_v32 }
 0x658   : > { %13834 = vst [vmem:[#allocation32_spill] sm:$0xff] %v11150_v46  ;;  %v11168_v46 = vld [vmem:[#allocation2 + $0x100] sm:$0xff] }
 0x65a   : > { %v11176_v53 = vpop.permute.xlu1 %8491 }
 0x65b   : > { %4324 = vrot.lane.b32.xlu1 %v11034_v59, %s8825_s25  ;;  %4572 = vrot.lane.b32.xlu0 %v11052_v54, %s8827_s24  ;;  %v11162_v24 = vpop.permute.xlu0 %4542  ;;  %13837 = vst [vmem:[#allocation35_spill] sm:$0xff] %v11176_v53 }
 0x65c   : > { %13836 = vst [vmem:[#allocation34_spill] sm:$0xff] %v11162_v24  ;;  %v11180_v24 = vld [vmem:[#allocation2 + $0xf8] sm:$0xff] }
 0x65e   : > { %v11190_v29 = vpop.permute.xlu1 %4544 }
 0x65f   : > { %4574 = vrot.lane.b32.xlu1 %v11034_v59, %s8827_s24  ;;  %4087 = vrot.lane.b32.xlu0 %v11048_v12, %s13805_s27  ;;  %v11178_v32 = vpop.permute.xlu0 %4548  ;;  %13839 = vst [vmem:[#allocation37_spill] sm:$0xff] %v11190_v29  ;;  %v11214_v29 = vld [vmem:[#allocation2 + $0x180] sm:$0xff] }
 0x660   : > { %13838 = vst [vmem:[#allocation36_spill] sm:$0xff] %v11178_v32 }
 0x662   : > { %v11202_v32 = vpop.permute.xlu1 %4550 }
 0x663   : > { %4085 = vrot.lane.b32.xlu1 %v11070_v20, %s13805_s27  ;;  %4872 = vrot.lane.b32.xlu0 %v11072_v62, %s8825_s25  ;;  %v11192_v13 = vpop.permute.xlu0 %8496  ;;  %13841 = vst [vmem:[#allocation39_spill] sm:$0xff] %v11202_v32 }
 0x664   : > { %13840 = vst [vmem:[#allocation38_spill] sm:$0xff] %v11192_v13 }
 0x667   : > { %4870 = vrot.lane.b32.xlu1 %v11078_v45, %s8825_s25  ;;  %4876 = vrot.lane.b32.xlu0 %v11080_v36, %s8825_s25  ;;  %v11204_v53 = vpop.permute.xlu0 %4556 }
 0x668   : > { %13842 = vst [vmem:[#allocation40_spill] sm:$0xff] %v11204_v53 }
 0x66b   : > { %4328 = vrot.lane.b32.xlu1 %v11070_v20, %s8825_s25  ;;  %4874 = vrot.lane.b32.xlu0 %v11086_v47, %s8825_s25  ;;  %v11212_v13 = vpop.permute.xlu0 %8506 }
 0x66c   : > { %13844 = vst [vmem:[#allocation42_spill] sm:$0xff] %v11212_v13  ;;  %v8644_v13 = vld [vmem:[%s13653_s14 + $0x14] ss:$36 sps:$4 sm:$0xff]  }
 0x66f   : > { %4578 = vrot.lane.b32.xlu1 %v11070_v20, %s8827_s24  ;;  %4884 = vrot.lane.b32.xlu0 %v11092_v5, %s8825_s25 }
 0x673   : > { %4868 = vrot.lane.b32.xlu1 %v11098_v41, %s8825_s25  ;;  %4888 = vrot.lane.b32.xlu0 %v11100_v33, %s8825_s25 }
 0x677   : > { %4878 = vrot.lane.b32.xlu1 %v11106_v17, %s8825_s25  ;;  %4886 = vrot.lane.b32.xlu0 %v11108_v55, %s8825_s25 }
 0x67b   : > { %4882 = vrot.lane.b32.xlu1 %v11114_v14, %s8825_s25  ;;  %4896 = vrot.lane.b32.xlu0 %v11116_v58, %s8825_s25 }
 0x67f   : > { %4880 = vrot.lane.b32.xlu1 %v11122_v49, %s8825_s25  ;;  %4900 = vrot.lane.b32.xlu0 %v11124_v1, %s8825_s25 }
 0x683   : > { %4890 = vrot.lane.b32.xlu1 %v11130_v31, %s8825_s25  ;;  %4898 = vrot.lane.b32.xlu0 %v11132_v25, %s8825_s25 }
 0x687   : > { %4894 = vrot.lane.b32.xlu1 %v11140_v9, %s8825_s25  ;;  %4908 = vrot.lane.b32.xlu0 %v11142_v11, %s8825_s25 }
 0x68b   : > { %4892 = vrot.lane.b32.xlu1 %v11152_v19, %s8825_s25  ;;  %4912 = vrot.lane.b32.xlu0 %v10799_v21, %s8825_s25 }
 0x68f   : > { %4902 = vrot.lane.b32.xlu1 %v11158_v28, %s8825_s25  ;;  %4330 = vrot.lane.b32.xlu0 %v11048_v12, %s8825_s25 }
 0x693   : > { %4906 = vrot.lane.b32.xlu1 %v11168_v46, %s8825_s25  ;;  %4910 = vrot.lane.b32.xlu0 %v11170_v61, %s8825_s25 }
 0x697   : > { %4904 = vrot.lane.b32.xlu1 %v11180_v24, %s8825_s25  ;;  %4920 = vrot.lane.b32.xlu0 %v11182_v38, %s8825_s25 }
 0x69b   : > { %4914 = vrot.lane.b32.xlu1 %v11188_v6, %s8825_s25  ;;  %4924 = vrot.lane.b32.xlu0 %v11018_v50, %s8825_s25  ;;  %v11216_v50 = vpop.permute.xlu1 %4554 }
 0x69c   : > { %13845 = vst [vmem:[#allocation43_spill] sm:$0xff] %v11216_v50 }
 0x69f   : > { %4918 = vrot.lane.b32.xlu1 %v11004_v57, %s8825_s25  ;;  %4922 = vrot.lane.b32.xlu0 %v11026_v3, %s8825_s25  ;;  %v11224_v53 = vpop.permute.xlu1 %8501 }
 0x6a0   : > { %13846 = vst [vmem:[#allocation44_spill] sm:$0xff] %v11224_v53 }
 0x6a3   : > { %4916 = vrot.lane.b32.xlu1 %v11012_v4, %s8825_s25  ;;  %4932 = vrot.lane.b32.xlu0 %v11206_v30, %s8825_s25  ;;  %v11237_v30 = vld [vmem:[#allocation2 + $0x1d0] sm:$0xff] }
 0x6a7   : > { %4926 = vrot.lane.b32.xlu1 %v11214_v29, %s8825_s25  ;;  %4934 = vrot.lane.b32.xlu0 %v11070_v20, %s8825_s25  ;;  %v8443_v20 = vunpack.i.l.bf16 %v10885_v42 }
 0x6ab   : > { %4930 = vrot.lane.b32.xlu1 %v11034_v59, %s8825_s25  ;;  %5137 = vrot.lane.b32.xlu0 %v11072_v62, %s13805_s27  ;;  %v4070_v32 = vpop.permute.xlu0 %4069 }
 0x6af   : > { %4928 = vrot.lane.b32.xlu1 %v11052_v54, %s8825_s25  ;;  %4810 = vrot.lane.b32.xlu0 %v8644_v13, %s13804_s0  ;;  %v11234_v50 = vpop.permute.xlu0 %4312 }
 0x6b1   : > { %v4068_v59 = vpop.permute.xlu1 %4067 }
 0x6b2   : > { %v4107_v53 = vsel %vm4089_vm4, %v4068_v59, %v4070_v32  ;;  %v4106_v62 = vsel %vm4089_vm4, %v8443_v20, %v4068_v59  ;;  %v8646_v32 = vld [vmem:[%s13653_s14 + $0x10] ss:$36 sps:$4 sm:$0xff]   ;;  %v8444_v20 = vunpack.i.h.bf16 %v10885_v42 }
 0x6b3   : > { %4938 = vrot.lane.b32.xlu1 %v11237_v30, %s8825_s25  ;;  %4167 = vmatprep.subr.bf16.mxu0 %v4107_v53  ;;  %v11247_v54 = vpop.permute.xlu0 %4562 }
 0x6b4   : > { %4168 = vmatpush1.bf16.msra.mxu0 %v4106_v62  ;;  %5141 = vrot.lane.b32.xlu0 %v11080_v36, %s13805_s27  ;;  %13847 = vst [vmem:[#allocation45_spill] sm:$0xff] %v11247_v54 }
 0x6b5   : > { %v11245_v13 = vpop.permute.xlu1 %4310 }
 0x6b7   : > { %5135 = vrot.lane.b32.xlu1 %v11078_v45, %s13805_s27 }
 0x6b8   : > { %5139 = vrot.lane.b32.xlu0 %v11086_v47, %s13805_s27 }
 0x6b9   : > { %v11256_v59 = vpop.permute.xlu1 %4560  ;;  %v4074_v53 = vpop.permute.xlu0 %4073 }
 0x6ba   : > { %13848 = vst [vmem:[#allocation46_spill] sm:$0xff] %v11256_v59  ;;  %v4108_v47 = vsel %vm4089_vm4, %v8444_v20, %v4074_v53 }
 0x6bb   : > { %4808 = vrot.lane.b32.xlu1 %v8646_v32, %s13804_s0 }
 0x6bc   : > { %5149 = vrot.lane.b32.xlu0 %v11092_v5, %s13805_s27 }
 0x6bd   : > { %v4076_v62 = vpop.permute.xlu1 %4075  ;;  %v11262_v54 = vpop.permute.xlu0 %4316 }
 0x6be   : > { %v4109_v45 = vsel %vm4089_vm4, %v4074_v53, %v4076_v62 }
 0x6bf   : > { %5133 = vrot.lane.b32.xlu1 %v11098_v41, %s13805_s27  ;;  %4169 = vmatprep.subr.bf16.mxu0 %v4109_v45  ;;  %v8448_v45 = vunpack.i.l.bf16 %v10831_v35 }
 0x6c0   : > { %4170 = vmatpush1.bf16.msra.mxu0 %v4108_v47  ;;  %4580 = vrot.lane.b32.xlu0 %v11048_v12, %s8827_s24 }
 0x6c1   : > { %v11270_v32 = vpop.permute.xlu1 %4318  ;;  %v11272_v59 = vpop.permute.xlu0 %4566 }
 0x6c2   : > { %13849 = vst [vmem:[#allocation47_spill] sm:$0xff] %v11272_v59 }
 0x6c3   : > { %5143 = vrot.lane.b32.xlu1 %v11106_v17, %s13805_s27 }
 0x6c4   : > { %5153 = vrot.lane.b32.xlu0 %v11100_v33, %s13805_s27 }
 0x6c5   : > { %v11278_v42 = vpop.permute.xlu1 %4568  ;;  %v4080_v62 = vpop.permute.xlu0 %4079 }
 0x6c6   : > { %13850 = vst [vmem:[#allocation48_spill] sm:$0xff] %v11278_v42  ;;  %v4110_v59 = vsel %vm4089_vm4, %v8448_v45, %v4080_v62 }
 0x6c7   : > { %5147 = vrot.lane.b32.xlu1 %v11114_v14, %s13805_s27 }
 0x6c8   : > { %5151 = vrot.lane.b32.xlu0 %v11108_v55, %s13805_s27 }
 0x6c9   : > { %v4082_v47 = vpop.permute.xlu1 %4081  ;;  %v11285_v53 = vpop.permute.xlu0 %4322 }
 0x6ca   : > { %v4111_v20 = vsel %vm4089_vm4, %v4080_v62, %v4082_v47 }
 0x6cb   : > { %5145 = vrot.lane.b32.xlu1 %v11122_v49, %s13805_s27  ;;  %4171 = vmatprep.subr.bf16.mxu0 %v4111_v20 }
 0x6cc   : > { %4172 = vmatpush1.bf16.msra.mxu0 %v4110_v59  ;;  %5161 = vrot.lane.b32.xlu0 %v11116_v58, %s13805_s27  ;;  %v8449_v59 = vunpack.i.h.bf16 %v10831_v35  ;;  %v4334_v35 = vsel %vm4332_vm14, %v10902_v43, %v10833_v7 }
 0x6cd   : > { %v11293_v42 = vpop.permute.xlu1 %4324  ;;  %v11295_v55 = vpop.permute.xlu0 %4572 }
 0x6ce   : > { %13851 = vst [vmem:[#allocation49_spill] sm:$0xff] %v11295_v55 }
 0x6cf   : > { %5155 = vrot.lane.b32.xlu1 %v11130_v31, %s13805_s27 }
 0x6d0   : > { %5165 = vrot.lane.b32.xlu0 %v11124_v1, %s13805_s27  ;;  %v8453_v1 = vunpack.i.l.bf16 %v10935_v23 }
 0x6d1   : > { %v11301_v47 = vpop.permute.xlu1 %4574  ;;  %v4088_v49 = vpop.permute.xlu0 %4087 }
 0x6d2   : > { %13852 = vst [vmem:[#allocation50_spill] sm:$0xff] %v11301_v47  ;;  %v4333_v7 = vsel %vm4332_vm14, %v8453_v1, %v10902_v43 }
 0x6d3   : > { %5159 = vrot.lane.b32.xlu1 %v11140_v9, %s13805_s27 }
 0x6d4   : > { %5163 = vrot.lane.b32.xlu0 %v11132_v25, %s13805_s27 }
 0x6d5   : > { %v4086_v62 = vpop.permute.xlu1 %4085  ;;  %v11308_v45 = vpop.permute.xlu0 %4872 }
 0x6d6   : > { %v4113_v20 = vsel %vm4089_vm4, %v4086_v62, %v4088_v49  ;;  %v4112_v55 = vsel %vm4089_vm4, %v8449_v59, %v4086_v62  ;;  %v8647_v59 = vld [vmem:[%s13653_s14 + $0x5c] ss:$36 sps:$4 sm:$0xff]   ;;  %v8454_v62 = vunpack.i.h.bf16 %v10935_v23 }
 0x6d7   : > { %5157 = vrot.lane.b32.xlu1 %v11152_v19, %s13805_s27  ;;  %4173 = vmatprep.subr.bf16.mxu0 %v4113_v20  ;;  %v4336_v20 = vsel %vm4332_vm14, %v10839_v34, %v10947_v8  ;;  %v8649_v23 = vld [vmem:[%s13653_s14 + $0x58] ss:$36 sps:$4 sm:$0xff]   ;;  %v4338_v8 = vsel %vm4332_vm14, %v10841_v39, %v10955_v37 }
 0x6d8   : > { %4174 = vmatpush1.bf16.msra.mxu0 %v4112_v55  ;;  %5173 = vrot.lane.b32.xlu0 %v11142_v11, %s13805_s27  ;;  %v3973_v55 = vsel %vm3972_vm10, %v10917_v16, %v10835_v51  ;;  %v8458_v16 = vunpack.i.l.bf16 %v10843_v48  ;;  %v4335_v43 = vsel %vm4332_vm14, %v8454_v62, %v10839_v34  ;;  %v3974_v34 = vsel %vm3972_vm10, %v10853_v15, %v10982_v63 }
 0x6d9   : > { %v11320_v47 = vpop.permute.xlu1 %4870  ;;  %4393 = vmatprep.subr.bf16.mxu0 %v4334_v35  ;;  %v11322_v49 = vpop.permute.xlu0 %4876  ;;  %v8463_v15 = vunpack.i.l.bf16 %v10969_v18 }
 0x6da   : > { %v4337_v37 = vsel %vm4332_vm14, %v8458_v16, %v10841_v39  ;;  %v8464_v16 = vunpack.i.h.bf16 %v10969_v18  ;;  %v8468_v18 = vunpack.i.l.bf16 %v10855_v27 }
 0x6db   : > { %5167 = vrot.lane.b32.xlu1 %v11158_v28, %s13805_s27  ;;  %4184 = vmatmul.mubr.bf16.vlgmr.msra.gmra.mrb[32].mxu0 %v3973_v55  ;;  %v8459_v55 = vunpack.i.h.bf16 %v10843_v48 }
 0x6dc   : > { %7943 = vmatprep.mubr.msk.bf16.mxu0 %vm3972_vm10, %v10982_v63  ;;  %4394 = vmatpush1.bf16.msra.mxu0 %v4333_v7 }
 0x6dd   : > { %v11340_v35 = vpop.permute.xlu1 %4328  ;;  %4395 = vmatprep.subr.bf16.mxu0 %v4336_v20  ;;  %4814 = vrot.lane.b32.xlu0 %v8647_v59, %s13804_s0  ;;  %v11343_v51 = vpop.permute.xlu0 %4874  ;;  %v4339_v39 = vsel %vm4332_vm14, %v8459_v55, %v10959_v52  ;;  %v8650_v20 = vld [vmem:[%s13653_s14 + $0xa4] ss:$36 sps:$4 sm:$0xff]  }
 0x6df   : > { %5171 = vrot.lane.b32.xlu1 %v11168_v46, %s13805_s27 }
 0x6e0   : > { %4396 = vmatpush1.bf16.msra.mxu0 %v4335_v43  ;;  %v4344_v43 = vsel %vm4332_vm14, %v10849_v0, %v10976_v26  ;;  %v13853_v26 = vld [vmem:[#allocation6_spill] sm:$0xff] }
 0x6e1   : > { %v11356_v1 = vpop.permute.xlu1 %4578  ;;  %4397 = vmatprep.subr.bf16.mxu0 %v4338_v8  ;;  %5177 = vrot.lane.b32.xlu0 %v10799_v21, %s13805_s27  ;;  %v11360_v59 = vpop.permute.xlu0 %4884  ;;  %v4340_v21 = vsel %vm4332_vm14, %v10959_v52, %v10845_v2  ;;  %v4342_v2 = vsel %vm4332_vm14, %v10965_v10, %v10847_v56  ;;  %v3975_v52 = vsel %vm3972_vm10, %v10986_v60, %v10857_v40  ;;  %v8652_v60 = vld [vmem:[%s13653_s14 + $0xa0] ss:$36 sps:$4 sm:$0xff]  }
 0x6e2   : > { %v4341_v56 = vsel %vm4332_vm14, %v8463_v15, %v10965_v10  ;;  %v4343_v10 = vsel %vm4332_vm14, %v8464_v16, %v10849_v0  ;;  %v4346_v8 = vsel %vm4332_vm14, %v13853_v26, %v10980_v44  ;;  %v8469_v15 = vunpack.i.h.bf16 %v10855_v27 }
 0x6e3   : > { %4812 = vrot.lane.b32.xlu1 %v8649_v23, %s13804_s0  ;;  %4194 = vmatmul.mubr.bf16.gmra.mrb[36].mxu0 %v3974_v34  ;;  %v8658_v34 = vld [vmem:[%s13653_s14 + $0x4] ss:$36 sps:$4 sm:$0xff]   ;;  %v4345_v44 = vsel %vm4332_vm14, %v8468_v18, %v13853_v26 }
 0x6e4   : > { %7944 = vmatprep.mubr.msk.bf16.mxu0 %vm3972_vm10, %v10857_v40  ;;  %4398 = vmatpush1.bf16.msra.mxu0 %v4337_v37  ;;  %v13854_v37 = vld [vmem:[#allocation8_spill] sm:$0xff] }
 0x6e5   : > { %v11374_v62 = vpop.permute.xlu1 %4868  ;;  %4399 = vmatprep.subr.bf16.mxu0 %v4340_v21  ;;  %5175 = vrot.lane.b32.xlu0 %v11170_v61, %s13805_s27  ;;  %v11378_v48 = vpop.permute.xlu0 %4888  ;;  %v3976_v21 = vsel %vm3972_vm10, %v13854_v37, %v10990_v22  ;;  %v13859_v37 = vld [vmem:[#allocation41_spill] sm:$0xff] }
 0x6e7   : > { %5169 = vrot.lane.b32.xlu1 %v11180_v24, %s13805_s27 }
 0x6e8   : > { %4400 = vmatpush1.bf16.msra.mxu0 %v4339_v39  ;;  %v13855_v39 = vld [vmem:[#allocation19_spill] sm:$0xff] }
 0x6e9   : > { %v11388_v63 = vpop.permute.xlu1 %4878  ;;  %4401 = vmatprep.subr.bf16.mxu0 %v4342_v2  ;;  %5185 = vrot.lane.b32.xlu0 %v11182_v38, %s13805_s27  ;;  %v11392_v7 = vpop.permute.xlu0 %4886  ;;  %v13856_v2 = vld [vmem:[#allocation10_spill] sm:$0xff] }
 0x6ea   : > { %v4347_v16 = vsel %vm4332_vm14, %v8469_v15, %v13856_v2  ;;  %v8655_v15 = vld [vmem:[%s13653_s14 + $0xec] ss:$36 sps:$4 sm:$0xff]  }
 0x6eb   : > { %5179 = vrot.lane.b32.xlu1 %v11188_v6, %s13805_s27  ;;  %4204 = vmatmul.mubr.bf16.gmra.mrb[40].mxu0 %v3975_v52 }
 0x6ec   : > { %7945 = vmatprep.mubr.msk.bf16.mxu0 %vm3972_vm10, %v10990_v22  ;;  %4402 = vmatpush1.bf16.msra.mxu0 %v4341_v56  ;;  %v13857_v22 = vld [vmem:[#allocation20_spill] sm:$0xff]  ;;  %v4350_v56 = vsel %vm4332_vm14, %v11245_v13, %v11234_v50  ;;  %v4352_v50 = vsel %vm4332_vm14, %v11262_v54, %v11270_v32 }
 0x6ed   : > { %v11410_v23 = vpop.permute.xlu1 %4882  ;;  %4403 = vmatprep.subr.bf16.mxu0 %v4344_v43  ;;  %4818 = vrot.lane.b32.xlu0 %v8650_v20, %s13804_s0  ;;  %v11413_v40 = vpop.permute.xlu0 %4896  ;;  %v4348_v20 = vsel %vm4332_vm14, %v13856_v2, %v13855_v39  ;;  %v13858_v43 = vld [vmem:[#allocation13_spill] sm:$0xff]  ;;  %v4354_v39 = vsel %vm4332_vm14, %v11285_v53, %v11293_v42  ;;  %v13862_v2 = vld [vmem:[#allocation11_spill] sm:$0xff] }
 0x6ee   : > { %v8473_v18 = vunpack.i.l.bf16 %v13858_v43 }
 0x6ef   : > { %5183 = vrot.lane.b32.xlu1 %v11004_v57, %s13805_s27 }
 0x6f0   : > { %4404 = vmatpush1.bf16.msra.mxu0 %v4343_v10  ;;  %v4349_v26 = vsel %vm4332_vm14, %v8473_v18, %v11245_v13  ;;  %v13861_v13 = vld [vmem:[#allocation21_spill] sm:$0xff]  ;;  %v8479_v18 = vunpack.i.h.bf16 %v13862_v2 }
 0x6f1   : > { %v11429_v55 = vpop.permute.xlu1 %4880  ;;  %4405 = vmatprep.subr.bf16.mxu0 %v4346_v8  ;;  %4936 = vrot.lane.b32.xlu0 %v11048_v12, %s8825_s25  ;;  %v11433_v0 = vpop.permute.xlu0 %4900  ;;  %v8474_v8 = vunpack.i.h.bf16 %v13858_v43 }
 0x6f3   : > { %4816 = vrot.lane.b32.xlu1 %v8652_v60, %s13804_s0  ;;  %4214 = vmatmul.mubr.bf16.gmra.mrb[44].mxu0 %v3976_v21  ;;  %v4351_v32 = vsel %vm4332_vm14, %v8474_v8, %v11262_v54  ;;  %v13865_v8 = vld [vmem:[#allocation16_spill] sm:$0xff] }
 0x6f4   : > { %4406 = vmatpush1.bf16.msra.mxu0 %v4345_v44  ;;  %7954 = vmatprep.mubr.msk.bf16.mxu0 %vm3972_vm10, %v8658_v34  ;;  %v8653_v44 = vld [vmem:[%s13653_s14 + $0xe8] ss:$36 sps:$4 sm:$0xff]  }
 0x6f5   : > { %v11446_v52 = vpop.permute.xlu1 %4890  ;;  %4407 = vmatprep.subr.bf16.mxu0 %v4348_v20  ;;  %5189 = vrot.lane.b32.xlu0 %v13857_v22, %s13805_s27  ;;  %v11450_v27 = vpop.permute.xlu0 %4898  ;;  %v8478_v20 = vunpack.i.l.bf16 %v13862_v2  ;;  %v13868_v2 = vld [vmem:[#allocation15_spill] sm:$0xff] }
 0x6f7   : > { %5181 = vrot.lane.b32.xlu1 %v11012_v4, %s13805_s27  ;;  %v4353_v54 = vsel %vm4332_vm14, %v8478_v20, %v11285_v53  ;;  %v4355_v53 = vsel %vm4332_vm14, %v8479_v18, %v11340_v35  ;;  %v8484_v18 = vunpack.i.h.bf16 %v13865_v8 }
 0x6f8   : > { %4408 = vmatpush1.bf16.msra.mxu0 %v4347_v16 }
 0x6f9   : > { %v11460_v10 = vpop.permute.xlu1 %4894  ;;  %4409 = vmatprep.subr.bf16.mxu0 %v4350_v56  ;;  %5187 = vrot.lane.b32.xlu0 %v11026_v3, %s13805_s27  ;;  %v11464_v60 = vpop.permute.xlu0 %4908 }
 0x6fb   : > { %5191 = vrot.lane.b32.xlu1 %v11214_v29, %s13805_s27 }
 0x6fc   : > { %4410 = vmatpush1.bf16.msra.mxu0 %v4349_v26  ;;  %v13863_v26 = vld [vmem:[#allocation23_spill] sm:$0xff] }
 0x6fd   : > { %v11474_v34 = vpop.permute.xlu1 %4892  ;;  %4411 = vmatprep.subr.bf16.mxu0 %v4352_v50  ;;  %5197 = vrot.lane.b32.xlu0 %v13859_v37, %s13805_s27  ;;  %v11478_v21 = vpop.permute.xlu0 %4912 }
 0x6fe   : > { %13860 = vst [vmem:[#allocation6_spill] sm:$0xff] %v11478_v21 }
 0x6ff   : > { %5195 = vrot.lane.b32.xlu1 %v13861_v13, %s13805_s27 }
 0x700   : > { %4412 = vmatpush1.bf16.msra.mxu0 %v4351_v32  ;;  %v13866_v32 = vld [vmem:[#allocation22_spill] sm:$0xff] }
 0x701   : > { %v11494_v16 = vpop.permute.xlu1 %4902  ;;  %4413 = vmatprep.subr.bf16.mxu0 %v4354_v39  ;;  %4822 = vrot.lane.b32.xlu0 %v8655_v15, %s13804_s0  ;;  %v4331_v56 = vpop.permute.xlu0 %4330  ;;  %v8483_v15 = vunpack.i.l.bf16 %v13865_v8  ;;  %v13867_v39 = vld [vmem:[#allocation9_spill] sm:$0xff] }
 0x702   : > { %v4356_v43 = vsel %vm4332_vm14, %v11340_v35, %v4331_v56  ;;  %v4584_v20 = vsel %vm4582_vm15, %v13868_v2, %v13867_v39  ;;  %v8659_v56 = vld [vmem:[%s13653_s14 + $0x4c] ss:$36 sps:$4 sm:$0xff]  }
 0x703   : > { %4820 = vrot.lane.b32.xlu1 %v8653_v44, %s13804_s0  ;;  %v8656_v44 = vld [vmem:[%s13653_s14] ss:$36 sps:$4 sm:$0xff]   ;;  %v13871_v39 = vld [vmem:[#allocation17_spill] sm:$0xff] }
 0x704   : > { %4414 = vmatpush1.bf16.msra.mxu0 %v4353_v54 }
 0x705   : > { %v11503_v42 = vpop.permute.xlu1 %4906  ;;  %5199 = vrot.lane.b32.xlu0 %v13863_v26, %s13805_s27  ;;  %4415 = vmatprep.subr.bf16.mxu0 %v4356_v43  ;;  %v11507_v50 = vpop.permute.xlu0 %4910  ;;  %v13869_v43 = vld [vmem:[#allocation24_spill] sm:$0xff] }
 0x706   : > { %13864 = vst [vmem:[#allocation8_spill] sm:$0xff] %v11507_v50  ;;  %v13872_v50 = vld [vmem:[#allocation7_spill] sm:$0xff] }
 0x707   : > { %5193 = vrot.lane.b32.xlu1 %v13866_v32, %s13805_s27  ;;  %v4586_v21 = vsel %vm4582_vm15, %v13872_v50, %v13871_v39 }
 0x708   : > { %4416 = vmatpush1.bf16.msra.mxu0 %v4355_v53  ;;  %v4583_v53 = vsel %vm4582_vm15, %v8483_v15, %v13868_v2  ;;  %v4585_v15 = vsel %vm4582_vm15, %v8484_v18, %v13872_v50  ;;  %v8661_v2 = vld [vmem:[%s13653_s14 + $0x48] ss:$36 sps:$4 sm:$0xff]  }
 0x709   : > { %v11523_v54 = vpop.permute.xlu1 %4904  ;;  %4643 = vmatprep.subr.bf16.mxu0 %v4584_v20  ;;  %5422 = vrot.lane.b32.xlu0 %v13869_v43, %s8827_s24  ;;  %v11527_v35 = vpop.permute.xlu0 %4920  ;;  %v13874_v43 = vld [vmem:[#allocation12_spill] sm:$0xff] }
 0x70a   : > { %13870 = vst [vmem:[#allocation19_spill] sm:$0xff] %v11527_v35  ;;  %v13875_v35 = vld [vmem:[#allocation25_spill] sm:$0xff] }
 0x70b   : > { %5203 = vrot.lane.b32.xlu1 %v11237_v30, %s13805_s27  ;;  %4426 = vmatmul.mubr.bf16.vlgmr.msra.gmra.mrb[32].mxu0 %v8656_v44  ;;  %v8488_v44 = vunpack.i.l.bf16 %v13874_v43 }
 0x70c   : > { %4644 = vmatpush1.bf16.msra.mxu0 %v4583_v53  ;;  %7955 = vmatprep.mubr.msk.bf16.mxu0 %vm3972_vm10, %v8659_v56  ;;  %v13876_v56 = vld [vmem:[#allocation18_spill] sm:$0xff] }
 0x70d   : > { %v11538_v20 = vpop.permute.xlu1 %4914  ;;  %4645 = vmatprep.subr.bf16.mxu0 %v4586_v21  ;;  %5426 = vrot.lane.b32.xlu0 %v11080_v36, %s8827_s24  ;;  %v11542_v8 = vpop.permute.xlu0 %4924  ;;  %v13877_v21 = vld [vmem:[#allocation14_spill] sm:$0xff] }
 0x70e   : > { %13873 = vst [vmem:[#allocation10_spill] sm:$0xff] %v11542_v8  ;;  %v4588_v53 = vsel %vm4582_vm15, %v13877_v21, %v13876_v56  ;;  %v8662_v36 = vld [vmem:[%s13653_s14 + $0x94] ss:$36 sps:$4 sm:$0xff]   ;;  %v4587_v18 = vsel %vm4582_vm15, %v8488_v44, %v13877_v21  ;;  %v13883_v21 = vld [vmem:[#allocation32_spill] sm:$0xff] }
 0x70f   : > { %5420 = vrot.lane.b32.xlu1 %v13875_v35, %s8827_s24  ;;  %v13879_v35 = vld [vmem:[#allocation26_spill] sm:$0xff]  ;;  %v13881_v56 = vld [vmem:[#allocation31_spill] sm:$0xff] }
 0x710   : > { %4646 = vmatpush1.bf16.msra.mxu0 %v4585_v15  ;;  %v13880_v15 = vld [vmem:[#allocation30_spill] sm:$0xff] }
 0x711   : > { %v11558_v39 = vpop.permute.xlu1 %4918  ;;  %4647 = vmatprep.subr.bf16.mxu0 %v4588_v53  ;;  %5424 = vrot.lane.b32.xlu0 %v13879_v35, %s8827_s24  ;;  %v11562_v50 = vpop.permute.xlu0 %4922  ;;  %v4590_v8 = vsel %vm4582_vm15, %v13881_v56, %v13880_v15  ;;  %v8489_v53 = vunpack.i.h.bf16 %v13874_v43  ;;  %v13882_v35 = vld [vmem:[#allocation35_spill] sm:$0xff]  ;;  %v8664_v43 = vld [vmem:[%s13653_s14 + $0x90] ss:$36 sps:$4 sm:$0xff]  }
 0x712   : > { %13878 = vst [vmem:[#allocation20_spill] sm:$0xff] %v11558_v39  ;;  %v8493_v44 = vunpack.i.l.bf16 %v13882_v35  ;;  %v8494_v15 = vunpack.i.h.bf16 %v13882_v35 }
 0x713   : > { %5418 = vrot.lane.b32.xlu1 %v11098_v41, %s8827_s24  ;;  %4436 = vmatmul.mubr.bf16.gmra.mrb[36].mxu0 %v8661_v2  ;;  %v4589_v2 = vsel %vm4582_vm15, %v8489_v53, %v13881_v56  ;;  %v13886_v53 = vld [vmem:[#allocation37_spill] sm:$0xff] }
 0x714   : > { %4648 = vmatpush1.bf16.msra.mxu0 %v4587_v18  ;;  %7956 = vmatprep.mubr.msk.bf16.mxu0 %vm3972_vm10, %v8662_v36 }
 0x715   : > { %v11573_v39 = vpop.permute.xlu1 %4916  ;;  %4649 = vmatprep.subr.bf16.mxu0 %v4590_v8  ;;  %5434 = vrot.lane.b32.xlu0 %v11092_v5, %s8827_s24  ;;  %v11577_v41 = vpop.permute.xlu0 %4932  ;;  %v13884_v8 = vld [vmem:[#allocation33_spill] sm:$0xff]  ;;  %v8665_v5 = vld [vmem:[%s13653_s14 + $0xdc] ss:$36 sps:$4 sm:$0xff]  }
 0x716   : > { %v4592_v36 = vsel %vm4582_vm15, %v13884_v8, %v13883_v21  ;;  %v4591_v56 = vsel %vm4582_vm15, %v8493_v44, %v13884_v8  ;;  %v13891_v44 = vld [vmem:[#allocation28_spill] sm:$0xff]  ;;  %v8667_v8 = vld [vmem:[%s13653_s14 + $0xd8] ss:$36 sps:$4 sm:$0xff]  }
 0x717   : > { %5428 = vrot.lane.b32.xlu1 %v11106_v17, %s8827_s24 }
 0x718   : > { %4650 = vmatpush1.bf16.msra.mxu0 %v4589_v2  ;;  %v13887_v2 = vld [vmem:[#allocation34_spill] sm:$0xff] }
 0x719   : > { %v11593_v18 = vpop.permute.xlu1 %4926  ;;  %4651 = vmatprep.subr.bf16.mxu0 %v4592_v36  ;;  %5438 = vrot.lane.b32.xlu0 %v11100_v33, %s8827_s24  ;;  %v11597_v17 = vpop.permute.xlu0 %4934  ;;  %v4594_v21 = vsel %vm4582_vm15, %v13887_v2, %v13886_v53  ;;  %v13888_v33 = vld [vmem:[#allocation27_spill] sm:$0xff] }
 0x71a   : > { %13885 = vst [vmem:[#allocation13_spill] sm:$0xff] %v11597_v17 }
 0x71b   : > { %5432 = vrot.lane.b32.xlu1 %v11114_v14, %s8827_s24  ;;  %4446 = vmatmul.mubr.bf16.gmra.mrb[40].mxu0 %v8664_v43  ;;  %v13890_v14 = vld [vmem:[#allocation38_spill] sm:$0xff]  ;;  %v4593_v43 = vsel %vm4582_vm15, %v8494_v15, %v13887_v2 }
 0x71c   : > { %4652 = vmatpush1.bf16.msra.mxu0 %v4591_v56  ;;  %7957 = vmatprep.mubr.msk.bf16.mxu0 %vm3972_vm10, %v8665_v5  ;;  %v8498_v17 = vunpack.i.l.bf16 %v13890_v14  ;;  %v13892_v5 = vld [vmem:[#allocation39_spill] sm:$0xff]  ;;  %v13893_v56 = vld [vmem:[#allocation36_spill] sm:$0xff]  ;;  %v8499_v2 = vunpack.i.h.bf16 %v13890_v14 }
 0x71d   : > { %v11608_v36 = vpop.permute.xlu1 %4930  ;;  %4653 = vmatprep.subr.bf16.mxu0 %v4594_v21  ;;  %5436 = vrot.lane.b32.xlu0 %v13888_v33, %s8827_s24  ;;  %v11612_v35 = vpop.permute.xlu0 %5137  ;;  %v4596_v53 = vsel %vm4582_vm15, %v13893_v56, %v13892_v5  ;;  %v8670_v21 = vld [vmem:[%s13653_s14 + $0x10] ss:$36 sps:$4 sm:$0xff]   ;;  %v13895_v5 = vld [vmem:[#allocation43_spill] sm:$0xff] }
 0x71e   : > { %13889 = vst [vmem:[#allocation41_spill] sm:$0xff] %v11612_v35 }
 0x71f   : > { %5430 = vrot.lane.b32.xlu1 %v13891_v44, %s8827_s24  ;;  %v4595_v44 = vsel %vm4582_vm15, %v8498_v17, %v13893_v56  ;;  %v13897_v17 = vld [vmem:[#allocation45_spill] sm:$0xff] }
 0x720   : > { %4654 = vmatpush1.bf16.msra.mxu0 %v4593_v43  ;;  %v13894_v43 = vld [vmem:[#allocation40_spill] sm:$0xff] }
 0x721   : > { %v11628_v33 = vpop.permute.xlu1 %4928  ;;  %4655 = vmatprep.subr.bf16.mxu0 %v4596_v53  ;;  %5201 = vrot.lane.b32.xlu0 %v11048_v12, %s13805_s27  ;;  %v11632_v15 = vpop.permute.xlu0 %4810  ;;  %v4598_v35 = vsel %vm4582_vm15, %v13895_v5, %v13894_v43 }
 0x723   : > { %5440 = vrot.lane.b32.xlu1 %v11130_v31, %s8827_s24  ;;  %4456 = vmatmul.mubr.bf16.gmra.mrb[44].mxu0 %v8667_v8  ;;  %v4597_v31 = vsel %vm4582_vm15, %v8499_v2, %v13895_v5  ;;  %v13898_v8 = vld [vmem:[#allocation46_spill] sm:$0xff]  ;;  %v13901_v2 = vld [vmem:[#allocation48_spill] sm:$0xff]  ;;  %v13902_v5 = vld [vmem:[#allocation47_spill] sm:$0xff] }
 0x724   : > { %4656 = vmatpush1.bf16.msra.mxu0 %v4595_v44  ;;  %7966 = vmatprep.mubr.msk.bf16.mxu0 %vm3972_vm10, %v8670_v21  ;;  %v4600_v56 = vsel %vm4582_vm15, %v13898_v8, %v13897_v17  ;;  %v13899_v21 = vld [vmem:[#allocation44_spill] sm:$0xff] }
 0x725   : > { %v11643_v53 = vpop.permute.xlu1 %4938  ;;  %4657 = vmatprep.subr.bf16.mxu0 %v4598_v35  ;;  %5446 = vrot.lane.b32.xlu0 %v11116_v58, %s8827_s24  ;;  %v8503_v44 = vunpack.i.l.bf16 %v13899_v21  ;;  %v13900_v58 = vld [vmem:[#allocation29_spill] sm:$0xff]  ;;  %v8504_v17 = vunpack.i.h.bf16 %v13899_v21  ;;  %v13905_v21 = vld [vmem:[#allocation42_spill] sm:$0xff] }
 0x726   : > { %v11647_v14 = vpop.permute.xlu0 %5141 }
 0x727   : > { %13896 = vst [vmem:[#allocation21_spill] sm:$0xff] %v11647_v14  ;;  %5444 = vrot.lane.b32.xlu1 %v11140_v9, %s8827_s24  ;;  %v4599_v9 = vsel %vm4582_vm15, %v8503_v44, %v13898_v8  ;;  %v13903_v8 = vld [vmem:[#allocation50_spill] sm:$0xff]  ;;  %v13904_v44 = vld [vmem:[#allocation49_spill] sm:$0xff] }
 0x728   : > { %4658 = vmatpush1.bf16.msra.mxu0 %v4597_v31  ;;  %v4602_v31 = vsel %vm4582_vm15, %v13902_v5, %v13901_v2 }
 0x729   : > { %v11657_v43 = vpop.permute.xlu1 %5135  ;;  %4659 = vmatprep.subr.bf16.mxu0 %v4600_v56  ;;  %5450 = vrot.lane.b32.xlu0 %v13900_v58, %s8827_s24  ;;  %v4604_v58 = vsel %vm4582_vm15, %v13904_v44, %v13903_v8  ;;  %v8668_v8 = vld [vmem:[%s13653_s14 + $0xc] ss:$36 sps:$4 sm:$0xff]  }
 0x72a   : > { %v11661_v35 = vpop.permute.xlu0 %5139 }
 0x72b   : > { %5442 = vrot.lane.b32.xlu1 %v11152_v19, %s8827_s24  ;;  %v4601_v19 = vsel %vm4582_vm15, %v8504_v17, %v13902_v5 }
 0x72c   : > { %4660 = vmatpush1.bf16.msra.mxu0 %v4599_v9  ;;  %v8508_v9 = vunpack.i.l.bf16 %v13905_v21 }
 0x72d   : > { %v11671_v14 = vpop.permute.xlu1 %4808  ;;  %4661 = vmatprep.subr.bf16.mxu0 %v4602_v31  ;;  %5448 = vrot.lane.b32.xlu0 %v11132_v25, %s8827_s24  ;;  %v8509_v31 = vunpack.i.h.bf16 %v13905_v21 }
 0x72e   : > { %v11675_v56 = vpop.permute.xlu0 %5149 }
 0x72f   : > { %5452 = vrot.lane.b32.xlu1 %v11158_v28, %s8827_s24  ;;  %v4603_v28 = vsel %vm4582_vm15, %v8508_v9, %v13904_v44  ;;  %v4941_v44 = vsel %vm4332_vm14, %v11320_v47, %v11308_v45  ;;  %v4943_v45 = vsel %vm4332_vm14, %v11322_v49, %v11388_v63 }
 0x730   : > { %4662 = vmatpush1.bf16.msra.mxu0 %v4601_v19  ;;  %v8788_v19 = vld [vmem:[#allocation2 + $0x128] sm:$0xff] }
 0x731   : > { %v11685_v2 = vpop.permute.xlu1 %5133  ;;  %4663 = vmatprep.subr.bf16.mxu0 %v4604_v58  ;;  %5458 = vrot.lane.b32.xlu0 %v11142_v11, %s8827_s24  ;;  %v8671_v58 = vld [vmem:[%s13653_s14 + $0x58] ss:$36 sps:$4 sm:$0xff]  }
 0x732   : > { %v4581_v25 = vpop.permute.xlu0 %4580 }
 0x733   : > { %5456 = vrot.lane.b32.xlu1 %v11168_v46, %s8827_s24  ;;  %v4606_v5 = vsel %vm4582_vm15, %v11356_v1, %v4581_v25  ;;  %v4605_v46 = vsel %vm4582_vm15, %v8509_v31, %v11356_v1  ;;  %v4940_v1 = vsel %vm4332_vm14, %v11374_v62, %v11320_v47  ;;  %v8673_v47 = vld [vmem:[%s13653_s14 + $0x54] ss:$36 sps:$4 sm:$0xff]   ;;  %v4945_v62 = vsel %vm4332_vm14, %v11410_v23, %v11360_v59  ;;  %v13909_v31 = vld [vmem:[#allocation20_spill] sm:$0xff] }
 0x734   : > { %4664 = vmatpush1.bf16.msra.mxu0 %v4603_v28  ;;  %v8683_v28 = vld [vmem:[%s13653_s14 + $0x64] ss:$36 sps:$4 sm:$0xff]  }
 0x735   : > { %v11696_v17 = vpop.permute.xlu1 %5143  ;;  %5462 = vrot.lane.b32.xlu0 %v8788_v19, %s8827_s24  ;;  %4665 = vmatprep.subr.bf16.mxu0 %v4606_v5  ;;  %v13908_v5 = vld [vmem:[#allocation19_spill] sm:$0xff] }
 0x736   : > { %v11699_v11 = vpop.permute.xlu0 %5153  ;;  %v4957_v19 = vsel %vm4332_vm14, %v13909_v31, %v13908_v5  ;;  %v5706_v5 = vld [vmem:[%s13655_s16 + $0x18] sm:$0xff] }
 0x737   : > { %5454 = vrot.lane.b32.xlu1 %v11180_v24, %s8827_s24 }
 0x738   : > { %4666 = vmatpush1.bf16.msra.mxu0 %v4605_v46 }
 0x739   : > { %v11714_v21 = vpop.permute.xlu1 %5147  ;;  %5000 = vmatprep.subr.bf16.mxu0 %v4941_v44  ;;  %5460 = vrot.lane.b32.xlu0 %v11170_v61, %s8827_s24  ;;  %v4956_v44 = vsel %vm4332_vm14, %v11573_v39, %v13909_v31  ;;  %v8691_v39 = vld [vmem:[%s13653_s14 + $0xf8] ss:$36 sps:$4 sm:$0xff]  }
 0x73a   : > { %v11718_v24 = vpop.permute.xlu0 %5151 }
 0x73b   : > { %5464 = vrot.lane.b32.xlu1 %v11188_v6, %s8827_s24  ;;  %4676 = vmatmul.mubr.bf16.vlgmr.msra.gmra.mrb[32].mxu0 %v8668_v8  ;;  %v4942_v6 = vsel %vm4332_vm14, %v11343_v51, %v11322_v49  ;;  %v4944_v49 = vsel %vm4332_vm14, %v11429_v55, %v11410_v23  ;;  %v4947_v51 = vsel %vm4332_vm14, %v11378_v48, %v11446_v52  ;;  %v8676_v23 = vld [vmem:[%s13653_s14 + $0x9c] ss:$36 sps:$4 sm:$0xff]   ;;  %v8688_v8 = vld [vmem:[%s13653_s14 + $0xb0] ss:$36 sps:$4 sm:$0xff]  }
 0x73c   : > { %5001 = vmatpush1.bf16.msra.mxu0 %v4940_v1  ;;  %7967 = vmatprep.mubr.msk.bf16.mxu0 %vm3972_vm10, %v8671_v58  ;;  %v4949_v55 = vsel %vm4332_vm14, %v11460_v10, %v11413_v40  ;;  %v8686_v58 = vld [vmem:[%s13653_s14 + $0xac] ss:$36 sps:$4 sm:$0xff]  }
 0x73d   : > { %v11729_v9 = vpop.permute.xlu1 %5145  ;;  %5002 = vmatprep.subr.bf16.mxu0 %v4943_v45  ;;  %5470 = vrot.lane.b32.xlu0 %v11182_v38, %s8827_s24  ;;  %v8674_v38 = vld [vmem:[%s13653_s14 + $0xa0] ss:$36 sps:$4 sm:$0xff]   ;;  %v13910_v45 = vld [vmem:[#allocation10_spill] sm:$0xff] }
 0x73e   : > { %v11733_v61 = vpop.permute.xlu0 %5161  ;;  %v5209_v31 = vsel %vm4089_vm4, %v11729_v9, %v11714_v21  ;;  %v5211_v9 = vsel %vm4089_vm4, %v11718_v24, %v11699_v11 }
 0x73f   : > { %5468 = vrot.lane.b32.xlu1 %v11004_v57, %s8827_s24 }
 0x740   : > { %5003 = vmatpush1.bf16.msra.mxu0 %v4942_v6  ;;  %v4959_v6 = vsel %vm4332_vm14, %v13910_v45, %v11593_v18 }
 0x741   : > { %v11749_v63 = vpop.permute.xlu1 %5155  ;;  %5004 = vmatprep.subr.bf16.mxu0 %v4945_v62  ;;  %5474 = vrot.lane.b32.xlu0 %v13857_v22, %s8827_s24  ;;  %v4958_v62 = vsel %vm4332_vm14, %v11562_v50, %v13910_v45  ;;  %v5640_v50 = vld [vmem:[%s13654_s15 + $0x8] sm:$0xff] }
 0x742   : > { %v11753_v57 = vpop.permute.xlu0 %5165 }
 0x743   : > { %5466 = vrot.lane.b32.xlu1 %v11012_v4, %s8827_s24  ;;  %4686 = vmatmul.mubr.bf16.gmra.mrb[36].mxu0 %v8673_v47  ;;  %v4946_v4 = vsel %vm4332_vm14, %v11392_v7, %v11378_v48  ;;  %v4948_v48 = vsel %vm4332_vm14, %v11474_v34, %v11460_v10  ;;  %v4951_v7 = vsel %vm4332_vm14, %v11433_v0, %v11494_v16 }
 0x744   : > { %5005 = vmatpush1.bf16.msra.mxu0 %v4944_v49  ;;  %7968 = vmatprep.mubr.msk.bf16.mxu0 %vm3972_vm10, %v8674_v38  ;;  %v4950_v10 = vsel %vm4332_vm14, %v11450_v27, %v11433_v0  ;;  %v8682_v0 = vld [vmem:[%s13653_s14 + $0x20] ss:$36 sps:$4 sm:$0xff]   ;;  %v4952_v27 = vsel %vm4332_vm14, %v11523_v54, %v11503_v42  ;;  %v8689_v38 = vld [vmem:[%s13653_s14 + $0xf4] ss:$36 sps:$4 sm:$0xff]   ;;  %v4961_v49 = vsel %vm4332_vm14, %v11608_v36, %v11577_v41 }
 0x745   : > { %v11764_v59 = vpop.permute.xlu1 %5159  ;;  %5006 = vmatprep.subr.bf16.mxu0 %v4947_v51  ;;  %5472 = vrot.lane.b32.xlu0 %v11026_v3, %s8827_s24  ;;  %v8677_v3 = vld [vmem:[%s13653_s14 + $0xe8] ss:$36 sps:$4 sm:$0xff]   ;;  %v5639_v41 = vld [vmem:[%s13654_s15] sm:$0xff] }
 0x746   : > { %v11768_v22 = vpop.permute.xlu0 %5163 }
 0x747   : > { %5476 = vrot.lane.b32.xlu1 %v11214_v29, %s8827_s24 }
 0x748   : > { %5007 = vmatpush1.bf16.msra.mxu0 %v4946_v4  ;;  %v4960_v4 = vsel %vm4332_vm14, %v11628_v33, %v11608_v36  ;;  %v13911_v36 = vld [vmem:[#allocation13_spill] sm:$0xff] }
 0x749   : > { %v11784_v52 = vpop.permute.xlu1 %5157  ;;  %5008 = vmatprep.subr.bf16.mxu0 %v4949_v55  ;;  %5482 = vrot.lane.b32.xlu0 %v13859_v37, %s8827_s24  ;;  %v8679_v37 = vld [vmem:[%s13653_s14 + $0xe4] ss:$36 sps:$4 sm:$0xff]  }
 0x74a   : > { %v11788_v29 = vpop.permute.xlu0 %5173  ;;  %v5213_v24 = vsel %vm4089_vm4, %v11784_v52, %v11764_v59  ;;  %v5215_v52 = vsel %vm4089_vm4, %v11768_v22, %v11753_v57  ;;  %v5646_v22 = vld [vmem:[%s13654_s15 + $0x38] sm:$0xff] }
 0x74b   : > { %5480 = vrot.lane.b32.xlu1 %v13861_v13, %s8827_s24  ;;  %4696 = vmatmul.mubr.bf16.gmra.mrb[40].mxu0 %v8676_v23  ;;  %v4953_v13 = vsel %vm4332_vm14, %v11503_v42, %v11464_v60  ;;  %v8680_v60 = vld [vmem:[%s13653_s14 + $0x1c] ss:$36 sps:$4 sm:$0xff]  }
 0x74c   : > { %5009 = vmatpush1.bf16.msra.mxu0 %v4948_v48  ;;  %7969 = vmatprep.mubr.msk.bf16.mxu0 %vm3972_vm10, %v8677_v3  ;;  %v13907_v42 = vld [vmem:[#allocation8_spill] sm:$0xff]  ;;  %v5704_v48 = vld [vmem:[%s13655_s16 + $0x8] sm:$0xff] }
 0x74d   : > { %v11799_v40 = vpop.permute.xlu1 %5167  ;;  %5010 = vmatprep.subr.bf16.mxu0 %v4951_v7  ;;  %5484 = vrot.lane.b32.xlu0 %v13863_v26, %s8827_s24 }
 0x74f   : > { %5478 = vrot.lane.b32.xlu1 %v13866_v32, %s8827_s24  ;;  %v11808_v34 = vpop.permute.xlu0 %4814 }
 0x750   : > { %5011 = vmatpush1.bf16.msra.mxu0 %v4950_v10  ;;  %v5703_v10 = vld [vmem:[%s13655_s16] sm:$0xff] }
 0x751   : > { %v11816_v16 = vpop.permute.xlu1 %5171  ;;  %5012 = vmatprep.subr.bf16.mxu0 %v4953_v13  ;;  %5486 = vrot.lane.b32.xlu0 %v11048_v12, %s8827_s24  ;;  %v13906_v12 = vld [vmem:[#allocation6_spill] sm:$0xff] }
 0x752   : > { %v4955_v32 = vsel %vm4332_vm14, %v13906_v12, %v11538_v20  ;;  %v4954_v54 = vsel %vm4332_vm14, %v13907_v42, %v13906_v12 }
 0x753   : > { %5488 = vrot.lane.b32.xlu1 %v11237_v30, %s8827_s24  ;;  %4706 = vmatmul.mubr.bf16.gmra.mrb[44].mxu0 %v8679_v37  ;;  %v11831_v26 = vpop.permute.xlu0 %5177  ;;  %v8685_v30 = vld [vmem:[%s13653_s14 + $0x68] ss:$36 sps:$4 sm:$0xff]   ;;  %s8828_s24 = smov 112  }
 0x754   : > { %5013 = vmatpush1.bf16.msra.mxu0 %v4952_v27  ;;  %7978 = vmatprep.mubr.msk.bf16.mxu0 %vm3972_vm10, %v11632_v15  ;;  %v13912_v37 = vld [vmem:[#allocation41_spill] sm:$0xff]  ;;  %v5642_v27 = vld [vmem:[%s13654_s15 + $0x18] sm:$0xff] }
 0x755   : > { %v11838_v25 = vpop.permute.xlu1 %4812  ;;  %5014 = vmatprep.subr.bf16.mxu0 %v4955_v32  ;;  %5396 = vrot.lane.b32.xlu0 %v8682_v0, %s13804_s0  ;;  %v4824_v0 = vsel %vm3972_vm10, %v11671_v14, %v11632_v15  ;;  %v5641_v15 = vld [vmem:[%s13654_s15 + $0x10] sm:$0xff]  ;;  %v13913_v14 = vld [vmem:[#allocation21_spill] sm:$0xff] }
 0x756   : > { %v5208_v32 = vsel %vm4089_vm4, %v13913_v14, %v11696_v17  ;;  %v5783_v17 = vld [vmem:[%s13656_s17] sm:$0xff] }
 0x757   : > { %5394 = vrot.lane.b32.xlu1 %v8680_v60, %s13804_s0  ;;  %v11851_v20 = vpop.permute.xlu0 %5175  ;;  %v5205_v60 = vsel %vm4089_vm4, %v11685_v2, %v11657_v43  ;;  %v5207_v2 = vsel %vm4089_vm4, %v11661_v35, %v13913_v14  ;;  %v4825_v35 = vsel %vm3972_vm10, %v11838_v25, %v11808_v34 }
 0x758   : > { %5015 = vmatpush1.bf16.msra.mxu0 %v4954_v54  ;;  %v5210_v54 = vsel %vm4089_vm4, %v11714_v21, %v11675_v56  ;;  %v5705_v56 = vld [vmem:[%s13655_s16 + $0x10] sm:$0xff]  ;;  %v5644_v21 = vld [vmem:[%s13654_s15 + $0x28] sm:$0xff] }
 0x759   : > { %v11856_v46 = vpop.permute.xlu1 %5169  ;;  %5016 = vmatprep.subr.bf16.mxu0 %v4957_v19  ;;  %5400 = vrot.lane.b32.xlu0 %v8685_v30, %s13804_s0 }
 0x75b   : > { %5398 = vrot.lane.b32.xlu1 %v8683_v28, %s13804_s0  ;;  %v11869_v1 = vpop.permute.xlu0 %5185 }
 0x75c   : > { %5017 = vmatpush1.bf16.msra.mxu0 %v4956_v44  ;;  %v5643_v44 = vld [vmem:[%s13654_s15 + $0x20] sm:$0xff] }
 0x75d   : > { %v11874_v47 = vpop.permute.xlu1 %5179  ;;  %5018 = vmatprep.subr.bf16.mxu0 %v4959_v6  ;;  %5404 = vrot.lane.b32.xlu0 %v8688_v8, %s13804_s0 }
 0x75f   : > { %5402 = vrot.lane.b32.xlu1 %v8686_v58, %s13804_s0  ;;  %v11887_v18 = vpop.permute.xlu0 %4818 }
 0x760   : > { %5019 = vmatpush1.bf16.msra.mxu0 %v4958_v62 }
 0x761   : > { %v11892_v51 = vpop.permute.xlu1 %5183  ;;  %5020 = vmatprep.subr.bf16.mxu0 %v4961_v49  ;;  %5408 = vrot.lane.b32.xlu0 %v8691_v39, %s13804_s0  ;;  %v5216_v39 = vsel %vm4089_vm4, %v11753_v57, %v11799_v40  ;;  %v5707_v40 = vld [vmem:[%s13655_s16 + $0x20] sm:$0xff] }
 0x762   : > { %v8694_v49 = vld [vmem:[%s13653_s14 + $0x1c] ss:$36 sps:$4 sm:$0xff]  }
 0x763   : > { %5406 = vrot.lane.b32.xlu1 %v8689_v38, %s13804_s0  ;;  %v4937_v23 = vpop.permute.xlu0 %4936  ;;  %s13596_s0 = scalar_lea.vmem %s13661_s22, %s8057_s4 }
 0x764   : > { %5021 = vmatpush1.bf16.msra.mxu0 %v4960_v4  ;;  %v4963_v55 = vsel %vm4332_vm14, %v4937_v23, %v11643_v53  ;;  %v4962_v33 = vsel %vm4332_vm14, %v13911_v36, %v4937_v23  ;;  %v5206_v53 = vsel %vm4089_vm4, %v11657_v43, %v13912_v37  ;;  %v5784_v43 = vld [vmem:[%s13656_s17 + $0x8] sm:$0xff]  ;;  %v5217_v4 = vsel %vm4089_vm4, %v11856_v46, %v11816_v16  ;;  %v5645_v23 = vld [vmem:[%s13654_s15 + $0x30] sm:$0xff] }
 0x765   : > { %v4817_v3 = vpop.permute.xlu1 %4816  ;;  %5654 = vperm.xlu0 %8332, %v5640_v50   ;;  %5022 = vmatprep.subr.bf16.mxu0 %v4963_v55  ;;  %v5219_v46 = vsel %vm4089_vm4, %v11851_v20, %v11831_v26 }
 0x766   : > { %v4826_v45 = vsel %vm3972_vm10, %v4817_v3, %v11887_v18 }
 0x767   : > { %5649 = vperm.xlu1 %8334, %v5639_v41   ;;  %v11912_v7 = vpop.permute.xlu0 %5189  ;;  %v5220_v41 = vsel %vm4089_vm4, %v11831_v26, %v11874_v47  ;;  %v5787_v47 = vld [vmem:[%s13656_s17 + $0x20] sm:$0xff] }
 0x768   : > { %5023 = vmatpush1.bf16.msra.mxu0 %v4962_v33  ;;  %v5710_v33 = vld [vmem:[%s13655_s16 + $0x38] sm:$0xff] }
 0x769   : > { %v11920_v13 = vpop.permute.xlu1 %5181  ;;  %5265 = vmatprep.subr.bf16.mxu0 %v5206_v53  ;;  %5718 = vperm.xlu0 %8332, %v5704_v48   ;;  %v5222_v48 = vsel %vm4089_vm4, %v11892_v51, %v11869_v1  ;;  %v5790_v53 = vld [vmem:[%s13656_s17 + $0x38] sm:$0xff] }
 0x76a   : > { %v5221_v26 = vsel %vm4089_vm4, %v11920_v13, %v11892_v51 }
 0x76b   : > { %5713 = vperm.xlu1 %8334, %v5703_v10   ;;  %5033 = vmatmul.mubr.bf16.vlgmr.msra.gmra.mrb[32].mxu0 %v4824_v0  ;;  %v11931_v12 = vpop.permute.xlu0 %5187  ;;  %v5709_v10 = vld [vmem:[%s13655_s16 + $0x30] sm:$0xff] }
 0x76c   : > { %7979 = vmatprep.mubr.msk.bf16.mxu0 %vm3972_vm10, %v11808_v34  ;;  %5266 = vmatpush1.bf16.msra.mxu0 %v5205_v60  ;;  %v5212_v34 = vsel %vm4089_vm4, %v11699_v11, %v11749_v63  ;;  %v5214_v63 = vsel %vm4089_vm4, %v11764_v59, %v11733_v61  ;;  %v5786_v11 = vld [vmem:[%s13656_s17 + $0x18] sm:$0xff]  ;;  %v5785_v61 = vld [vmem:[%s13656_s17 + $0x10] sm:$0xff]  ;;  %v5708_v59 = vld [vmem:[%s13655_s16 + $0x28] sm:$0xff]  ;;  %v5223_v51 = vsel %vm4089_vm4, %v11931_v12, %v11912_v7 }
 0x76d   : > { %v11941_v30 = vpop.permute.xlu1 %5191  ;;  %5267 = vmatprep.subr.bf16.mxu0 %v5208_v32  ;;  %5664 = vperm.xlu0 %8332, %v5642_v27   ;;  %v5789_v0 = vld [vmem:[%s13656_s17 + $0x30] sm:$0xff] }
 0x76e   : > { %v5224_v1 = vsel %vm4089_vm4, %v11912_v7, %v11941_v30  ;;  %v12089_v12 = vld [vmem:[#allocation2 + $0x10] sm:$0xff]  ;;  %v12095_v30 = vld [vmem:[#allocation2 + $0x8] sm:$0xff] }
 0x76f   : > { %5659 = vperm.xlu1 %8334, %v5641_v15   ;;  %v11949_v42 = vpop.permute.xlu0 %5197 }
 0x770   : > { %5268 = vmatpush1.bf16.msra.mxu0 %v5207_v2  ;;  %v12101_v2 = vld [vmem:[#allocation2] sm:$0xff] }
 0x771   : > { %v11957_v28 = vpop.permute.xlu1 %5195  ;;  %5269 = vmatprep.subr.bf16.mxu0 %v5210_v54  ;;  %5798 = vperm.xlu0 %8332, %v5784_v43   ;;  %v8692_v54 = vld [vmem:[%s13653_s14 + $0x18] ss:$36 sps:$4 sm:$0xff]  }
 0x772   : > { %v5226_v27 = vsel %vm4089_vm4, %v11957_v28, %v11949_v42  ;;  %v12105_v42 = vpack.i.bf16 %v12101_v2, %v12101_v2 }
 0x773   : > { %5793 = vperm.xlu1 %8334, %v5783_v17   ;;  %5043 = vmatmul.mubr.bf16.gmra.mrb[36].mxu0 %v4825_v35  ;;  %v4823_v19 = vpop.permute.xlu0 %4822  ;;  %v12113_v35 = vld [vmem:[#allocation2 + $0x30] sm:$0xff] }
 0x774   : > { %7980 = vmatprep.mubr.msk.bf16.mxu0 %vm3972_vm10, %v11887_v18  ;;  %5270 = vmatpush1.bf16.msra.mxu0 %v5209_v31  ;;  %v5218_v18 = vsel %vm4089_vm4, %v11816_v16, %v11788_v29  ;;  %v5788_v16 = vld [vmem:[%s13656_s17 + $0x28] sm:$0xff] }
 0x775   : > { %v4821_v25 = vpop.permute.xlu1 %4820  ;;  %5271 = vmatprep.subr.bf16.mxu0 %v5212_v34  ;;  %5728 = vperm.xlu0 %8332, %v5706_v5   ;;  %v8695_v5 = vld [vmem:[%s13653_s14 + $0x64] ss:$36 sps:$4 sm:$0xff]  }
 0x776   : > { %v4827_v57 = vsel %vm3972_vm10, %v4821_v25, %v4823_v19  ;;  %v12126_v25 = vld [vmem:[#allocation2 + $0x58] sm:$0xff] }
 0x777   : > { %5723 = vperm.xlu1 %8334, %v5705_v56   ;;  %v11982_v8 = vpop.permute.xlu0 %5199 }
 0x778   : > { %5272 = vmatpush1.bf16.msra.mxu0 %v5211_v9  ;;  %v12131_v9 = vld [vmem:[#allocation2 + $0x38] sm:$0xff] }
 0x779   : > { %v11990_v58 = vpop.permute.xlu1 %5193  ;;  %5273 = vmatprep.subr.bf16.mxu0 %v5214_v63  ;;  %5674 = vperm.xlu0 %8332, %v5644_v21   ;;  %v8697_v63 = vld [vmem:[%s13653_s14 + $0x60] ss:$36 sps:$4 sm:$0xff]  }
 0x77a   : > { %v5225_v15 = vsel %vm4089_vm4, %v11990_v58, %v11957_v28 }
 0x77b   : > { %5669 = vperm.xlu1 %8334, %v5643_v44   ;;  %5053 = vmatmul.mubr.bf16.gmra.mrb[40].mxu0 %v4826_v45  ;;  %v12000_v6 = vpop.permute.xlu0 %5422  ;;  %v8698_v45 = vld [vmem:[%s13653_s14 + $0xac] ss:$36 sps:$4 sm:$0xff]  }
 0x77c   : > { %7981 = vmatprep.mubr.msk.bf16.mxu0 %vm3972_vm10, %v4823_v19  ;;  %5274 = vmatpush1.bf16.msra.mxu0 %v5213_v24  ;;  %v12146_v24 = vld [vmem:[#allocation2 + $0x60] sm:$0xff] }
 0x77d   : > { %v12009_v62 = vpop.permute.xlu1 %5203  ;;  %5275 = vmatprep.subr.bf16.mxu0 %v5216_v39  ;;  %5808 = vperm.xlu0 %8332, %v5786_v11  }
 0x77f   : > { %5803 = vperm.xlu1 %8334, %v5785_v61   ;;  %v12017_v38 = vpop.permute.xlu0 %5426 }
 0x780   : > { %5276 = vmatpush1.bf16.msra.mxu0 %v5215_v52 }
 0x781   : > { %v12028_v50 = vpop.permute.xlu1 %5420  ;;  %5277 = vmatprep.subr.bf16.mxu0 %v5218_v18  ;;  %5738 = vperm.xlu0 %8332, %v5708_v59   ;;  %v8701_v18 = vld [vmem:[%s13653_s14 + $0xf4] ss:$36 sps:$4 sm:$0xff]  }
 0x782   : > { %v5491_v28 = vsel %vm4582_vm15, %v12028_v50, %v12000_v6 }
 0x783   : > { %5733 = vperm.xlu1 %8334, %v5707_v40   ;;  %5063 = vmatmul.mubr.bf16.gmra.mrb[44].mxu0 %v4827_v57  ;;  %v12037_v29 = vpop.permute.xlu0 %5424 }
 0x784   : > { %5278 = vmatpush1.bf16.msra.mxu0 %v5217_v4  ;;  %7990 = vmatprep.mubr.msk.bf16.mxu0 %vm3972_vm10, %v8694_v49 }
 0x785   : > { %v5419_v55 = vpop.permute.xlu1 %5418  ;;  %5279 = vmatprep.subr.bf16.mxu0 %v5220_v41  ;;  %5684 = vperm.xlu0 %8332, %v5646_v22   ;;  %v8703_v41 = vld [vmem:[%s13653_s14 + $0xf0] ss:$36 sps:$4 sm:$0xff]  }
 0x786   : > { %v5490_v19 = vsel %vm4582_vm15, %v5419_v55, %v12028_v50 }
 0x787   : > { %5679 = vperm.xlu1 %8334, %v5645_v23   ;;  %v12052_v3 = vpop.permute.xlu0 %5434 }
 0x788   : > { %5280 = vmatpush1.bf16.msra.mxu0 %v5219_v46 }
 0x789   : > { %v5429_v36 = vpop.permute.xlu1 %5428  ;;  %5281 = vmatprep.subr.bf16.mxu0 %v5222_v48  ;;  %5818 = vperm.xlu0 %8332, %v5788_v16  }
 0x78a   : > { %v5493_v34 = vsel %vm4582_vm15, %v12017_v38, %v5429_v36 }
 0x78b   : > { %5813 = vperm.xlu1 %8334, %v5787_v47   ;;  %v12066_v20 = vpop.permute.xlu0 %5438 }
 0x78c   : > { %5282 = vmatpush1.bf16.msra.mxu0 %v5221_v26 }
 0x78d   : > { %v5433_v37 = vpop.permute.xlu1 %5432  ;;  %5283 = vmatprep.subr.bf16.mxu0 %v5224_v1  ;;  %5748 = vperm.xlu0 %8332, %v5710_v33  }
 0x78e   : > { %v5495_v58 = vsel %vm4582_vm15, %v5433_v37, %v12052_v3 }
 0x78f   : > { %5743 = vperm.xlu1 %8334, %v5709_v10   ;;  %v5437_v13 = vpop.permute.xlu0 %5436 }
 0x790   : > { %5284 = vmatpush1.bf16.msra.mxu0 %v5223_v51  ;;  %v5496_v59 = vsel %vm4582_vm15, %v5437_v13, %v12066_v20 }
 0x791   : > { %v5431_v60 = vpop.permute.xlu1 %5430  ;;  %5285 = vmatprep.subr.bf16.mxu0 %v5226_v27  ;;  %5828 = vperm.xlu0 %8332, %v5790_v53  }
 0x792   : > { %v5494_v6 = vsel %vm4582_vm15, %v5431_v60, %v5433_v37 }
 0x793   : > { %5823 = vperm.xlu1 %8334, %v5789_v0   ;;  %v5202_v7 = vpop.permute.xlu0 %5201 }
 0x794   : > { %5286 = vmatpush1.bf16.msra.mxu0 %v5225_v15  ;;  %v5228_v14 = vsel %vm4089_vm4, %v5202_v7, %v12009_v62  ;;  %v5227_v43 = vsel %vm4089_vm4, %v11982_v8, %v5202_v7  ;;  %v5492_v8 = vsel %vm4582_vm15, %v12037_v29, %v12017_v38  ;;  %v8700_v38 = vld [vmem:[%s13653_s14 + $0xa8] ss:$36 sps:$4 sm:$0xff]  }
 0x795   : > { %v5441_v32 = vpop.permute.xlu1 %5440  ;;  %6095 = vrot.lane.b32.xlu0 %v12089_v12, %s13914_s28  ;;  %5287 = vmatprep.subr.bf16.mxu0 %v5228_v14 }
 0x796   : > { %v5497_v39 = vsel %vm4582_vm15, %v12066_v20, %v5441_v32 }
 0x797   : > { %6093 = vrot.lane.b32.xlu1 %v12095_v30, %s13914_s28  ;;  %v5447_v17 = vpop.permute.xlu0 %5446 }
 0x798   : > { %5288 = vmatpush1.bf16.msra.mxu0 %v5227_v43 }
 0x799   : > { %v5445_v31 = vpop.permute.xlu1 %5444  ;;  %5550 = vmatprep.subr.bf16.mxu0 %v5491_v28  ;;  %6099 = vrot.lane.b32.xlu0 %v12113_v35, %s13914_s28 }
 0x79a   : > { %v5499_v40 = vsel %vm4582_vm15, %v5445_v31, %v5447_v17 }
 0x79b   : > { %8511 = vrot.lane.b32.xlu1 %v12105_v42, %s13914_s28  ;;  %5298 = vmatmul.mubr.bf16.vlgmr.msra.gmra.mrb[32].mxu0 %v8692_v54  ;;  %v5451_v56 = vpop.permute.xlu0 %5450 }
 0x79c   : > { %5551 = vmatpush1.bf16.msra.mxu0 %v5490_v19  ;;  %7991 = vmatprep.mubr.msk.bf16.mxu0 %vm3972_vm10, %v8695_v5 }
 0x79d   : > { %v5443_v21 = vpop.permute.xlu1 %5442  ;;  %5552 = vmatprep.subr.bf16.mxu0 %v5493_v34  ;;  %6105 = vrot.lane.b32.xlu0 %v12126_v25, %s13914_s28 }
 0x79e   : > { %v5498_v50 = vsel %vm4582_vm15, %v5443_v21, %v5445_v31 }
 0x79f   : > { %6101 = vrot.lane.b32.xlu1 %v12131_v9, %s13914_s28  ;;  %v5449_v44 = vpop.permute.xlu0 %5448 }
 0x7a0   : > { %5553 = vmatpush1.bf16.msra.mxu0 %v5492_v8  ;;  %v5500_v29 = vsel %vm4582_vm15, %v5449_v44, %v5451_v56 }
 0x7a1   : > { %v5453_v11 = vpop.permute.xlu1 %5452  ;;  %5554 = vmatprep.subr.bf16.mxu0 %v5495_v58 }
 0x7a2   : > { %v5501_v22 = vsel %vm4582_vm15, %v5451_v56, %v5453_v11 }
 0x7a3   : > { %6107 = vrot.lane.b32.xlu1 %v12146_v24, %s13914_s28  ;;  %v5459_v61 = vpop.permute.xlu0 %5458  ;;  %5308 = vmatmul.mubr.bf16.gmra.mrb[36].mxu0 %v8697_v63 }
 0x7a4   : > { %5555 = vmatpush1.bf16.msra.mxu0 %v5494_v6  ;;  %7992 = vmatprep.mubr.msk.bf16.mxu0 %vm3972_vm10, %v8698_v45 }
 0x7a5   : > { %v5457_v62 = vpop.permute.xlu1 %5456  ;;  %5556 = vmatprep.subr.bf16.mxu0 %v5497_v39 }
 0x7a6   : > { %v5503_v55 = vsel %vm4582_vm15, %v5457_v62, %v5459_v61 }
 0x7a7   : > { %v5463_v52 = vpop.permute.xlu0 %5462 }
 0x7a8   : > { %5557 = vmatpush1.bf16.msra.mxu0 %v5496_v59 }
 0x7a9   : > { %v5455_v49 = vpop.permute.xlu1 %5454  ;;  %5558 = vmatprep.subr.bf16.mxu0 %v5499_v40 }
 0x7aa   : > { %v5502_v46 = vsel %vm4582_vm15, %v5455_v49, %v5457_v62 }
 0x7ab   : > { %v5461_v57 = vpop.permute.xlu0 %5460  ;;  %5318 = vmatmul.mubr.bf16.gmra.mrb[40].mxu0 %v8700_v38 }
 0x7ac   : > { %5559 = vmatpush1.bf16.msra.mxu0 %v5498_v50  ;;  %7993 = vmatprep.mubr.msk.bf16.mxu0 %vm3972_vm10, %v8701_v18  ;;  %v5504_v36 = vsel %vm4582_vm15, %v5461_v57, %v5463_v52 }
 0x7ad   : > { %v5465_v4 = vpop.permute.xlu1 %5464  ;;  %5560 = vmatprep.subr.bf16.mxu0 %v5501_v22 }
 0x7ae   : > { %v5505_v47 = vsel %vm4582_vm15, %v5463_v52, %v5465_v4 }
 0x7af   : > { %v5471_v23 = vpop.permute.xlu0 %5470 }
 0x7b0   : > { %5561 = vmatpush1.bf16.msra.mxu0 %v5500_v29 }
 0x7b1   : > { %v5469_v16 = vpop.permute.xlu1 %5468  ;;  %5562 = vmatprep.subr.bf16.mxu0 %v5503_v55 }
 0x7b2   : > { %v5507_v26 = vsel %vm4582_vm15, %v5469_v16, %v5471_v23 }
 0x7b3   : > { %v5475_v3 = vpop.permute.xlu0 %5474  ;;  %5328 = vmatmul.mubr.bf16.gmra.mrb[44].mxu0 %v8703_v41 }
 0x7b4   : > { %5563 = vmatpush1.bf16.msra.mxu0 %v5502_v46 }
 0x7b5   : > { %v5467_v48 = vpop.permute.xlu1 %5466  ;;  %5564 = vmatprep.subr.bf16.mxu0 %v5505_v47 }
 0x7b6   : > { %v5506_v10 = vsel %vm4582_vm15, %v5467_v48, %v5469_v16 }
 0x7b7   : > { %v5473_v33 = vpop.permute.xlu0 %5472 }
 0x7b8   : > { %5565 = vmatpush1.bf16.msra.mxu0 %v5504_v36  ;;  %v5508_v51 = vsel %vm4582_vm15, %v5473_v33, %v5475_v3 }
 0x7b9   : > { %v5477_v20 = vpop.permute.xlu1 %5476  ;;  %5566 = vmatprep.subr.bf16.mxu0 %v5507_v26 }
 0x7ba   : > { %v5509_v37 = vsel %vm4582_vm15, %v5475_v3, %v5477_v20 }
 0x7bb   : > { %v5483_v1 = vpop.permute.xlu0 %5482 }
 0x7bc   : > { %5567 = vmatpush1.bf16.msra.mxu0 %v5506_v10 }
 0x7bd   : > { %v5481_v53 = vpop.permute.xlu1 %5480  ;;  %5568 = vmatprep.subr.bf16.mxu0 %v5509_v37 }
 0x7be   : > { %v5511_v0 = vsel %vm4582_vm15, %v5481_v53, %v5483_v1 }
 0x7bf   : > { %v5485_v13 = vpop.permute.xlu0 %5484 }
 0x7c0   : > { %5569 = vmatpush1.bf16.msra.mxu0 %v5508_v51 }
 0x7c1   : > { %v5479_v27 = vpop.permute.xlu1 %5478  ;;  %5570 = vmatprep.subr.bf16.mxu0 %v5511_v0 }
 0x7c2   : > { %v5510_v60 = vsel %vm4582_vm15, %v5479_v27, %v5481_v53 }
 0x7c3   : > { %v5487_v15 = vpop.permute.xlu0 %5486 }
 0x7c4   : > { %5571 = vmatpush1.bf16.msra.mxu0 %v5510_v60  ;;  %v5512_v32 = vsel %vm4582_vm15, %v5485_v13, %v5487_v15 }
 0x7c5   : > { %v5489_v7 = vpop.permute.xlu1 %5488 }
 0x7c6   : > { %v5513_v14 = vsel %vm4582_vm15, %v5487_v15, %v5489_v7 }
 0x7c7   : > { %5572 = vmatprep.subr.bf16.mxu0 %v5513_v14  ;;  %v5397_v43 = vpop.permute.xlu0 %5396 }
 0x7c8   : > { %5573 = vmatpush1.bf16.msra.mxu0 %v5512_v32  ;;  %8002 = vmatprep.mubr.msk.bf16.mxu0 %vm3972_vm10, %v5397_v43 }
 0x7c9   : > { %v5395_v17 = vpop.permute.xlu1 %5394 }
 0x7ca   : > { %v5410_v54 = vsel %vm3972_vm10, %v5395_v17, %v5397_v43 }
 0x7cb   : > { %5583 = vmatmul.mubr.bf16.vlgmr.msra.gmra.mrb[32].mxu0 %v5410_v54  ;;  %v5401_v28 = vpop.permute.xlu0 %5400 }
 0x7cc   : > { %8003 = vmatprep.mubr.msk.bf16.mxu0 %vm3972_vm10, %v5401_v28 }
 0x7cd   : > { %v5399_v5 = vpop.permute.xlu1 %5398 }
 0x7ce   : > { %v5411_v31 = vsel %vm3972_vm10, %v5399_v5, %v5401_v28 }
 0x7cf   : > { %v5405_v19 = vpop.permute.xlu0 %5404 }
 0x7d1   : > { %v5403_v56 = vpop.permute.xlu1 %5402 }
 0x7d2   : > { %v5412_v34 = vsel %vm3972_vm10, %v5403_v56, %v5405_v19 }
 0x7d3   : > { %5593 = vmatmul.mubr.bf16.gmra.mrb[36].mxu0 %v5411_v31  ;;  %v5409_v21 = vpop.permute.xlu0 %5408 }
 0x7d4   : > { %8004 = vmatprep.mubr.msk.bf16.mxu0 %vm3972_vm10, %v5405_v19 }
 0x7d5   : > { %v5407_v8 = vpop.permute.xlu1 %5406 }
 0x7d6   : > { %v5413_v44 = vsel %vm3972_vm10, %v5407_v8, %v5409_v21 }
 0x7db   : > { %5603 = vmatmul.mubr.bf16.gmra.mrb[40].mxu0 %v5412_v34 }
 0x7dc   : > { %8005 = vmatprep.mubr.msk.bf16.mxu0 %vm3972_vm10, %v5409_v21 }
 0x7e3   : > { %5613 = vmatmul.mubr.bf16.gmra.mrb[44].mxu0 %v5413_v44 }
 0x7e4   : > { %v5655_v63 = vpop.permute.xlu0 %5654 }
 0x7e6   : > { %v5650_v58 = vpop.permute.xlu1 %5649 }
 0x7e8   : > { %v5719_v45 = vpop.permute.xlu0 %5718 }
 0x7ea   : > { %v5714_v11 = vpop.permute.xlu1 %5713 }
 0x7ec   : > { %v12190_v6 = vpop.permute.xlu0 %5664 }
 0x7ee   : > { %v12192_v61 = vpop.permute.xlu1 %5659 }
 0x7f0   : > { %v5799_v39 = vpop.permute.xlu0 %5798 }
 0x7f2   : > { %v5794_v62 = vpop.permute.xlu1 %5793 }
 0x7f4   : > { %v12194_v59 = vpop.permute.xlu0 %5728 }
 0x7f6   : > { %v12196_v52 = vpop.permute.xlu1 %5723 }
 0x7f8   : > { %v12198_v38 = vpop.permute.xlu0 %5674 }
 0x7fa   : > { %v12200_v40 = vpop.permute.xlu1 %5669 }
 0x7fc   : > { %v12202_v18 = vpop.permute.xlu0 %5808 }
 0x7fe   : > { %v12204_v49 = vpop.permute.xlu1 %5803 }
 0x800   : > { %v12206_v50 = vpop.permute.xlu0 %5738 }
 0x802   : > { %v12208_v57 = vpop.permute.xlu1 %5733 }
 0x804   : > { %v12210_v22 = vpop.permute.xlu0 %5684 }
 0x806   : > { %v12212_v4 = vpop.permute.xlu1 %5679 }
 0x808   : > { %v12214_v29 = vpop.permute.xlu0 %5818 }
 0x80a   : > { %v12216_v23 = vpop.permute.xlu1 %5813 }
 0x80c   : > { %v12218_v41 = vpop.permute.xlu0 %5748 }
 0x80e   : > { %v12220_v55 = vpop.permute.xlu1 %5743 }
 0x810   : > { %v12222_v16 = vpop.permute.xlu0 %5828 }
 0x812   : > { %v12224_v46 = vpop.permute.xlu1 %5823 }
 0x814   : > { %v6096_v47 = vpop.permute.xlu0 %6095 }
 0x816   : > { %v6094_v3 = vpop.permute.xlu1 %6093 }
 0x817   : > { %v6188_v48 = vsel %vm1572_vm7, %v6094_v3, %v6096_v47 }
 0x818   : > { %6251 = vmatprep.subr.bf16.mxu1 %v6188_v48  ;;  %v6100_v26 = vpop.permute.xlu0 %6099 }
 0x81a   : > { %v8512_v36 = vpop.permute.xlu1 %8511 }
 0x81b   : > { %v8513_v33 = vunpack.i.l.bf16 %v8512_v36  ;;  %v8514_v20 = vunpack.i.h.bf16 %v8512_v36  ;;  %v13915_v36 = vld [vmem:[#allocation5_spill] sm:$0xff] }
 0x81c   : > { %v12230_v51 = vpop.permute.xlu0 %6105 }
 0x81d   : > { %v6187_v10 = vsel %vm1572_vm7, %v8513_v33, %v6094_v3  ;;  %v6189_v53 = vsel %vm1572_vm7, %v8514_v20, %v6100_v26 }
 0x81e   : > { %v6102_v1 = vpop.permute.xlu1 %6101  ;;  %6252 = vmatpush1.bf16.msra.mxu1 %v6187_v10 }
 0x81f   : > { %v6190_v37 = vsel %vm1572_vm7, %v6100_v26, %v6102_v1 }
 0x820   : > { %6253 = vmatprep.subr.bf16.mxu1 %v6190_v37 }
 0x822   : > { %v6108_v13 = vpop.permute.xlu1 %6107  ;;  %6254 = vmatpush1.bf16.msra.mxu1 %v6189_v53 }
 0x823   : > { %v6192_v0 = vsel %vm1572_vm7, %v12230_v51, %v6108_v13 }
 0x824   : > { %6255 = vmatprep.subr.bf16.mxu1 %v6192_v0 }
 0x89e   : > { %v5584_v27 = vpop.f32.mrb[32].mxu0 }
 0x89f   : > { %v5687_v60 = vmul.f32 %v5650_v58, %v5584_v27  ;;  %v5586_v15 = vpop.f32.mrb[33].mxu0 }
 0x8a0   : > { %v5688_v7 = vmul.f32 %v5650_v58, %v5586_v15  ;;  %v5588_v14 = vpop.f32.mrb[34].mxu0 }
 0x8a1   : > { %v5751_v32 = vadd.f32 %v5714_v11, %v5687_v60  ;;  %v5689_v43 = vmul.f32 %v5655_v63, %v5588_v14  ;;  %v5590_v17 = vpop.f32.mrb[35].mxu0 }
 0x8a2   : > { %v5752_v54 = vadd.f32 %v5714_v11, %v5688_v7  ;;  %v5690_v28 = vmul.f32 %v5655_v63, %v5590_v17 }
 0x8a3   : > { %vm5767_vm4 = vcmp.ge.f32.partialorder %v5751_v32, 0.0  ;;  %v5831_v5 = vmul.f32 %v5794_v62, %v5751_v32  ;;  %v5753_v31 = vadd.f32 %v5719_v45, %v5689_v43 }
 0x8a4   : > { %vm5768_vm10 = vcmp.ge.f32.partialorder %v5752_v54, 0.0  ;;  %v5832_v19 = vmul.f32 %v5794_v62, %v5752_v54  ;;  %v5754_v56 = vadd.f32 %v5719_v45, %v5690_v28  ;;  %v13916_v45 = vld [vmem:[#allocation4_spill] sm:$0xff] }
 0x8a5   : > { %v5847_v34 = vsel %vm5767_vm4, %v5751_v32, %v5831_v5  ;;  %vm5769_vm0 = vcmp.ge.f32.partialorder %v5753_v31, 0.0  ;;  %v5833_v21 = vmul.f32 %v5799_v39, %v5753_v31 }
 0x8a6   : > { %v5848_v8 = vsel %vm5768_vm10, %v5752_v54, %v5832_v19  ;;  %vm5770_vm3 = vcmp.ge.f32.partialorder %v5754_v56, 0.0  ;;  %v5834_v44 = vmul.f32 %v5799_v39, %v5754_v56  ;;  %v5594_v3 = vpop.f32.mrb[36].mxu0  ;;  %v5863_v11 = vmul.f32 %v5847_v34, %v13915_v36 }
 0x8a7   : > { %v5849_v58 = vsel %vm5769_vm0, %v5753_v31, %v5833_v21  ;;  %v5691_v47 = vmul.f32 %v12192_v61, %v5594_v3  ;;  %v5596_v48 = vpop.f32.mrb[37].mxu0  ;;  %v5864_v20 = vmul.f32 %v5848_v8, %v13916_v45 }
 0x8a8   : > { %v5865_v63 = vmul.f32 %v5849_v58, %v13915_v36  ;;  %v5850_v33 = vsel %vm5770_vm3, %v5754_v56, %v5834_v44  ;;  %v5692_v26 = vmul.f32 %v12192_v61, %v5596_v48  ;;  %v5598_v62 = vpop.f32.mrb[38].mxu0  ;;  %vm719_vm3 = vcmask 130048  }
 0x8a9   : > { %v5866_v10 = vmul.f32 %v5850_v33, %v13916_v45  ;;  %v5755_v1 = vadd.f32 %v12196_v52, %v5691_v47  ;;  %v5693_v39 = vmul.f32 %v12190_v6, %v5598_v62  ;;  %v5600_v37 = vpop.f32.mrb[39].mxu0  ;;  %720 = vst.msk [vmem:[#allocation2 + $0x20] sm:$0xff] %vm719_vm3, %v12101_v2  ;;  %722 = vst.msk [vmem:[#allocation2 + $0x48] sm:$0xff] %vm719_vm3, %v12101_v2 }
 0x8aa   : > { %v5756_v53 = vadd.f32 %v12196_v52, %v5692_v26  ;;  %v5694_v13 = vmul.f32 %v12190_v6, %v5600_v37  ;;  %v5879_v0 = vpack.c.bf16 %v5865_v63, %v5863_v11  ;;  %724 = vst.msk [vmem:[#allocation2 + $0x70] sm:$0xff] %vm719_vm3, %v12101_v2  ;;  %726 = vst.msk [vmem:[#allocation2 + $0x98] sm:$0xff] %vm719_vm3, %v12101_v2 }
 0x8ab   : > { %vm5771_vm9 = vcmp.ge.f32.partialorder %v5755_v1, 0.0  ;;  %v5835_v27 = vmul.f32 %v12204_v49, %v5755_v1  ;;  %v5757_v61 = vadd.f32 %v12194_v59, %v5693_v39  ;;  %v5880_v60 = vpack.c.bf16 %v5866_v10, %v5864_v20  ;;  %728 = vst.msk [vmem:[#allocation2 + $0xc0] sm:$0xff] %vm719_vm3, %v12101_v2  ;;  %730 = vst.msk [vmem:[#allocation2 + $0xe8] sm:$0xff] %vm719_vm3, %v12101_v2 }
 0x8ac   : > { %vm5772_vm5 = vcmp.ge.f32.partialorder %v5756_v53, 0.0  ;;  %v5836_v15 = vmul.f32 %v12204_v49, %v5756_v53  ;;  %v5758_v7 = vadd.f32 %v12194_v59, %v5694_v13  ;;  %5895 = vrot.lane.b32.xlu1 %v5879_v0, %s13785_s6  ;;  %732 = vst.msk [vmem:[#allocation2 + $0x110] sm:$0xff] %vm719_vm3, %v12101_v2  ;;  %734 = vst.msk [vmem:[#allocation2 + $0x138] sm:$0xff] %vm719_vm3, %v12101_v2 }
 0x8ad   : > { %v5851_v14 = vsel %vm5771_vm9, %v5755_v1, %v5835_v27  ;;  %vm5773_vm6 = vcmp.ge.f32.partialorder %v5757_v61, 0.0  ;;  %v5837_v52 = vmul.f32 %v12202_v18, %v5757_v61  ;;  %5897 = vrot.lane.b32.xlu0 %v5880_v60, %s13785_s6  ;;  %736 = vst.msk [vmem:[#allocation2 + $0x160] sm:$0xff] %vm719_vm3, %v12101_v2  ;;  %738 = vst.msk [vmem:[#allocation2 + $0x188] sm:$0xff] %vm719_vm3, %v12101_v2 }
 0x8ae   : > { %v5852_v6 = vsel %vm5772_vm5, %v5756_v53, %v5836_v15  ;;  %vm5774_vm8 = vcmp.ge.f32.partialorder %v5758_v7, 0.0  ;;  %v5838_v32 = vmul.f32 %v12202_v18, %v5758_v7  ;;  %v5604_v43 = vpop.f32.mrb[40].mxu0  ;;  %v5867_v49 = vmul.f32 %v5851_v14, %v13915_v36  ;;  %740 = vst.msk [vmem:[#allocation2 + $0x1b0] sm:$0xff] %vm719_vm3, %v12101_v2  ;;  %742 = vst.msk [vmem:[#allocation2 + $0x1d8] sm:$0xff] %vm719_vm3, %v12101_v2 }
 0x8af   : > { %v5853_v17 = vsel %vm5773_vm6, %v5757_v61, %v5837_v52  ;;  %v5695_v54 = vmul.f32 %v12200_v40, %v5604_v43  ;;  %v5606_v28 = vpop.f32.mrb[41].mxu0  ;;  %v5868_v56 = vmul.f32 %v5852_v6, %v13916_v45  ;;  %744 = vst.msk [vmem:[#allocation2 + $0x200] sm:$0xff] %vm719_vm3, %v12101_v2  ;;  %746 = vst.msk [vmem:[#allocation2 + $0x228] sm:$0xff] %vm719_vm3, %v12101_v2 }
 0x8b0   : > { %v5869_v59 = vmul.f32 %v5853_v17, %v13915_v36  ;;  %v5854_v5 = vsel %vm5774_vm8, %v5758_v7, %v5838_v32  ;;  %v5696_v31 = vmul.f32 %v12200_v40, %v5606_v28  ;;  %v5608_v19 = vpop.f32.mrb[42].mxu0  ;;  %748 = vst.msk [vmem:[#allocation2 + $0x250] sm:$0xff] %vm719_vm3, %v12101_v2  ;;  %750 = vst.msk [vmem:[#allocation2 + $0x278] sm:$0xff] %vm719_vm3, %v12101_v2 }
 0x8b1   : > { %v5870_v34 = vmul.f32 %v5854_v5, %v13916_v45  ;;  %v5759_v21 = vadd.f32 %v12208_v57, %v5695_v54  ;;  %v5697_v18 = vmul.f32 %v12198_v38, %v5608_v19  ;;  %v5610_v8 = vpop.f32.mrb[43].mxu0  ;;  %v12294_v19 = vld [vmem:[#allocation2 + $0x80] sm:$0xff] }
 0x8b2   : > { %v5760_v44 = vadd.f32 %v12208_v57, %v5696_v31  ;;  %v5698_v3 = vmul.f32 %v12198_v38, %v5610_v8  ;;  %v5881_v58 = vpack.c.bf16 %v5869_v59, %v5867_v49  ;;  %v12330_v8 = vld [vmem:[#allocation2 + $0x120] sm:$0xff] }
 0x8b3   : > { %vm5775_vm11 = vcmp.ge.f32.partialorder %v5759_v21, 0.0  ;;  %v5839_v47 = vmul.f32 %v12216_v23, %v5759_v21  ;;  %v5761_v40 = vadd.f32 %v12206_v50, %v5697_v18  ;;  %v5882_v48 = vpack.c.bf16 %v5870_v34, %v5868_v56  ;;  %v12314_v56 = vld [vmem:[#allocation2 + $0xd8] sm:$0xff]  ;;  %v12318_v34 = vld [vmem:[#allocation2 + $0xd0] sm:$0xff] }
 0x8b4   : > { %vm5776_vm12 = vcmp.ge.f32.partialorder %v5760_v44, 0.0  ;;  %v5840_v11 = vmul.f32 %v12216_v23, %v5760_v44  ;;  %v5762_v63 = vadd.f32 %v12206_v50, %v5698_v3  ;;  %5899 = vrot.lane.b32.xlu1 %v5881_v58, %s13785_s6  ;;  %v12326_v18 = vld [vmem:[#allocation2 + $0xf8] sm:$0xff]  ;;  %v12340_v3 = vld [vmem:[#allocation2 + $0x128] sm:$0xff]  ;;  %v12346_v58 = vld [vmem:[#allocation2 + $0x150] sm:$0xff] }
 0x8b5   : > { %v5855_v33 = vsel %vm5775_vm11, %v5759_v21, %v5839_v47  ;;  %vm5777_vm13 = vcmp.ge.f32.partialorder %v5761_v40, 0.0  ;;  %v5841_v57 = vmul.f32 %v12214_v29, %v5761_v40  ;;  %5901 = vrot.lane.b32.xlu0 %v5882_v48, %s13785_s6  ;;  %v12322_v21 = vld [vmem:[#allocation2 + $0x100] sm:$0xff]  ;;  %v12350_v47 = vld [vmem:[#allocation2 + $0x178] sm:$0xff] }
 0x8b6   : > { %v5856_v38 = vsel %vm5776_vm12, %v5760_v44, %v5840_v11  ;;  %vm5778_vm14 = vcmp.ge.f32.partialorder %v5762_v63, 0.0  ;;  %v5842_v26 = vmul.f32 %v12214_v29, %v5762_v63  ;;  %v5614_v62 = vpop.f32.mrb[44].mxu0  ;;  %v5871_v23 = vmul.f32 %v5855_v33, %v13915_v36  ;;  %v12336_v44 = vld [vmem:[#allocation2 + $0x148] sm:$0xff]  ;;  %v12358_v48 = vld [vmem:[#allocation2 + $0x1a0] sm:$0xff]  ;;  %v12362_v11 = vld [vmem:[#allocation2 + $0x198] sm:$0xff] }
 0x8b7   : > { %v5857_v20 = vsel %vm5777_vm13, %v5761_v40, %v5841_v57  ;;  %v5699_v10 = vmul.f32 %v12212_v4, %v5614_v62  ;;  %v5616_v1 = vpop.f32.mrb[45].mxu0  ;;  %v5872_v13 = vmul.f32 %v5856_v38, %v13916_v45  ;;  %v12354_v40 = vld [vmem:[#allocation2 + $0x170] sm:$0xff]  ;;  %v12372_v33 = vld [vmem:[#allocation2 + $0x1c8] sm:$0xff] }
 0x8b8   : > { %v5873_v50 = vmul.f32 %v5857_v20, %v13915_v36  ;;  %v5858_v39 = vsel %vm5778_vm14, %v5762_v63, %v5842_v26  ;;  %v5700_v37 = vmul.f32 %v12212_v4, %v5616_v1  ;;  %v5618_v53 = vpop.f32.mrb[46].mxu0  ;;  %v12366_v63 = vld [vmem:[#allocation2 + $0x1c0] sm:$0xff] }
 0x8b9   : > { %v5874_v0 = vmul.f32 %v5858_v39, %v13916_v45  ;;  %v5763_v27 = vadd.f32 %v12220_v55, %v5699_v10  ;;  %v5701_v29 = vmul.f32 %v12210_v22, %v5618_v53  ;;  %v5620_v61 = vpop.f32.mrb[47].mxu0 }
 0x8ba   : > { %v5764_v60 = vadd.f32 %v12220_v55, %v5700_v37  ;;  %v5702_v15 = vmul.f32 %v12210_v22, %v5620_v61  ;;  %v5883_v7 = vpack.c.bf16 %v5873_v50, %v5871_v23 }
 0x8bb   : > { %vm5779_vm15 = vcmp.ge.f32.partialorder %v5763_v27, 0.0  ;;  %v5843_v14 = vmul.f32 %v12224_v46, %v5763_v27  ;;  %v5765_v4 = vadd.f32 %v12218_v41, %v5701_v29  ;;  %v5884_v52 = vpack.c.bf16 %v5874_v0, %v5872_v13  ;;  %v8706_v29 = vld [vmem:[%s13657_s18 + $0xc] ss:$48 sps:$4 sm:$0xff]  }
 0x8bc   : > { %vm5780_vm4 = vcmp.ge.f32.partialorder %v5764_v60, 0.0  ;;  %v5844_v6 = vmul.f32 %v12224_v46, %v5764_v60  ;;  %v5766_v32 = vadd.f32 %v12218_v41, %v5702_v15  ;;  %5903 = vrot.lane.b32.xlu1 %v5883_v7, %s13785_s6  ;;  %6283 = vmatprep.mubr.bf16.mxu1 %v8706_v29 }
 0x8bd   : > { %v5859_v43 = vsel %vm5779_vm15, %v5763_v27, %v5843_v14  ;;  %vm5781_vm10 = vcmp.ge.f32.partialorder %v5765_v4, 0.0  ;;  %v5845_v55 = vmul.f32 %v12222_v16, %v5765_v4  ;;  %5905 = vrot.lane.b32.xlu0 %v5884_v52, %s13785_s6 }
 0x8be   : > { %v5860_v22 = vsel %vm5780_vm4, %v5764_v60, %v5844_v6  ;;  %vm5782_vm0 = vcmp.ge.f32.partialorder %v5766_v32, 0.0  ;;  %v5846_v17 = vmul.f32 %v12222_v16, %v5766_v32  ;;  %v5875_v28 = vmul.f32 %v5859_v43, %v13915_v36  ;;  %v12300_v16 = vld [vmem:[#allocation2 + $0xa8] sm:$0xff] }
 0x8bf   : > { %v5861_v54 = vsel %vm5781_vm10, %v5765_v4, %v5845_v55  ;;  %v5876_v41 = vmul.f32 %v5860_v22, %v13916_v45 }
 0x8c0   : > { %v5877_v49 = vmul.f32 %v5861_v54, %v13915_v36  ;;  %v5862_v46 = vsel %vm5782_vm0, %v5766_v32, %v5846_v17  ;;  %v12304_v36 = vld [vmem:[#allocation2 + $0x88] sm:$0xff] }
 0x8c1   : > { %v5878_v59 = vmul.f32 %v5862_v46, %v13916_v45  ;;  %v12310_v45 = vld [vmem:[#allocation2 + $0xb0] sm:$0xff] }
 0x8c2   : > { %v5885_v5 = vpack.c.bf16 %v5877_v49, %v5875_v28 }
 0x8c3   : > { %v5886_v31 = vpack.c.bf16 %v5878_v59, %v5876_v41 }
 0x8c4   : > { %5907 = vrot.lane.b32.xlu1 %v5885_v5, %s13785_s6 }
 0x8c5   : > { %5909 = vrot.lane.b32.xlu0 %v5886_v31, %s13785_s6 }
 0x8c8   : > { %6111 = vrot.lane.b32.xlu1 %v12294_v19, %s13914_s28 }
 0x8c9   : > { %8516 = vrot.lane.b32.xlu0 %v12105_v42, %s13914_s28 }
 0x8cc   : > { %6117 = vrot.lane.b32.xlu1 %v12300_v16, %s13914_s28 }
 0x8cd   : > { %6113 = vrot.lane.b32.xlu0 %v12304_v36, %s13914_s28 }
 0x8d0   : > { %8521 = vrot.lane.b32.xlu1 %v12105_v42, %s13914_s28 }
 0x8d1   : > { %6119 = vrot.lane.b32.xlu0 %v12310_v45, %s13914_s28 }
 0x8d4   : > { %6125 = vrot.lane.b32.xlu1 %v12314_v56, %s13914_s28 }
 0x8d5   : > { %6123 = vrot.lane.b32.xlu0 %v12318_v34, %s13914_s28 }
 0x8d8   : > { %6131 = vrot.lane.b32.xlu1 %v12322_v21, %s13914_s28 }
 0x8d9   : > { %6129 = vrot.lane.b32.xlu0 %v12326_v18, %s13914_s28 }
 0x8dc   : > { %6135 = vrot.lane.b32.xlu1 %v12330_v8, %s13914_s28 }
 0x8dd   : > { %8526 = vrot.lane.b32.xlu0 %v12105_v42, %s13914_s28 }
 0x8e0   : > { %6141 = vrot.lane.b32.xlu1 %v12336_v44, %s13914_s28 }
 0x8e1   : > { %6137 = vrot.lane.b32.xlu0 %v12340_v3, %s13914_s28 }
 0x8e4   : > { %8531 = vrot.lane.b32.xlu1 %v12105_v42, %s13914_s28 }
 0x8e5   : > { %6143 = vrot.lane.b32.xlu0 %v12346_v58, %s13914_s28 }
 0x8e8   : > { %6149 = vrot.lane.b32.xlu1 %v12350_v47, %s13914_s28 }
 0x8e9   : > { %6147 = vrot.lane.b32.xlu0 %v12354_v40, %s13914_s28 }
 0x8ec   : > { %6155 = vrot.lane.b32.xlu1 %v12358_v48, %s13914_s28 }
 0x8ed   : > { %6153 = vrot.lane.b32.xlu0 %v12362_v11, %s13914_s28 }
 0x8f0   : > { %6159 = vrot.lane.b32.xlu1 %v12366_v63, %s13914_s28 }
 0x8f1   : > { %8536 = vrot.lane.b32.xlu0 %v12105_v42, %s13914_s28 }
 0x8f4   : > { %8541 = vrot.lane.b32.xlu1 %v12105_v42, %s13914_s28 }
 0x8f5   : > { %6161 = vrot.lane.b32.xlu0 %v12372_v33, %s13914_s28 }
 0x8f9   : > { %6175 = vrot.lane.b32.xlu0 %v12101_v2, %s13914_s28 }
 0x91e   : > { %v5896_v57 = vpop.permute.xlu1 %5895 }
 0x91f   : > { %5927 = vst.msk [vmem:[#allocation2 + $0x1e8] sm:$0xff] %vm1218_vm2, %v5896_v57  ;;  %v5898_v38 = vpop.permute.xlu0 %5897 }
 0x920   : > { %v12414_v26 = vsel %vm1201_vm1, %v5896_v57, %v5898_v38  ;;  %5929 = vst.msk [vmem:[#allocation2 + $0x1f8] sm:$0xff] %vm1201_vm1, %v5898_v38 }
 0x921   : > { %5928 = vst [vmem:[#allocation2 + $0x1f0] sm:$0xff] %v12414_v26  ;;  %6167 = vrot.lane.b32.xlu0 %v12414_v26, %s13914_s28 }
 0x926   : > { %v5900_v62 = vpop.permute.xlu1 %5899  ;;  %v12420_v20 = vld [vmem:[#allocation2 + $0x1e8] sm:$0xff] }
 0x927   : > { %5930 = vst.msk [vmem:[#allocation2 + $0x210] sm:$0xff] %vm1218_vm2, %v5900_v62  ;;  %v5902_v10 = vpop.permute.xlu0 %5901  ;;  %6165 = vrot.lane.b32.xlu1 %v12420_v20, %s13914_s28 }
 0x928   : > { %v12426_v1 = vsel %vm1201_vm1, %v5900_v62, %v5902_v10  ;;  %5932 = vst.msk [vmem:[#allocation2 + $0x220] sm:$0xff] %vm1201_vm1, %v5902_v10 }
 0x929   : > { %5931 = vst [vmem:[#allocation2 + $0x218] sm:$0xff] %v12426_v1 }
 0x92b   : > { %6173 = vrot.lane.b32.xlu1 %v12426_v1, %s13914_s28 }
 0x92e   : > { %v5904_v23 = vpop.permute.xlu1 %5903  ;;  %v12432_v50 = vld [vmem:[#allocation2 + $0x210] sm:$0xff] }
 0x92f   : > { %5933 = vst.msk [vmem:[#allocation2 + $0x238] sm:$0xff] %vm1218_vm2, %v5904_v23  ;;  %v5906_v39 = vpop.permute.xlu0 %5905  ;;  %6171 = vrot.lane.b32.xlu0 %v12432_v50, %s13914_s28 }
 0x930   : > { %v12438_v37 = vsel %vm1201_vm1, %v5904_v23, %v5906_v39  ;;  %5935 = vst.msk [vmem:[#allocation2 + $0x248] sm:$0xff] %vm1201_vm1, %v5906_v39 }
 0x931   : > { %5934 = vst [vmem:[#allocation2 + $0x240] sm:$0xff] %v12438_v37  ;;  %6179 = vrot.lane.b32.xlu1 %v12438_v37, %s13914_s28 }
 0x936   : > { %v5908_v53 = vpop.permute.xlu1 %5907  ;;  %v12444_v13 = vld [vmem:[#allocation2 + $0x238] sm:$0xff] }
 0x937   : > { %5936 = vst.msk [vmem:[#allocation2 + $0x260] sm:$0xff] %vm1218_vm2, %v5908_v53  ;;  %6177 = vrot.lane.b32.xlu0 %v12444_v13, %s13914_s28  ;;  %v5910_v0 = vpop.permute.xlu0 %5909 }
 0x938   : > { %v12450_v27 = vsel %vm1201_vm1, %v5908_v53, %v5910_v0  ;;  %5938 = vst.msk [vmem:[#allocation2 + $0x270] sm:$0xff] %vm1201_vm1, %v5910_v0  ;;  %vm6581_vm1 = vcmask 916480  }
 0x939   : > { %5937 = vst [vmem:[#allocation2 + $0x268] sm:$0xff] %v12450_v27 }
 0x93a   : > { %v6112_v61 = vpop.permute.xlu1 %6111 }
 0x93b   : > { %v8517_v60 = vpop.permute.xlu0 %8516  ;;  %6185 = vrot.lane.b32.xlu0 %v12450_v27, %s13914_s28 }
 0x93c   : > { %v8518_v15 = vunpack.i.l.bf16 %v8517_v60  ;;  %v8519_v7 = vunpack.i.h.bf16 %v8517_v60 }
 0x93e   : > { %v6118_v14 = vpop.permute.xlu1 %6117  ;;  %v12459_v4 = vld [vmem:[#allocation2 + $0x260] sm:$0xff]  ;;  %v6191_v52 = vsel %vm1572_vm7, %v8518_v15, %v12230_v51  ;;  %v6193_v55 = vsel %vm1572_vm7, %v8519_v7, %v6112_v61 }
 0x93f   : > { %6183 = vrot.lane.b32.xlu1 %v12459_v4, %s13914_s28  ;;  %v6114_v6 = vpop.permute.xlu0 %6113  ;;  %6256 = vmatpush1.bf16.msra.mxu1 %v6191_v52 }
 0x940   : > { %v6194_v32 = vsel %vm1572_vm7, %v6112_v61, %v6114_v6  ;;  %6487 = vrot.lane.b32.xlu0 %v12095_v30, %s8828_s24 }
 0x941   : > { %6257 = vmatprep.subr.bf16.mxu1 %v6194_v32 }
 0x942   : > { %v8522_v43 = vpop.permute.xlu1 %8521 }
 0x943   : > { %v8523_v22 = vunpack.i.l.bf16 %v8522_v43  ;;  %6181 = vrot.lane.b32.xlu1 %v12101_v2, %s13914_s28  ;;  %v6120_v51 = vpop.permute.xlu0 %6119  ;;  %6258 = vmatpush1.bf16.msra.mxu1 %v6193_v55  ;;  %v8524_v28 = vunpack.i.h.bf16 %v8522_v43 }
 0x944   : > { %v6196_v17 = vsel %vm1572_vm7, %v6118_v14, %v6120_v51  ;;  %8546 = vrot.lane.b32.xlu0 %v12105_v42, %s8828_s24 }
 0x945   : > { %6259 = vmatprep.subr.bf16.mxu1 %v6196_v17  ;;  %v6195_v54 = vsel %vm1572_vm7, %v8523_v22, %v6118_v14 }
 0x946   : > { %v6126_v30 = vpop.permute.xlu1 %6125 }
 0x947   : > { %6489 = vrot.lane.b32.xlu1 %v12089_v12, %s8828_s24  ;;  %v6124_v49 = vpop.permute.xlu0 %6123  ;;  %6260 = vmatpush1.bf16.msra.mxu1 %v6195_v54 }
 0x948   : > { %v6198_v46 = vsel %vm1572_vm7, %v6124_v49, %v6126_v30  ;;  %6495 = vrot.lane.b32.xlu0 %v12131_v9, %s8828_s24  ;;  %v6197_v59 = vsel %vm1572_vm7, %v8524_v28, %v6124_v49 }
 0x949   : > { %6261 = vmatprep.subr.bf16.mxu1 %v6198_v46 }
 0x94a   : > { %v6132_v41 = vpop.permute.xlu1 %6131 }
 0x94b   : > { %6493 = vrot.lane.b32.xlu1 %v12113_v35, %s8828_s24  ;;  %v6130_v5 = vpop.permute.xlu0 %6129  ;;  %6262 = vmatpush1.bf16.msra.mxu1 %v6197_v59  ;;  %v12571_v59 = vld [vmem:[#allocation2 + $0x18] sm:$0xff] }
 0x94c   : > { %v6200_v31 = vsel %vm1572_vm7, %v6130_v5, %v6132_v41  ;;  %6501 = vrot.lane.b32.xlu0 %v12146_v24, %s8828_s24  ;;  %13917 = vst [vmem:[#allocation11_spill] sm:$0xff] %v12571_v59 }
 0x94d   : > { %6263 = vmatprep.subr.bf16.mxu1 %v6200_v31 }
 0x94e   : > { %v6136_v12 = vpop.permute.xlu1 %6135 }
 0x94f   : > { %6499 = vrot.lane.b32.xlu1 %v12126_v25, %s8828_s24  ;;  %v8527_v9 = vpop.permute.xlu0 %8526 }
 0x950   : > { %v8528_v57 = vunpack.i.l.bf16 %v8527_v9  ;;  %6505 = vrot.lane.b32.xlu0 %v12294_v19, %s8828_s24  ;;  %v8529_v38 = vunpack.i.h.bf16 %v8527_v9 }
 0x952   : > { %v6142_v62 = vpop.permute.xlu1 %6141  ;;  %v6199_v35 = vsel %vm1572_vm7, %v8528_v57, %v6130_v5  ;;  %v6201_v23 = vsel %vm1572_vm7, %v8529_v38, %v6136_v12  ;;  %v12575_v5 = vld [vmem:[#allocation2 + $0x40] sm:$0xff]  ;;  %v12585_v38 = vld [vmem:[#allocation2 + $0x38] sm:$0xff] }
 0x953   : > { %8551 = vrot.lane.b32.xlu1 %v12105_v42, %s8828_s24  ;;  %v6138_v10 = vpop.permute.xlu0 %6137  ;;  %6264 = vmatpush1.bf16.msra.mxu1 %v6199_v35  ;;  %13918 = vst [vmem:[#allocation23_spill] sm:$0xff] %v12575_v5  ;;  %v12591_v35 = vld [vmem:[#allocation2 + $0x70] sm:$0xff] }
 0x954   : > { %v6202_v24 = vsel %vm1572_vm7, %v6136_v12, %v6138_v10  ;;  %6511 = vrot.lane.b32.xlu0 %v12300_v16, %s8828_s24  ;;  %v12579_v12 = vld [vmem:[#allocation2 + $0x10] sm:$0xff] }
 0x955   : > { %6265 = vmatprep.subr.bf16.mxu1 %v6202_v24 }
 0x956   : > { %v8532_v25 = vpop.permute.xlu1 %8531 }
 0x957   : > { %v8533_v39 = vunpack.i.l.bf16 %v8532_v25  ;;  %6507 = vrot.lane.b32.xlu1 %v12304_v36, %s8828_s24  ;;  %v6144_v53 = vpop.permute.xlu0 %6143  ;;  %6266 = vmatpush1.bf16.msra.mxu1 %v6201_v23  ;;  %v8534_v61 = vunpack.i.h.bf16 %v8532_v25  ;;  %v12597_v23 = vld [vmem:[#allocation2 + $0x68] sm:$0xff] }
 0x958   : > { %v6204_v0 = vsel %vm1572_vm7, %v6142_v62, %v6144_v53  ;;  %8556 = vrot.lane.b32.xlu0 %v12105_v42, %s8828_s24 }
 0x959   : > { %6267 = vmatprep.subr.bf16.mxu1 %v6204_v0  ;;  %v6203_v29 = vsel %vm1572_vm7, %v8533_v39, %v6142_v62  ;;  %v12587_v62 = vld [vmem:[#allocation2 + $0x48] sm:$0xff]  ;;  %v12603_v0 = vld [vmem:[#allocation2 + $0x90] sm:$0xff] }
 0x95a   : > { %v6150_v60 = vpop.permute.xlu1 %6149 }
 0x95b   : > { %6513 = vrot.lane.b32.xlu1 %v12310_v45, %s8828_s24  ;;  %v6148_v15 = vpop.permute.xlu0 %6147  ;;  %6268 = vmatpush1.bf16.msra.mxu1 %v6203_v29  ;;  %v12607_v29 = vld [vmem:[#allocation2 + $0x60] sm:$0xff] }
 0x95c   : > { %v6206_v7 = vsel %vm1572_vm7, %v6148_v15, %v6150_v60  ;;  %6519 = vrot.lane.b32.xlu0 %v12314_v56, %s8828_s24  ;;  %v6205_v52 = vsel %vm1572_vm7, %v8534_v61, %v6148_v15  ;;  %v12611_v61 = vld [vmem:[#allocation2 + $0x98] sm:$0xff] }
 0x95d   : > { %6269 = vmatprep.subr.bf16.mxu1 %v6206_v7  ;;  %v12615_v7 = vld [vmem:[#allocation2 + $0xc0] sm:$0xff] }
 0x95e   : > { %v6156_v14 = vpop.permute.xlu1 %6155 }
 0x95f   : > { %6517 = vrot.lane.b32.xlu1 %v12318_v34, %s8828_s24  ;;  %v6154_v6 = vpop.permute.xlu0 %6153  ;;  %6270 = vmatpush1.bf16.msra.mxu1 %v6205_v52 }
 0x960   : > { %v6208_v32 = vsel %vm1572_vm7, %v6154_v6, %v6156_v14  ;;  %6525 = vrot.lane.b32.xlu0 %v12322_v21, %s8828_s24 }
 0x961   : > { %6271 = vmatprep.subr.bf16.mxu1 %v6208_v32  ;;  %v12623_v32 = vld [vmem:[#allocation2 + $0xb8] sm:$0xff] }
 0x962   : > { %v6160_v17 = vpop.permute.xlu1 %6159 }
 0x963   : > { %6523 = vrot.lane.b32.xlu1 %v12326_v18, %s8828_s24  ;;  %v8537_v43 = vpop.permute.xlu0 %8536 }
 0x964   : > { %v8538_v55 = vunpack.i.l.bf16 %v8537_v43  ;;  %6529 = vrot.lane.b32.xlu0 %v12330_v8, %s8828_s24  ;;  %v8539_v22 = vunpack.i.h.bf16 %v8537_v43  ;;  %v12627_v43 = vld [vmem:[#allocation2 + $0xe0] sm:$0xff] }
 0x966   : > { %v6207_v51 = vsel %vm1572_vm7, %v8538_v55, %v6154_v6  ;;  %v6209_v30 = vsel %vm1572_vm7, %v8539_v22, %v6160_v17  ;;  %v8542_v49 = vpop.permute.xlu1 %8541 }
 0x967   : > { %8561 = vrot.lane.b32.xlu1 %v12105_v42, %s8828_s24  ;;  %v6162_v54 = vpop.permute.xlu0 %6161  ;;  %6272 = vmatpush1.bf16.msra.mxu1 %v6207_v51  ;;  %v8543_v41 = vunpack.i.l.bf16 %v8542_v49  ;;  %v8544_v10 = vunpack.i.h.bf16 %v8542_v49  ;;  %v8704_v49 = vld [vmem:[%s13657_s18 + $0x8] ss:$48 sps:$4 sm:$0xff]  }
 0x968   : > { %v6210_v28 = vsel %vm1572_vm7, %v6160_v17, %v6162_v54  ;;  %6535 = vrot.lane.b32.xlu0 %v12336_v44, %s8828_s24  ;;  %v12636_v17 = vld [vmem:[#allocation2 + $0xe8] sm:$0xff] }
 0x969   : > { %6273 = vmatprep.subr.bf16.mxu1 %v6210_v28  ;;  %v12640_v28 = vld [vmem:[#allocation2 + $0x110] sm:$0xff] }
 0x96b   : > { %6531 = vrot.lane.b32.xlu1 %v12340_v3, %s8828_s24  ;;  %6274 = vmatpush1.bf16.msra.mxu1 %v6209_v30  ;;  %v6176_v46 = vpop.permute.xlu0 %6175 }
 0x96c   : > { %8566 = vrot.lane.b32.xlu0 %v12105_v42, %s8828_s24 }
 0x96f   : > { %6537 = vrot.lane.b32.xlu1 %v12346_v58, %s8828_s24 }
 0x970   : > { %6543 = vrot.lane.b32.xlu0 %v12350_v47, %s8828_s24 }
 0x973   : > { %6541 = vrot.lane.b32.xlu1 %v12354_v40, %s8828_s24 }
 0x974   : > { %6549 = vrot.lane.b32.xlu0 %v12358_v48, %s8828_s24 }
 0x977   : > { %6547 = vrot.lane.b32.xlu1 %v12362_v11, %s8828_s24 }
 0x978   : > { %6553 = vrot.lane.b32.xlu0 %v12366_v63, %s8828_s24 }
 0x97b   : > { %8571 = vrot.lane.b32.xlu1 %v12105_v42, %s8828_s24 }
 0x97c   : > { %6559 = vrot.lane.b32.xlu0 %v12420_v20, %s8828_s24 }
 0x97f   : > { %6555 = vrot.lane.b32.xlu1 %v12372_v33, %s8828_s24 }
 0x980   : > { %8576 = vrot.lane.b32.xlu0 %v12105_v42, %s8828_s24  ;;  %v12565_v42 = vld [vmem:[#allocation2 + $0x20] sm:$0xff] }
 0x983   : > { %6561 = vrot.lane.b32.xlu1 %v12414_v26, %s8828_s24 }
 0x984   : > { %6567 = vrot.lane.b32.xlu0 %v12426_v1, %s8828_s24 }
 0x987   : > { %6565 = vrot.lane.b32.xlu1 %v12432_v50, %s8828_s24 }
 0x988   : > { %6573 = vrot.lane.b32.xlu0 %v12438_v37, %s8828_s24 }
 0x98b   : > { %6571 = vrot.lane.b32.xlu1 %v12444_v13, %s8828_s24 }
 0x98c   : > { %6577 = vrot.lane.b32.xlu0 %v12459_v4, %s8828_s24 }
 0x98f   : > { %6569 = vrot.lane.b32.xlu1 %v12101_v2, %s8828_s24 }
 0x990   : > { %6575 = vrot.lane.b32.xlu0 %v12101_v2, %s8828_s24 }
 0x993   : > { %6579 = vrot.lane.b32.xlu1 %v12450_v27, %s8828_s24  ;;  %v6168_v31 = vpop.permute.xlu0 %6167 }
 0x994   : > { %7052 = vrot.lane.b32.xlu0 %v12565_v42, %s13914_s28 }
 0x997   : > { %7050 = vrot.lane.b32.xlu1 %v12571_v59, %s13914_s28 }
 0x998   : > { %7056 = vrot.lane.b32.xlu0 %v12575_v5, %s13914_s28 }
 0x999   : > { %v6166_v2 = vpop.permute.xlu1 %6165 }
 0x99a   : > { %v6212_v9 = vsel %vm1572_vm7, %v6166_v2, %v6168_v31  ;;  %v6211_v57 = vsel %vm1572_vm7, %v8543_v41, %v6166_v2  ;;  %v8790_v41 = vld [vmem:[#allocation2 + $0x8] sm:$0xff] }
 0x99b   : > { %7048 = vrot.lane.b32.xlu1 %v12579_v12, %s13914_s28  ;;  %6275 = vmatprep.subr.bf16.mxu1 %v6212_v9  ;;  %v8707_v31 = vld [vmem:[%s13657_s18 + $0x6c] ss:$48 sps:$4 sm:$0xff]  }
 0x99c   : > { %6276 = vmatpush1.bf16.msra.mxu1 %v6211_v57  ;;  %7054 = vrot.lane.b32.xlu0 %v12585_v38, %s13914_s28  ;;  %v12657_v9 = vld [vmem:[#allocation2 + $0x108] sm:$0xff] }
 0x99d   : > { %v6174_v25 = vpop.permute.xlu1 %6173 }
 0x99f   : > { %7058 = vrot.lane.b32.xlu1 %v12587_v62, %s13914_s28 }
 0x9a0   : > { %7064 = vrot.lane.b32.xlu0 %v12591_v35, %s13914_s28 }
 0x9a1   : > { %v6172_v24 = vpop.permute.xlu0 %6171 }
 0x9a2   : > { %v6214_v39 = vsel %vm1572_vm7, %v6172_v24, %v6174_v25  ;;  %v6213_v53 = vsel %vm1572_vm7, %v8544_v10, %v6172_v24  ;;  %v12663_v10 = vld [vmem:[#allocation2] sm:$0xff]  ;;  %v12666_v24 = vld [vmem:[#allocation2 + $0x130] sm:$0xff] }
 0x9a3   : > { %7062 = vrot.lane.b32.xlu1 %v12597_v23, %s13914_s28  ;;  %6277 = vmatprep.subr.bf16.mxu1 %v6214_v39  ;;  %v6180_v15 = vpop.permute.xlu1 %6179  ;;  %v8792_v25 = vld [vmem:[#allocation2 + $0x30] sm:$0xff] }
 0x9a4   : > { %6278 = vmatpush1.bf16.msra.mxu1 %v6213_v53  ;;  %7068 = vrot.lane.b32.xlu0 %v12603_v0, %s13914_s28 }
 0x9a7   : > { %7060 = vrot.lane.b32.xlu1 %v12607_v29, %s13914_s28 }
 0x9a8   : > { %7066 = vrot.lane.b32.xlu0 %v12304_v36, %s13914_s28 }
 0x9a9   : > { %v6178_v60 = vpop.permute.xlu0 %6177 }
 0x9aa   : > { %v6216_v14 = vsel %vm1572_vm7, %v6178_v60, %v6180_v15  ;;  %v6215_v52 = vsel %vm1572_vm7, %v6176_v46, %v6178_v60  ;;  %v8709_v60 = vld [vmem:[%s13657_s18 + $0x68] ss:$48 sps:$4 sm:$0xff]  }
 0x9ab   : > { %7070 = vrot.lane.b32.xlu1 %v12611_v61, %s13914_s28  ;;  %6279 = vmatprep.subr.bf16.mxu1 %v6216_v14  ;;  %v8793_v15 = vld [vmem:[#allocation2 + $0x58] sm:$0xff] }
 0x9ac   : > { %6280 = vmatpush1.bf16.msra.mxu1 %v6215_v52  ;;  %7076 = vrot.lane.b32.xlu0 %v12615_v7, %s13914_s28  ;;  %v12680_v14 = vld [vmem:[#allocation2 + $0x138] sm:$0xff] }
 0x9ad   : > { %v6186_v6 = vpop.permute.xlu0 %6185 }
 0x9af   : > { %7074 = vrot.lane.b32.xlu1 %v12623_v32, %s13914_s28 }
 0x9b0   : > { %7080 = vrot.lane.b32.xlu0 %v12627_v43, %s13914_s28 }
 0x9b1   : > { %v6184_v55 = vpop.permute.xlu1 %6183 }
 0x9b2   : > { %v6218_v22 = vsel %vm1572_vm7, %v6184_v55, %v6186_v6  ;;  %v12632_v51 = vpop.permute.xlu0 %6487  ;;  %v12686_v6 = vld [vmem:[#allocation2 + $0x160] sm:$0xff] }
 0x9b3   : > { %7072 = vrot.lane.b32.xlu1 %v12310_v45, %s13914_s28  ;;  %6281 = vmatprep.subr.bf16.mxu1 %v6218_v22 }
 0x9b4   : > { %7078 = vrot.lane.b32.xlu0 %v12314_v56, %s13914_s28 }
 0x9b5   : > { %v6182_v54 = vpop.permute.xlu1 %6181 }
 0x9b6   : > { %v6217_v30 = vsel %vm1572_vm7, %v6182_v54, %v6184_v55  ;;  %v12646_v46 = vpop.permute.xlu0 %8546  ;;  %v8710_v55 = vld [vmem:[%s13657_s18 + $0xcc] ss:$48 sps:$4 sm:$0xff]  }
 0x9b7   : > { %7082 = vrot.lane.b32.xlu1 %v12636_v17, %s13914_s28  ;;  %6282 = vmatpush1.bf16.msra.mxu1 %v6217_v30  ;;  %v12701_v30 = vld [vmem:[#allocation2 + $0x158] sm:$0xff] }
 0x9b8   : > { %6364 = vmatprep.subr.bf16.mxu1 %v8790_v41  ;;  %7088 = vrot.lane.b32.xlu0 %v12640_v28, %s13914_s28  ;;  %13919 = vst [vmem:[#allocation16_spill] sm:$0xff] %v12701_v30  ;;  %v8712_v41 = vld [vmem:[%s13657_s18 + $0xc8] ss:$48 sps:$4 sm:$0xff]  }
 0x9b9   : > { %v12652_v2 = vpop.permute.xlu1 %6489 }
 0x9ba   : > { %6284 = vmatmul.mubr.bf16.vlgmr.msra.gmra.mrb[16].mxu1 %v8704_v49  ;;  %v12659_v57 = vpop.permute.xlu0 %6495 }
 0x9bb   : > { %7086 = vrot.lane.b32.xlu1 %v12657_v9, %s13914_s28  ;;  %6365 = vmatpush1.bf16.msra.mxu1 %v12663_v10 }
 0x9bc   : > { %6366 = vmatprep.subr.bf16.mxu1 %v8792_v25  ;;  %7092 = vrot.lane.b32.xlu0 %v12666_v24, %s13914_s28  ;;  %v8713_v25 = vld [vmem:[%s13657_s18 + $0x12c] ss:$48 sps:$4 sm:$0xff]  }
 0x9bd   : > { %v12670_v39 = vpop.permute.xlu1 %6493  ;;  %6293 = vmatprep.mubr.bf16.mxu1 %v8707_v31 }
 0x9be   : > { %v12672_v53 = vpop.permute.xlu0 %6501 }
 0x9bf   : > { %7084 = vrot.lane.b32.xlu1 %v12322_v21, %s13914_s28  ;;  %6367 = vmatpush1.bf16.msra.mxu1 %v12663_v10 }
 0x9c0   : > { %6368 = vmatprep.subr.bf16.mxu1 %v8793_v15  ;;  %7090 = vrot.lane.b32.xlu0 %v12340_v3, %s13914_s28 }
 0x9c1   : > { %v12684_v52 = vpop.permute.xlu1 %6499 }
 0x9c2   : > { %v12691_v22 = vpop.permute.xlu0 %6505  ;;  %6294 = vmatmul.mubr.bf16.gmra.mrb[20].mxu1 %v8709_v60 }
 0x9c3   : > { %7094 = vrot.lane.b32.xlu1 %v12680_v14, %s13914_s28  ;;  %6369 = vmatpush1.bf16.msra.mxu1 %v12663_v10 }
 0x9c4   : > { %6370 = vmatprep.subr.bf16.mxu1 %v12294_v19  ;;  %7100 = vrot.lane.b32.xlu0 %v12686_v6, %s13914_s28  ;;  %v12711_v19 = vld [vmem:[#allocation2 + $0x180] sm:$0xff] }
 0x9c5   : > { %v12699_v54 = vpop.permute.xlu1 %8551  ;;  %6303 = vmatprep.mubr.bf16.mxu1 %v8710_v55  ;;  %13920 = vst [vmem:[#allocation22_spill] sm:$0xff] %v12711_v19  ;;  %v12733_v55 = vld [vmem:[#allocation2 + $0x1b0] sm:$0xff] }
 0x9c6   : > { %v12703_v49 = vpop.permute.xlu0 %6511  ;;  %13922 = vst [vmem:[#allocation15_spill] sm:$0xff] %v12733_v55 }
 0x9c7   : > { %7098 = vrot.lane.b32.xlu1 %v12701_v30, %s13914_s28  ;;  %6371 = vmatpush1.bf16.msra.mxu1 %v12663_v10  ;;  %v12834_v30 = vld [vmem:[#allocation2 + $0x270] sm:$0xff] }
 0x9c8   : > { %6372 = vmatprep.subr.bf16.mxu1 %v12300_v16  ;;  %7104 = vrot.lane.b32.xlu0 %v12711_v19, %s13914_s28  ;;  %v12727_v16 = vld [vmem:[#allocation2 + $0x188] sm:$0xff]  ;;  %13932 = vst [vmem:[#allocation31_spill] sm:$0xff] %v12834_v30 }
 0x9c9   : > { %v12716_v31 = vpop.permute.xlu1 %6507  ;;  %13921 = vst [vmem:[#allocation9_spill] sm:$0xff] %v12727_v16 }
 0x9ca   : > { %v12721_v60 = vpop.permute.xlu0 %8556  ;;  %6304 = vmatmul.mubr.bf16.gmra.mrb[24].mxu1 %v8712_v41  ;;  %v12751_v41 = vld [vmem:[#allocation2 + $0x1a8] sm:$0xff] }
 0x9cb   : > { %7096 = vrot.lane.b32.xlu1 %v12346_v58, %s13914_s28  ;;  %6373 = vmatpush1.bf16.msra.mxu1 %v12663_v10  ;;  %v8715_v58 = vld [vmem:[%s13657_s18 + $0x128] ss:$48 sps:$4 sm:$0xff]   ;;  %13923 = vst [vmem:[#allocation24_spill] sm:$0xff] %v12751_v41 }
 0x9cc   : > { %6374 = vmatprep.subr.bf16.mxu1 %v12318_v34  ;;  %7102 = vrot.lane.b32.xlu0 %v12350_v47, %s13914_s28  ;;  %v8718_v47 = vld [vmem:[%s13657_s18 + $0x4] ss:$48 sps:$4 sm:$0xff]  }
 0x9cd   : > { %v12731_v15 = vpop.permute.xlu1 %6513  ;;  %6313 = vmatprep.mubr.bf16.mxu1 %v8713_v25 }
 0x9ce   : > { %v12735_v19 = vpop.permute.xlu0 %6519 }
 0x9cf   : > { %7106 = vrot.lane.b32.xlu1 %v12727_v16, %s13914_s28  ;;  %6375 = vmatpush1.bf16.msra.mxu1 %v12663_v10 }
 0x9d0   : > { %6376 = vmatprep.subr.bf16.mxu1 %v12326_v18  ;;  %7112 = vrot.lane.b32.xlu0 %v12733_v55, %s13914_s28  ;;  %v12758_v18 = vld [vmem:[#allocation2 + $0x1d0] sm:$0xff] }
 0x9d1   : > { %v12746_v34 = vpop.permute.xlu1 %6517  ;;  %13924 = vst [vmem:[#allocation17_spill] sm:$0xff] %v12758_v18 }
 0x9d2   : > { %v12753_v25 = vpop.permute.xlu0 %6525  ;;  %6314 = vmatmul.mubr.bf16.gmra.mrb[28].mxu1 %v8715_v58  ;;  %v12771_v58 = vld [vmem:[#allocation2 + $0x1d8] sm:$0xff] }
 0x9d3   : > { %7110 = vrot.lane.b32.xlu1 %v12751_v41, %s13914_s28  ;;  %6377 = vmatpush1.bf16.msra.mxu1 %v12663_v10  ;;  %13925 = vst [vmem:[#allocation7_spill] sm:$0xff] %v12771_v58 }
 0x9d4   : > { %6378 = vmatprep.subr.bf16.mxu1 %v12330_v8  ;;  %7116 = vrot.lane.b32.xlu0 %v12758_v18, %s13914_s28  ;;  %v12777_v18 = vld [vmem:[#allocation2 + $0x200] sm:$0xff] }
 0x9d5   : > { %v12763_v55 = vpop.permute.xlu1 %6523  ;;  %6396 = vmatprep.mubr.bf16.mxu1 %v8718_v47  ;;  %13926 = vst [vmem:[#allocation12_spill] sm:$0xff] %v12777_v18  ;;  %v12796_v47 = vld [vmem:[#allocation2 + $0x220] sm:$0xff] }
 0x9d6   : > { %v12765_v16 = vpop.permute.xlu0 %6529  ;;  %13928 = vst [vmem:[#allocation18_spill] sm:$0xff] %v12796_v47 }
 0x9d7   : > { %7108 = vrot.lane.b32.xlu1 %v12358_v48, %s13914_s28  ;;  %6379 = vmatpush1.bf16.msra.mxu1 %v12663_v10  ;;  %v12789_v48 = vld [vmem:[#allocation2 + $0x1f8] sm:$0xff] }
 0x9d8   : > { %6380 = vmatprep.subr.bf16.mxu1 %v12336_v44  ;;  %7114 = vrot.lane.b32.xlu0 %v12372_v33, %s13914_s28  ;;  %13927 = vst [vmem:[#allocation25_spill] sm:$0xff] %v12789_v48 }
 0x9d9   : > { %v12775_v8 = vpop.permute.xlu1 %8561 }
 0x9da   : > { %v12779_v41 = vpop.permute.xlu0 %6535 }
 0x9db   : > { %7118 = vrot.lane.b32.xlu1 %v12771_v58, %s13914_s28  ;;  %6381 = vmatpush1.bf16.msra.mxu1 %v12663_v10  ;;  %v12815_v58 = vld [vmem:[#allocation2 + $0x250] sm:$0xff] }
 0x9dc   : > { %6382 = vmatprep.subr.bf16.mxu1 %v12354_v40  ;;  %7124 = vrot.lane.b32.xlu0 %v12777_v18, %s13914_s28  ;;  %13930 = vst [vmem:[#allocation26_spill] sm:$0xff] %v12815_v58 }
 0x9dd   : > { %v12787_v44 = vpop.permute.xlu1 %6531 }
 0x9de   : > { %v12791_v33 = vpop.permute.xlu0 %8566 }
 0x9df   : > { %7122 = vrot.lane.b32.xlu1 %v12789_v48, %s13914_s28  ;;  %6383 = vmatpush1.bf16.msra.mxu1 %v12663_v10  ;;  %v12809_v48 = vld [vmem:[#allocation2 + $0x228] sm:$0xff] }
 0x9e0   : > { %6384 = vmatprep.subr.bf16.mxu1 %v12362_v11  ;;  %7128 = vrot.lane.b32.xlu0 %v12796_v47, %s13914_s28  ;;  %13929 = vst [vmem:[#allocation14_spill] sm:$0xff] %v12809_v48 }
 0x9e1   : > { %v12801_v40 = vpop.permute.xlu1 %6537 }
 0x9e2   : > { %v12803_v18 = vpop.permute.xlu0 %6543 }
 0x9e3   : > { %7120 = vrot.lane.b32.xlu1 %v12414_v26, %s13914_s28  ;;  %6385 = vmatpush1.bf16.msra.mxu1 %v12663_v10  ;;  %v12827_v26 = vld [vmem:[#allocation2 + $0x248] sm:$0xff] }
 0x9e4   : > { %6386 = vmatprep.subr.bf16.mxu1 %v12366_v63  ;;  %7126 = vrot.lane.b32.xlu0 %v12426_v1, %s13914_s28  ;;  %13931 = vst [vmem:[#allocation30_spill] sm:$0xff] %v12827_v26 }
 0x9e5   : > { %v12813_v11 = vpop.permute.xlu1 %6541 }
 0x9e6   : > { %v12817_v47 = vpop.permute.xlu0 %6549 }
 0x9e7   : > { %7130 = vrot.lane.b32.xlu1 %v12809_v48, %s13914_s28  ;;  %6387 = vmatpush1.bf16.msra.mxu1 %v12663_v10 }
 0x9e8   : > { %6388 = vmatprep.subr.bf16.mxu1 %v12420_v20  ;;  %7136 = vrot.lane.b32.xlu0 %v12815_v58, %s13914_s28 }
 0x9e9   : > { %v12825_v63 = vpop.permute.xlu1 %6547 }
 0x9ea   : > { %v12829_v1 = vpop.permute.xlu0 %6553 }
 0x9eb   : > { %7134 = vrot.lane.b32.xlu1 %v12827_v26, %s13914_s28  ;;  %6389 = vmatpush1.bf16.msra.mxu1 %v12663_v10  ;;  %v12847_v26 = vld [vmem:[#allocation2 + $0x278] sm:$0xff] }
 0x9ec   : > { %6390 = vmatprep.subr.bf16.mxu1 %v12432_v50  ;;  %7140 = vrot.lane.b32.xlu0 %v12834_v30, %s13914_s28  ;;  %13933 = vst [vmem:[#allocation35_spill] sm:$0xff] %v12847_v26 }
 0x9ed   : > { %v12839_v20 = vpop.permute.xlu1 %8571 }
 0x9ee   : > { %v12841_v58 = vpop.permute.xlu0 %6559 }
 0x9ef   : > { %7132 = vrot.lane.b32.xlu1 %v12438_v37, %s13914_s28  ;;  %6391 = vmatpush1.bf16.msra.mxu1 %v12663_v10 }
 0x9f0   : > { %6392 = vmatprep.subr.bf16.mxu1 %v12444_v13  ;;  %7349 = vrot.lane.b32.xlu0 %v12565_v42, %s8828_s24  ;;  %v8548_v13 = vunpack.i.l.bf16 %v12646_v46  ;;  %v8716_v42 = vld [vmem:[%s13657_s18] ss:$48 sps:$4 sm:$0xff]  }
 0x9f1   : > { %v12851_v50 = vpop.permute.xlu1 %6555 }
 0x9f2   : > { %v12853_v48 = vpop.permute.xlu0 %8576 }
 0x9f3   : > { %7142 = vrot.lane.b32.xlu1 %v12847_v26, %s13914_s28  ;;  %6393 = vmatpush1.bf16.msra.mxu1 %v12663_v10 }
 0x9f4   : > { %6394 = vmatprep.subr.bf16.mxu1 %v12459_v4  ;;  %7353 = vrot.lane.b32.xlu0 %v12575_v5, %s8828_s24  ;;  %v6583_v4 = vsel %vm6581_vm1, %v12632_v51, %v12652_v2  ;;  %v8719_v5 = vld [vmem:[%s13657_s18 + $0x64] ss:$48 sps:$4 sm:$0xff]   ;;  %v6585_v2 = vsel %vm6581_vm1, %v12670_v39, %v12659_v57 }
 0x9f5   : > { %v12861_v37 = vpop.permute.xlu1 %6561  ;;  %v8722_v57 = vld [vmem:[%s13657_s18 + $0xc4] ss:$48 sps:$4 sm:$0xff]  }
 0x9f6   : > { %v12867_v30 = vpop.permute.xlu0 %6567 }
 0x9f7   : > { %13934 = vst [vmem:[#allocation32_spill] sm:$0xff] %v12867_v30  ;;  %7347 = vrot.lane.b32.xlu1 %v12571_v59, %s8828_s24  ;;  %6395 = vmatpush1.bf16.msra.mxu1 %v12663_v10  ;;  %v8549_v30 = vunpack.i.h.bf16 %v12646_v46  ;;  %v6582_v10 = vsel %vm6581_vm1, %v8548_v13, %v12632_v51  ;;  %v8553_v46 = vunpack.i.l.bf16 %v12699_v54 }
 0x9f8   : > { %6646 = vmatprep.subr.bf16.mxu1 %v6583_v4  ;;  %7351 = vrot.lane.b32.xlu0 %v12585_v38, %s8828_s24 }
 0x9f9   : > { %v12877_v26 = vpop.permute.xlu1 %6565  ;;  %v6584_v51 = vsel %vm6581_vm1, %v8549_v30, %v12670_v39  ;;  %v8554_v39 = vunpack.i.h.bf16 %v12699_v54 }
 0x9fa   : > { %6397 = vmatmul.mubr.bf16.vlgmr.msra.gmra.mrb[16].mxu1 %v8716_v42  ;;  %v12885_v59 = vpop.permute.xlu0 %6573  ;;  %v8721_v42 = vld [vmem:[%s13657_s18 + $0x60] ss:$48 sps:$4 sm:$0xff]  }
 0x9fb   : > { %7345 = vrot.lane.b32.xlu1 %v12579_v12, %s8828_s24  ;;  %6647 = vmatpush1.bf16.msra.mxu1 %v6582_v10  ;;  %v6588_v54 = vsel %vm6581_vm1, %v8554_v39, %v12691_v22 }
 0x9fc   : > { %6648 = vmatprep.subr.bf16.mxu1 %v6585_v2  ;;  %7361 = vrot.lane.b32.xlu0 %v12591_v35, %s8828_s24  ;;  %v6587_v35 = vsel %vm6581_vm1, %v12684_v52, %v12672_v53  ;;  %v6589_v53 = vsel %vm6581_vm1, %v12691_v22, %v12716_v31  ;;  %v8725_v22 = vld [vmem:[%s13657_s18 + $0x124] ss:$48 sps:$4 sm:$0xff]  }
 0x9fd   : > { %v12894_v4 = vpop.permute.xlu1 %6571  ;;  %6406 = vmatprep.mubr.bf16.mxu1 %v8719_v5 }
 0x9fe   : > { %v12899_v13 = vpop.permute.xlu0 %6577 }
 0x9ff   : > { %7355 = vrot.lane.b32.xlu1 %v12587_v62, %s8828_s24  ;;  %6649 = vmatpush1.bf16.msra.mxu1 %v6584_v51  ;;  %v6586_v62 = vsel %vm6581_vm1, %v8553_v46, %v12684_v52  ;;  %v8558_v52 = vunpack.i.l.bf16 %v12721_v60  ;;  %v8724_v46 = vld [vmem:[%s13657_s18 + $0xc0] ss:$48 sps:$4 sm:$0xff]   ;;  %v8559_v51 = vunpack.i.h.bf16 %v12721_v60 }
 0xa00   : > { %6650 = vmatprep.subr.bf16.mxu1 %v6587_v35  ;;  %7365 = vrot.lane.b32.xlu0 %v12603_v0, %s8828_s24 }
 0xa01   : > { %v12911_v5 = vpop.permute.xlu1 %6569  ;;  %v6592_v60 = vsel %vm6581_vm1, %v8559_v51, %v12746_v34 }
 0xa02   : > { %v12919_v30 = vpop.permute.xlu0 %6575  ;;  %6407 = vmatmul.mubr.bf16.gmra.mrb[20].mxu1 %v8721_v42  ;;  %v6590_v42 = vsel %vm6581_vm1, %v8558_v52, %v12703_v49 }
 0xa03   : > { %7359 = vrot.lane.b32.xlu1 %v12597_v23, %s8828_s24  ;;  %6651 = vmatpush1.bf16.msra.mxu1 %v6586_v62  ;;  %v8564_v62 = vunpack.i.h.bf16 %v12775_v8 }
 0xa04   : > { %6652 = vmatprep.subr.bf16.mxu1 %v6589_v53  ;;  %7363 = vrot.lane.b32.xlu0 %v12304_v36, %s8828_s24  ;;  %v6591_v36 = vsel %vm6581_vm1, %v12703_v49, %v12731_v15  ;;  %v8563_v49 = vunpack.i.l.bf16 %v12775_v8 }
 0xa05   : > { %v12928_v10 = vpop.permute.xlu1 %6579  ;;  %6416 = vmatprep.mubr.bf16.mxu1 %v8722_v57  ;;  %v6596_v8 = vsel %vm6581_vm1, %v8564_v62, %v12765_v16  ;;  %v13938_v62 = vld [vmem:[#allocation9_spill] sm:$0xff] }
 0xa06   : > { %v12933_v2 = vpop.permute.xlu0 %7052  ;;  %v6594_v53 = vsel %vm6581_vm1, %v8563_v49, %v12763_v55 }
 0xa07   : > { %7357 = vrot.lane.b32.xlu1 %v12607_v29, %s8828_s24  ;;  %6653 = vmatpush1.bf16.msra.mxu1 %v6588_v54 }
 0xa08   : > { %6654 = vmatprep.subr.bf16.mxu1 %v6591_v36  ;;  %7373 = vrot.lane.b32.xlu0 %v12615_v7, %s8828_s24  ;;  %v6593_v7 = vsel %vm6581_vm1, %v12746_v34, %v12735_v19  ;;  %v6595_v19 = vsel %vm6581_vm1, %v12763_v55, %v12753_v25  ;;  %v8730_v34 = vld [vmem:[%s13657_s18 + $0x14] ss:$48 sps:$4 sm:$0xff]   ;;  %v8568_v55 = vunpack.i.l.bf16 %v12791_v33 }
 0xa09   : > { %v12945_v31 = vpop.permute.xlu1 %7050 }
 0xa0a   : > { %v12953_v35 = vpop.permute.xlu0 %7056  ;;  %6417 = vmatmul.mubr.bf16.gmra.mrb[24].mxu1 %v8724_v46 }
 0xa0b   : > { %7367 = vrot.lane.b32.xlu1 %v12611_v61, %s8828_s24  ;;  %6655 = vmatpush1.bf16.msra.mxu1 %v6590_v42  ;;  %v8727_v61 = vld [vmem:[%s13657_s18 + $0x120] ss:$48 sps:$4 sm:$0xff]  }
 0xa0c   : > { %6656 = vmatprep.subr.bf16.mxu1 %v6593_v7  ;;  %7377 = vrot.lane.b32.xlu0 %v12627_v43, %s8828_s24  ;;  %v8579_v7 = vunpack.i.h.bf16 %v12853_v48 }
 0xa0d   : > { %v12962_v15 = vpop.permute.xlu1 %7048  ;;  %6426 = vmatprep.mubr.bf16.mxu1 %v8725_v22  ;;  %v8574_v22 = vunpack.i.h.bf16 %v12839_v20 }
 0xa0e   : > { %v12967_v57 = vpop.permute.xlu0 %7054 }
 0xa0f   : > { %7371 = vrot.lane.b32.xlu1 %v12623_v32, %s8828_s24  ;;  %6657 = vmatpush1.bf16.msra.mxu1 %v6592_v60  ;;  %v8794_v60 = vld [vmem:[#allocation2 + $0x150] sm:$0xff] }
 0xa10   : > { %6658 = vmatprep.subr.bf16.mxu1 %v6595_v19  ;;  %7138 = vrot.lane.b32.xlu0 %v12450_v27, %s13914_s28  ;;  %v6597_v27 = vsel %vm6581_vm1, %v12765_v16, %v12787_v44  ;;  %v8569_v44 = vunpack.i.h.bf16 %v12791_v33  ;;  %v6598_v16 = vsel %vm6581_vm1, %v8568_v55, %v12779_v41  ;;  %v8573_v33 = vunpack.i.l.bf16 %v12839_v20  ;;  %v8795_v19 = vld [vmem:[#allocation2 + $0x178] sm:$0xff] }
 0xa11   : > { %v12979_v39 = vpop.permute.xlu1 %7058 }
 0xa12   : > { %v12987_v52 = vpop.permute.xlu0 %7064  ;;  %6427 = vmatmul.mubr.bf16.gmra.mrb[28].mxu1 %v8727_v61  ;;  %v13937_v61 = vld [vmem:[#allocation32_spill] sm:$0xff] }
 0xa13   : > { %7369 = vrot.lane.b32.xlu1 %v12310_v45, %s8828_s24  ;;  %6659 = vmatpush1.bf16.msra.mxu1 %v6594_v53  ;;  %v6599_v45 = vsel %vm6581_vm1, %v12779_v41, %v12801_v40  ;;  %v6600_v41 = vsel %vm6581_vm1, %v8569_v44, %v12813_v11  ;;  %v6611_v53 = vsel %vm6581_vm1, %v12894_v4, %v12885_v59  ;;  %v13941_v44 = vld [vmem:[#allocation17_spill] sm:$0xff] }
 0xa14   : > { %6660 = vmatprep.subr.bf16.mxu1 %v6597_v27  ;;  %7375 = vrot.lane.b32.xlu0 %v12314_v56, %s8828_s24  ;;  %v13939_v27 = vld [vmem:[#allocation15_spill] sm:$0xff]  ;;  %v6613_v59 = vsel %vm6581_vm1, %v12899_v13, %v12928_v10 }
 0xa15   : > { %v12996_v25 = vpop.permute.xlu1 %7062  ;;  %6678 = vmatprep.mubr.bf16.mxu1 %v8730_v34  ;;  %v13942_v10 = vld [vmem:[#allocation11_spill] sm:$0xff] }
 0xa16   : > { %v13001_v54 = vpop.permute.xlu0 %7068 }
 0xa17   : > { %7379 = vrot.lane.b32.xlu1 %v12636_v17, %s8828_s24  ;;  %6661 = vmatpush1.bf16.msra.mxu1 %v6596_v8  ;;  %v6601_v17 = vsel %vm6581_vm1, %v12813_v11, %v12803_v18  ;;  %v6603_v18 = vsel %vm6581_vm1, %v12825_v63, %v12817_v47  ;;  %v6602_v11 = vsel %vm6581_vm1, %v8573_v33, %v12825_v63  ;;  %v8578_v47 = vunpack.i.l.bf16 %v12853_v48  ;;  %v8796_v33 = vld [vmem:[#allocation2 + $0x1a0] sm:$0xff] }
 0xa18   : > { %6662 = vmatprep.subr.bf16.mxu1 %v6599_v45  ;;  %7385 = vrot.lane.b32.xlu0 %v12640_v28, %s8828_s24  ;;  %v6604_v63 = vsel %vm6581_vm1, %v8574_v22, %v12829_v1  ;;  %v6608_v48 = vsel %vm6581_vm1, %v8579_v7, %v12877_v26  ;;  %v13940_v45 = vld [vmem:[#allocation24_spill] sm:$0xff] }
 0xa19   : > { %v13010_v56 = vpop.permute.xlu1 %7060  ;;  %v8731_v22 = vld [vmem:[%s13657_s18 + $0x74] ss:$48 sps:$4 sm:$0xff]  }
 0xa1a   : > { %v13015_v46 = vpop.permute.xlu0 %7066 }
 0xa1b   : > { %7383 = vrot.lane.b32.xlu1 %v12657_v9, %s8828_s24  ;;  %6663 = vmatpush1.bf16.msra.mxu1 %v6598_v16 }
 0xa1c   : > { %6664 = vmatprep.subr.bf16.mxu1 %v6601_v17  ;;  %7389 = vrot.lane.b32.xlu0 %v12666_v24, %s8828_s24 }
 0xa1d   : > { %v13024_v28 = vpop.permute.xlu1 %7070 }
 0xa1e   : > { %v13029_v40 = vpop.permute.xlu0 %7076 }
 0xa1f   : > { %7381 = vrot.lane.b32.xlu1 %v12322_v21, %s8828_s24  ;;  %6665 = vmatpush1.bf16.msra.mxu1 %v6600_v41  ;;  %v6605_v21 = vsel %vm6581_vm1, %v12829_v1, %v12851_v50  ;;  %v6607_v50 = vsel %vm6581_vm1, %v12841_v58, %v12861_v37  ;;  %v6606_v1 = vsel %vm6581_vm1, %v8578_v47, %v12841_v58  ;;  %v8797_v41 = vld [vmem:[#allocation2 + $0x1c8] sm:$0xff]  ;;  %v13945_v47 = vld [vmem:[#allocation12_spill] sm:$0xff] }
 0xa20   : > { %6666 = vmatprep.subr.bf16.mxu1 %v6603_v18  ;;  %7387 = vrot.lane.b32.xlu0 %v12340_v3, %s8828_s24  ;;  %v6609_v37 = vsel %vm6581_vm1, %v12877_v26, %v13937_v61  ;;  %v6610_v26 = vsel %vm6581_vm1, %v12911_v5, %v12894_v4  ;;  %v6612_v4 = vsel %vm6581_vm1, %v12919_v30, %v12899_v13  ;;  %v8728_v5 = vld [vmem:[%s13657_s18 + $0x10] ss:$48 sps:$4 sm:$0xff]  }
 0xa21   : > { %v13038_v36 = vpop.permute.xlu1 %7074  ;;  %v13947_v61 = vld [vmem:[#allocation18_spill] sm:$0xff] }
 0xa22   : > { %v13043_v51 = vpop.permute.xlu0 %7080 }
 0xa23   : > { %7391 = vrot.lane.b32.xlu1 %v12680_v14, %s8828_s24  ;;  %6667 = vmatpush1.bf16.msra.mxu1 %v6602_v11  ;;  %v13935_v14 = vld [vmem:[#allocation16_spill] sm:$0xff]  ;;  %v13943_v11 = vld [vmem:[#allocation7_spill] sm:$0xff] }
 0xa24   : > { %6668 = vmatprep.subr.bf16.mxu1 %v6605_v21  ;;  %7397 = vrot.lane.b32.xlu0 %v12686_v6, %s8828_s24  ;;  %v13936_v6 = vld [vmem:[#allocation22_spill] sm:$0xff]  ;;  %v13944_v21 = vld [vmem:[#allocation23_spill] sm:$0xff] }
 0xa25   : > { %v13052_v3 = vpop.permute.xlu1 %7072 }
 0xa26   : > { %v13057_v20 = vpop.permute.xlu0 %7078 }
 0xa27   : > { %7395 = vrot.lane.b32.xlu1 %v13935_v14, %s8828_s24  ;;  %6669 = vmatpush1.bf16.msra.mxu1 %v6604_v63 }
 0xa28   : > { %6670 = vmatprep.subr.bf16.mxu1 %v6607_v50  ;;  %7401 = vrot.lane.b32.xlu0 %v13936_v6, %s8828_s24 }
 0xa29   : > { %v13066_v42 = vpop.permute.xlu1 %7082 }
 0xa2a   : > { %v13071_v49 = vpop.permute.xlu0 %7088 }
 0xa2b   : > { %7393 = vrot.lane.b32.xlu1 %v8794_v60, %s8828_s24  ;;  %6671 = vmatpush1.bf16.msra.mxu1 %v6606_v1  ;;  %v8733_v1 = vld [vmem:[%s13657_s18 + $0x70] ss:$48 sps:$4 sm:$0xff]   ;;  %v13946_v60 = vld [vmem:[#allocation25_spill] sm:$0xff] }
 0xa2c   : > { %6672 = vmatprep.subr.bf16.mxu1 %v6609_v37  ;;  %7399 = vrot.lane.b32.xlu0 %v8795_v19, %s8828_s24  ;;  %v8734_v19 = vld [vmem:[%s13657_s18 + $0xd4] ss:$48 sps:$4 sm:$0xff]  }
 0xa2d   : > { %v13078_v34 = vpop.permute.xlu1 %7086 }
 0xa2e   : > { %v13082_v58 = vpop.permute.xlu0 %7092 }
 0xa2f   : > { %7403 = vrot.lane.b32.xlu1 %v13938_v62, %s8828_s24  ;;  %6673 = vmatpush1.bf16.msra.mxu1 %v6608_v48 }
 0xa30   : > { %6674 = vmatprep.subr.bf16.mxu1 %v6611_v53  ;;  %7409 = vrot.lane.b32.xlu0 %v13939_v27, %s8828_s24  ;;  %v8798_v53 = vld [vmem:[#allocation2 + $0x1f0] sm:$0xff]  ;;  %v6749_v27 = vld [vmem:[#allocation2 + $0x88] sm:$0xff] }
 0xa31   : > { %v13091_v55 = vpop.permute.xlu1 %7084 }
 0xa32   : > { %v13096_v8 = vpop.permute.xlu0 %7090 }
 0xa33   : > { %7407 = vrot.lane.b32.xlu1 %v13940_v45, %s8828_s24  ;;  %6675 = vmatpush1.bf16.msra.mxu1 %v6610_v26 }
 0xa34   : > { %6676 = vmatprep.subr.bf16.mxu1 %v6613_v59  ;;  %7413 = vrot.lane.b32.xlu0 %v13941_v44, %s8828_s24  ;;  %v8736_v59 = vld [vmem:[%s13657_s18 + $0xd0] ss:$48 sps:$4 sm:$0xff]  }
 0xa35   : > { %v13105_v16 = vpop.permute.xlu1 %7094 }
 0xa36   : > { %v7101_v17 = vpop.permute.xlu0 %7100 }
 0xa37   : > { %7405 = vrot.lane.b32.xlu1 %v8796_v33, %s8828_s24  ;;  %6677 = vmatpush1.bf16.msra.mxu1 %v6612_v4 }
 0xa38   : > { %6815 = vmatprep.subr.bf16.mxu1 %v13942_v10  ;;  %7411 = vrot.lane.b32.xlu0 %v8797_v41, %s8828_s24  ;;  %v6751_v10 = vld [vmem:[#allocation2 + $0xb0] sm:$0xff] }
 0xa39   : > { %v7099_v18 = vpop.permute.xlu1 %7098 }
 0xa3a   : > { %6679 = vmatmul.mubr.bf16.vlgmr.msra.gmra.mrb[16].mxu1 %v8728_v5  ;;  %v7105_v13 = vpop.permute.xlu0 %7104  ;;  %v13120_v30 = vsel %vm1572_vm7, %v7099_v18, %v7101_v17  ;;  %v13948_v5 = vld [vmem:[#allocation14_spill] sm:$0xff] }
 0xa3b   : > { %7415 = vrot.lane.b32.xlu1 %v13943_v11, %s8828_s24  ;;  %6816 = vmatpush1.bf16.msra.mxu1 %v12579_v12  ;;  %v8737_v17 = vld [vmem:[%s13657_s18 + $0x134] ss:$48 sps:$4 sm:$0xff]  }
 0xa3c   : > { %6817 = vmatprep.subr.bf16.mxu1 %v13944_v21  ;;  %7421 = vrot.lane.b32.xlu0 %v13945_v47, %s8828_s24  ;;  %v6753_v21 = vld [vmem:[#allocation2 + $0xd8] sm:$0xff] }
 0xa3d   : > { %v7097_v63 = vpop.permute.xlu1 %7096  ;;  %6688 = vmatprep.mubr.bf16.mxu1 %v8731_v22 }
 0xa3e   : > { %v13129_v50 = vsel %vm1572_vm7, %v7097_v63, %v7099_v18  ;;  %v7103_v7 = vpop.permute.xlu0 %7102  ;;  %v8760_v18 = vld [vmem:[%s13657_s18 + $0x2c] ss:$48 sps:$4 sm:$0xff]   ;;  %v8739_v63 = vld [vmem:[%s13657_s18 + $0x130] ss:$48 sps:$4 sm:$0xff]  }
 0xa3f   : > { %7419 = vrot.lane.b32.xlu1 %v13946_v60, %s8828_s24  ;;  %6818 = vmatpush1.bf16.msra.mxu1 %v12585_v38  ;;  %v13138_v12 = vsel %vm1572_vm7, %v7103_v7, %v7105_v13  ;;  %v8799_v38 = vld [vmem:[#allocation2 + $0x218] sm:$0xff] }
 0xa40   : > { %6819 = vmatprep.subr.bf16.mxu1 %v12597_v23  ;;  %7425 = vrot.lane.b32.xlu0 %v13947_v61, %s8828_s24 }
 0xa41   : > { %v7107_v37 = vpop.permute.xlu1 %7106  ;;  %7537 = vmatprep.mubr.bf16.mxu0 %v8760_v18  ;;  %v6759_v18 = vld [vmem:[#allocation2 + $0x150] sm:$0xff] }
 0xa42   : > { %v7113_v48 = vpop.permute.xlu0 %7112  ;;  %6689 = vmatmul.mubr.bf16.gmra.mrb[20].mxu1 %v8733_v1  ;;  %v13147_v62 = vsel %vm1572_vm7, %v7105_v13, %v7107_v37  ;;  %v13951_v13 = vld [vmem:[#allocation31_spill] sm:$0xff]  ;;  %v8800_v1 = vld [vmem:[#allocation2 + $0x240] sm:$0xff] }
 0xa43   : > { %7417 = vrot.lane.b32.xlu1 %v8798_v53, %s8828_s24  ;;  %6820 = vmatpush1.bf16.msra.mxu1 %v12607_v29  ;;  %v6755_v53 = vld [vmem:[#allocation2 + $0x100] sm:$0xff] }
 0xa44   : > { %6821 = vmatprep.subr.bf16.mxu1 %v12603_v0  ;;  %7423 = vrot.lane.b32.xlu0 %v8799_v38, %s8828_s24  ;;  %v13949_v0 = vld [vmem:[#allocation26_spill] sm:$0xff] }
 0xa45   : > { %v7111_v23 = vpop.permute.xlu1 %7110  ;;  %6698 = vmatprep.mubr.bf16.mxu1 %v8734_v19  ;;  %v7595_v19 = vld [vmem:[%s13658_s19 + $0x8] sm:$0xff] }
 0xa46   : > { %v7117_v26 = vpop.permute.xlu0 %7116  ;;  %v13157_v4 = vsel %vm1572_vm7, %v7111_v23, %v7113_v48  ;;  %v8742_v48 = vld [vmem:[%s13657_s18 + $0x1c] ss:$48 sps:$4 sm:$0xff]  }
 0xa47   : > { %7427 = vrot.lane.b32.xlu1 %v13948_v5, %s8828_s24  ;;  %6822 = vmatpush1.bf16.msra.mxu1 %v6749_v27  ;;  %v7594_v27 = vld [vmem:[%s13658_s19] sm:$0xff] }
 0xa48   : > { %6823 = vmatprep.subr.bf16.mxu1 %v12623_v32  ;;  %7433 = vrot.lane.b32.xlu0 %v13949_v0, %s8828_s24  ;;  %v13950_v32 = vld [vmem:[#allocation30_spill] sm:$0xff]  ;;  %v6757_v0 = vld [vmem:[#allocation2 + $0x128] sm:$0xff] }
 0xa49   : > { %v7109_v29 = vpop.permute.xlu1 %7108 }
 0xa4a   : > { %v13168_v33 = vsel %vm1572_vm7, %v7109_v29, %v7111_v23  ;;  %v7115_v41 = vpop.permute.xlu0 %7114  ;;  %6699 = vmatmul.mubr.bf16.gmra.mrb[24].mxu1 %v8736_v59  ;;  %v7597_v59 = vld [vmem:[%s13658_s19 + $0x18] sm:$0xff] }
 0xa4b   : > { %7431 = vrot.lane.b32.xlu1 %v13950_v32, %s8828_s24  ;;  %6824 = vmatpush1.bf16.msra.mxu1 %v6751_v10  ;;  %v13176_v22 = vsel %vm1572_vm7, %v7115_v41, %v7117_v26  ;;  %v7599_v41 = vld [vmem:[%s13658_s19 + $0x28] sm:$0xff] }
 0xa4c   : > { %6825 = vmatprep.subr.bf16.mxu1 %v12627_v43  ;;  %7437 = vrot.lane.b32.xlu0 %v13951_v13, %s8828_s24  ;;  %v8801_v43 = vld [vmem:[#allocation2 + $0x268] sm:$0xff] }
 0xa4d   : > { %v7119_v11 = vpop.permute.xlu1 %7118  ;;  %6708 = vmatprep.mubr.bf16.mxu1 %v8737_v17  ;;  %v7596_v17 = vld [vmem:[%s13658_s19 + $0x10] sm:$0xff] }
 0xa4e   : > { %v7125_v47 = vpop.permute.xlu0 %7124  ;;  %v13185_v7 = vsel %vm1572_vm7, %v7117_v26, %v7119_v11 }
 0xa4f   : > { %7429 = vrot.lane.b32.xlu1 %v8800_v1, %s8828_s24  ;;  %6826 = vmatpush1.bf16.msra.mxu1 %v6753_v21  ;;  %v6761_v1 = vld [vmem:[#allocation2 + $0x178] sm:$0xff] }
 0xa50   : > { %6827 = vmatprep.subr.bf16.mxu1 %v12657_v9  ;;  %7435 = vrot.lane.b32.xlu0 %v8801_v43, %s8828_s24  ;;  %v13952_v9 = vld [vmem:[#allocation35_spill] sm:$0xff] }
 0xa51   : > { %v7123_v37 = vpop.permute.xlu1 %7122 }
 0xa52   : > { %v7129_v38 = vpop.permute.xlu0 %7128  ;;  %6709 = vmatmul.mubr.bf16.gmra.mrb[28].mxu1 %v8739_v63  ;;  %v13197_v23 = vsel %vm1572_vm7, %v7123_v37, %v7125_v47  ;;  %v7601_v63 = vld [vmem:[%s13658_s19 + $0x38] sm:$0xff] }
 0xa53   : > { %7439 = vrot.lane.b32.xlu1 %v13952_v9, %s8828_s24  ;;  %6828 = vmatpush1.bf16.msra.mxu1 %v6755_v53 }
 0xa54   : > { %6829 = vmatprep.subr.bf16.mxu1 %v12666_v24  ;;  %7609 = vperm.xlu0 %8332, %v7595_v19  }
 0xa55   : > { %v7121_v26 = vpop.permute.xlu1 %7120  ;;  %6847 = vmatprep.mubr.bf16.mxu1 %v8742_v48  ;;  %v7659_v48 = vld [vmem:[%s13659_s20 + $0x8] sm:$0xff] }
 0xa56   : > { %v13209_v5 = vsel %vm1572_vm7, %v7121_v26, %v7123_v37  ;;  %v7127_v29 = vpop.permute.xlu0 %7126  ;;  %v7661_v26 = vld [vmem:[%s13659_s20 + $0x18] sm:$0xff] }
 0xa57   : > { %7604 = vperm.xlu1 %8334, %v7594_v27   ;;  %6830 = vmatpush1.bf16.msra.mxu1 %v6757_v0  ;;  %v13212_v24 = vsel %vm1572_vm7, %v7127_v29, %v7129_v38 }
 0xa58   : > { %6831 = vmatprep.subr.bf16.mxu1 %v13935_v14  ;;  %7619 = vperm.xlu0 %8332, %v7597_v59   ;;  %v7598_v14 = vld [vmem:[%s13658_s19 + $0x20] sm:$0xff]  ;;  %v6765_v59 = vld [vmem:[#allocation2 + $0x1c8] sm:$0xff] }
 0xa59   : > { %v7131_v10 = vpop.permute.xlu1 %7130 }
 0xa5a   : > { %v7137_v11 = vpop.permute.xlu0 %7136  ;;  %v13222_v21 = vsel %vm1572_vm7, %v7129_v38, %v7131_v10  ;;  %v6763_v38 = vld [vmem:[#allocation2 + $0x1a0] sm:$0xff]  ;;  %v7663_v10 = vld [vmem:[%s13659_s20 + $0x28] sm:$0xff] }
 0xa5b   : > { %7614 = vperm.xlu1 %8334, %v7596_v17   ;;  %6832 = vmatpush1.bf16.msra.mxu1 %v6759_v18 }
 0xa5c   : > { %6833 = vmatprep.subr.bf16.mxu1 %v13936_v6  ;;  %7629 = vperm.xlu0 %8332, %v7599_v41   ;;  %v7600_v6 = vld [vmem:[%s13658_s19 + $0x30] sm:$0xff] }
 0xa5d   : > { %v7135_v47 = vpop.permute.xlu1 %7134 }
 0xa5e   : > { %v13231_v43 = vpop.permute.xlu0 %7140  ;;  %v13234_v37 = vsel %vm1572_vm7, %v7135_v47, %v7137_v11  ;;  %v6767_v11 = vld [vmem:[#allocation2 + $0x1f0] sm:$0xff] }
 0xa5f   : > { %7624 = vperm.xlu1 %8334, %v7598_v14   ;;  %6834 = vmatpush1.bf16.msra.mxu1 %v6761_v1 }
 0xa60   : > { %6835 = vmatprep.subr.bf16.mxu1 %v13940_v45  ;;  %7639 = vperm.xlu0 %8332, %v7601_v63   ;;  %v7658_v45 = vld [vmem:[%s13659_s20] sm:$0xff] }
 0xa61   : > { %v7133_v19 = vpop.permute.xlu1 %7132 }
 0xa62   : > { %v13244_v53 = vsel %vm1572_vm7, %v7133_v19, %v7135_v47  ;;  %v7350_v9 = vpop.permute.xlu0 %7349  ;;  %v7665_v47 = vld [vmem:[%s13659_s20 + $0x38] sm:$0xff]  ;;  %v7664_v19 = vld [vmem:[%s13659_s20 + $0x30] sm:$0xff] }
 0xa63   : > { %7634 = vperm.xlu1 %8334, %v7600_v6   ;;  %6836 = vmatpush1.bf16.msra.mxu1 %v6763_v38  ;;  %v6769_v6 = vld [vmem:[#allocation2 + $0x218] sm:$0xff] }
 0xa64   : > { %6837 = vmatprep.subr.bf16.mxu1 %v13941_v44  ;;  %7673 = vperm.xlu0 %8332, %v7659_v48   ;;  %v7660_v44 = vld [vmem:[%s13659_s20 + $0x10] sm:$0xff] }
 0xa65   : > { %v7143_v27 = vpop.permute.xlu1 %7142 }
 0xa66   : > { %v7354_v0 = vpop.permute.xlu0 %7353  ;;  %v13255_v29 = vsel %vm1572_vm7, %v13231_v43, %v7143_v27  ;;  %v6771_v27 = vld [vmem:[#allocation2 + $0x240] sm:$0xff] }
 0xa67   : > { %7668 = vperm.xlu1 %8334, %v7658_v45   ;;  %6838 = vmatpush1.bf16.msra.mxu1 %v6765_v59 }
 0xa68   : > { %6839 = vmatprep.subr.bf16.mxu1 %v13946_v60  ;;  %7683 = vperm.xlu0 %8332, %v7661_v26   ;;  %v7662_v60 = vld [vmem:[%s13659_s20 + $0x20] sm:$0xff] }
 0xa69   : > { %v7348_v17 = vpop.permute.xlu1 %7347 }
 0xa6a   : > { %v13265_v41 = vsel %vm6581_vm1, %v7348_v17, %v7350_v9  ;;  %v7352_v18 = vpop.permute.xlu0 %7351  ;;  %v7739_v9 = vld [vmem:[%s13660_s21 + $0x8] sm:$0xff] }
 0xa6b   : > { %7678 = vperm.xlu1 %8334, %v7660_v44   ;;  %7505 = vmatprep.subr.bf16.mxu0 %v13265_v41  ;;  %v13290_v45 = vsel %vm6581_vm1, %v7352_v18, %v7354_v0  ;;  %v7741_v44 = vld [vmem:[%s13660_s21 + $0x18] sm:$0xff]  ;;  %v7740_v18 = vld [vmem:[%s13660_s21 + $0x10] sm:$0xff] }
 0xa6c   : > { %6840 = vmatpush1.bf16.msra.mxu1 %v6767_v11  ;;  %7693 = vperm.xlu0 %8332, %v7663_v10   ;;  %v7145_v10 = vsel %vm1572_vm7, %v12945_v31, %v12933_v2  ;;  %v8743_v2 = vld [vmem:[%s13657_s18 + $0x7c] ss:$48 sps:$4 sm:$0xff]  }
 0xa6d   : > { %6841 = vmatprep.subr.bf16.mxu1 %v13947_v61  ;;  %v7346_v14 = vpop.permute.xlu1 %7345 }
 0xa6e   : > { %v13276_v63 = vsel %vm6581_vm1, %v7346_v14, %v7348_v17  ;;  %v7362_v1 = vpop.permute.xlu0 %7361  ;;  %v6773_v17 = vld [vmem:[#allocation2 + $0x268] sm:$0xff] }
 0xa6f   : > { %7688 = vperm.xlu1 %8334, %v7662_v60   ;;  %7506 = vmatpush1.bf16.msra.mxu0 %v13276_v63 }
 0xa70   : > { %6842 = vmatpush1.bf16.msra.mxu1 %v6769_v6  ;;  %7703 = vperm.xlu0 %8332, %v7665_v47   ;;  %v7743_v47 = vld [vmem:[%s13660_s21 + $0x28] sm:$0xff]  ;;  %v7742_v6 = vld [vmem:[%s13660_s21 + $0x20] sm:$0xff] }
 0xa71   : > { %6843 = vmatprep.subr.bf16.mxu1 %v13950_v32  ;;  %v7356_v61 = vpop.permute.xlu1 %7355  ;;  %v7738_v32 = vld [vmem:[%s13660_s21] sm:$0xff] }
 0xa72   : > { %v13284_v48 = vsel %vm6581_vm1, %v7354_v0, %v7356_v61  ;;  %v7366_v38 = vpop.permute.xlu0 %7365 }
 0xa73   : > { %7698 = vperm.xlu1 %8334, %v7664_v19   ;;  %7507 = vmatprep.subr.bf16.mxu0 %v13284_v48  ;;  %v7147_v19 = vsel %vm1572_vm7, %v12953_v35, %v12979_v39  ;;  %v7146_v39 = vsel %vm1572_vm7, %v12967_v57, %v12953_v35  ;;  %v8746_v35 = vld [vmem:[%s13657_s18 + $0xdc] ss:$48 sps:$4 sm:$0xff]  }
 0xa74   : > { %6844 = vmatpush1.bf16.msra.mxu1 %v6771_v27  ;;  %7508 = vmatpush1.bf16.msra.mxu0 %v13290_v45 }
 0xa75   : > { %6845 = vmatprep.subr.bf16.mxu1 %v13951_v13  ;;  %v7360_v26 = vpop.permute.xlu1 %7359  ;;  %7753 = vperm.xlu0 %8332, %v7739_v9   ;;  %v8740_v13 = vld [vmem:[%s13657_s18 + $0x18] ss:$48 sps:$4 sm:$0xff]  }
 0xa76   : > { %v13299_v59 = vsel %vm6581_vm1, %v7360_v26, %v7362_v1  ;;  %v7364_v0 = vpop.permute.xlu0 %7363  ;;  %v7144_v1 = vsel %vm1572_vm7, %v12962_v15, %v12945_v31  ;;  %v7745_v31 = vld [vmem:[%s13660_s21 + $0x38] sm:$0xff] }
 0xa77   : > { %7748 = vperm.xlu1 %8334, %v7738_v32   ;;  %7509 = vmatprep.subr.bf16.mxu0 %v13299_v59  ;;  %v13340_v15 = vsel %vm6581_vm1, %v7364_v0, %v7366_v38  ;;  %v7744_v32 = vld [vmem:[%s13660_s21 + $0x30] sm:$0xff] }
 0xa78   : > { %6846 = vmatpush1.bf16.msra.mxu1 %v6773_v17  ;;  %v7148_v17 = vsel %vm1572_vm7, %v13010_v56, %v12996_v25  ;;  %v7153_v56 = vsel %vm1572_vm7, %v13038_v36, %v13029_v40  ;;  %v7155_v40 = vsel %vm1572_vm7, %v13043_v51, %v13066_v42  ;;  %v7157_v42 = vsel %vm1572_vm7, %v13078_v34, %v13071_v49 }
 0xa79   : > { %7208 = vmatprep.subr.bf16.mxu1 %v7145_v10  ;;  %v7358_v11 = vpop.permute.xlu1 %7357  ;;  %7763 = vperm.xlu0 %8332, %v7741_v44  }
 0xa7a   : > { %v13315_v60 = vsel %vm6581_vm1, %v7358_v11, %v7360_v26  ;;  %v7374_v14 = vpop.permute.xlu0 %7373  ;;  %v8745_v26 = vld [vmem:[%s13657_s18 + $0x78] ss:$48 sps:$4 sm:$0xff]   ;;  %v7150_v11 = vsel %vm1572_vm7, %v13015_v46, %v13001_v54  ;;  %v7152_v46 = vsel %vm1572_vm7, %v13052_v3, %v13038_v36  ;;  %v7154_v36 = vsel %vm1572_vm7, %v13057_v20, %v13043_v51 }
 0xa7b   : > { %7758 = vperm.xlu1 %8334, %v7740_v18   ;;  %7510 = vmatpush1.bf16.msra.mxu0 %v13315_v60  ;;  %v8751_v3 = vld [vmem:[%s13657_s18 + $0x138] ss:$48 sps:$4 sm:$0xff]   ;;  %v7156_v51 = vsel %vm1572_vm7, %v13091_v55, %v13078_v34  ;;  %v7159_v20 = vsel %vm1572_vm7, %v13082_v58, %v13105_v16  ;;  %v7158_v34 = vsel %vm1572_vm7, %v13096_v8, %v13082_v58 }
 0xa7c   : > { %6848 = vmatmul.mubr.bf16.vlgmr.msra.gmra.mrb[16].mxu1 %v8740_v13 }
 0xa7d   : > { %7209 = vmatpush1.bf16.msra.mxu1 %v7144_v1  ;;  %v7368_v61 = vpop.permute.xlu1 %7367  ;;  %7773 = vperm.xlu0 %8332, %v7743_v47  }
 0xa7e   : > { %7210 = vmatprep.subr.bf16.mxu1 %v7147_v19  ;;  %v13334_v9 = vsel %vm6581_vm1, %v7366_v38, %v7368_v61  ;;  %v7378_v27 = vpop.permute.xlu0 %7377  ;;  %6857 = vmatprep.mubr.bf16.mxu1 %v8743_v2  ;;  %v7149_v38 = vsel %vm1572_vm7, %v12996_v25, %v12987_v52  ;;  %v7151_v52 = vsel %vm1572_vm7, %v13001_v54, %v13024_v28  ;;  %v8748_v25 = vld [vmem:[%s13657_s18 + $0xd8] ss:$48 sps:$4 sm:$0xff]  }
 0xa7f   : > { %7768 = vperm.xlu1 %8334, %v7742_v6   ;;  %7511 = vmatprep.subr.bf16.mxu0 %v13334_v9 }
 0xa80   : > { %7512 = vmatpush1.bf16.msra.mxu0 %v13340_v15 }
 0xa81   : > { %7211 = vmatpush1.bf16.msra.mxu1 %v7146_v39  ;;  %v7372_v0 = vpop.permute.xlu1 %7371  ;;  %7783 = vperm.xlu0 %8332, %v7745_v31  }
 0xa82   : > { %7212 = vmatprep.subr.bf16.mxu1 %v7149_v38  ;;  %v13360_v57 = vsel %vm6581_vm1, %v7372_v0, %v7374_v14  ;;  %v13362_v44 = vpop.permute.xlu0 %7138  ;;  %v8749_v14 = vld [vmem:[%s13657_s18 + $0x13c] ss:$48 sps:$4 sm:$0xff]  }
 0xa83   : > { %7778 = vperm.xlu1 %8334, %v7744_v32   ;;  %7513 = vmatprep.subr.bf16.mxu0 %v13360_v57 }
 0xa84   : > { %6858 = vmatmul.mubr.bf16.gmra.mrb[20].mxu1 %v8745_v26 }
 0xa85   : > { %7213 = vmatpush1.bf16.msra.mxu1 %v7148_v17  ;;  %v7370_v10 = vpop.permute.xlu1 %7369  ;;  %6867 = vmatprep.mubr.bf16.mxu1 %v8746_v35 }
 0xa86   : > { %7214 = vmatprep.subr.bf16.mxu1 %v7151_v52  ;;  %v13372_v13 = vsel %vm6581_vm1, %v7370_v10, %v7372_v0  ;;  %v7376_v18 = vpop.permute.xlu0 %7375 }
 0xa87   : > { %7514 = vmatpush1.bf16.msra.mxu0 %v13372_v13  ;;  %v13392_v54 = vsel %vm6581_vm1, %v7376_v18, %v7378_v27 }
 0xa89   : > { %7215 = vmatpush1.bf16.msra.mxu1 %v7150_v11  ;;  %v7380_v28 = vpop.permute.xlu1 %7379 }
 0xa8a   : > { %7216 = vmatprep.subr.bf16.mxu1 %v7153_v56  ;;  %v13388_v47 = vsel %vm6581_vm1, %v7378_v27, %v7380_v28  ;;  %v7386_v2 = vpop.permute.xlu0 %7385  ;;  %v8754_v27 = vld [vmem:[%s13657_s18 + $0x24] ss:$48 sps:$4 sm:$0xff]  }
 0xa8b   : > { %7515 = vmatprep.subr.bf16.mxu0 %v13388_v47 }
 0xa8c   : > { %7516 = vmatpush1.bf16.msra.mxu0 %v13392_v54  ;;  %6868 = vmatmul.mubr.bf16.gmra.mrb[24].mxu1 %v8748_v25 }
 0xa8d   : > { %7217 = vmatpush1.bf16.msra.mxu1 %v7152_v46  ;;  %v7384_v1 = vpop.permute.xlu1 %7383  ;;  %6877 = vmatprep.mubr.bf16.mxu1 %v8749_v14 }
 0xa8e   : > { %7218 = vmatprep.subr.bf16.mxu1 %v7155_v40  ;;  %v13402_v6 = vsel %vm6581_vm1, %v7384_v1, %v7386_v2  ;;  %v7390_v19 = vpop.permute.xlu0 %7389 }
 0xa8f   : > { %7517 = vmatprep.subr.bf16.mxu0 %v13402_v6 }
 0xa91   : > { %7219 = vmatpush1.bf16.msra.mxu1 %v7154_v36  ;;  %v7382_v61 = vpop.permute.xlu1 %7381  ;;  %v8764_v36 = vld [vmem:[%s13657_s18 + $0xe4] ss:$48 sps:$4 sm:$0xff]  }
 0xa92   : > { %7220 = vmatprep.subr.bf16.mxu1 %v7157_v42  ;;  %v13418_v31 = vsel %vm6581_vm1, %v7382_v61, %v7384_v1  ;;  %v7388_v39 = vpop.permute.xlu0 %7387  ;;  %v8761_v61 = vld [vmem:[%s13657_s18 + $0x8c] ss:$48 sps:$4 sm:$0xff]  }
 0xa93   : > { %7518 = vmatpush1.bf16.msra.mxu0 %v13418_v31  ;;  %v13432_v38 = vsel %vm6581_vm1, %v7388_v39, %v7390_v19 }
 0xa94   : > { %6878 = vmatmul.mubr.bf16.gmra.mrb[28].mxu1 %v8751_v3 }
 0xa95   : > { %7221 = vmatpush1.bf16.msra.mxu1 %v7156_v51  ;;  %v7392_v49 = vpop.permute.xlu1 %7391  ;;  %7240 = vmatprep.mubr.bf16.mxu1 %v8754_v27  ;;  %v8763_v27 = vld [vmem:[%s13657_s18 + $0x88] ss:$48 sps:$4 sm:$0xff]  }
 0xa96   : > { %7222 = vmatprep.subr.bf16.mxu1 %v7159_v20  ;;  %v13428_v32 = vsel %vm6581_vm1, %v7390_v19, %v7392_v49  ;;  %v7398_v26 = vpop.permute.xlu0 %7397 }
 0xa97   : > { %7519 = vmatprep.subr.bf16.mxu0 %v13428_v32 }
 0xa98   : > { %7520 = vmatpush1.bf16.msra.mxu0 %v13432_v38 }
 0xa99   : > { %7223 = vmatpush1.bf16.msra.mxu1 %v7158_v34  ;;  %v7396_v55 = vpop.permute.xlu1 %7395 }
 0xa9a   : > { %7224 = vmatprep.subr.bf16.mxu1 %v13120_v30  ;;  %v13440_v16 = vsel %vm6581_vm1, %v7396_v55, %v7398_v26  ;;  %v7402_v0 = vpop.permute.xlu0 %7401 }
 0xa9b   : > { %7521 = vmatprep.subr.bf16.mxu0 %v13440_v16 }
 0xa9d   : > { %7225 = vmatpush1.bf16.msra.mxu1 %v13129_v50  ;;  %v7394_v35 = vpop.permute.xlu1 %7393 }
 0xa9e   : > { %7226 = vmatprep.subr.bf16.mxu1 %v13147_v62  ;;  %v13446_v17 = vsel %vm6581_vm1, %v7394_v35, %v7396_v55  ;;  %v7400_v58 = vpop.permute.xlu0 %7399 }
 0xa9f   : > { %7522 = vmatpush1.bf16.msra.mxu0 %v13446_v17  ;;  %v13456_v50 = vsel %vm6581_vm1, %v7400_v58, %v7402_v0 }
 0xaa1   : > { %7227 = vmatpush1.bf16.msra.mxu1 %v13138_v12  ;;  %v7404_v8 = vpop.permute.xlu1 %7403 }
 0xaa2   : > { %7228 = vmatprep.subr.bf16.mxu1 %v13157_v4  ;;  %v13452_v30 = vsel %vm6581_vm1, %v7402_v0, %v7404_v8  ;;  %v7410_v52 = vpop.permute.xlu0 %7409 }
 0xaa3   : > { %7523 = vmatprep.subr.bf16.mxu0 %v13452_v30 }
 0xaa4   : > { %7524 = vmatpush1.bf16.msra.mxu0 %v13456_v50 }
 0xaa5   : > { %7229 = vmatpush1.bf16.msra.mxu1 %v13168_v33  ;;  %v7408_v62 = vpop.permute.xlu1 %7407 }
 0xaa6   : > { %7230 = vmatprep.subr.bf16.mxu1 %v13185_v7  ;;  %v13462_v12 = vsel %vm6581_vm1, %v7408_v62, %v7410_v52  ;;  %v7414_v4 = vpop.permute.xlu0 %7413 }
 0xaa7   : > { %7525 = vmatprep.subr.bf16.mxu0 %v13462_v12 }
 0xaa9   : > { %7231 = vmatpush1.bf16.msra.mxu1 %v13176_v22  ;;  %v7406_v10 = vpop.permute.xlu1 %7405 }
 0xaaa   : > { %7232 = vmatprep.subr.bf16.mxu1 %v13197_v23  ;;  %v13468_v18 = vsel %vm6581_vm1, %v7406_v10, %v7408_v62  ;;  %v7412_v11 = vpop.permute.xlu0 %7411 }
 0xaab   : > { %7526 = vmatpush1.bf16.msra.mxu0 %v13468_v18  ;;  %v13478_v22 = vsel %vm6581_vm1, %v7412_v11, %v7414_v4 }
 0xaad   : > { %7233 = vmatpush1.bf16.msra.mxu1 %v13209_v5  ;;  %v7416_v33 = vpop.permute.xlu1 %7415 }
 0xaae   : > { %7234 = vmatprep.subr.bf16.mxu1 %v13222_v21  ;;  %v13474_v7 = vsel %vm6581_vm1, %v7414_v4, %v7416_v33  ;;  %v7422_v25 = vpop.permute.xlu0 %7421 }
 0xaaf   : > { %7527 = vmatprep.subr.bf16.mxu0 %v13474_v7 }
 0xab0   : > { %7528 = vmatpush1.bf16.msra.mxu0 %v13478_v22 }
 0xab1   : > { %7235 = vmatpush1.bf16.msra.mxu1 %v13212_v24  ;;  %v7420_v23 = vpop.permute.xlu1 %7419  ;;  %v7174_v24 = vsel %vm1572_vm7, %v13362_v44, %v13231_v43 }
 0xab2   : > { %7236 = vmatprep.subr.bf16.mxu1 %v13234_v37  ;;  %v13484_v5 = vsel %vm6581_vm1, %v7420_v23, %v7422_v25  ;;  %v7426_v21 = vpop.permute.xlu0 %7425  ;;  %v8752_v37 = vld [vmem:[%s13657_s18 + $0x20] ss:$48 sps:$4 sm:$0xff]  }
 0xab3   : > { %7529 = vmatprep.subr.bf16.mxu0 %v13484_v5 }
 0xab5   : > { %7237 = vmatpush1.bf16.msra.mxu1 %v13244_v53  ;;  %v7418_v56 = vpop.permute.xlu1 %7417  ;;  %v8755_v53 = vld [vmem:[%s13657_s18 + $0x84] ss:$48 sps:$4 sm:$0xff]  }
 0xab6   : > { %7238 = vmatprep.subr.bf16.mxu1 %v13255_v29  ;;  %v13490_v28 = vsel %vm6581_vm1, %v7418_v56, %v7420_v23  ;;  %v7424_v14 = vpop.permute.xlu0 %7423 }
 0xab7   : > { %7530 = vmatpush1.bf16.msra.mxu0 %v13490_v28  ;;  %v7467_v40 = vsel %vm6581_vm1, %v7424_v14, %v7426_v21 }
 0xab9   : > { %7239 = vmatpush1.bf16.msra.mxu1 %v7174_v24  ;;  %v7428_v2 = vpop.permute.xlu1 %7427 }
 0xaba   : > { %8058 = vmatprep.subr.bf16.mxu1 %v13265_v41  ;;  %v7468_v29 = vsel %vm6581_vm1, %v7426_v21, %v7428_v2  ;;  %v7434_v46 = vpop.permute.xlu0 %7433  ;;  %v8757_v41 = vld [vmem:[%s13657_s18 + $0x80] ss:$48 sps:$4 sm:$0xff]  }
 0xabb   : > { %7531 = vmatprep.subr.bf16.mxu0 %v7468_v29 }
 0xabc   : > { %7241 = vmatmul.mubr.bf16.vlgmr.msra.gmra.mrb[16].mxu1 %v8752_v37  ;;  %7532 = vmatpush1.bf16.msra.mxu0 %v7467_v40 }
 0xabd   : > { %8074 = vmatpush1.bf16.msra.mxu1 %v13276_v63  ;;  %v7432_v43 = vpop.permute.xlu1 %7431  ;;  %7250 = vmatprep.mubr.bf16.mxu1 %v8755_v53 }
 0xabe   : > { %8059 = vmatprep.subr.bf16.mxu1 %v13284_v48  ;;  %v7470_v44 = vsel %vm6581_vm1, %v7432_v43, %v7434_v46  ;;  %v7438_v1 = vpop.permute.xlu0 %7437 }
 0xabf   : > { %7533 = vmatprep.subr.bf16.mxu0 %v7470_v44 }
 0xac1   : > { %8075 = vmatpush1.bf16.msra.mxu1 %v13290_v45  ;;  %v7430_v19 = vpop.permute.xlu1 %7429 }
 0xac2   : > { %8060 = vmatprep.subr.bf16.mxu1 %v13299_v59  ;;  %v7469_v63 = vsel %vm6581_vm1, %v7430_v19, %v7432_v43  ;;  %v7436_v48 = vpop.permute.xlu0 %7435  ;;  %v8758_v59 = vld [vmem:[%s13657_s18 + $0x28] ss:$48 sps:$4 sm:$0xff]  }
 0xac3   : > { %7534 = vmatpush1.bf16.msra.mxu0 %v7469_v63  ;;  %v7471_v42 = vsel %vm6581_vm1, %v7436_v48, %v7438_v1 }
 0xac4   : > { %7251 = vmatmul.mubr.bf16.gmra.mrb[20].mxu1 %v8757_v41 }
 0xac5   : > { %8076 = vmatpush1.bf16.msra.mxu1 %v13315_v60  ;;  %v7440_v3 = vpop.permute.xlu1 %7439  ;;  %7260 = vmatprep.mubr.bf16.mxu1 %v8764_v36  ;;  %v8766_v60 = vld [vmem:[%s13657_s18 + $0xe0] ss:$48 sps:$4 sm:$0xff]  }
 0xac6   : > { %8061 = vmatprep.subr.bf16.mxu1 %v13334_v9  ;;  %v7472_v45 = vsel %vm6581_vm1, %v7438_v1, %v7440_v3  ;;  %v8767_v9 = vld [vmem:[%s13657_s18 + $0x144] ss:$48 sps:$4 sm:$0xff]  }
 0xac7   : > { %7535 = vmatprep.subr.bf16.mxu0 %v7472_v45 }
 0xac8   : > { %7536 = vmatpush1.bf16.msra.mxu0 %v7471_v42 }
 0xac9   : > { %8077 = vmatpush1.bf16.msra.mxu1 %v13340_v15  ;;  %v8769_v15 = vld [vmem:[%s13657_s18 + $0x140] ss:$48 sps:$4 sm:$0xff]  }
 0xaca   : > { %8062 = vmatprep.subr.bf16.mxu1 %v13360_v57  ;;  %v8772_v57 = vld [vmem:[%s13657_s18 + $0xec] ss:$48 sps:$4 sm:$0xff]  }
 0xacb   : > { %7538 = vmatmul.mubr.bf16.vlgmr.msra.gmra.mrb[48].mxu0 %v8758_v59 }
 0xacc   : > { %7547 = vmatprep.mubr.bf16.mxu0 %v8761_v61  ;;  %7261 = vmatmul.mubr.bf16.gmra.mrb[24].mxu1 %v8766_v60 }
 0xacd   : > { %8078 = vmatpush1.bf16.msra.mxu1 %v13372_v13  ;;  %7270 = vmatprep.mubr.bf16.mxu1 %v8767_v9  ;;  %v8770_v13 = vld [vmem:[%s13657_s18 + $0xe8] ss:$48 sps:$4 sm:$0xff]  }
 0xace   : > { %8063 = vmatprep.subr.bf16.mxu1 %v13388_v47  ;;  %v8773_v47 = vld [vmem:[%s13657_s18 + $0x14c] ss:$48 sps:$4 sm:$0xff]  }
 0xad1   : > { %8079 = vmatpush1.bf16.msra.mxu1 %v13392_v54  ;;  %v8775_v54 = vld [vmem:[%s13657_s18 + $0x148] ss:$48 sps:$4 sm:$0xff]  }
 0xad2   : > { %8064 = vmatprep.subr.bf16.mxu1 %v13402_v6 }
 0xad3   : > { %7548 = vmatmul.mubr.bf16.gmra.mrb[52].mxu0 %v8763_v27 }
 0xad4   : > { %7271 = vmatmul.mubr.bf16.gmra.mrb[28].mxu1 %v8769_v15 }
 0xad5   : > { %8080 = vmatpush1.bf16.msra.mxu1 %v13418_v31  ;;  %7557 = vmatprep.mubr.bf16.mxu1 %v8772_v57  ;;  %v7610_v31 = vpop.permute.xlu0 %7609 }
 0xad6   : > { %8065 = vmatprep.subr.bf16.mxu1 %v13428_v32  ;;  %v7605_v6 = vpop.permute.xlu1 %7604 }
 0xad9   : > { %8081 = vmatpush1.bf16.msra.mxu1 %v13432_v38  ;;  %v13572_v51 = vpop.permute.xlu0 %7619 }
 0xada   : > { %8066 = vmatprep.subr.bf16.mxu1 %v13440_v16  ;;  %v13570_v39 = vpop.permute.xlu1 %7614 }
 0xadd   : > { %8082 = vmatpush1.bf16.msra.mxu1 %v13446_v17  ;;  %v13576_v49 = vpop.permute.xlu0 %7629 }
 0xade   : > { %8067 = vmatprep.subr.bf16.mxu1 %v13452_v30  ;;  %v13574_v20 = vpop.permute.xlu1 %7624 }
 0xae1   : > { %8083 = vmatpush1.bf16.msra.mxu1 %v13456_v50  ;;  %v13580_v26 = vpop.permute.xlu0 %7639 }
 0xae2   : > { %8068 = vmatprep.subr.bf16.mxu1 %v13462_v12  ;;  %v13578_v32 = vpop.permute.xlu1 %7634 }
 0xae5   : > { %8084 = vmatpush1.bf16.msra.mxu1 %v13468_v18  ;;  %v7674_v34 = vpop.permute.xlu0 %7673 }
 0xae6   : > { %8069 = vmatprep.subr.bf16.mxu1 %v13474_v7  ;;  %v7669_v38 = vpop.permute.xlu1 %7668 }
 0xae9   : > { %8085 = vmatpush1.bf16.msra.mxu1 %v13478_v22  ;;  %v13582_v58 = vpop.permute.xlu0 %7683 }
 0xaea   : > { %8070 = vmatprep.subr.bf16.mxu1 %v13484_v5  ;;  %v7679_v35 = vpop.permute.xlu1 %7678 }
 0xaed   : > { %8086 = vmatpush1.bf16.msra.mxu1 %v13490_v28  ;;  %v13586_v62 = vpop.permute.xlu0 %7693 }
 0xaee   : > { %8071 = vmatprep.subr.bf16.mxu1 %v7468_v29  ;;  %v13584_v30 = vpop.permute.xlu1 %7688 }
 0xaf1   : > { %8087 = vmatpush1.bf16.msra.mxu1 %v7467_v40  ;;  %v13590_v33 = vpop.permute.xlu0 %7703 }
 0xaf2   : > { %8072 = vmatprep.subr.bf16.mxu1 %v7470_v44  ;;  %v13588_v4 = vpop.permute.xlu1 %7698 }
 0xaf5   : > { %8088 = vmatpush1.bf16.msra.mxu1 %v7469_v63  ;;  %v7754_v46 = vpop.permute.xlu0 %7753 }
 0xaf6   : > { %8073 = vmatprep.subr.bf16.mxu1 %v7472_v45  ;;  %v7749_v24 = vpop.permute.xlu1 %7748 }
 0xaf9   : > { %8089 = vmatpush1.bf16.msra.mxu1 %v7471_v42 }
 0xafc   : > { %7558 = vmatmul.mubr.bf16.vlgmr.msra.gmra.mrb[24].mxu1 %v8770_v13 }
 0xafd   : > { %7567 = vmatprep.mubr.bf16.mxu1 %v8773_v47  ;;  %v7759_v47 = vpop.permute.xlu1 %7758 }
 0xb04   : > { %7568 = vmatmul.mubr.bf16.gmra.mrb[28].mxu1 %v8775_v54 }
 0xb8f   : > { %v7242_v55 = vpop.f32.mrb[16].mxu1 }
 0xb90   : > { %v7244_v16 = vpop.f32.mrb[17].mxu1 }
 0xb91   : > { %v7246_v0 = vpop.f32.mrb[18].mxu1 }
 0xb92   : > { %v7248_v17 = vpop.f32.mrb[19].mxu1 }
 0xb97   : > { %v7252_v8 = vpop.f32.mrb[20].mxu1 }
 0xb98   : > { %v7254_v52 = vpop.f32.mrb[21].mxu1 }
 0xb99   : > { %v7256_v50 = vpop.f32.mrb[22].mxu1 }
 0xb9a   : > { %v7258_v12 = vpop.f32.mrb[23].mxu1 }
 0xb9e   : > { %v7539_v10 = vpop.f32.mrb[48].mxu0 }
 0xb9f   : > { %v8106_v18 = vadd.f32 %v7539_v10, %v7242_v55  ;;  %v7541_v11 = vpop.f32.mrb[49].mxu0 }
 0xba0   : > { %v8107_v7 = vadd.f32 %v7541_v11, %v7244_v16  ;;  %v7543_v25 = vpop.f32.mrb[50].mxu0 }
 0xba1   : > { %v7642_v22 = vmul.f32 %v8106_v18, %v7605_v6  ;;  %v8108_v23 = vadd.f32 %v7543_v25, %v7246_v0  ;;  %v7545_v5 = vpop.f32.mrb[51].mxu0  ;;  %v7769_v25 = vpop.permute.xlu1 %7768 }
 0xba2   : > { %v7643_v21 = vmul.f32 %v8107_v7, %v7605_v6  ;;  %v8109_v56 = vadd.f32 %v7545_v5, %v7248_v17 }
 0xba3   : > { %v7706_v28 = vadd.f32 %v7669_v38, %v7642_v22  ;;  %v7644_v14 = vmul.f32 %v8108_v23, %v7610_v31 }
 0xba4   : > { %v7707_v37 = vadd.f32 %v7669_v38, %v7643_v21  ;;  %v7645_v2 = vmul.f32 %v8109_v56, %v7610_v31 }
 0xba5   : > { %vm7722_vm2 = vcmp.ge.f32.partialorder %v7706_v28, 0.0  ;;  %v7786_v53 = vmul.f32 %v7749_v24, %v7706_v28  ;;  %v7708_v29 = vadd.f32 %v7674_v34, %v7644_v14 }
 0xba6   : > { %vm7723_vm7 = vcmp.ge.f32.partialorder %v7707_v37, 0.0  ;;  %v7787_v40 = vmul.f32 %v7749_v24, %v7707_v37  ;;  %v7709_v43 = vadd.f32 %v7674_v34, %v7645_v2  ;;  %v7549_v44 = vpop.f32.mrb[52].mxu0  ;;  %v7764_v34 = vpop.permute.xlu0 %7763 }
 0xba7   : > { %v7802_v1 = vsel %vm7722_vm2, %v7706_v28, %v7786_v53  ;;  %vm7724_vm9 = vcmp.ge.f32.partialorder %v7708_v29, 0.0  ;;  %v7788_v41 = vmul.f32 %v7754_v46, %v7708_v29  ;;  %v8110_v19 = vadd.f32 %v7549_v44, %v7252_v8  ;;  %v7551_v36 = vpop.f32.mrb[53].mxu0 }
 0xba8   : > { %7818 = vst [vmem:[%s13596_s0] sm:$0xff] %v7802_v1  ;;  %v7803_v63 = vsel %vm7723_vm7, %v7707_v37, %v7787_v40  ;;  %vm7725_vm5 = vcmp.ge.f32.partialorder %v7709_v43, 0.0  ;;  %v7789_v48 = vmul.f32 %v7754_v46, %v7709_v43  ;;  %v8111_v3 = vadd.f32 %v7551_v36, %v7254_v52  ;;  %v7553_v45 = vpop.f32.mrb[54].mxu0 }
 0xba9   : > { %7819 = vst [vmem:[%s13596_s0 + $0x8] sm:$0xff] %v7803_v63  ;;  %v7804_v42 = vsel %vm7724_vm9, %v7708_v29, %v7788_v41  ;;  %v7646_v59 = vmul.f32 %v8110_v19, %v13570_v39  ;;  %v8112_v61 = vadd.f32 %v7553_v45, %v7256_v50  ;;  %v7555_v60 = vpop.f32.mrb[55].mxu0  ;;  %v7779_v41 = vpop.permute.xlu1 %7778 }
 0xbaa   : > { %7820 = vst [vmem:[%s13596_s0 + $0x10] sm:$0xff] %v7804_v42  ;;  %v7805_v9 = vsel %vm7725_vm5, %v7709_v43, %v7789_v48  ;;  %v7647_v27 = vmul.f32 %v8111_v3, %v13570_v39  ;;  %v8113_v15 = vadd.f32 %v7555_v60, %v7258_v12  ;;  %v7774_v56 = vpop.permute.xlu0 %7773 }
 0xbab   : > { %7821 = vst [vmem:[%s13596_s0 + $0x18] sm:$0xff] %v7805_v9  ;;  %v7710_v57 = vadd.f32 %v7679_v35, %v7646_v59  ;;  %v7648_v13 = vmul.f32 %v8112_v61, %v13572_v51 }
 0xbac   : > { %v7711_v54 = vadd.f32 %v7679_v35, %v7647_v27  ;;  %v7649_v6 = vmul.f32 %v8113_v15, %v13572_v51 }
 0xbad   : > { %vm7726_vm6 = vcmp.ge.f32.partialorder %v7710_v57, 0.0  ;;  %v7790_v31 = vmul.f32 %v7759_v47, %v7710_v57  ;;  %v7712_v38 = vadd.f32 %v13582_v58, %v7648_v13 }
 0xbae   : > { %vm7727_vm8 = vcmp.ge.f32.partialorder %v7711_v54, 0.0  ;;  %v7791_v39 = vmul.f32 %v7759_v47, %v7711_v54  ;;  %v7713_v55 = vadd.f32 %v13582_v58, %v7649_v6 }
 0xbaf   : > { %v7806_v16 = vsel %vm7726_vm6, %v7710_v57, %v7790_v31  ;;  %vm7728_vm11 = vcmp.ge.f32.partialorder %v7712_v38, 0.0  ;;  %v7792_v0 = vmul.f32 %v7764_v34, %v7712_v38 }
 0xbb0   : > { %7822 = vst [vmem:[%s13596_s0 + $0x20] sm:$0xff] %v7806_v16  ;;  %v7807_v17 = vsel %vm7727_vm8, %v7711_v54, %v7791_v39  ;;  %vm7729_vm12 = vcmp.ge.f32.partialorder %v7713_v55, 0.0  ;;  %v7793_v35 = vmul.f32 %v7764_v34, %v7713_v55 }
 0xbb1   : > { %7823 = vst [vmem:[%s13596_s0 + $0x28] sm:$0xff] %v7807_v17  ;;  %v7808_v51 = vsel %vm7728_vm11, %v7712_v38, %v7792_v0 }
 0xbb2   : > { %7824 = vst [vmem:[%s13596_s0 + $0x30] sm:$0xff] %v7808_v51  ;;  %v7809_v8 = vsel %vm7729_vm12, %v7713_v55, %v7793_v35 }
 0xbb3   : > { %7825 = vst [vmem:[%s13596_s0 + $0x38] sm:$0xff] %v7809_v8 }
 0xbcf   : > { %v7559_v52 = vpop.f32.mrb[24].mxu1 }
 0xbd0   : > { %v7650_v50 = vmul.f32 %v13574_v20, %v7559_v52  ;;  %v7561_v12 = vpop.f32.mrb[25].mxu1 }
 0xbd1   : > { %v7651_v10 = vmul.f32 %v13574_v20, %v7561_v12  ;;  %v7563_v18 = vpop.f32.mrb[26].mxu1 }
 0xbd2   : > { %v7714_v58 = vadd.f32 %v13584_v30, %v7650_v50  ;;  %v7652_v11 = vmul.f32 %v13576_v49, %v7563_v18  ;;  %v7565_v7 = vpop.f32.mrb[27].mxu1 }
 0xbd3   : > { %v7715_v22 = vadd.f32 %v13584_v30, %v7651_v10  ;;  %v7653_v23 = vmul.f32 %v13576_v49, %v7565_v7 }
 0xbd4   : > { %vm7730_vm13 = vcmp.ge.f32.partialorder %v7714_v58, 0.0  ;;  %v7794_v5 = vmul.f32 %v7769_v25, %v7714_v58  ;;  %v7716_v21 = vadd.f32 %v13586_v62, %v7652_v11 }
 0xbd5   : > { %vm7731_vm14 = vcmp.ge.f32.partialorder %v7715_v22, 0.0  ;;  %v7795_v20 = vmul.f32 %v7769_v25, %v7715_v22  ;;  %v7717_v28 = vadd.f32 %v13586_v62, %v7653_v23 }
 0xbd6   : > { %v7810_v14 = vsel %vm7730_vm13, %v7714_v58, %v7794_v5  ;;  %vm7732_vm15 = vcmp.ge.f32.partialorder %v7716_v21, 0.0  ;;  %v7796_v24 = vmul.f32 %v7774_v56, %v7716_v21 }
 0xbd7   : > { %7826 = vst [vmem:[%s13596_s0 + $0x40] sm:$0xff] %v7810_v14  ;;  %v7811_v37 = vsel %vm7731_vm14, %v7715_v22, %v7795_v20  ;;  %vm7733_vm4 = vcmp.ge.f32.partialorder %v7717_v28, 0.0  ;;  %v7797_v30 = vmul.f32 %v7774_v56, %v7717_v28  ;;  %v7569_v49 = vpop.f32.mrb[28].mxu1 }
 0xbd8   : > { %7827 = vst [vmem:[%s13596_s0 + $0x48] sm:$0xff] %v7811_v37  ;;  %v7812_v2 = vsel %vm7732_vm15, %v7716_v21, %v7796_v24  ;;  %v7654_v53 = vmul.f32 %v13578_v32, %v7569_v49  ;;  %v7571_v29 = vpop.f32.mrb[29].mxu1 }
 0xbd9   : > { %7828 = vst [vmem:[%s13596_s0 + $0x50] sm:$0xff] %v7812_v2  ;;  %v7813_v46 = vsel %vm7733_vm4, %v7717_v28, %v7797_v30  ;;  %v7655_v40 = vmul.f32 %v13578_v32, %v7571_v29  ;;  %v7573_v43 = vpop.f32.mrb[30].mxu1  ;;  %v7784_v32 = vpop.permute.xlu0 %7783 }
 0xbda   : > { %7829 = vst [vmem:[%s13596_s0 + $0x58] sm:$0xff] %v7813_v46  ;;  %v7718_v62 = vadd.f32 %v13588_v4, %v7654_v53  ;;  %v7656_v44 = vmul.f32 %v13580_v26, %v7573_v43  ;;  %v7575_v1 = vpop.f32.mrb[31].mxu1 }
 0xbdb   : > { %v7719_v19 = vadd.f32 %v13588_v4, %v7655_v40  ;;  %v7657_v36 = vmul.f32 %v13580_v26, %v7575_v1 }
 0xbdc   : > { %vm7734_vm10 = vcmp.ge.f32.partialorder %v7718_v62, 0.0  ;;  %v7798_v63 = vmul.f32 %v7779_v41, %v7718_v62  ;;  %v7720_v48 = vadd.f32 %v13590_v33, %v7656_v44 }
 0xbdd   : > { %vm7735_vm0 = vcmp.ge.f32.partialorder %v7719_v19, 0.0  ;;  %v7799_v3 = vmul.f32 %v7779_v41, %v7719_v19  ;;  %v7721_v45 = vadd.f32 %v13590_v33, %v7657_v36 }
 0xbde   : > { %v7814_v42 = vsel %vm7734_vm10, %v7718_v62, %v7798_v63  ;;  %vm7736_vm3 = vcmp.ge.f32.partialorder %v7720_v48, 0.0  ;;  %v7800_v59 = vmul.f32 %v7784_v32, %v7720_v48 }
 0xbdf   : > { %7830 = vst [vmem:[%s13596_s0 + $0x60] sm:$0xff] %v7814_v42  ;;  %v7815_v61 = vsel %vm7735_vm0, %v7719_v19, %v7799_v3  ;;  %vm7737_vm1 = vcmp.ge.f32.partialorder %v7721_v45, 0.0  ;;  %v7801_v4 = vmul.f32 %v7784_v32, %v7721_v45 }
 0xbe0   : > { %7831 = vst [vmem:[%s13596_s0 + $0x68] sm:$0xff] %v7815_v61  ;;  %v7816_v26 = vsel %vm7736_vm3, %v7720_v48, %v7800_v59 }
 0xbe1   : > { %7832 = vst [vmem:[%s13596_s0 + $0x70] sm:$0xff] %v7816_v26  ;;  %v7817_v60 = vsel %vm7737_vm1, %v7721_v45, %v7801_v4 }
 0xbe2   : > { %7833 = vst [vmem:[%s13596_s0 + $0x78] sm:$0xff] %v7817_v60 }
 0xbe3 PF: > { %s32_s3 = sadd.s32 1, %s8808_s3  }
 0xbe4   : > { %p29_p4 = scmp.ge.s32.totalorder %s32_s3, 4  }
 0xbe6   :  { %31 = sbr.rel (!%p29_p4) target bundleno = 8 (0x8), region = 138 }

</bundles_post_ra>
